<compile_context>
chip_gen: v7x
topology: tpu7x:2x2x1
jax: 0.10.0
libtpu: 0.0.40
codegen_flags: <defaults>
</compile_context>

<pallas_src>
import functools
import math

import numpy as np
import jax
import jax.numpy as jnp
from jax import lax
from jax.experimental import pallas as pl
from jax.experimental.pallas import tpu as pltpu


# ---------------------------------------------------------------------------
# Relative sinusoidal positional embedding (parameter setup, plain numpy)
# ---------------------------------------------------------------------------
def calc_rel_position_embedding(seq_len, embedding_dim, init_size=1568, padding_idx=0):
    """Replicates RelativeSinusoidalPositionalEmbedding; returns (embedding_dim, 2*seq_len)."""
    num_embeddings = init_size + 1
    half_dim = embedding_dim // 2
    scale = math.log(10000) / (half_dim - 1)
    freq = np.exp(np.arange(half_dim, dtype=np.float32) * -scale)
    pos = np.arange(-num_embeddings // 2, num_embeddings // 2, dtype=np.float32)
    emb = pos[:, None] * freq[None, :]
    weights = np.concatenate([np.sin(emb), np.cos(emb)], axis=1).astype(np.float32)
    if embedding_dim % 2 == 1:
        weights = np.concatenate([weights, np.zeros((num_embeddings, 1), np.float32)], axis=1)
    weights[padding_idx, :] = 0.0
    origin_shift = num_embeddings // 2 + 1
    assert seq_len <= origin_shift, "seq_len larger than precomputed table not supported here"
    positions = np.arange(-seq_len, seq_len) + origin_shift
    embed = weights[positions]                    # (2*seq_len, embedding_dim)
    return jnp.asarray(embed.T, jnp.float32)      # (embedding_dim, 2*seq_len)  == buffer .T


# ---------------------------------------------------------------------------
# One-time probe: verify strided pltpu.roll semantics (per-row right-roll by shift + i)
# ---------------------------------------------------------------------------
_STRIDED_ROLL_OK = None


def _strided_roll_supported():
    global _STRIDED_ROLL_OK
    if _STRIDED_ROLL_OK is None:
        rows, cols, s = 8, 128, 5

        def kern(x_ref, o_ref):
            o_ref[...] = pltpu.roll(x_ref[...], shift=s, axis=1, stride=1, stride_axis=0)

        x = jnp.arange(rows * cols, dtype=jnp.float32).reshape(rows, cols)
        try:
            got = pl.pallas_call(
                kern, out_shape=jax.ShapeDtypeStruct((rows, cols), jnp.float32))(x)
            want = jnp.stack([jnp.roll(x[i], s + i) for i in range(rows)])
            _STRIDED_ROLL_OK = bool(jnp.array_equal(got, want))
        except Exception:
            _STRIDED_ROLL_OK = False
    return _STRIDED_ROLL_OK


# ---------------------------------------------------------------------------
# 2D relative shift:  out[i, j] = x_full[i, j - i + L]   (per-row right-roll by i + L)
# Fast path: one strided XLU roll.  Fallback: log2(2L) conditional static rolls.
# ---------------------------------------------------------------------------
def _rel_shift(x_full, L, use_xlu_roll):
    if use_xlu_roll:
        rolled = pltpu.roll(x_full, shift=L, axis=1, stride=1, stride_axis=0)
    else:
        two_l = 2 * L
        row = lax.broadcasted_iota(jnp.int32, (L, two_l), 0)
        amount = row + L
        rolled = x_full
        step = 1
        while step < two_l:
            r = jnp.concatenate([rolled[:, -step:], rolled[:, :-step]], axis=1)
            rolled = jnp.where((amount & step) != 0, r, rolled)
            step <<= 1
    return rolled[:, :L]


# ---------------------------------------------------------------------------
# Pallas kernel: one (batch, head_group) tile per grid point
# ---------------------------------------------------------------------------
def _rel_mha_kernel(*refs, use_prev, n_heads_blk, head_dim, seq_len,
                    inv_sqrt_d, compute_dtype, use_xlu_roll):
    if use_prev:
        (q_ref, k_ref, v_ref, rr_ref, rw_ref, pe_ref,
         prev_ref, out_ref, score_ref) = refs
    else:
        (q_ref, k_ref, v_ref, rr_ref, rw_ref, pe_ref,
         out_ref, score_ref) = refs
        prev_ref = None

    L, D, G = seq_len, head_dim, n_heads_blk
    pe = pe_ref[...]                              # (D, 2L) compute dtype, already * 1/sqrt(D)

    # Static unroll over the head group (group sized so G*D is one 128-lane tile -> G small).
    for hh in range(G):
        hcols = slice(hh * D, (hh + 1) * D)       # static lane slice of the fused-head block
        q = q_ref[0, :, hcols].astype(jnp.float32)    # (L, D) f32 for the bias adds
        k = k_ref[0, :, hcols]                        # (L, D) compute dtype (MXU operand)
        v = v_ref[0, :, hcols]
        rr = rr_ref[hh]                               # (1, D) f32
        rw = rw_ref[hh]

        q_rr = ((q + rr) * inv_sqrt_d).astype(compute_dtype)   # carries the AC scale
        q_rw = (q + rw).astype(compute_dtype)                  # BD / E scale rides on pe

        # AC[i, j] = s * (q_i + r_r_bias) . k_j  -- contract last dims, no materialized k.T
        ac = lax.dot_general(q_rr, k, (((1,), (1,)), ((), ())),
                             preferred_element_type=jnp.float32)          # (L, L)

        # Fused positional matmul: [q + r_w_bias ; k] (2L, D) @ pe (D, 2L) -> (2L, 2L)
        # rows [:L] = BD_full, rows [L:] = E_full.
        stacked = jnp.concatenate([q_rw, k], axis=0)
        be = jnp.dot(stacked, pe, preferred_element_type=jnp.float32)     # (2L, 2L)

        bd = _rel_shift(be[:L], L, use_xlu_roll)                          # (L, L)
        e = _rel_shift(be[L:], L, use_xlu_roll).T                         # (L, L)

        score = ac + bd + e
        if use_prev:                                  # skip_op and prev is not None
            score = score + prev_ref[0, hh]
        score_ref[0, hh] = score                      # returned "prev"

        # softmax over the last axis (stats in f32); dropout p=0 / eval -> identity
        m = jnp.max(score, axis=-1, keepdims=True)
        p = jnp.exp(score - m)
        denom = jnp.sum(p, axis=-1, keepdims=True)
        attn = p * pl.reciprocal(denom, approx=True)  # EUP slot; VALU stays free

        o = jnp.dot(attn.astype(compute_dtype), v,
                    preferred_element_type=jnp.float32)                   # (L, D)
        # lane-dense output block: write head hh's slice of the final (L, d_model) layout
        out_ref[0, :, hcols] = o.astype(out_ref.dtype)


def _pick_head_group(n_head, head_dim):
    """Smallest G dividing n_head with G*head_dim a multiple of 128 lanes; else all heads
    (then each block spans the full d_model, which is always legal)."""
    for g in range(1, n_head):
        if n_head % g == 0 and (g * head_dim) % 128 == 0:
            return g
    return n_head


def _estimate_vmem_bytes(G, L, D, use_prev, compute_dtype):
    cb = jnp.dtype(compute_dtype).itemsize
    pad = lambda n: -(-n // 128) * 128
    gd, ll = pad(G * D), pad(L)
    blocks = (3 * L * gd * cb                     # q / k / v windows
              + D * pad(2 * L) * cb               # pe
              + 2 * G * 128 * 4                   # r_r / r_w bias rows
              + L * gd * 4                        # out
              + (2 if use_prev else 1) * G * L * ll * 4)   # score (+ prev)
    temps = (2 * L) * pad(2 * L) * 4 + 8 * L * ll * 4 + 4 * L * pad(D) * 4
    return 2 * blocks + temps                     # x2: double-buffered pipeline windows


def rel_mha_pallas(x, W_qkv, r_r_bias, r_w_bias, pe, prev, skip_op,
                   n_head, head_dim, seq_len, compute_dtype=jnp.bfloat16):
    B, L, dm = x.shape
    H, D = n_head, head_dim
    assert L == seq_len and dm == H * D

    # QKV projection hoisted to XLA: one (B*L, dm) x (dm, 3dm) matmul at full MXU width.
    # Cast to the MXU compute dtype here (fuses into the projection epilogue, halves DMA).
    qkv = jnp.dot(x, W_qkv, precision=jax.lax.Precision.HIGHEST).astype(compute_dtype)

    rr = r_r_bias.reshape(H, 1, D).astype(jnp.float32)
    rw = r_w_bias.reshape(H, 1, D).astype(jnp.float32)
    inv_sqrt_d = 1.0 / math.sqrt(D)
    pe_s = (pe * inv_sqrt_d).astype(compute_dtype)        # carries the BD / E scale

    G = _pick_head_group(H, D)
    nG = H // G
    GD = G * D
    use_prev = bool(skip_op) and (prev is not None)
    use_xlu_roll = ((2 * L) % 128 == 0) and _strided_roll_supported()

    kernel = functools.partial(
        _rel_mha_kernel, use_prev=use_prev, n_heads_blk=G, head_dim=D, seq_len=L,
        inv_sqrt_d=inv_sqrt_d, compute_dtype=compute_dtype, use_xlu_roll=use_xlu_roll)

    # q/k/v stay in (B, L, H*D) layout (no XLA transpose); lane-dense (1, L, G*D) windows.
    if GD % 128 == 0:
        # three column-offset windows of the single fused qkv tensor (no XLA-side split)
        qkv_operands = [qkv, qkv, qkv]
        q_spec = pl.BlockSpec((1, L, GD), lambda b, g: (b, 0, g))
        k_spec = pl.BlockSpec((1, L, GD), lambda b, g: (b, 0, nG + g))
        v_spec = pl.BlockSpec((1, L, GD), lambda b, g: (b, 0, 2 * nG + g))
    else:
        # unaligned d_model (G == H here): split into contiguous full-width slices
        qkv_operands = [qkv[..., :dm], qkv[..., dm:2 * dm], qkv[..., 2 * dm:]]
        q_spec = k_spec = v_spec = pl.BlockSpec((1, L, GD), lambda b, g: (b, 0, g))

    in_specs = [q_spec, k_spec, v_spec,
                pl.BlockSpec((G, 1, D), lambda b, g: (g, 0, 0)),       # r_r_bias
                pl.BlockSpec((G, 1, D), lambda b, g: (g, 0, 0)),       # r_w_bias
                pl.BlockSpec((D, 2 * L), lambda b, g: (0, 0))]         # scaled rel pos emb
    operands = qkv_operands + [rr, rw, pe_s]
    if use_prev:                                                       # no dead zeros DMA otherwise
        in_specs.append(pl.BlockSpec((1, G, L, L), lambda b, g: (b, g, 0, 0)))
        operands.append(prev.astype(jnp.float32))

    out_specs = [
        pl.BlockSpec((1, L, GD), lambda b, g: (b, 0, g)),              # (B, L, dm), lane-dense
        pl.BlockSpec((1, G, L, L), lambda b, g: (b, g, 0, 0)),         # attn score ("prev")
    ]
    out_shape = (jax.ShapeDtypeStruct((B, L, dm), x.dtype),
                 jax.ShapeDtypeStruct((B, H, L, L), jnp.float32))

    est = _estimate_vmem_bytes(G, L, D, use_prev, compute_dtype)
    vmem_limit = None
    if est > 32 * 1024 * 1024:
        # TODO(synk): for L >= ~512 switch to flash-style query tiling instead of only
        # raising the limit (the O(G*L^2) score block is the binding constraint on v7x).
        try:
            cap = getattr(pltpu.get_tpu_info(), "vmem_capacity_bytes", 64 * 1024 * 1024)
        except Exception:
            cap = 64 * 1024 * 1024
        vmem_limit = int(min(est * 3 // 2, cap * 3 // 4))   # headroom for compiler scratch

    v_out, score = pl.pallas_call(
        kernel,
        out_shape=out_shape,
        grid_spec=pltpu.PrefetchScalarGridSpec(
            num_scalar_prefetch=0,
            grid=(B, nG),
            in_specs=in_specs,
            out_specs=out_specs,
        ),
        compiler_params=pltpu.CompilerParams(
            dimension_semantics=("parallel", "parallel"),
            vmem_limit_bytes=vmem_limit),
    )(*operands)
    return v_out, score


# ---------------------------------------------------------------------------
# Pure-JAX reference (mirrors the PyTorch forward, incl. the pad/view _shift)
# ---------------------------------------------------------------------------
def _shift_ref(BD, seq_len):
    b, h, L, _ = BD.shape
    BD = jnp.pad(BD, ((0, 0), (0, 0), (0, 0), (0, 1)))
    BD = BD.reshape(b, h, -1, L)
    BD = BD[:, :, :-1].reshape(b, h, L, -1)
    return BD[:, :, :, seq_len:]


def reference_forward(x, W_qkv, r_r_bias, r_w_bias, pe, prev, skip_op,
                      n_head, head_dim, seq_len):
    hp = jax.lax.Precision.HIGHEST
    B, L, dm = x.shape
    qkv = jnp.dot(x, W_qkv, precision=hp)
    q, k, v = jnp.split(qkv, 3, axis=-1)
    q = q.reshape(B, L, n_head, head_dim).transpose(0, 2, 1, 3)
    k = k.reshape(B, L, n_head, head_dim).transpose(0, 2, 1, 3)
    v = v.reshape(B, L, n_head, head_dim).transpose(0, 2, 1, 3)
    AC = jnp.einsum('bhid,bhjd->bhij', q + r_r_bias, k, precision=hp)
    BD = _shift_ref(jnp.einsum('bhid,dp->bhip', q + r_w_bias, pe, precision=hp), seq_len)
    E = _shift_ref(jnp.einsum('bhjd,dp->bhjp', k, pe, precision=hp),
                   seq_len).transpose(0, 1, 3, 2)
    score = (AC + BD + E) / math.sqrt(head_dim)
    if skip_op and prev is not None:
        score = score + prev
    attn = jax.nn.softmax(score, axis=-1)
    out = jnp.einsum('bhij,bhjd->bhid', attn, v,
                     precision=hp).transpose(0, 2, 1, 3).reshape(B, L, dm)
    return out, score


# ---------------------------------------------------------------------------
if __name__ == "__main__":
    def run_case(B, seq_len, d_model, n_head, compute_dtype, tol_v, tol_s):
        head_dim = d_model // n_head
        key = jax.random.PRNGKey(0)
        k1, k2, k3, k4 = jax.random.split(key, 4)
        x = jax.random.normal(k1, (B, seq_len, d_model), jnp.float32)
        W_qkv = jax.random.normal(k2, (d_model, 3 * d_model), jnp.float32) / math.sqrt(d_model)
        r_r_bias = jax.random.normal(k3, (1, n_head, 1, head_dim), jnp.float32) * 0.1
        r_w_bias = jax.random.normal(k4, (1, n_head, 1, head_dim), jnp.float32) * 0.1
        pe = calc_rel_position_embedding(seq_len, head_dim)   # (head_dim, 2*seq_len)

        # pass 1: prev=None, skip_op=False
        v_out, score = rel_mha_pallas(x, W_qkv, r_r_bias, r_w_bias, pe,
                                      prev=None, skip_op=False,
                                      n_head=n_head, head_dim=head_dim, seq_len=seq_len,
                                      compute_dtype=compute_dtype)
        jax.block_until_ready((v_out, score))
        ref_v, ref_s = reference_forward(x, W_qkv, r_r_bias, r_w_bias, pe, None, False,
                                         n_head, head_dim, seq_len)
        np.testing.assert_allclose(np.asarray(v_out), np.asarray(ref_v), rtol=tol_v, atol=tol_v)
        np.testing.assert_allclose(np.asarray(score), np.asarray(ref_s), rtol=tol_s, atol=tol_s)

        # pass 2: residual prev path (skip_op=True); same prev fed to kernel and reference
        v_out2, score2 = rel_mha_pallas(x, W_qkv, r_r_bias, r_w_bias, pe,
                                        prev=score, skip_op=True,
                                        n_head=n_head, head_dim=head_dim, seq_len=seq_len,
                                        compute_dtype=compute_dtype)
        jax.block_until_ready((v_out2, score2))
        ref_v2, ref_s2 = reference_forward(x, W_qkv, r_r_bias, r_w_bias, pe, score, True,
                                           n_head, head_dim, seq_len)
        np.testing.assert_allclose(np.asarray(v_out2), np.asarray(ref_v2), rtol=tol_v, atol=tol_v)
        np.testing.assert_allclose(np.asarray(score2), np.asarray(ref_s2), rtol=tol_s, atol=tol_s)

    # Main config: lane-dense input/output (d_model = 128), 2L = 128 relative positions.
    #   f32 reference-exactness path
    run_case(B=2, seq_len=64, d_model=128, n_head=4,
             compute_dtype=jnp.float32, tol_v=2e-2, tol_s=2e-2)
    #   default bf16 MXU-operand path (f32 accumulation / softmax stats)
    run_case(B=2, seq_len=64, d_model=128, n_head=4,
             compute_dtype=jnp.bfloat16, tol_v=1e-1, tol_s=2e-1)

    # Tiny, non-128-aligned config (original toy shape): select-fallback shift path.
    run_case(B=2, seq_len=8, d_model=32, n_head=2,
             compute_dtype=jnp.float32, tol_v=2e-2, tol_s=2e-2)

    print("KERNEL_OK")
</pallas_src>

<mosaic_0001>
module attributes {stable_mosaic.version = 11 : i64} {
  func.func @kern(%arg0: memref<8x128xf32, #tpu.memory_space<vmem>>, %arg1: memref<8x128xf32, #tpu.memory_space<vmem>>) attributes {dimension_semantics = [], scalar_prefetch = 0 : i64, scratch_operands = 0 : i64, tpu.core_type = #tpu.core_type<tc>} {
    %c0 = arith.constant 0 : index
    %c0_0 = arith.constant 0 : index
    %0 = vector.load %arg0[%c0, %c0_0] : memref<8x128xf32, #tpu.memory_space<vmem>>, vector<8x128xf32>
    %c5_i32 = arith.constant 5 : i32
    %1 = tpu.dynamic_rotate %0 by %c5_i32 dim 1 {stride = 1 : si32, stride_dimension = 0 : si32} : vector<8x128xf32>, i32 -> vector<8x128xf32>
    %c0_1 = arith.constant 0 : index
    %c0_2 = arith.constant 0 : index
    %2 = vector.load %arg1[%c0_1, %c0_2] : memref<8x128xf32, #tpu.memory_space<vmem>>, vector<8x128xf32>
    tpu.vector_store %arg1[%c0_1, %c0_2], %1 {strides = array<i32>} : memref<8x128xf32, #tpu.memory_space<vmem>>, vector<8x128xf32>,
    return
  }
}

module attributes {stable_mosaic.version = 11 : i64} {
  func.func @_rel_mha_kernel(%arg0: i32, %arg1: i32, %arg2: memref<1x64x128xf32, #tpu.memory_space<vmem>>, %arg3: memref<1x64x128xf32, #tpu.memory_space<vmem>>, %arg4: memref<1x64x128xf32, #tpu.memory_space<vmem>>, %arg5: memref<4x1x32xf32, #tpu.memory_space<vmem>>, %arg6: memref<4x1x32xf32, #tpu.memory_space<vmem>>, %arg7: memref<32x128xf32, #tpu.memory_space<vmem>>, %arg8: memref<1x64x128xf32, #tpu.memory_space<vmem>>, %arg9: memref<1x4x64x64xf32, #tpu.memory_space<vmem>>) attributes {dimension_semantics = [#tpu.dimension_semantics<parallel>, #tpu.dimension_semantics<parallel>], iteration_bounds = array<i64: 2, 1>, scalar_prefetch = 0 : i64, scratch_operands = 0 : i64, tpu.core_type = #tpu.core_type<tc>, window_params = [{transform_indices = @transform_0, window_bounds = array<i64: 1, 64, 128>}, {transform_indices = @transform_1, window_bounds = array<i64: 1, 64, 128>}, {transform_indices = @transform_2, window_bounds = array<i64: 1, 64, 128>}, {transform_indices = @transform_3, window_bounds = array<i64: 4, 1, 32>}, {transform_indices = @transform_4, window_bounds = array<i64: 4, 1, 32>}, {pipeline_mode = #tpu.pipeline_mode<synchronous>, transform_indices = @transform_5, window_bounds = array<i64: 32, 128>}, {transform_indices = @transform_6, window_bounds = array<i64: 1, 64, 128>}, {transform_indices = @transform_7, window_bounds = array<i64: 1, 4, 64, 64>}]} {
    %c0 = arith.constant 0 : index
    %c0_0 = arith.constant 0 : index
    %0 = vector.load %arg7[%c0, %c0_0] : memref<32x128xf32, #tpu.memory_space<vmem>>, vector<32x128xf32>
    %c0_1 = arith.constant 0 : index
    %c0_2 = arith.constant 0 : index
    %c0_3 = arith.constant 0 : index
    %1 = vector.load %arg2[%c0_1, %c0_2, %c0_3] : memref<1x64x128xf32, #tpu.memory_space<vmem>>, vector<1x64x32xf32>
    %2 = vector.shape_cast %1 : vector<1x64x32xf32> to vector<64x32xf32>
    %c0_4 = arith.constant 0 : index
    %c0_5 = arith.constant 0 : index
    %c0_6 = arith.constant 0 : index
    %3 = vector.load %arg3[%c0_4, %c0_5, %c0_6] : memref<1x64x128xf32, #tpu.memory_space<vmem>>, vector<1x64x32xf32>
    %4 = vector.shape_cast %3 : vector<1x64x32xf32> to vector<64x32xf32>
    %c0_7 = arith.constant 0 : index
    %c0_8 = arith.constant 0 : index
    %c0_9 = arith.constant 0 : index
    %5 = vector.load %arg4[%c0_7, %c0_8, %c0_9] : memref<1x64x128xf32, #tpu.memory_space<vmem>>, vector<1x64x32xf32>
    %6 = vector.shape_cast %5 : vector<1x64x32xf32> to vector<64x32xf32>
    %c0_10 = arith.constant 0 : index
    %c0_11 = arith.constant 0 : index
    %c0_12 = arith.constant 0 : index
    %7 = vector.load %arg5[%c0_10, %c0_11, %c0_12] : memref<4x1x32xf32, #tpu.memory_space<vmem>>, vector<1x1x32xf32>
    %8 = vector.shape_cast %7 : vector<1x1x32xf32> to vector<1x32xf32>
    %c0_13 = arith.constant 0 : index
    %c0_14 = arith.constant 0 : index
    %c0_15 = arith.constant 0 : index
    %9 = vector.load %arg6[%c0_13, %c0_14, %c0_15] : memref<4x1x32xf32, #tpu.memory_space<vmem>>, vector<1x1x32xf32>
    %10 = vector.shape_cast %9 : vector<1x1x32xf32> to vector<1x32xf32>
    %11 = vector.broadcast %8 : vector<1x32xf32> to vector<64x32xf32>
    %12 = arith.addf %2, %11 : vector<64x32xf32>
    %cst = arith.constant 0.176776692 : f32
    %13 = vector.broadcast %cst : f32 to vector<64x32xf32>
    %14 = arith.mulf %12, %13 : vector<64x32xf32>
    %15 = vector.broadcast %10 : vector<1x32xf32> to vector<64x32xf32>
    %16 = arith.addf %2, %15 : vector<64x32xf32>
    %cst_16 = arith.constant dense<0.000000e+00> : vector<64x64xf32>
    %17 = tpu.matmul %14, %4, %cst_16 {dimension_numbers = #tpu.dot_dimension_numbers<[1], [1], [0], [0], [0, 0, 1, 0], [], []>} : vector<64x32xf32>, vector<64x32xf32>, vector<64x64xf32> -> vector<64x64xf32>
    %18 = tpu.concatenate %16, %4 in 0 : vector<64x32xf32>, vector<64x32xf32> -> vector<128x32xf32>
    %cst_17 = arith.constant dense<0.000000e+00> : vector<128x128xf32>
    %19 = tpu.matmul %18, %0, %cst_17 {dimension_numbers = #tpu.dot_dimension_numbers<[1], [0], [0], [1], [0, 0, 1, 1], [], []>} : vector<128x32xf32>, vector<32x128xf32>, vector<128x128xf32> -> vector<128x128xf32>
    %20 = vector.extract_strided_slice %19 {offsets = [0, 0], sizes = [64, 128], strides = [1, 1]} : vector<128x128xf32> to vector<64x128xf32>
    %21 = tpu.iota {dimensions = array<i32: 0>} : vector<64x128xi32>
    %c64_i32 = arith.constant 64 : i32
    %22 = vector.broadcast %c64_i32 : i32 to vector<64x128xi32>
    %23 = arith.addi %21, %22 : vector<64x128xi32>
    %24 = vector.extract_strided_slice %20 {offsets = [0, 127], sizes = [64, 1], strides = [1, 1]} : vector<64x128xf32> to vector<64x1xf32>
    %25 = vector.extract_strided_slice %20 {offsets = [0, 0], sizes = [64, 127], strides = [1, 1]} : vector<64x128xf32> to vector<64x127xf32>
    %26 = tpu.concatenate %24, %25 in 1 : vector<64x1xf32>, vector<64x127xf32> -> vector<64x128xf32>
    %c1_i32 = arith.constant 1 : i32
    %27 = vector.broadcast %c1_i32 : i32 to vector<64x128xi32>
    %28 = arith.andi %23, %27 : vector<64x128xi32>
    %c0_i32 = arith.constant 0 : i32
    %29 = vector.broadcast %c0_i32 : i32 to vector<64x128xi32>
    %30 = arith.cmpi ne, %28, %29 : vector<64x128xi32>
    %31 = arith.select %30, %26, %20 : vector<64x128xi1>, vector<64x128xf32>
    %32 = vector.extract_strided_slice %31 {offsets = [0, 126], sizes = [64, 2], strides = [1, 1]} : vector<64x128xf32> to vector<64x2xf32>
    %33 = vector.extract_strided_slice %31 {offsets = [0, 0], sizes = [64, 126], strides = [1, 1]} : vector<64x128xf32> to vector<64x126xf32>
    %34 = tpu.concatenate %32, %33 in 1 : vector<64x2xf32>, vector<64x126xf32> -> vector<64x128xf32>
    %c2_i32 = arith.constant 2 : i32
    %35 = vector.broadcast %c2_i32 : i32 to vector<64x128xi32>
    %36 = arith.andi %23, %35 : vector<64x128xi32>
    %c0_i32_18 = arith.constant 0 : i32
    %37 = vector.broadcast %c0_i32_18 : i32 to vector<64x128xi32>
    %38 = arith.cmpi ne, %36, %37 : vector<64x128xi32>
    %39 = arith.select %38, %34, %31 : vector<64x128xi1>, vector<64x128xf32>
    %40 = vector.extract_strided_slice %39 {offsets = [0, 124], sizes = [64, 4], strides = [1, 1]} : vector<64x128xf32> to vector<64x4xf32>
    %41 = vector.extract_strided_slice %39 {offsets = [0, 0], sizes = [64, 124], strides = [1, 1]} : vector<64x128xf32> to vector<64x124xf32>
    %42 = tpu.concatenate %40, %41 in 1 : vector<64x4xf32>, vector<64x124xf32> -> vector<64x128xf32>
    %c4_i32 = arith.constant 4 : i32
    %43 = vector.broadcast %c4_i32 : i32 to vector<64x128xi32>
    %44 = arith.andi %23, %43 : vector<64x128xi32>
    %c0_i32_19 = arith.constant 0 : i32
    %45 = vector.broadcast %c0_i32_19 : i32 to vector<64x128xi32>
    %46 = arith.cmpi ne, %44, %45 : vector<64x128xi32>
    %47 = arith.select %46, %42, %39 : vector<64x128xi1>, vector<64x128xf32>
    %48 = vector.extract_strided_slice %47 {offsets = [0, 120], sizes = [64, 8], strides = [1, 1]} : vector<64x128xf32> to vector<64x8xf32>
    %49 = vector.extract_strided_slice %47 {offsets = [0, 0], sizes = [64, 120], strides = [1, 1]} : vector<64x128xf32> to vector<64x120xf32>
    %50 = tpu.concatenate %48, %49 in 1 : vector<64x8xf32>, vector<64x120xf32> -> vector<64x128xf32>
    %c8_i32 = arith.constant 8 : i32
    %51 = vector.broadcast %c8_i32 : i32 to vector<64x128xi32>
    %52 = arith.andi %23, %51 : vector<64x128xi32>
    %c0_i32_20 = arith.constant 0 : i32
    %53 = vector.broadcast %c0_i32_20 : i32 to vector<64x128xi32>
    %54 = arith.cmpi ne, %52, %53 : vector<64x128xi32>
    %55 = arith.select %54, %50, %47 : vector<64x128xi1>, vector<64x128xf32>
    %56 = vector.extract_strided_slice %55 {offsets = [0, 112], sizes = [64, 16], strides = [1, 1]} : vector<64x128xf32> to vector<64x16xf32>
    %57 = vector.extract_strided_slice %55 {offsets = [0, 0], sizes = [64, 112], strides = [1, 1]} : vector<64x128xf32> to vector<64x112xf32>
    %58 = tpu.concatenate %56, %57 in 1 : vector<64x16xf32>, vector<64x112xf32> -> vector<64x128xf32>
    %c16_i32 = arith.constant 16 : i32
    %59 = vector.broadcast %c16_i32 : i32 to vector<64x128xi32>
    %60 = arith.andi %23, %59 : vector<64x128xi32>
    %c0_i32_21 = arith.constant 0 : i32
    %61 = vector.broadcast %c0_i32_21 : i32 to vector<64x128xi32>
    %62 = arith.cmpi ne, %60, %61 : vector<64x128xi32>
    %63 = arith.select %62, %58, %55 : vector<64x128xi1>, vector<64x128xf32>
    %64 = vector.extract_strided_slice %63 {offsets = [0, 96], sizes = [64, 32], strides = [1, 1]} : vector<64x128xf32> to vector<64x32xf32>
    %65 = vector.extract_strided_slice %63 {offsets = [0, 0], sizes = [64, 96], strides = [1, 1]} : vector<64x128xf32> to vector<64x96xf32>
    %66 = tpu.concatenate %64, %65 in 1 : vector<64x32xf32>, vector<64x96xf32> -> vector<64x128xf32>
    %c32_i32 = arith.constant 32 : i32
    %67 = vector.broadcast %c32_i32 : i32 to vector<64x128xi32>
    %68 = arith.andi %23, %67 : vector<64x128xi32>
    %c0_i32_22 = arith.constant 0 : i32
    %69 = vector.broadcast %c0_i32_22 : i32 to vector<64x128xi32>
    %70 = arith.cmpi ne, %68, %69 : vector<64x128xi32>
    %71 = arith.select %70, %66, %63 : vector<64x128xi1>, vector<64x128xf32>
    %72 = vector.extract_strided_slice %71 {offsets = [0, 64], sizes = [64, 64], strides = [1, 1]} : vector<64x128xf32> to vector<64x64xf32>
    %73 = vector.extract_strided_slice %71 {offsets = [0, 0], sizes = [64, 64], strides = [1, 1]} : vector<64x128xf32> to vector<64x64xf32>
    %74 = tpu.concatenate %72, %73 in 1 : vector<64x64xf32>, vector<64x64xf32> -> vector<64x128xf32>
    %c64_i32_23 = arith.constant 64 : i32
    %75 = vector.broadcast %c64_i32_23 : i32 to vector<64x128xi32>
    %76 = arith.andi %23, %75 : vector<64x128xi32>
    %c0_i32_24 = arith.constant 0 : i32
    %77 = vector.broadcast %c0_i32_24 : i32 to vector<64x128xi32>
    %78 = arith.cmpi ne, %76, %77 : vector<64x128xi32>
    %79 = arith.select %78, %74, %71 : vector<64x128xi1>, vector<64x128xf32>
    %80 = vector.extract_strided_slice %79 {offsets = [0, 0], sizes = [64, 64], strides = [1, 1]} : vector<64x128xf32> to vector<64x64xf32>
    %81 = vector.extract_strided_slice %19 {offsets = [64, 0], sizes = [64, 128], strides = [1, 1]} : vector<128x128xf32> to vector<64x128xf32>
    %82 = tpu.iota {dimensions = array<i32: 0>} : vector<64x128xi32>
    %c64_i32_25 = arith.constant 64 : i32
    %83 = vector.broadcast %c64_i32_25 : i32 to vector<64x128xi32>
    %84 = arith.addi %82, %83 : vector<64x128xi32>
    %85 = vector.extract_strided_slice %81 {offsets = [0, 127], sizes = [64, 1], strides = [1, 1]} : vector<64x128xf32> to vector<64x1xf32>
    %86 = vector.extract_strided_slice %81 {offsets = [0, 0], sizes = [64, 127], strides = [1, 1]} : vector<64x128xf32> to vector<64x127xf32>
    %87 = tpu.concatenate %85, %86 in 1 : vector<64x1xf32>, vector<64x127xf32> -> vector<64x128xf32>
    %c1_i32_26 = arith.constant 1 : i32
    %88 = vector.broadcast %c1_i32_26 : i32 to vector<64x128xi32>
    %89 = arith.andi %84, %88 : vector<64x128xi32>
    %c0_i32_27 = arith.constant 0 : i32
    %90 = vector.broadcast %c0_i32_27 : i32 to vector<64x128xi32>
    %91 = arith.cmpi ne, %89, %90 : vector<64x128xi32>
    %92 = arith.select %91, %87, %81 : vector<64x128xi1>, vector<64x128xf32>
    %93 = vector.extract_strided_slice %92 {offsets = [0, 126], sizes = [64, 2], strides = [1, 1]} : vector<64x128xf32> to vector<64x2xf32>
    %94 = vector.extract_strided_slice %92 {offsets = [0, 0], sizes = [64, 126], strides = [1, 1]} : vector<64x128xf32> to vector<64x126xf32>
    %95 = tpu.concatenate %93, %94 in 1 : vector<64x2xf32>, vector<64x126xf32> -> vector<64x128xf32>
    %c2_i32_28 = arith.constant 2 : i32
    %96 = vector.broadcast %c2_i32_28 : i32 to vector<64x128xi32>
    %97 = arith.andi %84, %96 : vector<64x128xi32>
    %c0_i32_29 = arith.constant 0 : i32
    %98 = vector.broadcast %c0_i32_29 : i32 to vector<64x128xi32>
    %99 = arith.cmpi ne, %97, %98 : vector<64x128xi32>
    %100 = arith.select %99, %95, %92 : vector<64x128xi1>, vector<64x128xf32>
    %101 = vector.extract_strided_slice %100 {offsets = [0, 124], sizes = [64, 4], strides = [1, 1]} : vector<64x128xf32> to vector<64x4xf32>
    %102 = vector.extract_strided_slice %100 {offsets = [0, 0], sizes = [64, 124], strides = [1, 1]} : vector<64x128xf32> to vector<64x124xf32>
    %103 = tpu.concatenate %101, %102 in 1 : vector<64x4xf32>, vector<64x124xf32> -> vector<64x128xf32>
    %c4_i32_30 = arith.constant 4 : i32
    %104 = vector.broadcast %c4_i32_30 : i32 to vector<64x128xi32>
    %105 = arith.andi %84, %104 : vector<64x128xi32>
    %c0_i32_31 = arith.constant 0 : i32
    %106 = vector.broadcast %c0_i32_31 : i32 to vector<64x128xi32>
    %107 = arith.cmpi ne, %105, %106 : vector<64x128xi32>
    %108 = arith.select %107, %103, %100 : vector<64x128xi1>, vector<64x128xf32>
    %109 = vector.extract_strided_slice %108 {offsets = [0, 120], sizes = [64, 8], strides = [1, 1]} : vector<64x128xf32> to vector<64x8xf32>
    %110 = vector.extract_strided_slice %108 {offsets = [0, 0], sizes = [64, 120], strides = [1, 1]} : vector<64x128xf32> to vector<64x120xf32>
    %111 = tpu.concatenate %109, %110 in 1 : vector<64x8xf32>, vector<64x120xf32> -> vector<64x128xf32>
    %c8_i32_32 = arith.constant 8 : i32
    %112 = vector.broadcast %c8_i32_32 : i32 to vector<64x128xi32>
    %113 = arith.andi %84, %112 : vector<64x128xi32>
    %c0_i32_33 = arith.constant 0 : i32
    %114 = vector.broadcast %c0_i32_33 : i32 to vector<64x128xi32>
    %115 = arith.cmpi ne, %113, %114 : vector<64x128xi32>
    %116 = arith.select %115, %111, %108 : vector<64x128xi1>, vector<64x128xf32>
    %117 = vector.extract_strided_slice %116 {offsets = [0, 112], sizes = [64, 16], strides = [1, 1]} : vector<64x128xf32> to vector<64x16xf32>
    %118 = vector.extract_strided_slice %116 {offsets = [0, 0], sizes = [64, 112], strides = [1, 1]} : vector<64x128xf32> to vector<64x112xf32>
    %119 = tpu.concatenate %117, %118 in 1 : vector<64x16xf32>, vector<64x112xf32> -> vector<64x128xf32>
    %c16_i32_34 = arith.constant 16 : i32
    %120 = vector.broadcast %c16_i32_34 : i32 to vector<64x128xi32>
    %121 = arith.andi %84, %120 : vector<64x128xi32>
    %c0_i32_35 = arith.constant 0 : i32
    %122 = vector.broadcast %c0_i32_35 : i32 to vector<64x128xi32>
    %123 = arith.cmpi ne, %121, %122 : vector<64x128xi32>
    %124 = arith.select %123, %119, %116 : vector<64x128xi1>, vector<64x128xf32>
    %125 = vector.extract_strided_slice %124 {offsets = [0, 96], sizes = [64, 32], strides = [1, 1]} : vector<64x128xf32> to vector<64x32xf32>
    %126 = vector.extract_strided_slice %124 {offsets = [0, 0], sizes = [64, 96], strides = [1, 1]} : vector<64x128xf32> to vector<64x96xf32>
    %127 = tpu.concatenate %125, %126 in 1 : vector<64x32xf32>, vector<64x96xf32> -> vector<64x128xf32>
    %c32_i32_36 = arith.constant 32 : i32
    %128 = vector.broadcast %c32_i32_36 : i32 to vector<64x128xi32>
    %129 = arith.andi %84, %128 : vector<64x128xi32>
    %c0_i32_37 = arith.constant 0 : i32
    %130 = vector.broadcast %c0_i32_37 : i32 to vector<64x128xi32>
    %131 = arith.cmpi ne, %129, %130 : vector<64x128xi32>
    %132 = arith.select %131, %127, %124 : vector<64x128xi1>, vector<64x128xf32>
    %133 = vector.extract_strided_slice %132 {offsets = [0, 64], sizes = [64, 64], strides = [1, 1]} : vector<64x128xf32> to vector<64x64xf32>
    %134 = vector.extract_strided_slice %132 {offsets = [0, 0], sizes = [64, 64], strides = [1, 1]} : vector<64x128xf32> to vector<64x64xf32>
    %135 = tpu.concatenate %133, %134 in 1 : vector<64x64xf32>, vector<64x64xf32> -> vector<64x128xf32>
    %c64_i32_38 = arith.constant 64 : i32
    %136 = vector.broadcast %c64_i32_38 : i32 to vector<64x128xi32>
    %137 = arith.andi %84, %136 : vector<64x128xi32>
    %c0_i32_39 = arith.constant 0 : i32
    %138 = vector.broadcast %c0_i32_39 : i32 to vector<64x128xi32>
    %139 = arith.cmpi ne, %137, %138 : vector<64x128xi32>
    %140 = arith.select %139, %135, %132 : vector<64x128xi1>, vector<64x128xf32>
    %141 = vector.extract_strided_slice %140 {offsets = [0, 0], sizes = [64, 64], strides = [1, 1]} : vector<64x128xf32> to vector<64x64xf32>
    %142 = tpu.transpose %141, [1, 0] : vector<64x64xf32> -> vector<64x64xf32>
    %143 = arith.addf %17, %80 : vector<64x64xf32>
    %144 = arith.addf %143, %142 : vector<64x64xf32>
    %c0_40 = arith.constant 0 : index
    %c0_41 = arith.constant 0 : index
    %c0_42 = arith.constant 0 : index
    %c0_43 = arith.constant 0 : index
    %145 = vector.load %arg9[%c0_40, %c0_41, %c0_42, %c0_43] : memref<1x4x64x64xf32, #tpu.memory_space<vmem>>, vector<1x1x64x64xf32>
    %146 = vector.shape_cast %145 : vector<1x1x64x64xf32> to vector<64x64xf32>
    %147 = vector.shape_cast %144 : vector<64x64xf32> to vector<1x1x64x64xf32>
    tpu.vector_store %arg9[%c0_40, %c0_41, %c0_42, %c0_43], %147 {strides = array<i32>} : memref<1x4x64x64xf32, #tpu.memory_space<vmem>>, vector<1x1x64x64xf32>,
    %cst_44 = arith.constant dense<0xFF800000> : vector<64xf32>
    %148 = vector.multi_reduction <maximumf>, %144, %cst_44 [1] : vector<64x64xf32> to vector<64xf32>
    %149 = vector.shape_cast %148 : vector<64xf32> to vector<64x1xf32>
    %150 = vector.broadcast %149 : vector<64x1xf32> to vector<64x64xf32>
    %151 = arith.subf %144, %150 : vector<64x64xf32>
    %152 = math.exp %151 : vector<64x64xf32>
    %cst_45 = arith.constant dense<0.000000e+00> : vector<64xf32>
    %153 = vector.multi_reduction <add>, %152, %cst_45 [1] : vector<64x64xf32> to vector<64xf32>
    %154 = vector.shape_cast %153 : vector<64xf32> to vector<64x1xf32>
    %155 = tpu.reciprocal %154 {approx = true} : vector<64x1xf32> -> vector<64x1xf32>
    %156 = vector.broadcast %155 : vector<64x1xf32> to vector<64x64xf32>
    %157 = arith.mulf %152, %156 : vector<64x64xf32>
    %cst_46 = arith.constant dense<0.000000e+00> : vector<64x32xf32>
    %158 = tpu.matmul %157, %6, %cst_46 {dimension_numbers = #tpu.dot_dimension_numbers<[1], [0], [0], [1], [0, 0, 1, 1], [], []>} : vector<64x64xf32>, vector<64x32xf32>, vector<64x32xf32> -> vector<64x32xf32>
    %c0_47 = arith.constant 0 : index
    %c0_48 = arith.constant 0 : index
    %c0_49 = arith.constant 0 : index
    %159 = vector.load %arg8[%c0_47, %c0_48, %c0_49] : memref<1x64x128xf32, #tpu.memory_space<vmem>>, vector<1x64x32xf32>
    %160 = vector.shape_cast %159 : vector<1x64x32xf32> to vector<64x32xf32>
    %161 = vector.shape_cast %158 : vector<64x32xf32> to vector<1x64x32xf32>
    tpu.vector_store %arg8[%c0_47, %c0_48, %c0_49], %161 {strides = array<i32>} : memref<1x64x128xf32, #tpu.memory_space<vmem>>, vector<1x64x32xf32>,
    %c0_50 = arith.constant 0 : index
    %c0_51 = arith.constant 0 : index
    %c32 = arith.constant 32 : index
    %162 = vector.load %arg2[%c0_50, %c0_51, %c32] : memref<1x64x128xf32, #tpu.memory_space<vmem>>, vector<1x64x32xf32>
    %163 = vector.shape_cast %162 : vector<1x64x32xf32> to vector<64x32xf32>
    %c0_52 = arith.constant 0 : index
    %c0_53 = arith.constant 0 : index
    %c32_54 = arith.constant 32 : index
    %164 = vector.load %arg3[%c0_52, %c0_53, %c32_54] : memref<1x64x128xf32, #tpu.memory_space<vmem>>, vector<1x64x32xf32>
    %165 = vector.shape_cast %164 : vector<1x64x32xf32> to vector<64x32xf32>
    %c0_55 = arith.constant 0 : index
    %c0_56 = arith.constant 0 : index
    %c32_57 = arith.constant 32 : index
    %166 = vector.load %arg4[%c0_55, %c0_56, %c32_57] : memref<1x64x128xf32, #tpu.memory_space<vmem>>, vector<1x64x32xf32>
    %167 = vector.shape_cast %166 : vector<1x64x32xf32> to vector<64x32xf32>
    %c1 = arith.constant 1 : index
    %c0_58 = arith.constant 0 : index
    %c0_59 = arith.constant 0 : index
    %168 = vector.load %arg5[%c1, %c0_58, %c0_59] : memref<4x1x32xf32, #tpu.memory_space<vmem>>, vector<1x1x32xf32>
    %169 = vector.shape_cast %168 : vector<1x1x32xf32> to vector<1x32xf32>
    %c1_60 = arith.constant 1 : index
    %c0_61 = arith.constant 0 : index
    %c0_62 = arith.constant 0 : index
    %170 = vector.load %arg6[%c1_60, %c0_61, %c0_62] : memref<4x1x32xf32, #tpu.memory_space<vmem>>, vector<1x1x32xf32>
    %171 = vector.shape_cast %170 : vector<1x1x32xf32> to vector<1x32xf32>
    %172 = vector.broadcast %169 : vector<1x32xf32> to vector<64x32xf32>
    %173 = arith.addf %163, %172 : vector<64x32xf32>
    %cst_63 = arith.constant 0.176776692 : f32
    %174 = vector.broadcast %cst_63 : f32 to vector<64x32xf32>
    %175 = arith.mulf %173, %174 : vector<64x32xf32>
    %176 = vector.broadcast %171 : vector<1x32xf32> to vector<64x32xf32>
    %177 = arith.addf %163, %176 : vector<64x32xf32>
    %cst_64 = arith.constant dense<0.000000e+00> : vector<64x64xf32>
    %178 = tpu.matmul %175, %165, %cst_64 {dimension_numbers = #tpu.dot_dimension_numbers<[1], [1], [0], [0], [0, 0, 1, 0], [], []>} : vector<64x32xf32>, vector<64x32xf32>, vector<64x64xf32> -> vector<64x64xf32>
    %179 = tpu.concatenate %177, %165 in 0 : vector<64x32xf32>, vector<64x32xf32> -> vector<128x32xf32>
    %cst_65 = arith.constant dense<0.000000e+00> : vector<128x128xf32>
    %180 = tpu.matmul %179, %0, %cst_65 {dimension_numbers = #tpu.dot_dimension_numbers<[1], [0], [0], [1], [0, 0, 1, 1], [], []>} : vector<128x32xf32>, vector<32x128xf32>, vector<128x128xf32> -> vector<128x128xf32>
    %181 = vector.extract_strided_slice %180 {offsets = [0, 0], sizes = [64, 128], strides = [1, 1]} : vector<128x128xf32> to vector<64x128xf32>
    %182 = tpu.iota {dimensions = array<i32: 0>} : vector<64x128xi32>
    %c64_i32_66 = arith.constant 64 : i32
    %183 = vector.broadcast %c64_i32_66 : i32 to vector<64x128xi32>
    %184 = arith.addi %182, %183 : vector<64x128xi32>
    %185 = vector.extract_strided_slice %181 {offsets = [0, 127], sizes = [64, 1], strides = [1, 1]} : vector<64x128xf32> to vector<64x1xf32>
    %186 = vector.extract_strided_slice %181 {offsets = [0, 0], sizes = [64, 127], strides = [1, 1]} : vector<64x128xf32> to vector<64x127xf32>
    %187 = tpu.concatenate %185, %186 in 1 : vector<64x1xf32>, vector<64x127xf32> -> vector<64x128xf32>
    %c1_i32_67 = arith.constant 1 : i32
    %188 = vector.broadcast %c1_i32_67 : i32 to vector<64x128xi32>
    %189 = arith.andi %184, %188 : vector<64x128xi32>
    %c0_i32_68 = arith.constant 0 : i32
    %190 = vector.broadcast %c0_i32_68 : i32 to vector<64x128xi32>
    %191 = arith.cmpi ne, %189, %190 : vector<64x128xi32>
    %192 = arith.select %191, %187, %181 : vector<64x128xi1>, vector<64x128xf32>
    %193 = vector.extract_strided_slice %192 {offsets = [0, 126], sizes = [64, 2], strides = [1, 1]} : vector<64x128xf32> to vector<64x2xf32>
    %194 = vector.extract_strided_slice %192 {offsets = [0, 0], sizes = [64, 126], strides = [1, 1]} : vector<64x128xf32> to vector<64x126xf32>
    %195 = tpu.concatenate %193, %194 in 1 : vector<64x2xf32>, vector<64x126xf32> -> vector<64x128xf32>
    %c2_i32_69 = arith.constant 2 : i32
    %196 = vector.broadcast %c2_i32_69 : i32 to vector<64x128xi32>
    %197 = arith.andi %184, %196 : vector<64x128xi32>
    %c0_i32_70 = arith.constant 0 : i32
    %198 = vector.broadcast %c0_i32_70 : i32 to vector<64x128xi32>
    %199 = arith.cmpi ne, %197, %198 : vector<64x128xi32>
    %200 = arith.select %199, %195, %192 : vector<64x128xi1>, vector<64x128xf32>
    %201 = vector.extract_strided_slice %200 {offsets = [0, 124], sizes = [64, 4], strides = [1, 1]} : vector<64x128xf32> to vector<64x4xf32>
    %202 = vector.extract_strided_slice %200 {offsets = [0, 0], sizes = [64, 124], strides = [1, 1]} : vector<64x128xf32> to vector<64x124xf32>
    %203 = tpu.concatenate %201, %202 in 1 : vector<64x4xf32>, vector<64x124xf32> -> vector<64x128xf32>
    %c4_i32_71 = arith.constant 4 : i32
    %204 = vector.broadcast %c4_i32_71 : i32 to vector<64x128xi32>
    %205 = arith.andi %184, %204 : vector<64x128xi32>
    %c0_i32_72 = arith.constant 0 : i32
    %206 = vector.broadcast %c0_i32_72 : i32 to vector<64x128xi32>
    %207 = arith.cmpi ne, %205, %206 : vector<64x128xi32>
    %208 = arith.select %207, %203, %200 : vector<64x128xi1>, vector<64x128xf32>
    %209 = vector.extract_strided_slice %208 {offsets = [0, 120], sizes = [64, 8], strides = [1, 1]} : vector<64x128xf32> to vector<64x8xf32>
    %210 = vector.extract_strided_slice %208 {offsets = [0, 0], sizes = [64, 120], strides = [1, 1]} : vector<64x128xf32> to vector<64x120xf32>
    %211 = tpu.concatenate %209, %210 in 1 : vector<64x8xf32>, vector<64x120xf32> -> vector<64x128xf32>
    %c8_i32_73 = arith.constant 8 : i32
    %212 = vector.broadcast %c8_i32_73 : i32 to vector<64x128xi32>
    %213 = arith.andi %184, %212 : vector<64x128xi32>
    %c0_i32_74 = arith.constant 0 : i32
    %214 = vector.broadcast %c0_i32_74 : i32 to vector<64x128xi32>
    %215 = arith.cmpi ne, %213, %214 : vector<64x128xi32>
    %216 = arith.select %215, %211, %208 : vector<64x128xi1>, vector<64x128xf32>
    %217 = vector.extract_strided_slice %216 {offsets = [0, 112], sizes = [64, 16], strides = [1, 1]} : vector<64x128xf32> to vector<64x16xf32>
    %218 = vector.extract_strided_slice %216 {offsets = [0, 0], sizes = [64, 112], strides = [1, 1]} : vector<64x128xf32> to vector<64x112xf32>
    %219 = tpu.concatenate %217, %218 in 1 : vector<64x16xf32>, vector<64x112xf32> -> vector<64x128xf32>
    %c16_i32_75 = arith.constant 16 : i32
    %220 = vector.broadcast %c16_i32_75 : i32 to vector<64x128xi32>
    %221 = arith.andi %184, %220 : vector<64x128xi32>
    %c0_i32_76 = arith.constant 0 : i32
    %222 = vector.broadcast %c0_i32_76 : i32 to vector<64x128xi32>
    %223 = arith.cmpi ne, %221, %222 : vector<64x128xi32>
    %224 = arith.select %223, %219, %216 : vector<64x128xi1>, vector<64x128xf32>
    %225 = vector.extract_strided_slice %224 {offsets = [0, 96], sizes = [64, 32], strides = [1, 1]} : vector<64x128xf32> to vector<64x32xf32>
    %226 = vector.extract_strided_slice %224 {offsets = [0, 0], sizes = [64, 96], strides = [1, 1]} : vector<64x128xf32> to vector<64x96xf32>
    %227 = tpu.concatenate %225, %226 in 1 : vector<64x32xf32>, vector<64x96xf32> -> vector<64x128xf32>
    %c32_i32_77 = arith.constant 32 : i32
    %228 = vector.broadcast %c32_i32_77 : i32 to vector<64x128xi32>
    %229 = arith.andi %184, %228 : vector<64x128xi32>
    %c0_i32_78 = arith.constant 0 : i32
    %230 = vector.broadcast %c0_i32_78 : i32 to vector<64x128xi32>
    %231 = arith.cmpi ne, %229, %230 : vector<64x128xi32>
    %232 = arith.select %231, %227, %224 : vector<64x128xi1>, vector<64x128xf32>
    %233 = vector.extract_strided_slice %232 {offsets = [0, 64], sizes = [64, 64], strides = [1, 1]} : vector<64x128xf32> to vector<64x64xf32>
    %234 = vector.extract_strided_slice %232 {offsets = [0, 0], sizes = [64, 64], strides = [1, 1]} : vector<64x128xf32> to vector<64x64xf32>
    %235 = tpu.concatenate %233, %234 in 1 : vector<64x64xf32>, vector<64x64xf32> -> vector<64x128xf32>
    %c64_i32_79 = arith.constant 64 : i32
    %236 = vector.broadcast %c64_i32_79 : i32 to vector<64x128xi32>
    %237 = arith.andi %184, %236 : vector<64x128xi32>
    %c0_i32_80 = arith.constant 0 : i32
    %238 = vector.broadcast %c0_i32_80 : i32 to vector<64x128xi32>
    %239 = arith.cmpi ne, %237, %238 : vector<64x128xi32>
    %240 = arith.select %239, %235, %232 : vector<64x128xi1>, vector<64x128xf32>
    %241 = vector.extract_strided_slice %240 {offsets = [0, 0], sizes = [64, 64], strides = [1, 1]} : vector<64x128xf32> to vector<64x64xf32>
    %242 = vector.extract_strided_slice %180 {offsets = [64, 0], sizes = [64, 128], strides = [1, 1]} : vector<128x128xf32> to vector<64x128xf32>
    %243 = tpu.iota {dimensions = array<i32: 0>} : vector<64x128xi32>
    %c64_i32_81 = arith.constant 64 : i32
    %244 = vector.broadcast %c64_i32_81 : i32 to vector<64x128xi32>
    %245 = arith.addi %243, %244 : vector<64x128xi32>
    %246 = vector.extract_strided_slice %242 {offsets = [0, 127], sizes = [64, 1], strides = [1, 1]} : vector<64x128xf32> to vector<64x1xf32>
    %247 = vector.extract_strided_slice %242 {offsets = [0, 0], sizes = [64, 127], strides = [1, 1]} : vector<64x128xf32> to vector<64x127xf32>
    %248 = tpu.concatenate %246, %247 in 1 : vector<64x1xf32>, vector<64x127xf32> -> vector<64x128xf32>
    %c1_i32_82 = arith.constant 1 : i32
    %249 = vector.broadcast %c1_i32_82 : i32 to vector<64x128xi32>
    %250 = arith.andi %245, %249 : vector<64x128xi32>
    %c0_i32_83 = arith.constant 0 : i32
    %251 = vector.broadcast %c0_i32_83 : i32 to vector<64x128xi32>
    %252 = arith.cmpi ne, %250, %251 : vector<64x128xi32>
    %253 = arith.select %252, %248, %242 : vector<64x128xi1>, vector<64x128xf32>
    %254 = vector.extract_strided_slice %253 {offsets = [0, 126], sizes = [64, 2], strides = [1, 1]} : vector<64x128xf32> to vector<64x2xf32>
    %255 = vector.extract_strided_slice %253 {offsets = [0, 0], sizes = [64, 126], strides = [1, 1]} : vector<64x128xf32> to vector<64x126xf32>
    %256 = tpu.concatenate %254, %255 in 1 : vector<64x2xf32>, vector<64x126xf32> -> vector<64x128xf32>
    %c2_i32_84 = arith.constant 2 : i32
    %257 = vector.broadcast %c2_i32_84 : i32 to vector<64x128xi32>
    %258 = arith.andi %245, %257 : vector<64x128xi32>
    %c0_i32_85 = arith.constant 0 : i32
    %259 = vector.broadcast %c0_i32_85 : i32 to vector<64x128xi32>
    %260 = arith.cmpi ne, %258, %259 : vector<64x128xi32>
    %261 = arith.select %260, %256, %253 : vector<64x128xi1>, vector<64x128xf32>
    %262 = vector.extract_strided_slice %261 {offsets = [0, 124], sizes = [64, 4], strides = [1, 1]} : vector<64x128xf32> to vector<64x4xf32>
    %263 = vector.extract_strided_slice %261 {offsets = [0, 0], sizes = [64, 124], strides = [1, 1]} : vector<64x128xf32> to vector<64x124xf32>
    %264 = tpu.concatenate %262, %263 in 1 : vector<64x4xf32>, vector<64x124xf32> -> vector<64x128xf32>
    %c4_i32_86 = arith.constant 4 : i32
    %265 = vector.broadcast %c4_i32_86 : i32 to vector<64x128xi32>
    %266 = arith.andi %245, %265 : vector<64x128xi32>
    %c0_i32_87 = arith.constant 0 : i32
    %267 = vector.broadcast %c0_i32_87 : i32 to vector<64x128xi32>
    %268 = arith.cmpi ne, %266, %267 : vector<64x128xi32>
    %269 = arith.select %268, %264, %261 : vector<64x128xi1>, vector<64x128xf32>
    %270 = vector.extract_strided_slice %269 {offsets = [0, 120], sizes = [64, 8], strides = [1, 1]} : vector<64x128xf32> to vector<64x8xf32>
    %271 = vector.extract_strided_slice %269 {offsets = [0, 0], sizes = [64, 120], strides = [1, 1]} : vector<64x128xf32> to vector<64x120xf32>
    %272 = tpu.concatenate %270, %271 in 1 : vector<64x8xf32>, vector<64x120xf32> -> vector<64x128xf32>
    %c8_i32_88 = arith.constant 8 : i32
    %273 = vector.broadcast %c8_i32_88 : i32 to vector<64x128xi32>
    %274 = arith.andi %245, %273 : vector<64x128xi32>
    %c0_i32_89 = arith.constant 0 : i32
    %275 = vector.broadcast %c0_i32_89 : i32 to vector<64x128xi32>
    %276 = arith.cmpi ne, %274, %275 : vector<64x128xi32>
    %277 = arith.select %276, %272, %269 : vector<64x128xi1>, vector<64x128xf32>
    %278 = vector.extract_strided_slice %277 {offsets = [0, 112], sizes = [64, 16], strides = [1, 1]} : vector<64x128xf32> to vector<64x16xf32>
    %279 = vector.extract_strided_slice %277 {offsets = [0, 0], sizes = [64, 112], strides = [1, 1]} : vector<64x128xf32> to vector<64x112xf32>
    %280 = tpu.concatenate %278, %279 in 1 : vector<64x16xf32>, vector<64x112xf32> -> vector<64x128xf32>
    %c16_i32_90 = arith.constant 16 : i32
    %281 = vector.broadcast %c16_i32_90 : i32 to vector<64x128xi32>
    %282 = arith.andi %245, %281 : vector<64x128xi32>
    %c0_i32_91 = arith.constant 0 : i32
    %283 = vector.broadcast %c0_i32_91 : i32 to vector<64x128xi32>
    %284 = arith.cmpi ne, %282, %283 : vector<64x128xi32>
    %285 = arith.select %284, %280, %277 : vector<64x128xi1>, vector<64x128xf32>
    %286 = vector.extract_strided_slice %285 {offsets = [0, 96], sizes = [64, 32], strides = [1, 1]} : vector<64x128xf32> to vector<64x32xf32>
    %287 = vector.extract_strided_slice %285 {offsets = [0, 0], sizes = [64, 96], strides = [1, 1]} : vector<64x128xf32> to vector<64x96xf32>
    %288 = tpu.concatenate %286, %287 in 1 : vector<64x32xf32>, vector<64x96xf32> -> vector<64x128xf32>
    %c32_i32_92 = arith.constant 32 : i32
    %289 = vector.broadcast %c32_i32_92 : i32 to vector<64x128xi32>
    %290 = arith.andi %245, %289 : vector<64x128xi32>
    %c0_i32_93 = arith.constant 0 : i32
    %291 = vector.broadcast %c0_i32_93 : i32 to vector<64x128xi32>
    %292 = arith.cmpi ne, %290, %291 : vector<64x128xi32>
    %293 = arith.select %292, %288, %285 : vector<64x128xi1>, vector<64x128xf32>
    %294 = vector.extract_strided_slice %293 {offsets = [0, 64], sizes = [64, 64], strides = [1, 1]} : vector<64x128xf32> to vector<64x64xf32>
    %295 = vector.extract_strided_slice %293 {offsets = [0, 0], sizes = [64, 64], strides = [1, 1]} : vector<64x128xf32> to vector<64x64xf32>
    %296 = tpu.concatenate %294, %295 in 1 : vector<64x64xf32>, vector<64x64xf32> -> vector<64x128xf32>
    %c64_i32_94 = arith.constant 64 : i32
    %297 = vector.broadcast %c64_i32_94 : i32 to vector<64x128xi32>
    %298 = arith.andi %245, %297 : vector<64x128xi32>
    %c0_i32_95 = arith.constant 0 : i32
    %299 = vector.broadcast %c0_i32_95 : i32 to vector<64x128xi32>
    %300 = arith.cmpi ne, %298, %299 : vector<64x128xi32>
    %301 = arith.select %300, %296, %293 : vector<64x128xi1>, vector<64x128xf32>
    %302 = vector.extract_strided_slice %301 {offsets = [0, 0], sizes = [64, 64], strides = [1, 1]} : vector<64x128xf32> to vector<64x64xf32>
    %303 = tpu.transpose %302, [1, 0] : vector<64x64xf32> -> vector<64x64xf32>
    %304 = arith.addf %178, %241 : vector<64x64xf32>
    %305 = arith.addf %304, %303 : vector<64x64xf32>
    %c0_96 = arith.constant 0 : index
    %c1_97 = arith.constant 1 : index
    %c0_98 = arith.constant 0 : index
    %c0_99 = arith.constant 0 : index
    %306 = vector.load %arg9[%c0_96, %c1_97, %c0_98, %c0_99] : memref<1x4x64x64xf32, #tpu.memory_space<vmem>>, vector<1x1x64x64xf32>
    %307 = vector.shape_cast %306 : vector<1x1x64x64xf32> to vector<64x64xf32>
    %308 = vector.shape_cast %305 : vector<64x64xf32> to vector<1x1x64x64xf32>
    tpu.vector_store %arg9[%c0_96, %c1_97, %c0_98, %c0_99], %308 {strides = array<i32>} : memref<1x4x64x64xf32, #tpu.memory_space<vmem>>, vector<1x1x64x64xf32>,
    %cst_100 = arith.constant dense<0xFF800000> : vector<64xf32>
    %309 = vector.multi_reduction <maximumf>, %305, %cst_100 [1] : vector<64x64xf32> to vector<64xf32>
    %310 = vector.shape_cast %309 : vector<64xf32> to vector<64x1xf32>
    %311 = vector.broadcast %310 : vector<64x1xf32> to vector<64x64xf32>
    %312 = arith.subf %305, %311 : vector<64x64xf32>
    %313 = math.exp %312 : vector<64x64xf32>
    %cst_101 = arith.constant dense<0.000000e+00> : vector<64xf32>
    %314 = vector.multi_reduction <add>, %313, %cst_101 [1] : vector<64x64xf32> to vector<64xf32>
    %315 = vector.shape_cast %314 : vector<64xf32> to vector<64x1xf32>
    %316 = tpu.reciprocal %315 {approx = true} : vector<64x1xf32> -> vector<64x1xf32>
    %317 = vector.broadcast %316 : vector<64x1xf32> to vector<64x64xf32>
    %318 = arith.mulf %313, %317 : vector<64x64xf32>
    %cst_102 = arith.constant dense<0.000000e+00> : vector<64x32xf32>
    %319 = tpu.matmul %318, %167, %cst_102 {dimension_numbers = #tpu.dot_dimension_numbers<[1], [0], [0], [1], [0, 0, 1, 1], [], []>} : vector<64x64xf32>, vector<64x32xf32>, vector<64x32xf32> -> vector<64x32xf32>
    %c0_103 = arith.constant 0 : index
    %c0_104 = arith.constant 0 : index
    %c32_105 = arith.constant 32 : index
    %320 = vector.load %arg8[%c0_103, %c0_104, %c32_105] : memref<1x64x128xf32, #tpu.memory_space<vmem>>, vector<1x64x32xf32>
    %321 = vector.shape_cast %320 : vector<1x64x32xf32> to vector<64x32xf32>
    %322 = vector.shape_cast %319 : vector<64x32xf32> to vector<1x64x32xf32>
    tpu.vector_store %arg8[%c0_103, %c0_104, %c32_105], %322 {strides = array<i32>} : memref<1x64x128xf32, #tpu.memory_space<vmem>>, vector<1x64x32xf32>,
    %c0_106 = arith.constant 0 : index
    %c0_107 = arith.constant 0 : index
    %c64 = arith.constant 64 : index
    %323 = vector.load %arg2[%c0_106, %c0_107, %c64] : memref<1x64x128xf32, #tpu.memory_space<vmem>>, vector<1x64x32xf32>
    %324 = vector.shape_cast %323 : vector<1x64x32xf32> to vector<64x32xf32>
    %c0_108 = arith.constant 0 : index
    %c0_109 = arith.constant 0 : index
    %c64_110 = arith.constant 64 : index
    %325 = vector.load %arg3[%c0_108, %c0_109, %c64_110] : memref<1x64x128xf32, #tpu.memory_space<vmem>>, vector<1x64x32xf32>
    %326 = vector.shape_cast %325 : vector<1x64x32xf32> to vector<64x32xf32>
    %c0_111 = arith.constant 0 : index
    %c0_112 = arith.constant 0 : index
    %c64_113 = arith.constant 64 : index
    %327 = vector.load %arg4[%c0_111, %c0_112, %c64_113] : memref<1x64x128xf32, #tpu.memory_space<vmem>>, vector<1x64x32xf32>
    %328 = vector.shape_cast %327 : vector<1x64x32xf32> to vector<64x32xf32>
    %c2 = arith.constant 2 : index
    %c0_114 = arith.constant 0 : index
    %c0_115 = arith.constant 0 : index
    %329 = vector.load %arg5[%c2, %c0_114, %c0_115] : memref<4x1x32xf32, #tpu.memory_space<vmem>>, vector<1x1x32xf32>
    %330 = vector.shape_cast %329 : vector<1x1x32xf32> to vector<1x32xf32>
    %c2_116 = arith.constant 2 : index
    %c0_117 = arith.constant 0 : index
    %c0_118 = arith.constant 0 : index
    %331 = vector.load %arg6[%c2_116, %c0_117, %c0_118] : memref<4x1x32xf32, #tpu.memory_space<vmem>>, vector<1x1x32xf32>
    %332 = vector.shape_cast %331 : vector<1x1x32xf32> to vector<1x32xf32>
    %333 = vector.broadcast %330 : vector<1x32xf32> to vector<64x32xf32>
    %334 = arith.addf %324, %333 : vector<64x32xf32>
    %cst_119 = arith.constant 0.176776692 : f32
    %335 = vector.broadcast %cst_119 : f32 to vector<64x32xf32>
    %336 = arith.mulf %334, %335 : vector<64x32xf32>
    %337 = vector.broadcast %332 : vector<1x32xf32> to vector<64x32xf32>
    %338 = arith.addf %324, %337 : vector<64x32xf32>
    %cst_120 = arith.constant dense<0.000000e+00> : vector<64x64xf32>
    %339 = tpu.matmul %336, %326, %cst_120 {dimension_numbers = #tpu.dot_dimension_numbers<[1], [1], [0], [0], [0, 0, 1, 0], [], []>} : vector<64x32xf32>, vector<64x32xf32>, vector<64x64xf32> -> vector<64x64xf32>
    %340 = tpu.concatenate %338, %326 in 0 : vector<64x32xf32>, vector<64x32xf32> -> vector<128x32xf32>
    %cst_121 = arith.constant dense<0.000000e+00> : vector<128x128xf32>
    %341 = tpu.matmul %340, %0, %cst_121 {dimension_numbers = #tpu.dot_dimension_numbers<[1], [0], [0], [1], [0, 0, 1, 1], [], []>} : vector<128x32xf32>, vector<32x128xf32>, vector<128x128xf32> -> vector<128x128xf32>
    %342 = vector.extract_strided_slice %341 {offsets = [0, 0], sizes = [64, 128], strides = [1, 1]} : vector<128x128xf32> to vector<64x128xf32>
    %343 = tpu.iota {dimensions = array<i32: 0>} : vector<64x128xi32>
    %c64_i32_122 = arith.constant 64 : i32
    %344 = vector.broadcast %c64_i32_122 : i32 to vector<64x128xi32>
    %345 = arith.addi %343, %344 : vector<64x128xi32>
    %346 = vector.extract_strided_slice %342 {offsets = [0, 127], sizes = [64, 1], strides = [1, 1]} : vector<64x128xf32> to vector<64x1xf32>
    %347 = vector.extract_strided_slice %342 {offsets = [0, 0], sizes = [64, 127], strides = [1, 1]} : vector<64x128xf32> to vector<64x127xf32>
    %348 = tpu.concatenate %346, %347 in 1 : vector<64x1xf32>, vector<64x127xf32> -> vector<64x128xf32>
    %c1_i32_123 = arith.constant 1 : i32
    %349 = vector.broadcast %c1_i32_123 : i32 to vector<64x128xi32>
    %350 = arith.andi %345, %349 : vector<64x128xi32>
    %c0_i32_124 = arith.constant 0 : i32
    %351 = vector.broadcast %c0_i32_124 : i32 to vector<64x128xi32>
    %352 = arith.cmpi ne, %350, %351 : vector<64x128xi32>
    %353 = arith.select %352, %348, %342 : vector<64x128xi1>, vector<64x128xf32>
    %354 = vector.extract_strided_slice %353 {offsets = [0, 126], sizes = [64, 2], strides = [1, 1]} : vector<64x128xf32> to vector<64x2xf32>
    %355 = vector.extract_strided_slice %353 {offsets = [0, 0], sizes = [64, 126], strides = [1, 1]} : vector<64x128xf32> to vector<64x126xf32>
    %356 = tpu.concatenate %354, %355 in 1 : vector<64x2xf32>, vector<64x126xf32> -> vector<64x128xf32>
    %c2_i32_125 = arith.constant 2 : i32
    %357 = vector.broadcast %c2_i32_125 : i32 to vector<64x128xi32>
    %358 = arith.andi %345, %357 : vector<64x128xi32>
    %c0_i32_126 = arith.constant 0 : i32
    %359 = vector.broadcast %c0_i32_126 : i32 to vector<64x128xi32>
    %360 = arith.cmpi ne, %358, %359 : vector<64x128xi32>
    %361 = arith.select %360, %356, %353 : vector<64x128xi1>, vector<64x128xf32>
    %362 = vector.extract_strided_slice %361 {offsets = [0, 124], sizes = [64, 4], strides = [1, 1]} : vector<64x128xf32> to vector<64x4xf32>
    %363 = vector.extract_strided_slice %361 {offsets = [0, 0], sizes = [64, 124], strides = [1, 1]} : vector<64x128xf32> to vector<64x124xf32>
    %364 = tpu.concatenate %362, %363 in 1 : vector<64x4xf32>, vector<64x124xf32> -> vector<64x128xf32>
    %c4_i32_127 = arith.constant 4 : i32
    %365 = vector.broadcast %c4_i32_127 : i32 to vector<64x128xi32>
    %366 = arith.andi %345, %365 : vector<64x128xi32>
    %c0_i32_128 = arith.constant 0 : i32
    %367 = vector.broadcast %c0_i32_128 : i32 to vector<64x128xi32>
    %368 = arith.cmpi ne, %366, %367 : vector<64x128xi32>
    %369 = arith.select %368, %364, %361 : vector<64x128xi1>, vector<64x128xf32>
    %370 = vector.extract_strided_slice %369 {offsets = [0, 120], sizes = [64, 8], strides = [1, 1]} : vector<64x128xf32> to vector<64x8xf32>
    %371 = vector.extract_strided_slice %369 {offsets = [0, 0], sizes = [64, 120], strides = [1, 1]} : vector<64x128xf32> to vector<64x120xf32>
    %372 = tpu.concatenate %370, %371 in 1 : vector<64x8xf32>, vector<64x120xf32> -> vector<64x128xf32>
    %c8_i32_129 = arith.constant 8 : i32
    %373 = vector.broadcast %c8_i32_129 : i32 to vector<64x128xi32>
    %374 = arith.andi %345, %373 : vector<64x128xi32>
    %c0_i32_130 = arith.constant 0 : i32
    %375 = vector.broadcast %c0_i32_130 : i32 to vector<64x128xi32>
    %376 = arith.cmpi ne, %374, %375 : vector<64x128xi32>
    %377 = arith.select %376, %372, %369 : vector<64x128xi1>, vector<64x128xf32>
    %378 = vector.extract_strided_slice %377 {offsets = [0, 112], sizes = [64, 16], strides = [1, 1]} : vector<64x128xf32> to vector<64x16xf32>
    %379 = vector.extract_strided_slice %377 {offsets = [0, 0], sizes = [64, 112], strides = [1, 1]} : vector<64x128xf32> to vector<64x112xf32>
    %380 = tpu.concatenate %378, %379 in 1 : vector<64x16xf32>, vector<64x112xf32> -> vector<64x128xf32>
    %c16_i32_131 = arith.constant 16 : i32
    %381 = vector.broadcast %c16_i32_131 : i32 to vector<64x128xi32>
    %382 = arith.andi %345, %381 : vector<64x128xi32>
    %c0_i32_132 = arith.constant 0 : i32
    %383 = vector.broadcast %c0_i32_132 : i32 to vector<64x128xi32>
    %384 = arith.cmpi ne, %382, %383 : vector<64x128xi32>
    %385 = arith.select %384, %380, %377 : vector<64x128xi1>, vector<64x128xf32>
    %386 = vector.extract_strided_slice %385 {offsets = [0, 96], sizes = [64, 32], strides = [1, 1]} : vector<64x128xf32> to vector<64x32xf32>
    %387 = vector.extract_strided_slice %385 {offsets = [0, 0], sizes = [64, 96], strides = [1, 1]} : vector<64x128xf32> to vector<64x96xf32>
    %388 = tpu.concatenate %386, %387 in 1 : vector<64x32xf32>, vector<64x96xf32> -> vector<64x128xf32>
    %c32_i32_133 = arith.constant 32 : i32
    %389 = vector.broadcast %c32_i32_133 : i32 to vector<64x128xi32>
    %390 = arith.andi %345, %389 : vector<64x128xi32>
    %c0_i32_134 = arith.constant 0 : i32
    %391 = vector.broadcast %c0_i32_134 : i32 to vector<64x128xi32>
    %392 = arith.cmpi ne, %390, %391 : vector<64x128xi32>
    %393 = arith.select %392, %388, %385 : vector<64x128xi1>, vector<64x128xf32>
    %394 = vector.extract_strided_slice %393 {offsets = [0, 64], sizes = [64, 64], strides = [1, 1]} : vector<64x128xf32> to vector<64x64xf32>
    %395 = vector.extract_strided_slice %393 {offsets = [0, 0], sizes = [64, 64], strides = [1, 1]} : vector<64x128xf32> to vector<64x64xf32>
    %396 = tpu.concatenate %394, %395 in 1 : vector<64x64xf32>, vector<64x64xf32> -> vector<64x128xf32>
    %c64_i32_135 = arith.constant 64 : i32
    %397 = vector.broadcast %c64_i32_135 : i32 to vector<64x128xi32>
    %398 = arith.andi %345, %397 : vector<64x128xi32>
    %c0_i32_136 = arith.constant 0 : i32
    %399 = vector.broadcast %c0_i32_136 : i32 to vector<64x128xi32>
    %400 = arith.cmpi ne, %398, %399 : vector<64x128xi32>
    %401 = arith.select %400, %396, %393 : vector<64x128xi1>, vector<64x128xf32>
    %402 = vector.extract_strided_slice %401 {offsets = [0, 0], sizes = [64, 64], strides = [1, 1]} : vector<64x128xf32> to vector<64x64xf32>
    %403 = vector.extract_strided_slice %341 {offsets = [64, 0], sizes = [64, 128], strides = [1, 1]} : vector<128x128xf32> to vector<64x128xf32>
    %404 = tpu.iota {dimensions = array<i32: 0>} : vector<64x128xi32>
    %c64_i32_137 = arith.constant 64 : i32
    %405 = vector.broadcast %c64_i32_137 : i32 to vector<64x128xi32>
    %406 = arith.addi %404, %405 : vector<64x128xi32>
    %407 = vector.extract_strided_slice %403 {offsets = [0, 127], sizes = [64, 1], strides = [1, 1]} : vector<64x128xf32> to vector<64x1xf32>
    %408 = vector.extract_strided_slice %403 {offsets = [0, 0], sizes = [64, 127], strides = [1, 1]} : vector<64x128xf32> to vector<64x127xf32>
    %409 = tpu.concatenate %407, %408 in 1 : vector<64x1xf32>, vector<64x127xf32> -> vector<64x128xf32>
    %c1_i32_138 = arith.constant 1 : i32
    %410 = vector.broadcast %c1_i32_138 : i32 to vector<64x128xi32>
    %411 = arith.andi %406, %410 : vector<64x128xi32>
    %c0_i32_139 = arith.constant 0 : i32
    %412 = vector.broadcast %c0_i32_139 : i32 to vector<64x128xi32>
    %413 = arith.cmpi ne, %411, %412 : vector<64x128xi32>
    %414 = arith.select %413, %409, %403 : vector<64x128xi1>, vector<64x128xf32>
    %415 = vector.extract_strided_slice %414 {offsets = [0, 126], sizes = [64, 2], strides = [1, 1]} : vector<64x128xf32> to vector<64x2xf32>
    %416 = vector.extract_strided_slice %414 {offsets = [0, 0], sizes = [64, 126], strides = [1, 1]} : vector<64x128xf32> to vector<64x126xf32>
    %417 = tpu.concatenate %415, %416 in 1 : vector<64x2xf32>, vector<64x126xf32> -> vector<64x128xf32>
    %c2_i32_140 = arith.constant 2 : i32
    %418 = vector.broadcast %c2_i32_140 : i32 to vector<64x128xi32>
    %419 = arith.andi %406, %418 : vector<64x128xi32>
    %c0_i32_141 = arith.constant 0 : i32
    %420 = vector.broadcast %c0_i32_141 : i32 to vector<64x128xi32>
    %421 = arith.cmpi ne, %419, %420 : vector<64x128xi32>
    %422 = arith.select %421, %417, %414 : vector<64x128xi1>, vector<64x128xf32>
    %423 = vector.extract_strided_slice %422 {offsets = [0, 124], sizes = [64, 4], strides = [1, 1]} : vector<64x128xf32> to vector<64x4xf32>
    %424 = vector.extract_strided_slice %422 {offsets = [0, 0], sizes = [64, 124], strides = [1, 1]} : vector<64x128xf32> to vector<64x124xf32>
    %425 = tpu.concatenate %423, %424 in 1 : vector<64x4xf32>, vector<64x124xf32> -> vector<64x128xf32>
    %c4_i32_142 = arith.constant 4 : i32
    %426 = vector.broadcast %c4_i32_142 : i32 to vector<64x128xi32>
    %427 = arith.andi %406, %426 : vector<64x128xi32>
    %c0_i32_143 = arith.constant 0 : i32
    %428 = vector.broadcast %c0_i32_143 : i32 to vector<64x128xi32>
    %429 = arith.cmpi ne, %427, %428 : vector<64x128xi32>
    %430 = arith.select %429, %425, %422 : vector<64x128xi1>, vector<64x128xf32>
    %431 = vector.extract_strided_slice %430 {offsets = [0, 120], sizes = [64, 8], strides = [1, 1]} : vector<64x128xf32> to vector<64x8xf32>
    %432 = vector.extract_strided_slice %430 {offsets = [0, 0], sizes = [64, 120], strides = [1, 1]} : vector<64x128xf32> to vector<64x120xf32>
    %433 = tpu.concatenate %431, %432 in 1 : vector<64x8xf32>, vector<64x120xf32> -> vector<64x128xf32>
    %c8_i32_144 = arith.constant 8 : i32
    %434 = vector.broadcast %c8_i32_144 : i32 to vector<64x128xi32>
    %435 = arith.andi %406, %434 : vector<64x128xi32>
    %c0_i32_145 = arith.constant 0 : i32
    %436 = vector.broadcast %c0_i32_145 : i32 to vector<64x128xi32>
    %437 = arith.cmpi ne, %435, %436 : vector<64x128xi32>
    %438 = arith.select %437, %433, %430 : vector<64x128xi1>, vector<64x128xf32>
    %439 = vector.extract_strided_slice %438 {offsets = [0, 112], sizes = [64, 16], strides = [1, 1]} : vector<64x128xf32> to vector<64x16xf32>
    %440 = vector.extract_strided_slice %438 {offsets = [0, 0], sizes = [64, 112], strides = [1, 1]} : vector<64x128xf32> to vector<64x112xf32>
    %441 = tpu.concatenate %439, %440 in 1 : vector<64x16xf32>, vector<64x112xf32> -> vector<64x128xf32>
    %c16_i32_146 = arith.constant 16 : i32
    %442 = vector.broadcast %c16_i32_146 : i32 to vector<64x128xi32>
    %443 = arith.andi %406, %442 : vector<64x128xi32>
    %c0_i32_147 = arith.constant 0 : i32
    %444 = vector.broadcast %c0_i32_147 : i32 to vector<64x128xi32>
    %445 = arith.cmpi ne, %443, %444 : vector<64x128xi32>
    %446 = arith.select %445, %441, %438 : vector<64x128xi1>, vector<64x128xf32>
    %447 = vector.extract_strided_slice %446 {offsets = [0, 96], sizes = [64, 32], strides = [1, 1]} : vector<64x128xf32> to vector<64x32xf32>
    %448 = vector.extract_strided_slice %446 {offsets = [0, 0], sizes = [64, 96], strides = [1, 1]} : vector<64x128xf32> to vector<64x96xf32>
    %449 = tpu.concatenate %447, %448 in 1 : vector<64x32xf32>, vector<64x96xf32> -> vector<64x128xf32>
    %c32_i32_148 = arith.constant 32 : i32
    %450 = vector.broadcast %c32_i32_148 : i32 to vector<64x128xi32>
    %451 = arith.andi %406, %450 : vector<64x128xi32>
    %c0_i32_149 = arith.constant 0 : i32
    %452 = vector.broadcast %c0_i32_149 : i32 to vector<64x128xi32>
    %453 = arith.cmpi ne, %451, %452 : vector<64x128xi32>
    %454 = arith.select %453, %449, %446 : vector<64x128xi1>, vector<64x128xf32>
    %455 = vector.extract_strided_slice %454 {offsets = [0, 64], sizes = [64, 64], strides = [1, 1]} : vector<64x128xf32> to vector<64x64xf32>
    %456 = vector.extract_strided_slice %454 {offsets = [0, 0], sizes = [64, 64], strides = [1, 1]} : vector<64x128xf32> to vector<64x64xf32>
    %457 = tpu.concatenate %455, %456 in 1 : vector<64x64xf32>, vector<64x64xf32> -> vector<64x128xf32>
    %c64_i32_150 = arith.constant 64 : i32
    %458 = vector.broadcast %c64_i32_150 : i32 to vector<64x128xi32>
    %459 = arith.andi %406, %458 : vector<64x128xi32>
    %c0_i32_151 = arith.constant 0 : i32
    %460 = vector.broadcast %c0_i32_151 : i32 to vector<64x128xi32>
    %461 = arith.cmpi ne, %459, %460 : vector<64x128xi32>
    %462 = arith.select %461, %457, %454 : vector<64x128xi1>, vector<64x128xf32>
    %463 = vector.extract_strided_slice %462 {offsets = [0, 0], sizes = [64, 64], strides = [1, 1]} : vector<64x128xf32> to vector<64x64xf32>
    %464 = tpu.transpose %463, [1, 0] : vector<64x64xf32> -> vector<64x64xf32>
    %465 = arith.addf %339, %402 : vector<64x64xf32>
    %466 = arith.addf %465, %464 : vector<64x64xf32>
    %c0_152 = arith.constant 0 : index
    %c2_153 = arith.constant 2 : index
    %c0_154 = arith.constant 0 : index
    %c0_155 = arith.constant 0 : index
    %467 = vector.load %arg9[%c0_152, %c2_153, %c0_154, %c0_155] : memref<1x4x64x64xf32, #tpu.memory_space<vmem>>, vector<1x1x64x64xf32>
    %468 = vector.shape_cast %467 : vector<1x1x64x64xf32> to vector<64x64xf32>
    %469 = vector.shape_cast %466 : vector<64x64xf32> to vector<1x1x64x64xf32>
    tpu.vector_store %arg9[%c0_152, %c2_153, %c0_154, %c0_155], %469 {strides = array<i32>} : memref<1x4x64x64xf32, #tpu.memory_space<vmem>>, vector<1x1x64x64xf32>,
    %cst_156 = arith.constant dense<0xFF800000> : vector<64xf32>
    %470 = vector.multi_reduction <maximumf>, %466, %cst_156 [1] : vector<64x64xf32> to vector<64xf32>
    %471 = vector.shape_cast %470 : vector<64xf32> to vector<64x1xf32>
    %472 = vector.broadcast %471 : vector<64x1xf32> to vector<64x64xf32>
    %473 = arith.subf %466, %472 : vector<64x64xf32>
    %474 = math.exp %473 : vector<64x64xf32>
    %cst_157 = arith.constant dense<0.000000e+00> : vector<64xf32>
    %475 = vector.multi_reduction <add>, %474, %cst_157 [1] : vector<64x64xf32> to vector<64xf32>
    %476 = vector.shape_cast %475 : vector<64xf32> to vector<64x1xf32>
    %477 = tpu.reciprocal %476 {approx = true} : vector<64x1xf32> -> vector<64x1xf32>
    %478 = vector.broadcast %477 : vector<64x1xf32> to vector<64x64xf32>
    %479 = arith.mulf %474, %478 : vector<64x64xf32>
    %cst_158 = arith.constant dense<0.000000e+00> : vector<64x32xf32>
    %480 = tpu.matmul %479, %328, %cst_158 {dimension_numbers = #tpu.dot_dimension_numbers<[1], [0], [0], [1], [0, 0, 1, 1], [], []>} : vector<64x64xf32>, vector<64x32xf32>, vector<64x32xf32> -> vector<64x32xf32>
    %c0_159 = arith.constant 0 : index
    %c0_160 = arith.constant 0 : index
    %c64_161 = arith.constant 64 : index
    %481 = vector.load %arg8[%c0_159, %c0_160, %c64_161] : memref<1x64x128xf32, #tpu.memory_space<vmem>>, vector<1x64x32xf32>
    %482 = vector.shape_cast %481 : vector<1x64x32xf32> to vector<64x32xf32>
    %483 = vector.shape_cast %480 : vector<64x32xf32> to vector<1x64x32xf32>
    tpu.vector_store %arg8[%c0_159, %c0_160, %c64_161], %483 {strides = array<i32>} : memref<1x64x128xf32, #tpu.memory_space<vmem>>, vector<1x64x32xf32>,
    %c0_162 = arith.constant 0 : index
    %c0_163 = arith.constant 0 : index
    %c96 = arith.constant 96 : index
    %484 = vector.load %arg2[%c0_162, %c0_163, %c96] : memref<1x64x128xf32, #tpu.memory_space<vmem>>, vector<1x64x32xf32>
    %485 = vector.shape_cast %484 : vector<1x64x32xf32> to vector<64x32xf32>
    %c0_164 = arith.constant 0 : index
    %c0_165 = arith.constant 0 : index
    %c96_166 = arith.constant 96 : index
    %486 = vector.load %arg3[%c0_164, %c0_165, %c96_166] : memref<1x64x128xf32, #tpu.memory_space<vmem>>, vector<1x64x32xf32>
    %487 = vector.shape_cast %486 : vector<1x64x32xf32> to vector<64x32xf32>
    %c0_167 = arith.constant 0 : index
    %c0_168 = arith.constant 0 : index
    %c96_169 = arith.constant 96 : index
    %488 = vector.load %arg4[%c0_167, %c0_168, %c96_169] : memref<1x64x128xf32, #tpu.memory_space<vmem>>, vector<1x64x32xf32>
    %489 = vector.shape_cast %488 : vector<1x64x32xf32> to vector<64x32xf32>
    %c3 = arith.constant 3 : index
    %c0_170 = arith.constant 0 : index
    %c0_171 = arith.constant 0 : index
    %490 = vector.load %arg5[%c3, %c0_170, %c0_171] : memref<4x1x32xf32, #tpu.memory_space<vmem>>, vector<1x1x32xf32>
    %491 = vector.shape_cast %490 : vector<1x1x32xf32> to vector<1x32xf32>
    %c3_172 = arith.constant 3 : index
    %c0_173 = arith.constant 0 : index
    %c0_174 = arith.constant 0 : index
    %492 = vector.load %arg6[%c3_172, %c0_173, %c0_174] : memref<4x1x32xf32, #tpu.memory_space<vmem>>, vector<1x1x32xf32>
    %493 = vector.shape_cast %492 : vector<1x1x32xf32> to vector<1x32xf32>
    %494 = vector.broadcast %491 : vector<1x32xf32> to vector<64x32xf32>
    %495 = arith.addf %485, %494 : vector<64x32xf32>
    %cst_175 = arith.constant 0.176776692 : f32
    %496 = vector.broadcast %cst_175 : f32 to vector<64x32xf32>
    %497 = arith.mulf %495, %496 : vector<64x32xf32>
    %498 = vector.broadcast %493 : vector<1x32xf32> to vector<64x32xf32>
    %499 = arith.addf %485, %498 : vector<64x32xf32>
    %cst_176 = arith.constant dense<0.000000e+00> : vector<64x64xf32>
    %500 = tpu.matmul %497, %487, %cst_176 {dimension_numbers = #tpu.dot_dimension_numbers<[1], [1], [0], [0], [0, 0, 1, 0], [], []>} : vector<64x32xf32>, vector<64x32xf32>, vector<64x64xf32> -> vector<64x64xf32>
    %501 = tpu.concatenate %499, %487 in 0 : vector<64x32xf32>, vector<64x32xf32> -> vector<128x32xf32>
    %cst_177 = arith.constant dense<0.000000e+00> : vector<128x128xf32>
    %502 = tpu.matmul %501, %0, %cst_177 {dimension_numbers = #tpu.dot_dimension_numbers<[1], [0], [0], [1], [0, 0, 1, 1], [], []>} : vector<128x32xf32>, vector<32x128xf32>, vector<128x128xf32> -> vector<128x128xf32>
    %503 = vector.extract_strided_slice %502 {offsets = [0, 0], sizes = [64, 128], strides = [1, 1]} : vector<128x128xf32> to vector<64x128xf32>
    %504 = tpu.iota {dimensions = array<i32: 0>} : vector<64x128xi32>
    %c64_i32_178 = arith.constant 64 : i32
    %505 = vector.broadcast %c64_i32_178 : i32 to vector<64x128xi32>
    %506 = arith.addi %504, %505 : vector<64x128xi32>
    %507 = vector.extract_strided_slice %503 {offsets = [0, 127], sizes = [64, 1], strides = [1, 1]} : vector<64x128xf32> to vector<64x1xf32>
    %508 = vector.extract_strided_slice %503 {offsets = [0, 0], sizes = [64, 127], strides = [1, 1]} : vector<64x128xf32> to vector<64x127xf32>
    %509 = tpu.concatenate %507, %508 in 1 : vector<64x1xf32>, vector<64x127xf32> -> vector<64x128xf32>
    %c1_i32_179 = arith.constant 1 : i32
    %510 = vector.broadcast %c1_i32_179 : i32 to vector<64x128xi32>
    %511 = arith.andi %506, %510 : vector<64x128xi32>
    %c0_i32_180 = arith.constant 0 : i32
    %512 = vector.broadcast %c0_i32_180 : i32 to vector<64x128xi32>
    %513 = arith.cmpi ne, %511, %512 : vector<64x128xi32>
    %514 = arith.select %513, %509, %503 : vector<64x128xi1>, vector<64x128xf32>
    %515 = vector.extract_strided_slice %514 {offsets = [0, 126], sizes = [64, 2], strides = [1, 1]} : vector<64x128xf32> to vector<64x2xf32>
    %516 = vector.extract_strided_slice %514 {offsets = [0, 0], sizes = [64, 126], strides = [1, 1]} : vector<64x128xf32> to vector<64x126xf32>
    %517 = tpu.concatenate %515, %516 in 1 : vector<64x2xf32>, vector<64x126xf32> -> vector<64x128xf32>
    %c2_i32_181 = arith.constant 2 : i32
    %518 = vector.broadcast %c2_i32_181 : i32 to vector<64x128xi32>
    %519 = arith.andi %506, %518 : vector<64x128xi32>
    %c0_i32_182 = arith.constant 0 : i32
    %520 = vector.broadcast %c0_i32_182 : i32 to vector<64x128xi32>
    %521 = arith.cmpi ne, %519, %520 : vector<64x128xi32>
    %522 = arith.select %521, %517, %514 : vector<64x128xi1>, vector<64x128xf32>
    %523 = vector.extract_strided_slice %522 {offsets = [0, 124], sizes = [64, 4], strides = [1, 1]} : vector<64x128xf32> to vector<64x4xf32>
    %524 = vector.extract_strided_slice %522 {offsets = [0, 0], sizes = [64, 124], strides = [1, 1]} : vector<64x128xf32> to vector<64x124xf32>
    %525 = tpu.concatenate %523, %524 in 1 : vector<64x4xf32>, vector<64x124xf32> -> vector<64x128xf32>
    %c4_i32_183 = arith.constant 4 : i32
    %526 = vector.broadcast %c4_i32_183 : i32 to vector<64x128xi32>
    %527 = arith.andi %506, %526 : vector<64x128xi32>
    %c0_i32_184 = arith.constant 0 : i32
    %528 = vector.broadcast %c0_i32_184 : i32 to vector<64x128xi32>
    %529 = arith.cmpi ne, %527, %528 : vector<64x128xi32>
    %530 = arith.select %529, %525, %522 : vector<64x128xi1>, vector<64x128xf32>
    %531 = vector.extract_strided_slice %530 {offsets = [0, 120], sizes = [64, 8], strides = [1, 1]} : vector<64x128xf32> to vector<64x8xf32>
    %532 = vector.extract_strided_slice %530 {offsets = [0, 0], sizes = [64, 120], strides = [1, 1]} : vector<64x128xf32> to vector<64x120xf32>
    %533 = tpu.concatenate %531, %532 in 1 : vector<64x8xf32>, vector<64x120xf32> -> vector<64x128xf32>
    %c8_i32_185 = arith.constant 8 : i32
    %534 = vector.broadcast %c8_i32_185 : i32 to vector<64x128xi32>
    %535 = arith.andi %506, %534 : vector<64x128xi32>
    %c0_i32_186 = arith.constant 0 : i32
    %536 = vector.broadcast %c0_i32_186 : i32 to vector<64x128xi32>
    %537 = arith.cmpi ne, %535, %536 : vector<64x128xi32>
    %538 = arith.select %537, %533, %530 : vector<64x128xi1>, vector<64x128xf32>
    %539 = vector.extract_strided_slice %538 {offsets = [0, 112], sizes = [64, 16], strides = [1, 1]} : vector<64x128xf32> to vector<64x16xf32>
    %540 = vector.extract_strided_slice %538 {offsets = [0, 0], sizes = [64, 112], strides = [1, 1]} : vector<64x128xf32> to vector<64x112xf32>
    %541 = tpu.concatenate %539, %540 in 1 : vector<64x16xf32>, vector<64x112xf32> -> vector<64x128xf32>
    %c16_i32_187 = arith.constant 16 : i32
    %542 = vector.broadcast %c16_i32_187 : i32 to vector<64x128xi32>
    %543 = arith.andi %506, %542 : vector<64x128xi32>
    %c0_i32_188 = arith.constant 0 : i32
    %544 = vector.broadcast %c0_i32_188 : i32 to vector<64x128xi32>
    %545 = arith.cmpi ne, %543, %544 : vector<64x128xi32>
    %546 = arith.select %545, %541, %538 : vector<64x128xi1>, vector<64x128xf32>
    %547 = vector.extract_strided_slice %546 {offsets = [0, 96], sizes = [64, 32], strides = [1, 1]} : vector<64x128xf32> to vector<64x32xf32>
    %548 = vector.extract_strided_slice %546 {offsets = [0, 0], sizes = [64, 96], strides = [1, 1]} : vector<64x128xf32> to vector<64x96xf32>
    %549 = tpu.concatenate %547, %548 in 1 : vector<64x32xf32>, vector<64x96xf32> -> vector<64x128xf32>
    %c32_i32_189 = arith.constant 32 : i32
    %550 = vector.broadcast %c32_i32_189 : i32 to vector<64x128xi32>
    %551 = arith.andi %506, %550 : vector<64x128xi32>
    %c0_i32_190 = arith.constant 0 : i32
    %552 = vector.broadcast %c0_i32_190 : i32 to vector<64x128xi32>
    %553 = arith.cmpi ne, %551, %552 : vector<64x128xi32>
    %554 = arith.select %553, %549, %546 : vector<64x128xi1>, vector<64x128xf32>
    %555 = vector.extract_strided_slice %554 {offsets = [0, 64], sizes = [64, 64], strides = [1, 1]} : vector<64x128xf32> to vector<64x64xf32>
    %556 = vector.extract_strided_slice %554 {offsets = [0, 0], sizes = [64, 64], strides = [1, 1]} : vector<64x128xf32> to vector<64x64xf32>
    %557 = tpu.concatenate %555, %556 in 1 : vector<64x64xf32>, vector<64x64xf32> -> vector<64x128xf32>
    %c64_i32_191 = arith.constant 64 : i32
    %558 = vector.broadcast %c64_i32_191 : i32 to vector<64x128xi32>
    %559 = arith.andi %506, %558 : vector<64x128xi32>
    %c0_i32_192 = arith.constant 0 : i32
    %560 = vector.broadcast %c0_i32_192 : i32 to vector<64x128xi32>
    %561 = arith.cmpi ne, %559, %560 : vector<64x128xi32>
    %562 = arith.select %561, %557, %554 : vector<64x128xi1>, vector<64x128xf32>
    %563 = vector.extract_strided_slice %562 {offsets = [0, 0], sizes = [64, 64], strides = [1, 1]} : vector<64x128xf32> to vector<64x64xf32>
    %564 = vector.extract_strided_slice %502 {offsets = [64, 0], sizes = [64, 128], strides = [1, 1]} : vector<128x128xf32> to vector<64x128xf32>
    %565 = tpu.iota {dimensions = array<i32: 0>} : vector<64x128xi32>
    %c64_i32_193 = arith.constant 64 : i32
    %566 = vector.broadcast %c64_i32_193 : i32 to vector<64x128xi32>
    %567 = arith.addi %565, %566 : vector<64x128xi32>
    %568 = vector.extract_strided_slice %564 {offsets = [0, 127], sizes = [64, 1], strides = [1, 1]} : vector<64x128xf32> to vector<64x1xf32>
    %569 = vector.extract_strided_slice %564 {offsets = [0, 0], sizes = [64, 127], strides = [1, 1]} : vector<64x128xf32> to vector<64x127xf32>
    %570 = tpu.concatenate %568, %569 in 1 : vector<64x1xf32>, vector<64x127xf32> -> vector<64x128xf32>
    %c1_i32_194 = arith.constant 1 : i32
    %571 = vector.broadcast %c1_i32_194 : i32 to vector<64x128xi32>
    %572 = arith.andi %567, %571 : vector<64x128xi32>
    %c0_i32_195 = arith.constant 0 : i32
    %573 = vector.broadcast %c0_i32_195 : i32 to vector<64x128xi32>
    %574 = arith.cmpi ne, %572, %573 : vector<64x128xi32>
    %575 = arith.select %574, %570, %564 : vector<64x128xi1>, vector<64x128xf32>
    %576 = vector.extract_strided_slice %575 {offsets = [0, 126], sizes = [64, 2], strides = [1, 1]} : vector<64x128xf32> to vector<64x2xf32>
    %577 = vector.extract_strided_slice %575 {offsets = [0, 0], sizes = [64, 126], strides = [1, 1]} : vector<64x128xf32> to vector<64x126xf32>
    %578 = tpu.concatenate %576, %577 in 1 : vector<64x2xf32>, vector<64x126xf32> -> vector<64x128xf32>
    %c2_i32_196 = arith.constant 2 : i32
    %579 = vector.broadcast %c2_i32_196 : i32 to vector<64x128xi32>
    %580 = arith.andi %567, %579 : vector<64x128xi32>
    %c0_i32_197 = arith.constant 0 : i32
    %581 = vector.broadcast %c0_i32_197 : i32 to vector<64x128xi32>
    %582 = arith.cmpi ne, %580, %581 : vector<64x128xi32>
    %583 = arith.select %582, %578, %575 : vector<64x128xi1>, vector<64x128xf32>
    %584 = vector.extract_strided_slice %583 {offsets = [0, 124], sizes = [64, 4], strides = [1, 1]} : vector<64x128xf32> to vector<64x4xf32>
    %585 = vector.extract_strided_slice %583 {offsets = [0, 0], sizes = [64, 124], strides = [1, 1]} : vector<64x128xf32> to vector<64x124xf32>
    %586 = tpu.concatenate %584, %585 in 1 : vector<64x4xf32>, vector<64x124xf32> -> vector<64x128xf32>
    %c4_i32_198 = arith.constant 4 : i32
    %587 = vector.broadcast %c4_i32_198 : i32 to vector<64x128xi32>
    %588 = arith.andi %567, %587 : vector<64x128xi32>
    %c0_i32_199 = arith.constant 0 : i32
    %589 = vector.broadcast %c0_i32_199 : i32 to vector<64x128xi32>
    %590 = arith.cmpi ne, %588, %589 : vector<64x128xi32>
    %591 = arith.select %590, %586, %583 : vector<64x128xi1>, vector<64x128xf32>
    %592 = vector.extract_strided_slice %591 {offsets = [0, 120], sizes = [64, 8], strides = [1, 1]} : vector<64x128xf32> to vector<64x8xf32>
    %593 = vector.extract_strided_slice %591 {offsets = [0, 0], sizes = [64, 120], strides = [1, 1]} : vector<64x128xf32> to vector<64x120xf32>
    %594 = tpu.concatenate %592, %593 in 1 : vector<64x8xf32>, vector<64x120xf32> -> vector<64x128xf32>
    %c8_i32_200 = arith.constant 8 : i32
    %595 = vector.broadcast %c8_i32_200 : i32 to vector<64x128xi32>
    %596 = arith.andi %567, %595 : vector<64x128xi32>
    %c0_i32_201 = arith.constant 0 : i32
    %597 = vector.broadcast %c0_i32_201 : i32 to vector<64x128xi32>
    %598 = arith.cmpi ne, %596, %597 : vector<64x128xi32>
    %599 = arith.select %598, %594, %591 : vector<64x128xi1>, vector<64x128xf32>
    %600 = vector.extract_strided_slice %599 {offsets = [0, 112], sizes = [64, 16], strides = [1, 1]} : vector<64x128xf32> to vector<64x16xf32>
    %601 = vector.extract_strided_slice %599 {offsets = [0, 0], sizes = [64, 112], strides = [1, 1]} : vector<64x128xf32> to vector<64x112xf32>
    %602 = tpu.concatenate %600, %601 in 1 : vector<64x16xf32>, vector<64x112xf32> -> vector<64x128xf32>
    %c16_i32_202 = arith.constant 16 : i32
    %603 = vector.broadcast %c16_i32_202 : i32 to vector<64x128xi32>
    %604 = arith.andi %567, %603 : vector<64x128xi32>
    %c0_i32_203 = arith.constant 0 : i32
    %605 = vector.broadcast %c0_i32_203 : i32 to vector<64x128xi32>
    %606 = arith.cmpi ne, %604, %605 : vector<64x128xi32>
    %607 = arith.select %606, %602, %599 : vector<64x128xi1>, vector<64x128xf32>
    %608 = vector.extract_strided_slice %607 {offsets = [0, 96], sizes = [64, 32], strides = [1, 1]} : vector<64x128xf32> to vector<64x32xf32>
    %609 = vector.extract_strided_slice %607 {offsets = [0, 0], sizes = [64, 96], strides = [1, 1]} : vector<64x128xf32> to vector<64x96xf32>
    %610 = tpu.concatenate %608, %609 in 1 : vector<64x32xf32>, vector<64x96xf32> -> vector<64x128xf32>
    %c32_i32_204 = arith.constant 32 : i32
    %611 = vector.broadcast %c32_i32_204 : i32 to vector<64x128xi32>
    %612 = arith.andi %567, %611 : vector<64x128xi32>
    %c0_i32_205 = arith.constant 0 : i32
    %613 = vector.broadcast %c0_i32_205 : i32 to vector<64x128xi32>
    %614 = arith.cmpi ne, %612, %613 : vector<64x128xi32>
    %615 = arith.select %614, %610, %607 : vector<64x128xi1>, vector<64x128xf32>
    %616 = vector.extract_strided_slice %615 {offsets = [0, 64], sizes = [64, 64], strides = [1, 1]} : vector<64x128xf32> to vector<64x64xf32>
    %617 = vector.extract_strided_slice %615 {offsets = [0, 0], sizes = [64, 64], strides = [1, 1]} : vector<64x128xf32> to vector<64x64xf32>
    %618 = tpu.concatenate %616, %617 in 1 : vector<64x64xf32>, vector<64x64xf32> -> vector<64x128xf32>
    %c64_i32_206 = arith.constant 64 : i32
    %619 = vector.broadcast %c64_i32_206 : i32 to vector<64x128xi32>
    %620 = arith.andi %567, %619 : vector<64x128xi32>
    %c0_i32_207 = arith.constant 0 : i32
    %621 = vector.broadcast %c0_i32_207 : i32 to vector<64x128xi32>
    %622 = arith.cmpi ne, %620, %621 : vector<64x128xi32>
    %623 = arith.select %622, %618, %615 : vector<64x128xi1>, vector<64x128xf32>
    %624 = vector.extract_strided_slice %623 {offsets = [0, 0], sizes = [64, 64], strides = [1, 1]} : vector<64x128xf32> to vector<64x64xf32>
    %625 = tpu.transpose %624, [1, 0] : vector<64x64xf32> -> vector<64x64xf32>
    %626 = arith.addf %500, %563 : vector<64x64xf32>
    %627 = arith.addf %626, %625 : vector<64x64xf32>
    %c0_208 = arith.constant 0 : index
    %c3_209 = arith.constant 3 : index
    %c0_210 = arith.constant 0 : index
    %c0_211 = arith.constant 0 : index
    %628 = vector.load %arg9[%c0_208, %c3_209, %c0_210, %c0_211] : memref<1x4x64x64xf32, #tpu.memory_space<vmem>>, vector<1x1x64x64xf32>
    %629 = vector.shape_cast %628 : vector<1x1x64x64xf32> to vector<64x64xf32>
    %630 = vector.shape_cast %627 : vector<64x64xf32> to vector<1x1x64x64xf32>
    tpu.vector_store %arg9[%c0_208, %c3_209, %c0_210, %c0_211], %630 {strides = array<i32>} : memref<1x4x64x64xf32, #tpu.memory_space<vmem>>, vector<1x1x64x64xf32>,
    %cst_212 = arith.constant dense<0xFF800000> : vector<64xf32>
    %631 = vector.multi_reduction <maximumf>, %627, %cst_212 [1] : vector<64x64xf32> to vector<64xf32>
    %632 = vector.shape_cast %631 : vector<64xf32> to vector<64x1xf32>
    %633 = vector.broadcast %632 : vector<64x1xf32> to vector<64x64xf32>
    %634 = arith.subf %627, %633 : vector<64x64xf32>
    %635 = math.exp %634 : vector<64x64xf32>
    %cst_213 = arith.constant dense<0.000000e+00> : vector<64xf32>
    %636 = vector.multi_reduction <add>, %635, %cst_213 [1] : vector<64x64xf32> to vector<64xf32>
    %637 = vector.shape_cast %636 : vector<64xf32> to vector<64x1xf32>
    %638 = tpu.reciprocal %637 {approx = true} : vector<64x1xf32> -> vector<64x1xf32>
    %639 = vector.broadcast %638 : vector<64x1xf32> to vector<64x64xf32>
    %640 = arith.mulf %635, %639 : vector<64x64xf32>
    %cst_214 = arith.constant dense<0.000000e+00> : vector<64x32xf32>
    %641 = tpu.matmul %640, %489, %cst_214 {dimension_numbers = #tpu.dot_dimension_numbers<[1], [0], [0], [1], [0, 0, 1, 1], [], []>} : vector<64x64xf32>, vector<64x32xf32>, vector<64x32xf32> -> vector<64x32xf32>
    %c0_215 = arith.constant 0 : index
    %c0_216 = arith.constant 0 : index
    %c96_217 = arith.constant 96 : index
    %642 = vector.load %arg8[%c0_215, %c0_216, %c96_217] : memref<1x64x128xf32, #tpu.memory_space<vmem>>, vector<1x64x32xf32>
    %643 = vector.shape_cast %642 : vector<1x64x32xf32> to vector<64x32xf32>
    %644 = vector.shape_cast %641 : vector<64x32xf32> to vector<1x64x32xf32>
    tpu.vector_store %arg8[%c0_215, %c0_216, %c96_217], %644 {strides = array<i32>} : memref<1x64x128xf32, #tpu.memory_space<vmem>>, vector<1x64x32xf32>,
    return
  }
  func.func @transform_0(%arg0: i32, %arg1: i32) -> (i32, i32, i32) {
    %c0_i32 = arith.constant 0 : i32
    %c0_i32_0 = arith.constant 0 : i32
    return %arg0, %c0_i32, %arg1 : i32, i32, i32
  }
  func.func @transform_1(%arg0: i32, %arg1: i32) -> (i32, i32, i32) {
    %c1_i32 = arith.constant 1 : i32
    %0 = arith.addi %c1_i32, %arg1 : i32
    %c0_i32 = arith.constant 0 : i32
    %c0_i32_0 = arith.constant 0 : i32
    return %arg0, %c0_i32, %0 : i32, i32, i32
  }
  func.func @transform_2(%arg0: i32, %arg1: i32) -> (i32, i32, i32) {
    %c2_i32 = arith.constant 2 : i32
    %0 = arith.addi %c2_i32, %arg1 : i32
    %c0_i32 = arith.constant 0 : i32
    %c0_i32_0 = arith.constant 0 : i32
    return %arg0, %c0_i32, %0 : i32, i32, i32
  }
  func.func @transform_3(%arg0: i32, %arg1: i32) -> (i32, i32, i32) {
    %c0_i32 = arith.constant 0 : i32
    %c0_i32_0 = arith.constant 0 : i32
    %c0_i32_1 = arith.constant 0 : i32
    return %arg1, %c0_i32, %c0_i32_0 : i32, i32, i32
  }
  func.func @transform_4(%arg0: i32, %arg1: i32) -> (i32, i32, i32) {
    %c0_i32 = arith.constant 0 : i32
    %c0_i32_0 = arith.constant 0 : i32
    %c0_i32_1 = arith.constant 0 : i32
    return %arg1, %c0_i32, %c0_i32_0 : i32, i32, i32
  }
  func.func @transform_5(%arg0: i32, %arg1: i32) -> (i32, i32) {
    %c0_i32 = arith.constant 0 : i32
    %c0_i32_0 = arith.constant 0 : i32
    %c0_i32_1 = arith.constant 0 : i32
    return %c0_i32, %c0_i32_0 : i32, i32
  }
  func.func @transform_6(%arg0: i32, %arg1: i32) -> (i32, i32, i32) {
    %c0_i32 = arith.constant 0 : i32
    %c0_i32_0 = arith.constant 0 : i32
    return %arg0, %c0_i32, %arg1 : i32, i32, i32
  }
  func.func @transform_7(%arg0: i32, %arg1: i32) -> (i32, i32, i32, i32) {
    %c0_i32 = arith.constant 0 : i32
    %c0_i32_0 = arith.constant 0 : i32
    %c0_i32_1 = arith.constant 0 : i32
    return %arg0, %arg1, %c0_i32, %c0_i32_0 : i32, i32, i32, i32
  }
}

</mosaic_0001>

<bundles_post_ra>
// kernel: tpu_custom_call.1
= control target key start
LH: loop header
LB: loop body
LE: loop exit
PB: predicated region body
PF: predicated region fallthrough
CT: control target
= control target key end

     0   :  { %6 = vsyncpa [#allocation3], 0  ;;  %s130_s0 = inlined_call_operand.hbm [shape: f32[8,128], index: 0, kind: input, shape index: {}]   ;;  %s131_s1 = inlined_call_operand.hbm [shape: f32[8,128], index: 1, kind: output, shape index: {}]  }
   0x1   :  { %7 = vsyncpa [#allocation4], 0  ;;  %s93_s6 = smov [#allocation2]   ;;  %s45_s10 = scalar_lea.hbm %s130_s0, 128 }
   0x2   :  { %s14_s7 = sshll.u32 %s93_s6, 4  ;;  %p46_p0 = scmp.ne.s32.totalorder %s130_s0, %s45_s10  ;;  %s15_s7 = int_to_ptr.vmem [resolvable:$true] %s14_s7 }
   0x3   :  { %p49_p1 = scmp.lt.u32.totalorder %s45_s10, %s130_s0 }
   0x5   :  { %p51_p2 = pnand %p49_p1, %p46_p0 }
   0x7   :  { %54 = shalt.err (!%p51_p2)
}
   0x8   :  { %s55_s15 = scalar_lea.vmem %s15_s7, 128  ;;  %p60_p4 = scmp.lt.s32.totalorder %s15_s7, %s15_s7 }
   0x9   :  { %p56_p3 = scmp.ne.s32.totalorder %s15_s7, %s55_s15  ;;  %p61_p5 = scmp.lt.s32.totalorder %s55_s15, %s55_s15 }
   0xb   :  { %p62_p6 = por %p61_p5, %p60_p4 }
   0xd   :  { %p63_p7 = pnand %p62_p6, %p56_p3 }
   0xf   :  { %66 = shalt.err (!%p63_p7)
}
  0x10   :  { %17 = dma.hbm_to_vmem [thread:$0]  %s130_s0, 128, %s15_s7, [#allocation3]  }
  0x11   :  { %89 = dma.done.wait [#allocation3], 128  }
  0x12   :  { %90 = vsyncadd [#allocation3], 4294967168  ;;  %v21_v0 = vld [vmem:[#allocation2] sm:$0xff]  ;;  %s94_s18 = smov 261   ;;  %s95_s19 = smov [#allocation5]  }
  0x13   :  { %24 = vrot.lane.b32.xlu0 %v21_v0, %s94_s18  ;;  %s33_s20 = sshll.u32 %s95_s19, 4  ;;  %s34_s20 = int_to_ptr.vmem [resolvable:$true] %s33_s20 }
  0x14   :  { %s67_s21 = scalar_lea.vmem %s34_s20, 128  ;;  %p72_p9 = scmp.lt.s32.totalorder %s34_s20, %s34_s20 }
  0x15   :  { %p68_p8 = scmp.ne.s32.totalorder %s34_s20, %s67_s21  ;;  %p73_p10 = scmp.lt.s32.totalorder %s67_s21, %s67_s21 }
  0x17   :  { %p74_p11 = por %p73_p10, %p72_p9 }
  0x19   :  { %p75_p12 = pnand %p74_p11, %p68_p8 }
  0x85   :  { %v25_v1 = vpop.permute.xlu0 %24 }
  0x86   :  { %26 = vst [vmem:[#allocation5] sm:$0xff] %v25_v1 }
  0x87   :  { %78 = shalt.err (!%p75_p12)
}
  0x88   :  { %s79_s0 = scalar_lea.hbm %s131_s1, 128 }
  0x89   :  { %p80_p13 = scmp.ne.s32.totalorder %s131_s1, %s79_s0  ;;  %p83_p0 = scmp.lt.u32.totalorder %s79_s0, %s131_s1 }
  0x8b   :  { %p85_p1 = pnand %p83_p0, %p80_p13 }
  0x8d   :  { %88 = shalt.err (!%p85_p1)
}
  0x8e   :  { %36 = dma.vmem_to_hbm [thread:$0]  %s34_s20, 128, %s131_s1, [#allocation4]  }
  0x8f   :  { %91 = dma.done.wait [#allocation4], 128  }
  0x90   :  { %92 = vsyncadd [#allocation4], 4294967168 }
  0x91   :  { %40 = vsyncpa [#allocation3], 1 }
  0x92   :  { %41 = vsyncpa [#allocation4], 1 }

// kernel: tpu_custom_call.1
= control target key start
LH: loop header
LB: loop body
LE: loop exit
PB: predicated region body
PF: predicated region fallthrough
CT: control target
= control target key end

     0   :  { %s11086_s0 = inlined_call_operand.hbm [shape: f32[2,64,384], index: 0, kind: input, shape index: {}]   ;;  %s11087_s1 = inlined_call_operand.hbm [shape: f32[2,64,384], index: 1, kind: input, shape index: {}]   ;;  %s11088_s2 = inlined_call_operand.hbm [shape: f32[2,64,384], index: 2, kind: input, shape index: {}]   ;;  %s11089_s3 = inlined_call_operand.vmem [shape: f32[4,1,32], index: 3, kind: input, shape index: {}]   ;;  %s11090_s4 = inlined_call_operand.vmem [shape: f32[4,1,32], index: 4, kind: input, shape index: {}]   ;;  %s11091_s5 = inlined_call_operand.hbm [shape: f32[32,128], index: 5, kind: input, shape index: {}]   ;;  %s11092_s6 = inlined_call_operand.hbm [shape: f32[2,64,128], index: 6, kind: output, shape index: {0}]   ;;  %s11093_s7 = inlined_call_operand.hbm [shape: f32[2,4,64,64], index: 7, kind: output, shape index: {1}]  }
   0x1   :  { %11273 = sst [smem:[#allocation59_spill]] %s11086_s0 }
   0x2   :  { %11274 = sst [smem:[#allocation60_spill]] %s11087_s1 }
   0x3   :  { %11275 = sst [smem:[#allocation61_spill]] %s11092_s6 }
   0x4   :  { %13 = vsyncpa [#allocation3], 0 }
   0x5   :  { %15 = vsyncpa [#allocation3 + $0x1], 0 }
   0x6   :  { %16 = vsyncpa [#allocation6], 0 }
   0x7   :  { %18 = vsyncpa [#allocation6 + $0x1], 0 }
   0x8   :  { %19 = vsyncpa [#allocation9], 0 }
   0x9   :  { %20 = vsyncpa [#allocation4], 0 }
   0xa   :  { %22 = vsyncpa [#allocation4 + $0x1], 0 }
   0xb   :  { %23 = vsyncpa [#allocation12], 0 }
   0xc   :  { %25 = vsyncpa [#allocation12 + $0x1], 0  ;;  %s7678_s24 = smov 0   ;;  %s7680_s25 = smov 0  }
   0xd   :  { %s7682_s26 = smov 0   ;;  %s7684_s27 = smov 0  }
   0xe   :  { %s7686_s28 = smov 0   ;;  %s7688_s29 = smov 0  }
   0xf LB: > { %11276 = sst [smem:[#allocation18_spill]] %s7598_s24  ;;  %s43_s30 = sadd.s32 1, %s7614_s28  ;;  %s7618_s29 = sphi %s7688_s29, %s31_s29   ;;  %s7614_s28 = sphi %s7686_s28, %s11692_s28   ;;  %s7610_s27 = sphi %s7684_s27, %s11691_s27   ;;  %s7606_s26 = sphi %s7682_s26, %s11690_s26   ;;  %s7602_s25 = sphi %s7680_s25, %s11694_s25   ;;  %s7598_s24 = sphi %s7678_s24, %s11693_s24  }
  0x10   : > { %11277 = sst [smem:[#allocation19_spill]] %s7606_s26  ;;  %s52_s8 = sadd.s32 1, %s7606_s26 }
  0x11   : > { %11278 = sst [smem:[#allocation20_spill]] %s7614_s28  ;;  %p45_p0 = scmp.ge.s32.totalorder %s43_s30, 2 }
  0x12   : > { %11279 = sst [smem:[#allocation21_spill]] %s7618_s29  ;;  %p11095_p1 = scmp.ne.s32.totalorder %s7606_s26, %s7602_s25 }
  0x13   : > { %p60_p2 = scmp.eq.s32.totalorder %s7618_s29, 0  ;;  %s11696_s30 = smov (%p45_p0, %s43_s30), 0 }
  0x14   : > { %11280 = sst [smem:[#allocation22_spill]] %s11696_s30  ;;  %s47_s9 = ssub.s32 %s7614_s28, %s11696_s30 }
  0x15   : > { %p61_p3 = por %p60_p2, %p11095_p1  ;;  %p50_p5 = scmp.eq.s32.totalorder %s47_s9, 0 }
  0x16   : > { %p7102_p6 = scmp.lt.s32.totalorder %s7618_s29, 2  ;;  %s11094_s10 = sand.u32 1, %s7606_s26  }
  0x17   : > { %s7724_s11 = smul.u32 3072, %s7614_s28  ;;  %s7731_s13 = sshll.u32 %s11094_s10, 6 }
  0x18   : > { %s7727_s12 = scalar_select %p50_p5, %s7606_s26, %s52_s8  }
  0x19   : > { %p7733_p7 = pnand %p7102_p6, %p61_p3  ;;  %s329_s15 = sand.u32 1, %s7618_s29  }
  0x1a   : > { %11281 = sst [smem:[#allocation23_spill]] %s7727_s12  ;;  %s11283_s1 = sld [smem:[#allocation60_spill]] }
  0x1b   : > { %s11282_s14 = scalar_select %p7733_p7, 1, 0 }
  0x1c   : > { %s333_s20 = scalar_lea.vmem [#allocation5], %s7731_s13  ;;  %s7747_s22 = scalar_lea.sflag [#allocation6], %s329_s15 }
  0x1d   : > { %s342_s21 = sshll.u32 %s333_s20, 4  ;;  %p7752_p9 = pneg %p7733_p7  ;;  %s7745_s21 = int_to_ptr.vmem [resolvable:$true] %s342_s21 }
  0x1f   : > { %s11284_s8 = scalar_select %p7752_p9, 1, 0 }
  0x20   : > { %s5932_s18 = scalar_lea.hbm %s11283_s1, %s7724_s11  ;;  %s7381_s17 = scalar_lea.hbm %s11283_s1, 6144 }
  0x21   : > { %s7742_s19 = scalar_lea.hbm %s5932_s18, 128  ;;  %s7406_s23 = scalar_lea.hbm %s5932_s18, 1152 }
  0x22   : > { %p7377_p8 = scmp.ne.s32.totalorder %s7742_s19, %s7406_s23  ;;  %p7382_p12 = scmp.lt.u32.totalorder %s7742_s19, %s11283_s1 }
  0x23   : > { %p7383_p13 = scmp.lt.u32.totalorder %s7381_s17, %s7406_s23  ;;  %p7385_p2 = scmp.lt.u32.totalorder %s7406_s23, %s7742_s19 }
  0x24   : > { %p7379_p10 = pnand %p7752_p9, %p7377_p8 }
  0x25   : > { %p7384_p0 = por %p7383_p13, %p7382_p12 }
  0x26   : > { %p7380_p11 = pneg %p7379_p10 }
  0x27   : > { %p7386_p3 = por %p7385_p2, %p7384_p0 }
  0x29   : > { %p7387_p5 = pnand %p7386_p3, %p7380_p11 }
  0x2b   : > { %7390 = shalt.err (!%p7387_p5)
}
  0x2c   : > { %s7391_s15 = scalar_lea.vmem %s7745_s21, 1024  ;;  %s7620_s18 = smov [#allocation5]  }
  0x2d   : > { %p7392_p6 = scmp.ne.s32.totalorder %s7745_s21, %s7391_s15  ;;  %s7396_s9 = sshll.u32 %s7620_s18, 4  ;;  %s7397_s9 = int_to_ptr.vmem [resolvable:$false] %s7396_s9 }
  0x2e   : > { %s7398_s10 = scalar_lea.vmem %s7397_s9, 2048  ;;  %p7399_p4 = scmp.lt.s32.totalorder %s7745_s21, %s7397_s9 }
  0x2f   : > { %p7394_p8 = pnand %p7392_p6, %p7752_p9  ;;  %p7400_p1 = scmp.lt.s32.totalorder %s7398_s10, %s7391_s15 }
  0x31   : > { %p7395_p10 = pneg %p7394_p8  ;;  %p7401_p12 = por %p7400_p1, %p7399_p4 }
  0x33   : > { %p7402_p13 = pnand %p7401_p12, %p7395_p10 }
  0x35   : > { %7405 = shalt.err (!%p7402_p13)
}
  0x36   : > { %s11096_s23 = smov 384   ;;  %s11098_s16 = smov 128  }
  0x37   : > { %s11100_s17 = smov 8   ;;  %s7780_s20 = sadd.s32 4294967295, %s7618_s29  }
  0x38   : > { %7090 = dma.hbm_to_vmem [thread:$0]  (!%p7733_p7), %s7742_s19, 1024, %s7745_s21, %s7747_s22, %s11096_s23, %s11098_s16, %s11100_s17  }
  0x39   : > { %s6078_s15 = sadd.s32 4294967294, %s7618_s29   ;;  %p65_p1 = scmp.ne.s32.totalorder %s7602_s25, %s7598_s24 }
  0x3a   : > { %p11108_p4 = scmp.eq.s32.totalorder %s7780_s20, 0  ;;  %p224_p11 = scmp.eq.s32.totalorder %s7780_s20, 1 }
  0x3b   : > { %p230_p0 = scmp.eq.s32.totalorder %s6078_s15, 1  ;;  %p6079_p2 = scmp.ge.s32.totalorder %s7618_s29, 1 }
  0x3c   : > { %p7790_p3 = por %p11108_p4, %p65_p1  ;;  %p11286_p5 = scmp.ne.s32.totalorder %s7606_s26, %s7602_s25 }
  0x3d   : > { %p7801_p8 = por %p230_p0, %p65_p1  ;;  %p265_p10 = scmp.lt.s32.totalorder %s7618_s29, 3 }
  0x3e   : > { %s11285_s18 = scalar_select %p7790_p3, 1, 0 }
  0x3f   : > { %p7797_p6 = por %p224_p11, %p11286_p5  ;;  %p7806_p12 = pnand %p6079_p2, %p265_p10 }
  0x40   : > { %s11288_s21 = scalar_select %p7801_p8, 1, 0 }
  0x41   : > { %s11287_s19 = scalar_select %p7797_p6, 1, 0 }
  0x42   : > { %11289 = sst [smem:[#allocation24_spill]] %s11288_s21  ;;  %s7624_s10 = smov [#allocation8]  }
  0x43   : > { %s11290_s9 = scalar_select %p7806_p12, 1, 0 }
  0x44   : > { %s293_s15 = sshll.u32 %s7624_s10, 4  ;;  %p7080_p13 = pneg %p7806_p12  ;;  %s7810_s15 = int_to_ptr.vmem [resolvable:$true] %s293_s15 }
  0x45   : > { %s11291_s0 = sld [smem:[#allocation59_spill]]  ;;  %s311_s1 = scalar_lea.vmem [#allocation2], %s7731_s13 }
  0x46   : > { %s319_s30 = sshll.u32 %s311_s1, 4  ;;  %p7823_p1 = pnand %p7080_p13, %p11108_p4  ;;  %s7827_s30 = int_to_ptr.vmem [resolvable:$true] %s319_s30 }
  0x47   : > { %s11293_s10 = sand.u32 1, %s7606_s26  }
  0x48   : > { %s11292_s28 = scalar_select %p7823_p1, 1, 0 }
  0x49   : > { %s7831_s12 = scalar_lea.sflag [#allocation3], %s11293_s10 }
  0x4b   : > { %s7818_s17 = scalar_lea.hbm %s11291_s0, %s7724_s11  ;;  %s7412_s21 = scalar_lea.hbm %s11291_s0, 6144 }
  0x4c   : > { %s7407_s29 = scalar_lea.hbm %s7818_s17, 1024  ;;  %p7413_p5 = scmp.lt.u32.totalorder %s7818_s17, %s11291_s0 }
  0x4d   : > { %p7408_p11 = scmp.ne.s32.totalorder %s7818_s17, %s7407_s29  ;;  %p7414_p10 = scmp.lt.u32.totalorder %s7412_s21, %s7407_s29 }
  0x4e   : > { %p7416_p4 = scmp.lt.u32.totalorder %s7407_s29, %s7818_s17 }
  0x4f   : > { %p7410_p0 = pnand %p7408_p11, %p7752_p9  ;;  %p7415_p13 = por %p7414_p10, %p7413_p5 }
  0x51   : > { %p7411_p2 = pneg %p7410_p0  ;;  %p7417_p8 = por %p7416_p4, %p7415_p13 }
  0x53   : > { %p7418_p6 = pnand %p7417_p8, %p7411_p2 }
  0x55   : > { %7421 = shalt.err (!%p7418_p6)
}
  0x56   : > { %s7422_s10 = scalar_lea.vmem %s7827_s30, 1024  ;;  %s7625_s23 = smov [#allocation2]  }
  0x57   : > { %p7423_p11 = scmp.ne.s32.totalorder %s7827_s30, %s7422_s10  ;;  %s7427_s16 = sshll.u32 %s7625_s23, 4  ;;  %s7428_s16 = int_to_ptr.vmem [resolvable:$false] %s7427_s16 }
  0x58   : > { %s7429_s24 = scalar_lea.vmem %s7428_s16, 2048  ;;  %p7430_p12 = scmp.lt.s32.totalorder %s7827_s30, %s7428_s16 }
  0x59   : > { %p7425_p0 = pnand %p7423_p11, %p7752_p9  ;;  %p7431_p1 = scmp.lt.s32.totalorder %s7429_s24, %s7422_s10 }
  0x5b   : > { %p7426_p3 = pneg %p7425_p0  ;;  %p7432_p5 = por %p7431_p1, %p7430_p12 }
  0x5d   : > { %p7433_p10 = pnand %p7432_p5, %p7426_p3 }
  0x5f   : > { %7436 = shalt.err (!%p7433_p10)
}
  0x60   : > { %s11294_s29 = smov 8   ;;  %s11295_s21 = smov 128  }
  0x61   : > { %s11296_s1 = smov 384   ;;  %s7437_s23 = scalar_lea.hbm %s11091_s5, 512 }
  0x62   : > { %7087 = dma.hbm_to_vmem [thread:$0]  (!%p7733_p7), %s7818_s17, 1024, %s7827_s30, %s7831_s12, %s11296_s1, %s11295_s21, %s11294_s29  }
  0x63   : > { %p7438_p4 = scmp.ne.s32.totalorder %s11091_s5, %s7437_s23  ;;  %p11297_p3 = scmp.ne.s32.totalorder %s11292_s28, 0 }
  0x64   : > { %p7444_p1 = scmp.lt.u32.totalorder %s7437_s23, %s11091_s5 }
  0x65   : > { %p7439_p6 = pneg %p11297_p3 }
  0x67   : > { %p7440_p8 = pnand %p7439_p6, %p7438_p4 }
  0x69   : > { %p7441_p12 = pneg %p7440_p8 }
  0x6b   : > { %p7446_p2 = pnand %p7444_p1, %p7441_p12 }
  0x6d   : > { %7449 = shalt.err (!%p7446_p2)
}
  0x6e   : > { %s7450_s30 = scalar_lea.vmem %s7810_s15, 512  ;;  %p7458_p5 = scmp.lt.s32.totalorder %s7810_s15, %s7810_s15 }
  0x6f   : > { %p7451_p13 = scmp.ne.s32.totalorder %s7810_s15, %s7450_s30  ;;  %p7459_p10 = scmp.lt.s32.totalorder %s7450_s30, %s7450_s30 }
  0x71   : > { %p7453_p11 = pnand %p7451_p13, %p7439_p6  ;;  %p7460_p7 = por %p7459_p10, %p7458_p5 }
  0x73   : > { %p7454_p0 = pneg %p7453_p11 }
  0x75   : > { %p7461_p9 = pnand %p7460_p7, %p7454_p0 }
  0x77   : > { %7464 = shalt.err (!%p7461_p9)
}
  0x78   : > { %7083 = dma.hbm_to_vmem [thread:$0]  (!%p11297_p3), %s11091_s5, 512, %s7810_s15, [#allocation9], %s11295_s21, %s11295_s21, %s11294_s29  }
  0x79   : > { %s5940_s17 = scalar_lea.hbm %s11088_s2, %s7724_s11  ;;  %s356_s23 = scalar_lea.vmem [#allocation7], %s7731_s13 }
  0x7a   : > { %s365_s16 = sshll.u32 %s356_s23, 4  ;;  %s7887_s10 = scalar_lea.hbm %s5940_s17, 256  ;;  %s7889_s16 = int_to_ptr.vmem [resolvable:$true] %s365_s16 }
  0x7b   : > { %s7495_s28 = scalar_lea.hbm %s5940_s17, 1280  ;;  %p11298_p9 = scmp.ne.s32.totalorder %s11284_s8, 0 }
  0x7c   : > { %p7466_p7 = scmp.ne.s32.totalorder %s7887_s10, %s7495_s28  ;;  %s7470_s30 = scalar_lea.hbm %s11088_s2, 6144 }
  0x7d   : > { %p7471_p3 = scmp.lt.u32.totalorder %s7887_s10, %s11088_s2  ;;  %p7472_p8 = scmp.lt.u32.totalorder %s7470_s30, %s7495_s28 }
  0x7e   : > { %p7468_p4 = pnand %p7466_p7, %p11298_p9  ;;  %p7474_p1 = scmp.lt.u32.totalorder %s7495_s28, %s7887_s10 }
  0x7f   : > { %p7473_p12 = por %p7472_p8, %p7471_p3 }
  0x80   : > { %p7469_p6 = pneg %p7468_p4 }
  0x81   : > { %p7475_p2 = por %p7474_p1, %p7473_p12 }
  0x83   : > { %p7476_p13 = pnand %p7475_p2, %p7469_p6 }
  0x85   : > { %7479 = shalt.err (!%p7476_p13)
}
  0x86   : > { %s7480_s13 = scalar_lea.vmem %s7889_s16, 1024  ;;  %s7626_s6 = smov [#allocation7]  }
  0x87   : > { %p7481_p11 = scmp.ne.s32.totalorder %s7889_s16, %s7480_s13  ;;  %s7485_s26 = sshll.u32 %s7626_s6, 4  ;;  %s7486_s26 = int_to_ptr.vmem [resolvable:$false] %s7485_s26 }
  0x88   : > { %s7487_s12 = scalar_lea.vmem %s7486_s26, 2048  ;;  %p7488_p10 = scmp.lt.s32.totalorder %s7889_s16, %s7486_s26 }
  0x89   : > { %p7483_p0 = pnand %p7481_p11, %p11298_p9  ;;  %p7489_p7 = scmp.lt.s32.totalorder %s7487_s12, %s7480_s13 }
  0x8b   : > { %p7484_p5 = pneg %p7483_p0  ;;  %p7490_p4 = por %p7489_p7, %p7488_p10 }
  0x8d   : > { %p7491_p3 = pnand %p7490_p4, %p7484_p5 }
  0x8f   : > { %7494 = shalt.err (!%p7491_p3)
}
  0x90   : > { %p11299_p6 = scmp.ne.s32.totalorder %s11282_s14, 0  ;;  %p11300_p9 = scmp.ne.s32.totalorder %s11290_s9, 0 }
  0x92   : > { %7093 = dma.hbm_to_vmem [thread:$0]  (!%p11299_p6), %s7887_s10, 1024, %s7889_s16, %s7747_s22, %s11296_s1, %s11295_s21, %s11294_s29  }
  0x93   : > { %377 = sbr.rel (%p11300_p9) target bundleno = 5428 (0x1534), region = 44 }
  0x9a   : > { %s7918_s8 = sand.u32 1, %s7602_s25   ;;  %p11301_p8 = scmp.ne.s32.totalorder %s11285_s18, 0 }
  0x9b   : > { %s7921_s17 = sshll.u32 %s7918_s8, 6  ;;  %s380_s14 = scalar_lea.sflag [#allocation3], %s7918_s8 }
  0x9c   : > { %s7925_s23 = scalar_lea.vmem [#allocation2], %s7921_s17 }
  0x9d   : > { %7577 = dma.done.wait (%p11301_p8), %s380_s14, 1024  }
  0x9e   : > { %7579 = vsyncadd (%p11301_p8), %s380_s14, 4294966272  ;;  %s388_s22 = sand.u32 1, %s7780_s20   ;;  %s7933_s29 = scalar_lea.vmem [#allocation5], %s7921_s17 }
  0x9f   : > { %s389_s9 = scalar_lea.sflag [#allocation6], %s388_s22 }
  0xa0   : > { %7581 = dma.done.wait (%p11301_p8), %s389_s9, 2048  }
  0xa1   : > { %7583 = vsyncadd (%p11301_p8), %s389_s9, 4294965248  ;;  %s7940_s21 = scalar_lea.vmem [#allocation7], %s7921_s17  ;;  %p11302_p12 = scmp.eq.s32.totalorder %s7780_s20, 0 }
  0xa3   : > { %7585 = dma.done.wait (%p11302_p12), [#allocation9], 512   ;;  %p11303_p1 = pmov %p11302_p12 }
  0xa4   : > { %v472_v0 = vld [vmem:[#allocation8] sm:$0xff]  ;;  %v473_v1 = vld [vmem:[#allocation8 + $0x8] sm:$0xff]  ;;  %v474_v2 = vld [vmem:[#allocation8 + $0x10] sm:$0xff]  ;;  %vm11118_vm0 = vcmask 261120   ;;  %s7627_s20 = smov 1   ;;  %v732_v47 = vlaneseq  ;;  %v11306_v55 = vmov 0 }
  0xa5   : > { %7587 = vsyncadd (%p11303_p1), [#allocation9], 4294966784  ;;  %v7946_v3 = vpack.c.bf16 %v473_v1, %v472_v0  ;;  %v475_v4 = vld [vmem:[#allocation8 + $0x18] sm:$0xff]  ;;  %v7949_v5 = vld [vmem:[%s7925_s23] sm:$0xff]  ;;  %s7628_s16 = smov 2   ;;  %v11309_v59 = vmov 0 }
  0xa6   : > { %v6098_v6 = vld [vmem:[%s11090_s4] ss:$0 sm:$0xff]  ;;  %v7954_v7 = vpack.c.bf16 %v475_v4, %v474_v2  ;;  %v7961_v9 = vld [vmem:[%s7925_s23 + $0x8] sm:$0xff]  ;;  %v7965_v10 = vld [vmem:[%s7925_s23 + $0x10] sm:$0xff]  ;;  %v8069_v48 = vshrl.u32 %v732_v47, 7  ;;  %s7629_s24 = smov 32  }
  0xa7   : > { %11304 = vst [vmem:[#allocation25_spill] sm:$0xff] %v7946_v3  ;;  %v530_v8 = vadd.f32 %v6098_v6, %v7949_v5  ;;  %6866 = vmatprep.subr.bf16.mxu0 %v7946_v3  ;;  %v531_v11 = vadd.f32 %v6098_v6, %v7961_v9  ;;  %v532_v12 = vadd.f32 %v6098_v6, %v7965_v10  ;;  %v7971_v13 = vld [vmem:[%s7925_s23 + $0x18] sm:$0xff]  ;;  %v7974_v14 = vld [vmem:[%s7925_s23 + $0x20] sm:$0xff]  ;;  %v7981_v17 = vld [vmem:[%s7925_s23 + $0x28] sm:$0xff]  ;;  %s7630_s0 = smov 96   ;;  %s7631_s11 = smov 4  }
  0xa8   : > { %11305 = vst [vmem:[#allocation26_spill] sm:$0xff] %v7954_v7  ;;  %6868 = vmatpush3.bf16.msra.mxu0 %v7946_v3  ;;  %v533_v15 = vadd.f32 %v6098_v6, %v7971_v13  ;;  %v534_v16 = vadd.f32 %v6098_v6, %v7974_v14  ;;  %v7984_v18 = vld [vmem:[%s7925_s23 + $0x30] sm:$0xff]  ;;  %v535_v19 = vadd.f32 %v6098_v6, %v7981_v17  ;;  %v7991_v21 = vld [vmem:[%s7925_s23 + $0x38] sm:$0xff]  ;;  %v7997_v23 = vld [vmem:[%s7933_s29] sm:$0xff]  ;;  %v740_v49 = vadd.s32 56, %v8069_v48  ;;  %s7632_s13 = smov 8  }
  0xa9   : > { %6521 = vmatprep.mubr.msk.f32.mxu0 %vm11118_vm0, %v530_v8  ;;  %6870 = vmatprep.subr.bf16.mxu0 %v7954_v7  ;;  %v536_v20 = vadd.f32 %v6098_v6, %v7984_v18  ;;  %v537_v22 = vadd.f32 %v6098_v6, %v7991_v21  ;;  %v8003_v24 = vld [vmem:[%s7933_s29 + $0x8] sm:$0xff]  ;;  %v8006_v25 = vld [vmem:[%s7933_s29 + $0x10] sm:$0xff]  ;;  %v8013_v26 = vld [vmem:[%s7933_s29 + $0x18] sm:$0xff]  ;;  %v736_v51 = vadd.s32 24, %v8069_v48  ;;  %v738_v60 = vadd.s32 40, %v8069_v48  ;;  %s7633_s6 = smov 16  }
  0xaa   : > { %v8016_v27 = vld [vmem:[%s7933_s29 + $0x20] sm:$0xff]  ;;  %v8023_v28 = vld [vmem:[%s7933_s29 + $0x28] sm:$0xff]  ;;  %v8026_v29 = vld [vmem:[%s7933_s29 + $0x30] sm:$0xff]  ;;  %v8072_v50 = vadd.s32 64, %v740_v49  ;;  %v11312_v8 = vmov 0  ;;  %s7634_s26 = smov 64  }
  0xab   : > { %v8033_v30 = vld [vmem:[%s7933_s29 + $0x38] sm:$0xff]  ;;  %v8076_v53 = vadd.s32 64, %v736_v51  ;;  %v6142_v61 = vld [vmem:[%s11090_s4 + $0x1] ss:$0 sm:$0xff]  ;;  %v8106_v1 = vadd.s32 64, %v738_v60  ;;  %vm8141_vm4 = vmpackc.low %vm11118_vm0, %vm11118_vm0  ;;  %s6096_s18 = sshll.u32 %s7918_s8, 8 }
  0xac   : > { %6872 = vmatpush3.bf16.msra.mxu0 %v7954_v7  ;;  %v788_v52 = vand.u32 1, %v8072_v50  ;;  %s8925_s1 = scalar_lea.vmem [#allocation11], %s6096_s18  ;;  %s9400_s10 = scalar_lea.vmem [#allocation10], %s7921_s17 }
  0xad   : > { %v784_v56 = vand.u32 1, %v8076_v53  ;;  %v786_v4 = vand.u32 1, %v8106_v1  ;;  %p11682_p13 = scmp.ne.s32.totalorder %s11287_s19, 0 }
  0xae   : > { %vm8078_vm1 = vcmp.ne.s32.totalorder %v788_v52, 0 }
  0xaf   : > { %6522 = vmatmul.mubr.msk.f32.vlgmr.msra.gmra.mrb[0].mxu0 %vm11118_vm0, %v531_v11  ;;  %v11307_v55 = vsel %vm8078_vm1, 4294967295, %v11306_v55  ;;  %vm8089_vm2 = vcmp.ne.s32.totalorder %v784_v56, 0  ;;  %vm8121_vm3 = vcmp.ne.s32.totalorder %v786_v4, 0 }
  0xb0   : > { %6524 = vmatprep.mubr.msk.f32.mxu0 %vm11118_vm0, %v532_v12  ;;  %11308 = vst [vmem:[#allocation27_spill] sm:$0xff] %v11307_v55  ;;  %v11310_v59 = vsel %vm8089_vm2, 4294967295, %v11309_v59  ;;  %v11313_v8 = vsel %vm8121_vm3, 4294967295, %v11312_v8  ;;  %v6879_v12 = vpack.c.bf16 %v8013_v26, %v8006_v25 }
  0xb1   : > { %11311 = vst [vmem:[#allocation28_spill] sm:$0xff] %v11310_v59  ;;  %11314 = vst [vmem:[#allocation29_spill] sm:$0xff] %v11313_v8 }
  0xb3   : > { %6525 = vmatmul.mubr.msk.f32.gmra.mrb[2].mxu0 %vm11118_vm0, %v533_v15  ;;  %v6873_v15 = vpack.c.bf16 %v8003_v24, %v7997_v23 }
  0xb4   : > { %6527 = vmatprep.mubr.msk.f32.mxu0 %vm11118_vm0, %v534_v16  ;;  %v11315_v16 = vmov 0 }
  0xb5   : > { %v11316_v16 = vsel %vm8141_vm4, 4294967295, %v11315_v16  ;;  %6875 = vmatprep.subr.msk.bf16.mxu1 %vm8141_vm4, %v6873_v15 }
  0xb6   : > { %11317 = vst [vmem:[#allocation30_spill] sm:$0xff] %v11316_v16  ;;  %6878 = vmatpush3.bf16.xpose.msk.msra.mxu1 %vm8141_vm4, %v6873_v15  ;;  %v493_v15 = vld [vmem:[%s7940_s21 + $0x8] sm:$0xff] }
  0xb7   : > { %6528 = vmatmul.mubr.msk.f32.gmra.mrb[4].mxu0 %vm11118_vm0, %v535_v19  ;;  %6881 = vmatprep.subr.msk.bf16.mxu1 %vm8141_vm4, %v6879_v12  ;;  %v6097_v19 = vld [vmem:[%s11089_s3] ss:$0 sm:$0xff] }
  0xb8   : > { %6530 = vmatprep.mubr.msk.f32.mxu0 %vm11118_vm0, %v536_v20  ;;  %v508_v20 = vadd.f32 %v6097_v19, %v7949_v5  ;;  %v511_v49 = vadd.f32 %v6097_v19, %v7971_v13  ;;  %v512_v52 = vadd.f32 %v6097_v19, %v7974_v14  ;;  %v513_v56 = vadd.f32 %v6097_v19, %v7981_v17 }
  0xb9   : > { %v514_v60 = vadd.f32 %v6097_v19, %v7984_v18 }
  0xbb   : > { %6531 = vmatmul.mubr.msk.f32.gmra.mrb[6].mxu0 %vm11118_vm0, %v537_v22  ;;  %v516_v22 = vmul.f32 0.17677669, %v508_v20 }
  0xbc   : > { %6533 = vmatprep.mubr.msk.f32.mxu0 %vm11118_vm0, %v7997_v23 }
  0xbd   : > { %6561 = vmatprep.mubr.msk.f32.mxu1 %vm11118_vm0, %v516_v22 }
  0xbe   : > { %6884 = vmatpush3.bf16.xpose.msk.msra.mxu1 %vm8141_vm4, %v6879_v12  ;;  %v492_v12 = vld [vmem:[%s7940_s21] sm:$0xff] }
  0xbf   : > { %6534 = vmatmul.mubr.msk.f32.gmra.mrb[8].mxu0 %vm11118_vm0, %v8003_v24  ;;  %v6897_v20 = vpack.c.bf16 %v493_v15, %v492_v12 }
  0xc0   : > { %6536 = vmatprep.mubr.msk.f32.mxu0 %vm11118_vm0, %v8006_v25 }
  0xc1   : > { %6898 = vmatprep.subr.bf16.mxu0 %v6897_v20 }
  0xc2   : > { %6900 = vmatpush3.bf16.msra.mxu0 %v6897_v20  ;;  %v11324_v20 = vmov 0 }
  0xc3   : > { %6537 = vmatmul.mubr.msk.f32.gmra.mrb[10].mxu0 %vm11118_vm0, %v8013_v26 }
  0xc4   : > { %6539 = vmatprep.mubr.msk.f32.mxu0 %vm11118_vm0, %v8016_v27 }
  0xc7   : > { %6540 = vmatmul.mubr.msk.f32.gmra.mrb[12].mxu0 %vm11118_vm0, %v8023_v28 }
  0xc8   : > { %6542 = vmatprep.mubr.msk.f32.mxu0 %vm11118_vm0, %v8026_v29 }
  0xcb   : > { %6543 = vmatmul.mubr.msk.f32.gmra.mrb[14].mxu0 %vm11118_vm0, %v8033_v30 }
 0x182   : > { %v8037_v31 = vpop.f32.mrb[0].mxu0 }
 0x183   : > { %v8039_v32 = vpop.f32.mrb[1].mxu0 }
 0x186   : > { %v8041_v33 = vpop.f32.mrb[2].mxu0 }
 0x187   : > { %v8043_v34 = vpop.f32.mrb[3].mxu0 }
 0x18a   : > { %v8045_v35 = vpop.f32.mrb[4].mxu0 }
 0x18b   : > { %v8047_v36 = vpop.f32.mrb[5].mxu0 }
 0x18e   : > { %v6532_v37 = vpop.f32.mrb[6].mxu0 }
 0x18f   : > { %v8049_v38 = vpop.f32.mrb[7].mxu0 }
 0x192   : > { %v8051_v39 = vpop.f32.mrb[8].mxu0 }
 0x193   : > { %v8053_v40 = vpop.f32.mrb[9].mxu0 }
 0x196   : > { %v6538_v41 = vpop.f32.mrb[10].mxu0 }
 0x197   : > { %v8055_v42 = vpop.f32.mrb[11].mxu0 }
 0x19a   : > { %v6541_v43 = vpop.f32.mrb[12].mxu0 }
 0x19b   : > { %1160 = vrot.lane.b32.xlu1 %v6541_v43, %s7627_s20  ;;  %v8058_v44 = vpop.f32.mrb[13].mxu0 }
 0x19e   : > { %v6544_v45 = vpop.f32.mrb[14].mxu0 }
 0x19f   : > { %1164 = vrot.lane.b32.xlu0 %v6544_v45, %s7627_s20  ;;  %v8061_v46 = vpop.f32.mrb[15].mxu0 }
 0x1a0   : > { %1162 = vrot.lane.b32.xlu1 %v8061_v46, %s7627_s20 }
 0x1a3   : > { %1156 = vrot.lane.b32.xlu0 %v6538_v41, %s7627_s20 }
 0x1a4   : > { %771 = vrot.lane.b32.xlu1 %v6532_v37, %s7627_s20 }
 0x1a8   : > { %1152 = vrot.lane.b32.xlu1 %v8051_v39, %s7627_s20 }
 0x20d   : > { %v1161_v54 = vpop.permute.xlu1 %1160 }
 0x20e   : > { %v8127_v11 = vsel %vm8121_vm3, %v1161_v54, %v6541_v43  ;;  %v509_v43 = vadd.f32 %v6097_v19, %v7961_v9  ;;  %v519_v54 = vmul.f32 0.17677669, %v511_v49  ;;  %v496_v49 = vld [vmem:[%s7940_s21 + $0x20] sm:$0xff] }
 0x210   : > { %v517_v47 = vmul.f32 0.17677669, %v509_v43 }
 0x211   : > { %v1165_v57 = vpop.permute.xlu0 %1164 }
 0x212   : > { %v8085_v58 = vsel %vm8078_vm1, %v1165_v57, %v6544_v45  ;;  %v8097_v62 = vpop.permute.xlu1 %1162  ;;  %v510_v45 = vadd.f32 %v6097_v19, %v7965_v10  ;;  %v520_v57 = vmul.f32 0.17677669, %v512_v52 }
 0x213   : > { %1204 = vrot.lane.b32.xlu0 %v8085_v58, %s7628_s16 }
 0x214   : > { %v518_v51 = vmul.f32 0.17677669, %v510_v45 }
 0x215   : > { %v1157_v63 = vpop.permute.xlu0 %1156 }
 0x216   : > { %v8101_v0 = vsel %vm8089_vm2, %v1157_v63, %v6538_v41  ;;  %v772_v2 = vpop.permute.xlu1 %771  ;;  %v6891_v41 = vpack.c.bf16 %v8033_v30, %v8026_v29  ;;  %v515_v63 = vadd.f32 %v6097_v19, %v7991_v21  ;;  %v494_v19 = vld [vmem:[%s7940_s21 + $0x10] sm:$0xff] }
 0x217   : > { %1881 = vrot.lane.b32.xlu0 %v6142_v61, %s7629_s24  ;;  %1196 = vrot.lane.b32.xlu1 %v8101_v0, %s7628_s16  ;;  %v8115_v6 = vsel %vm8078_vm1, %v772_v2, %v6532_v37  ;;  %v6885_v37 = vpack.c.bf16 %v8023_v28, %v8016_v27  ;;  %v521_v61 = vmul.f32 0.17677669, %v513_v56  ;;  %v522_v2 = vmul.f32 0.17677669, %v514_v60  ;;  %v499_v60 = vld [vmem:[%s7940_s21 + $0x38] sm:$0xff] }
 0x218   : > { %v523_v4 = vmul.f32 0.17677669, %v515_v63  ;;  %v11318_v63 = vmov 0 }
 0x219   : > { %6887 = vmatprep.subr.msk.bf16.mxu1 %vm8141_vm4, %v6885_v37 }
 0x21a   : > { %6890 = vmatpush3.bf16.xpose.msk.msra.mxu1 %vm8141_vm4, %v6885_v37  ;;  %v495_v37 = vld [vmem:[%s7940_s21 + $0x18] sm:$0xff] }
 0x21b   : > { %1154 = vrot.lane.b32.xlu0 %v8055_v42, %s7627_s20  ;;  %763 = vrot.lane.b32.xlu1 %v8041_v33, %s7627_s20 }
 0x21c   : > { %6893 = vmatprep.subr.msk.bf16.mxu1 %vm8141_vm4, %v6891_v41 }
 0x21f   : > { %1158 = vrot.lane.b32.xlu0 %v8058_v44, %s7627_s20  ;;  %827 = vrot.lane.b32.xlu1 %v8115_v6, %s7628_s16 }
 0x222   : > { %6896 = vmatpush3.bf16.xpose.msk.msra.mxu1 %vm8141_vm4, %v6891_v41  ;;  %v6901_v41 = vpack.c.bf16 %v495_v37, %v494_v19  ;;  %v840_v19 = vand.u32 2, %v8076_v53 }
 0x223   : > { %1200 = vrot.lane.b32.xlu0 %v8127_v11, %s7628_s16  ;;  %6914 = vmatprep.subr.bf16.mxu1 %v7946_v3 }
 0x224   : > { %6902 = vmatprep.subr.bf16.mxu0 %v6901_v41  ;;  %vm8282_vm8 = vcmp.ne.s32.totalorder %v840_v19, 0 }
 0x225   : > { %6904 = vmatpush3.bf16.msra.mxu0 %v6901_v41  ;;  %v11326_v41 = vmov 0 }
 0x226   : > { %v11327_v41 = vsel %vm8282_vm8, 4294967295, %v11326_v41 }
 0x227   : > { %767 = vrot.lane.b32.xlu0 %v8045_v35, %s7627_s20  ;;  %11328 = vst [vmem:[#allocation33_spill] sm:$0xff] %v11327_v41 }
 0x229   : > { %6562 = vmatmul.mubr.msk.f32.vlgmr.msra.gmra.mrb[0].mxu1 %vm11118_vm0, %v517_v47 }
 0x22a   : > { %6564 = vmatprep.mubr.msk.f32.mxu1 %vm11118_vm0, %v518_v51  ;;  %6916 = vmatpush3.bf16.msra.mxu1 %v7946_v3  ;;  %v497_v51 = vld [vmem:[%s7940_s21 + $0x28] sm:$0xff] }
 0x22b   : > { %769 = vrot.lane.b32.xlu0 %v8049_v38, %s7627_s20  ;;  %6918 = vmatprep.subr.bf16.mxu1 %v7954_v7  ;;  %v6905_v52 = vpack.c.bf16 %v497_v51, %v496_v49  ;;  %v11329_v49 = vmov 0 }
 0x22d   : > { %6565 = vmatmul.mubr.msk.f32.gmra.mrb[2].mxu1 %vm11118_vm0, %v519_v54  ;;  %6906 = vmatprep.subr.bf16.mxu0 %v6905_v52 }
 0x22e   : > { %6567 = vmatprep.mubr.msk.f32.mxu1 %vm11118_vm0, %v520_v57  ;;  %6920 = vmatpush3.bf16.msra.mxu1 %v7954_v7  ;;  %v498_v57 = vld [vmem:[%s7940_s21 + $0x30] sm:$0xff] }
 0x22f   : > { %6908 = vmatpush3.bf16.msra.mxu0 %v6905_v52 }
 0x231   : > { %6568 = vmatmul.mubr.msk.f32.gmra.mrb[4].mxu1 %vm11118_vm0, %v521_v61 }
 0x232   : > { %6570 = vmatprep.mubr.msk.f32.mxu1 %vm11118_vm0, %v522_v2  ;;  %v11321_v2 = vmov 0 }
 0x235   : > { %6571 = vmatmul.mubr.msk.f32.gmra.mrb[6].mxu1 %vm11118_vm0, %v523_v4 }
 0x285   : > { %v8190_v22 = vpop.permute.xlu0 %1204 }
 0x289   : > { %v1882_v43 = vpop.permute.xlu0 %1881 }
 0x28a   : > { %v1884_v45 = vadd.f32 %v1882_v43, %v7949_v5  ;;  %v1885_v47 = vadd.f32 %v1882_v43, %v7961_v9  ;;  %v1886_v54 = vadd.f32 %v1882_v43, %v7965_v10  ;;  %v1887_v56 = vadd.f32 %v1882_v43, %v7971_v13 }
 0x28b   : > { %v6909_v5 = vpack.c.bf16 %v499_v60, %v498_v57  ;;  %v1888_v9 = vadd.f32 %v1882_v43, %v7974_v14  ;;  %v1889_v61 = vadd.f32 %v1882_v43, %v7981_v17  ;;  %v1890_v10 = vadd.f32 %v1882_v43, %v7984_v18 }
 0x28c   : > { %1908 = vrot.lane.b32.xlu0 %v1884_v45, %s7630_s0  ;;  %1910 = vrot.lane.b32.xlu1 %v1885_v47, %s7630_s0  ;;  %v1891_v13 = vadd.f32 %v1882_v43, %v7991_v21  ;;  %v735_v14 = vadd.s32 16, %v8069_v48  ;;  %v734_v17 = vadd.s32 8, %v8069_v48  ;;  %v842_v43 = vand.u32 2, %v8106_v1 }
 0x28d   : > { %6910 = vmatprep.subr.bf16.mxu0 %v6909_v5  ;;  %v739_v45 = vadd.s32 48, %v8069_v48  ;;  %v844_v60 = vand.u32 2, %v8072_v50 }
 0x28e   : > { %6912 = vmatpush3.bf16.msra.mxu0 %v6909_v5  ;;  %v8228_v18 = vadd.s32 64, %v735_v14  ;;  %v8230_v21 = vadd.s32 64, %v734_v17  ;;  %vm8302_vm9 = vcmp.ne.s32.totalorder %v842_v43, 0  ;;  %v11334_v5 = vmov 0 }
 0x28f   : > { %v11330_v49 = vsel %vm8302_vm9, 4294967295, %v11329_v49  ;;  %v8306_v52 = vadd.s32 64, %v739_v45  ;;  %vm8345_vm11 = vcmp.ne.s32.totalorder %v844_v60, 0 }
 0x290   : > { %1912 = vrot.lane.b32.xlu0 %v1886_v54, %s7630_s0  ;;  %1914 = vrot.lane.b32.xlu1 %v1887_v56, %s7630_s0  ;;  %v11335_v5 = vsel %vm8345_vm11, 4294967295, %v11334_v5 }
 0x291   : > { %11336 = vst [vmem:[#allocation35_spill] sm:$0xff] %v11335_v5 }
 0x294   : > { %1916 = vrot.lane.b32.xlu0 %v1888_v9, %s7630_s0  ;;  %1918 = vrot.lane.b32.xlu1 %v1889_v61, %s7630_s0 }
 0x298   : > { %1920 = vrot.lane.b32.xlu0 %v1890_v10, %s7630_s0  ;;  %1922 = vrot.lane.b32.xlu1 %v1891_v13, %s7630_s0 }
 0x29c   : > { %1924 = vrot.lane.b32.xlu0 %v7997_v23, %s7630_s0  ;;  %1926 = vrot.lane.b32.xlu1 %v8003_v24, %s7630_s0  ;;  %v737_v23 = vadd.s32 32, %v8069_v48  ;;  %v1155_v24 = vpop.permute.xlu0 %1154 }
 0x2a0   : > { %1928 = vrot.lane.b32.xlu0 %v8006_v25, %s7630_s0  ;;  %1930 = vrot.lane.b32.xlu1 %v8013_v26, %s7630_s0  ;;  %v783_v25 = vand.u32 1, %v8228_v18  ;;  %v782_v26 = vand.u32 1, %v8230_v21  ;;  %v1159_v12 = vpop.permute.xlu0 %1158 }
 0x2a2   : > { %vm8245_vm5 = vcmp.ne.s32.totalorder %v783_v25, 0  ;;  %vm8249_vm6 = vcmp.ne.s32.totalorder %v782_v26, 0 }
 0x2a3   : > { %v11319_v63 = vsel %vm8245_vm5, 4294967295, %v11318_v63  ;;  %v11322_v2 = vsel %vm8249_vm6, 4294967295, %v11321_v2  ;;  %v8257_v15 = vsel %vm8245_vm5, %v1155_v24, %v8055_v42 }
 0x2a4   : > { %1932 = vrot.lane.b32.xlu0 %v8016_v27, %s7630_s0  ;;  %1934 = vrot.lane.b32.xlu1 %v8023_v28, %s7630_s0  ;;  %v8239_v27 = vadd.s32 64, %v737_v23  ;;  %v1153_v28 = vpop.permute.xlu1 %1152  ;;  %11320 = vst [vmem:[#allocation31_spill] sm:$0xff] %v11319_v63  ;;  %11323 = vst [vmem:[#allocation32_spill] sm:$0xff] %v11322_v2 }
 0x2a8   : > { %759 = vrot.lane.b32.xlu0 %v8037_v31, %s7627_s20  ;;  %1936 = vrot.lane.b32.xlu1 %v8026_v29, %s7630_s0  ;;  %v785_v29 = vand.u32 1, %v8239_v27  ;;  %v1197_v4 = vpop.permute.xlu1 %1196 }
 0x2aa   : > { %vm8268_vm7 = vcmp.ne.s32.totalorder %v785_v29, 0 }
 0x2ab   : > { %v11325_v20 = vsel %vm8268_vm7, 4294967295, %v11324_v20  ;;  %v8276_v42 = vsel %vm8268_vm7, %v1159_v12, %v8058_v44  ;;  %v8291_v44 = vsel %vm8282_vm8, %v1197_v4, %v8101_v0 }
 0x2ac   : > { %1938 = vrot.lane.b32.xlu0 %v8033_v30, %s7630_s0  ;;  %1150 = vrot.lane.b32.xlu1 %v8053_v40, %s7627_s20  ;;  %v8262_v30 = vsel %vm8249_vm6, %v1153_v28, %v8051_v39  ;;  %v764_v37 = vpop.permute.xlu1 %763  ;;  %v1201_v39 = vpop.permute.xlu0 %1200  ;;  %v8385_v28 = vadd.s32 64, %v8069_v48  ;;  %v11343_v48 = vmov 0 }
 0x2ad   : > { %v8296_v47 = vsel %vm8089_vm2, %v764_v37, %v8041_v33  ;;  %v8311_v0 = vsel %vm8302_vm9, %v1201_v39, %v8127_v11  ;;  %v787_v33 = vand.u32 1, %v8306_v52  ;;  %v11331_v11 = vmov 0 }
 0x2ae   : > { %v781_v12 = vand.u32 1, %v8385_v28  ;;  %v839_v39 = vand.u32 2, %v8228_v18 }
 0x2af   : > { %vm8325_vm10 = vcmp.ne.s32.totalorder %v787_v33, 0  ;;  %v11347_v33 = vmov 0 }
 0x2b0   : > { %1194 = vrot.lane.b32.xlu1 %v8257_v15, %s7628_s16  ;;  %1192 = vrot.lane.b32.xlu0 %v8262_v30, %s7628_s16  ;;  %v768_v51 = vpop.permute.xlu0 %767  ;;  %v11332_v11 = vsel %vm8325_vm10, 4294967295, %v11331_v11  ;;  %vm8400_vm12 = vcmp.ne.s32.totalorder %v781_v12, 0  ;;  %vm8416_vm13 = vcmp.ne.s32.totalorder %v839_v39, 0 }
 0x2b1   : > { %v8321_v54 = vsel %vm8121_vm3, %v768_v51, %v8045_v35  ;;  %11333 = vst [vmem:[#allocation34_spill] sm:$0xff] %v11332_v11  ;;  %v8341_v35 = vsel %vm8325_vm10, %v8097_v62, %v8061_v46  ;;  %v8359_v46 = vpop.permute.xlu1 %827  ;;  %v11344_v48 = vsel %vm8400_vm12, 4294967295, %v11343_v48  ;;  %v11348_v33 = vsel %vm8416_vm13, 4294967295, %v11347_v33 }
 0x2b2   : > { %11345 = vst [vmem:[#allocation42_spill] sm:$0xff] %v11344_v48  ;;  %11349 = vst [vmem:[#allocation44_spill] sm:$0xff] %v11348_v33 }
 0x2b4   : > { %761 = vrot.lane.b32.xlu1 %v8043_v34, %s7627_s20  ;;  %1198 = vrot.lane.b32.xlu0 %v8276_v42, %s7628_s16  ;;  %v770_v56 = vpop.permute.xlu0 %769 }
 0x2b5   : > { %v8332_v57 = vsel %vm8325_vm10, %v770_v56, %v8049_v38  ;;  %v8353_v38 = vsel %vm8345_vm11, %v8190_v22, %v8085_v58 }
 0x2b8   : > { %1236 = vrot.lane.b32.xlu0 %v8291_v44, %s7631_s11  ;;  %819 = vrot.lane.b32.xlu1 %v8296_v47, %s7628_s16 }
 0x2bc   : > { %1240 = vrot.lane.b32.xlu0 %v8311_v0, %s7631_s11  ;;  %765 = vrot.lane.b32.xlu1 %v8047_v36, %s7627_s20 }
 0x2c0   : > { %823 = vrot.lane.b32.xlu1 %v8321_v54, %s7628_s16 }
 0x2c4   : > { %825 = vrot.lane.b32.xlu1 %v8332_v57, %s7628_s16 }
 0x2c8   : > { %1202 = vrot.lane.b32.xlu1 %v8341_v35, %s7628_s16 }
 0x2cc   : > { %1244 = vrot.lane.b32.xlu1 %v8353_v38, %s7631_s11 }
 0x2d0   : > { %757 = vrot.lane.b32.xlu1 %v8039_v32, %s7627_s20 }
 0x2fe   : > { %v1909_v62 = vpop.permute.xlu0 %1908  ;;  %v1911_v9 = vpop.permute.xlu1 %1910 }
 0x2ff   : > { %6609 = vmatprep.mubr.msk.f32.mxu1 %vm11118_vm0, %v1909_v62 }
 0x300   : > { %6610 = vmatmul.mubr.msk.f32.vlgmr.msra.gmra.mrb[8].mxu1 %vm11118_vm0, %v1911_v9 }
 0x302   : > { %v1913_v61 = vpop.permute.xlu0 %1912  ;;  %v1915_v10 = vpop.permute.xlu1 %1914 }
 0x303   : > { %6612 = vmatprep.mubr.msk.f32.mxu1 %vm11118_vm0, %v1913_v61 }
 0x304   : > { %6613 = vmatmul.mubr.msk.f32.gmra.mrb[10].mxu1 %vm11118_vm0, %v1915_v10 }
 0x306   : > { %v1917_v58 = vpop.permute.xlu0 %1916  ;;  %v1919_v22 = vpop.permute.xlu1 %1918 }
 0x307   : > { %6615 = vmatprep.mubr.msk.f32.mxu1 %vm11118_vm0, %v1917_v58 }
 0x308   : > { %6616 = vmatmul.mubr.msk.f32.gmra.mrb[12].mxu1 %vm11118_vm0, %v1919_v22  ;;  %v11350_v22 = vmov 0 }
 0x30a   : > { %v1921_v13 = vpop.permute.xlu0 %1920  ;;  %v1923_v14 = vpop.permute.xlu1 %1922 }
 0x30b   : > { %6618 = vmatprep.mubr.msk.f32.mxu1 %vm11118_vm0, %v1921_v13 }
 0x30c   : > { %6619 = vmatmul.mubr.msk.f32.gmra.mrb[14].mxu1 %vm11118_vm0, %v1923_v14  ;;  %v900_v14 = vand.u32 4, %v8072_v50 }
 0x30e   : > { %v1925_v17 = vpop.permute.xlu0 %1924  ;;  %v1927_v23 = vpop.permute.xlu1 %1926  ;;  %vm8475_vm15 = vcmp.ne.s32.totalorder %v900_v14, 0 }
 0x30f   : > { %v8369_v24 = vpack.c.bf16 %v1927_v23, %v1925_v17  ;;  %6621 = vmatprep.mubr.msk.f32.mxu1 %vm11118_vm0, %v1925_v17 }
 0x310   : > { %6622 = vmatmul.mubr.msk.f32.gmra.mrb[16].mxu1 %vm11118_vm0, %v1927_v23  ;;  %v11352_v23 = vmov 0 }
 0x311   : > { %11337 = vst [vmem:[#allocation36_spill] sm:$0xff] %v8369_v24  ;;  %6923 = vmatprep.subr.msk.bf16.mxu0 %vm8141_vm4, %v8369_v24  ;;  %v11353_v23 = vsel %vm8475_vm15, 4294967295, %v11352_v23 }
 0x312   : > { %v8376_v25 = vpop.permute.xlu0 %1928  ;;  %v8378_v26 = vpop.permute.xlu1 %1930  ;;  %11354 = vst [vmem:[#allocation45_spill] sm:$0xff] %v11353_v23 }
 0x313   : > { %11338 = vst [vmem:[#allocation37_spill] sm:$0xff] %v8376_v25  ;;  %11339 = vst [vmem:[#allocation38_spill] sm:$0xff] %v8378_v26  ;;  %6624 = vmatprep.mubr.msk.f32.mxu1 %vm11118_vm0, %v8376_v25 }
 0x314   : > { %6625 = vmatmul.mubr.msk.f32.gmra.mrb[18].mxu1 %vm11118_vm0, %v8378_v26  ;;  %v7355_v26 = vld [vmem:[%s7925_s23] sm:$0xff] }
 0x316   : > { %v8387_v29 = vpop.permute.xlu0 %1932  ;;  %v8389_v4 = vpop.permute.xlu1 %1934 }
 0x317   : > { %11340 = vst [vmem:[#allocation39_spill] sm:$0xff] %v8387_v29  ;;  %11341 = vst [vmem:[#allocation40_spill] sm:$0xff] %v8389_v4  ;;  %6627 = vmatprep.mubr.msk.f32.mxu1 %vm11118_vm0, %v8387_v29 }
 0x318   : > { %6628 = vmatmul.mubr.msk.f32.gmra.mrb[20].mxu1 %vm11118_vm0, %v8389_v4 }
 0x31a   : > { %v760_v19 = vpop.permute.xlu0 %759  ;;  %v8396_v37 = vpop.permute.xlu1 %1936 }
 0x31b   : > { %11342 = vst [vmem:[#allocation41_spill] sm:$0xff] %v8396_v37  ;;  %6630 = vmatprep.mubr.msk.f32.mxu1 %vm11118_vm0, %v8396_v37 }
 0x31e   : > { %v8405_v43 = vpop.permute.xlu0 %1938  ;;  %v1151_v45 = vpop.permute.xlu1 %1150 }
 0x31f   : > { %11346 = vst [vmem:[#allocation43_spill] sm:$0xff] %v8405_v43  ;;  %v8410_v51 = vsel %vm8400_vm12, %v1151_v45, %v8053_v40  ;;  %6631 = vmatmul.mubr.msk.f32.gmra.mrb[22].mxu1 %vm11118_vm0, %v8405_v43 }
 0x320   : > { %1190 = vrot.lane.b32.xlu1 %v8410_v51, %s7628_s16 }
 0x322   : > { %v1195_v56 = vpop.permute.xlu1 %1194  ;;  %v1193_v39 = vpop.permute.xlu0 %1192 }
 0x323   : > { %v8423_v60 = vsel %vm8416_vm13, %v1195_v56, %v8257_v15 }
 0x324   : > { %1234 = vrot.lane.b32.xlu1 %v8423_v60, %s7631_s11 }
 0x326   : > { %v762_v40 = vpop.permute.xlu1 %761  ;;  %v1199_v56 = vpop.permute.xlu0 %1198 }
 0x327   : > { %v8430_v62 = vsel %vm8245_vm5, %v762_v40, %v8043_v34  ;;  %v843_v34 = vand.u32 2, %v8306_v52  ;;  %v8502_v40 = vsel %vm8249_vm6, %v760_v19, %v8037_v31  ;;  %v11358_v19 = vmov 0 }
 0x328   : > { %817 = vrot.lane.b32.xlu1 %v8430_v62, %s7628_s16 }
 0x329   : > { %vm8456_vm14 = vcmp.ne.s32.totalorder %v843_v34, 0  ;;  %v841_v34 = vand.u32 2, %v8239_v27 }
 0x32a   : > { %v820_v9 = vpop.permute.xlu1 %819  ;;  %v11351_v22 = vsel %vm8456_vm14, 4294967295, %v11350_v22  ;;  %v1237_v31 = vpop.permute.xlu0 %1236 }
 0x32b   : > { %v8437_v61 = vsel %vm8282_vm8, %v820_v9, %v8296_v47 }
 0x32c   : > { %875 = vrot.lane.b32.xlu1 %v8437_v61, %s7631_s11 }
 0x32e   : > { %v766_v15 = vpop.permute.xlu1 %765 }
 0x32f   : > { %v8444_v10 = vsel %vm8268_vm7, %v766_v15, %v8047_v36 }
 0x330   : > { %821 = vrot.lane.b32.xlu1 %v8444_v10, %s7628_s16 }
 0x332   : > { %v824_v58 = vpop.permute.xlu1 %823 }
 0x333   : > { %v8452_v47 = vsel %vm8302_vm9, %v824_v58, %v8321_v54 }
 0x334   : > { %879 = vrot.lane.b32.xlu1 %v8452_v47, %s7631_s11 }
 0x336   : > { %v826_v36 = vpop.permute.xlu1 %825 }
 0x337   : > { %v8463_v13 = vsel %vm8456_vm14, %v826_v36, %v8332_v57 }
 0x338   : > { %881 = vrot.lane.b32.xlu1 %v8463_v13, %s7631_s11 }
 0x33a   : > { %v1203_v54 = vpop.permute.xlu1 %1202 }
 0x33b   : > { %v8471_v17 = vsel %vm8456_vm14, %v1203_v54, %v8341_v35  ;;  %v8487_v35 = vsel %vm8345_vm11, %v8359_v46, %v8115_v6  ;;  %v896_v6 = vand.u32 4, %v8076_v53  ;;  %v8511_v46 = vpop.f32.mrb[0].mxu1  ;;  %v11361_v54 = vmov 0 }
 0x33c   : > { %1242 = vrot.lane.b32.xlu0 %v8471_v17, %s7631_s11  ;;  %v8518_v15 = vpop.f32.mrb[1].mxu1 }
 0x33d   : > { %vm8522_vm4 = vcmp.ne.s32.totalorder %v896_v6, 0  ;;  %v8527_v53 = vpop.f32.mrb[2].mxu1 }
 0x33e   : > { %v1245_v57 = vpop.permute.xlu1 %1244  ;;  %v11359_v19 = vsel %vm8522_vm4, 4294967295, %v11358_v19  ;;  %v8529_v58 = vpop.f32.mrb[3].mxu1 }
 0x33f   : > { %v1261_v12 = vsel %vm8475_vm15, %v1245_v57, %v8353_v38  ;;  %v838_v38 = vand.u32 2, %v8230_v21  ;;  %11360 = vst [vmem:[#allocation47_spill] sm:$0xff] %v11359_v19  ;;  %v8531_v36 = vpop.f32.mrb[4].mxu1  ;;  %v898_v57 = vand.u32 4, %v8106_v1  ;;  %v837_v1 = vand.u32 2, %v8385_v28 }
 0x340   : > { %1284 = vrot.lane.b32.xlu0 %v1261_v12, %s7632_s13  ;;  %v8536_v14 = vpop.f32.mrb[5].mxu1 }
 0x341   : > { %vm8506_vm0 = vcmp.ne.s32.totalorder %v838_v38, 0  ;;  %v8544_v12 = vpop.f32.mrb[6].mxu1  ;;  %v1241_v38 = vpop.permute.xlu0 %1240  ;;  %vm8552_vm14 = vcmp.ne.s32.totalorder %v898_v57, 0  ;;  %vm8561_vm9 = vcmp.ne.s32.totalorder %v837_v1, 0 }
 0x342   : > { %v758_v50 = vpop.permute.xlu1 %757  ;;  %v8516_v9 = vsel %vm8506_vm0, %v1193_v39, %v8262_v30  ;;  %v1257_v30 = vsel %vm8522_vm4, %v1237_v31, %v8291_v44  ;;  %v8546_v39 = vpop.f32.mrb[7].mxu1  ;;  %v11364_v44 = vmov 0  ;;  %v1259_v6 = vsel %vm8552_vm14, %v1241_v38, %v8311_v0 }
 0x343   : > { %v8492_v45 = vsel %vm8400_vm12, %v758_v50, %v8039_v32  ;;  %v11355_v32 = vmov 0  ;;  %vm8539_vm12 = vcmp.ne.s32.totalorder %v841_v34, 0  ;;  %v11365_v44 = vsel %vm8552_vm14, 4294967295, %v11364_v44 }
 0x344   : > { %883 = vrot.lane.b32.xlu0 %v8487_v35, %s7631_s11  ;;  %813 = vrot.lane.b32.xlu1 %v8492_v45, %s7628_s16  ;;  %v11356_v32 = vsel %vm8506_vm0, 4294967295, %v11355_v32  ;;  %v11362_v54 = vsel %vm8539_vm12, 4294967295, %v11361_v54  ;;  %v1218_v50 = vsel %vm8539_vm12, %v1199_v56, %v8276_v42  ;;  %11366 = vst [vmem:[#allocation49_spill] sm:$0xff] %v11365_v44  ;;  %v11367_v31 = vmov 0 }
 0x345   : > { %11357 = vst [vmem:[#allocation46_spill] sm:$0xff] %v11356_v32  ;;  %11363 = vst [vmem:[#allocation48_spill] sm:$0xff] %v11362_v54  ;;  %v11368_v31 = vsel %vm8561_vm9, 4294967295, %v11367_v31  ;;  %v895_v42 = vand.u32 4, %v8228_v18  ;;  %v11370_v0 = vmov 0  ;;  %v1845_v54 = vld [vmem:[%s7940_s21 + $0x28] sm:$0xff] }
 0x346   : > { %11369 = vst [vmem:[#allocation50_spill] sm:$0xff] %v11368_v31  ;;  %v11382_v31 = vmov 0 }
 0x347   : > { %vm8573_vm7 = vcmp.ne.s32.totalorder %v895_v42, 0 }
 0x348   : > { %815 = vrot.lane.b32.xlu0 %v8502_v40, %s7628_s16  ;;  %v11371_v0 = vsel %vm8573_vm7, 4294967295, %v11370_v0 }
 0x349   : > { %11372 = vst [vmem:[#allocation51_spill] sm:$0xff] %v11371_v0 }
 0x34c   : > { %1232 = vrot.lane.b32.xlu0 %v8516_v9, %s7631_s11 }
 0x350   : > { %1276 = vrot.lane.b32.xlu0 %v1257_v30, %s7632_s13 }
 0x354   : > { %1238 = vrot.lane.b32.xlu0 %v1218_v50, %s7631_s11 }
 0x358   : > { %1280 = vrot.lane.b32.xlu0 %v1259_v6, %s7632_s13 }
 0x392   : > { %v1191_v56 = vpop.permute.xlu1 %1190 }
 0x393   : > { %v8569_v34 = vsel %vm8561_vm9, %v1191_v56, %v8410_v51 }
 0x394   : > { %1230 = vrot.lane.b32.xlu1 %v8569_v34, %s7631_s11 }
 0x396   : > { %v1235_v30 = vpop.permute.xlu1 %1234 }
 0x397   : > { %v1256_v57 = vsel %vm8573_vm7, %v1235_v30, %v8423_v60 }
 0x398   : > { %1314 = vrot.lane.b32.xlu1 %v1256_v57, %s7633_s6 }
 0x39a   : > { %v818_v18 = vpop.permute.xlu1 %817 }
 0x39b   : > { %v8584_v51 = vsel %vm8416_vm13, %v818_v18, %v8430_v62  ;;  %v899_v62 = vand.u32 4, %v8306_v52 }
 0x39c   : > { %873 = vrot.lane.b32.xlu1 %v8584_v51, %s7631_s11 }
 0x39d   : > { %vm8604_vm13 = vcmp.ne.s32.totalorder %v899_v62, 0 }
 0x39e   : > { %v876_v38 = vpop.permute.xlu1 %875 }
 0x39f   : > { %v912_v6 = vsel %vm8522_vm4, %v876_v38, %v8437_v61  ;;  %v11373_v61 = vmov 0 }
 0x3a0   : > { %931 = vrot.lane.b32.xlu1 %v912_v6, %s7632_s13  ;;  %v11374_v61 = vsel %vm8604_vm13, 4294967295, %v11373_v61 }
 0x3a1   : > { %11375 = vst [vmem:[#allocation52_spill] sm:$0xff] %v11374_v61 }
 0x3a2   : > { %v822_v60 = vpop.permute.xlu1 %821 }
 0x3a3   : > { %v8595_v1 = vsel %vm8539_vm12, %v822_v60, %v8444_v10 }
 0x3a4   : > { %877 = vrot.lane.b32.xlu1 %v8595_v1, %s7631_s11 }
 0x3a6   : > { %v880_v42 = vpop.permute.xlu1 %879 }
 0x3a7   : > { %v914_v56 = vsel %vm8552_vm14, %v880_v42, %v8452_v47 }
 0x3a8   : > { %935 = vrot.lane.b32.xlu1 %v914_v56, %s7632_s13 }
 0x3aa   : > { %v882_v30 = vpop.permute.xlu1 %881 }
 0x3ab   : > { %v915_v10 = vsel %vm8604_vm13, %v882_v30, %v8463_v13 }
 0x3ac   : > { %993 = vrot.lane.b32.xlu1 %v915_v10, %s7633_s6 }
 0x3ae   : > { %v1243_v57 = vpop.permute.xlu0 %1242 }
 0x3af   : > { %v1260_v52 = vsel %vm8604_vm13, %v1243_v57, %v8471_v17  ;;  %v894_v17 = vand.u32 4, %v8230_v21  ;;  %v897_v21 = vand.u32 4, %v8239_v27 }
 0x3b0   : > { %1322 = vrot.lane.b32.xlu0 %v1260_v52, %s7633_s6 }
 0x3b1   : > { %vm8633_vm13 = vcmp.ne.s32.totalorder %v894_v17, 0 }
 0x3b2   : > { %v1285_v47 = vpop.permute.xlu0 %1284 }
 0x3b4   : > { %1324 = vrot.lane.b32.xlu0 %v1285_v47, %s7633_s6 }
 0x3b6   : > { %v884_v18 = vpop.permute.xlu0 %883  ;;  %v814_v38 = vpop.permute.xlu1 %813 }
 0x3b7   : > { %v916_v6 = vsel %vm8475_vm15, %v884_v18, %v8487_v35  ;;  %v8623_v13 = vsel %vm8561_vm9, %v814_v38, %v8492_v45  ;;  %v11376_v35 = vmov 0  ;;  %vm8643_vm9 = vcmp.ne.s32.totalorder %v897_v21, 0 }
 0x3b8   : > { %939 = vrot.lane.b32.xlu0 %v916_v6, %s7632_s13  ;;  %869 = vrot.lane.b32.xlu1 %v8623_v13, %s7631_s11  ;;  %v11377_v35 = vsel %vm8633_vm13, 4294967295, %v11376_v35 }
 0x3b9   : > { %11378 = vst [vmem:[#allocation53_spill] sm:$0xff] %v11377_v35 }
 0x3ba   : > { %v816_v60 = vpop.permute.xlu0 %815 }
 0x3bb   : > { %v854_v62 = vsel %vm8506_vm0, %v816_v60, %v8502_v40  ;;  %v11379_v40 = vmov 0 }
 0x3bc   : > { %871 = vrot.lane.b32.xlu0 %v854_v62, %s7631_s11  ;;  %v11380_v40 = vsel %vm8643_vm9, 4294967295, %v11379_v40 }
 0x3bd   : > { %11381 = vst [vmem:[#allocation54_spill] sm:$0xff] %v11380_v40 }
 0x3be   : > { %v1233_v45 = vpop.permute.xlu0 %1232 }
 0x3bf   : > { %v1255_v42 = vsel %vm8633_vm13, %v1233_v45, %v8516_v9 }
 0x3c0   : > { %1272 = vrot.lane.b32.xlu0 %v1255_v42, %s7632_s13 }
 0x3c2   : > { %v1277_v56 = vpop.permute.xlu0 %1276 }
 0x3c4   : > { %1316 = vrot.lane.b32.xlu0 %v1277_v56, %s7633_s6 }
 0x3c6   : > { %v1239_v30 = vpop.permute.xlu0 %1238 }
 0x3c7   : > { %v1258_v10 = vsel %vm8643_vm9, %v1239_v30, %v1218_v50 }
 0x3c8   : > { %1358 = vrot.lane.b32.xlu0 %v1258_v10, %s7629_s24 }
 0x3ca   : > { %v1281_v57 = vpop.permute.xlu0 %1280 }
 0x3cc   : > { %1360 = vrot.lane.b32.xlu0 %v1281_v57, %s7629_s24  ;;  %v893_v57 = vand.u32 4, %v8385_v28 }
 0x3ce   : > { %vm8684_vm14 = vcmp.ne.s32.totalorder %v893_v57, 0 }
 0x3cf   : > { %v11383_v31 = vsel %vm8684_vm14, 4294967295, %v11382_v31 }
 0x3d0   : > { %11384 = vst [vmem:[#allocation55_spill] sm:$0xff] %v11383_v31 }
 0x3d3   : > { %v8651_v9 = vpop.f32.mrb[8].mxu1 }
 0x3d4   : > { %v8653_v52 = vpop.f32.mrb[9].mxu1 }
 0x3d7   : > { %v8655_v27 = vpop.f32.mrb[10].mxu1 }
 0x3d8   : > { %v8657_v47 = vpop.f32.mrb[11].mxu1 }
 0x3db   : > { %v8659_v18 = vpop.f32.mrb[12].mxu1 }
 0x3dc   : > { %v8661_v38 = vpop.f32.mrb[13].mxu1 }
 0x3df   : > { %v8663_v6 = vpop.f32.mrb[14].mxu1 }
 0x3e0   : > { %v8665_v50 = vpop.f32.mrb[15].mxu1 }
 0x3e3   : > { %v8667_v17 = vpop.f32.mrb[16].mxu1 }
 0x3e4   : > { %v8669_v60 = vpop.f32.mrb[17].mxu1 }
 0x3e7   : > { %v8671_v45 = vpop.f32.mrb[18].mxu1 }
 0x3e8   : > { %v8673_v42 = vpop.f32.mrb[19].mxu1 }
 0x3eb   : > { %v8675_v21 = vpop.f32.mrb[20].mxu1 }
 0x3ec   : > { %v8677_v56 = vpop.f32.mrb[21].mxu1 }
 0x3f2   : > { %v8679_v30 = vpop.f32.mrb[22].mxu1 }
 0x3f3   : > { %v8681_v10 = vpop.f32.mrb[23].mxu1 }
 0x406   : > { %v1231_v7 = vpop.permute.xlu1 %1230 }
 0x407   : > { %v1254_v3 = vsel %vm8684_vm14, %v1231_v7, %v8569_v34 }
 0x408   : > { %1390 = vrot.lane.b32.xlu1 %v1254_v3, %s7634_s26 }
 0x40a   : > { %v1315_v43 = vpop.permute.xlu1 %1314 }
 0x40c   : > { %1394 = vrot.lane.b32.xlu1 %v1315_v43, %s7634_s26 }
 0x40e   : > { %v874_v33 = vpop.permute.xlu1 %873 }
 0x412   : > { %v932_v16 = vpop.permute.xlu1 %931 }
 0x416   : > { %v878_v34 = vpop.permute.xlu1 %877 }
 0x422   : > { %v1323_v37 = vpop.permute.xlu0 %1322 }
 0x426   : > { %v1325_v4 = vpop.permute.xlu0 %1324 }
 0x42a   : > { %v940_v29 = vpop.permute.xlu0 %939 }
 0x42b   : > { %995 = vrot.lane.b32.xlu0 %v940_v29, %s7633_s6  ;;  %v936_v29 = vpop.permute.xlu1 %935 }
 0x42e   : > { %v872_v28 = vpop.permute.xlu0 %871 }
 0x42f   : > { %v910_v57 = vsel %vm8633_vm13, %v872_v28, %v854_v62  ;;  %v994_v62 = vpop.permute.xlu1 %993 }
 0x430   : > { %927 = vrot.lane.b32.xlu0 %v910_v57, %s7632_s13  ;;  %v913_v57 = vsel %vm8643_vm9, %v878_v34, %v8595_v1 }
 0x432   : > { %v1273_v7 = vpop.permute.xlu0 %1272 }
 0x434   : > { %1362 = vrot.lane.b32.xlu0 %v1323_v37, %s7629_s24  ;;  %v911_v37 = vsel %vm8573_vm7, %v874_v33, %v8584_v51 }
 0x436   : > { %v1317_v3 = vpop.permute.xlu0 %1316 }
 0x438   : > { %1364 = vrot.lane.b32.xlu0 %v1325_v4, %s7629_s24  ;;  %v870_v4 = vpop.permute.xlu1 %869 }
 0x43a   : > { %v1359_v43 = vpop.permute.xlu0 %1358 }
 0x43b   : > { %1398 = vrot.lane.b32.xlu1 %v1359_v43, %s7634_s26 }
 0x43c   : > { %1392 = vrot.lane.b32.xlu0 %v1273_v7, %s7634_s26 }
 0x43e   : > { %v1361_v28 = vpop.permute.xlu0 %1360 }
 0x43f   : > { %987 = vrot.lane.b32.xlu1 %v932_v16, %s7633_s6  ;;  %v909_v16 = vsel %vm8684_vm14, %v870_v4, %v8623_v13  ;;  %vm11386_vm14 = vnez %v11330_v49 }
 0x440   : > { %1396 = vrot.lane.b32.xlu0 %v1317_v3, %s7634_s26 }
 0x443   : > { %1047 = vrot.lane.b32.xlu1 %v936_v29, %s7629_s24 }
 0x444   : > { %985 = vrot.lane.b32.xlu0 %v911_v37, %s7633_s6 }
 0x447   : > { %1049 = vrot.lane.b32.xlu1 %v994_v62, %s7629_s24 }
 0x448   : > { %1400 = vrot.lane.b32.xlu0 %v1361_v28, %s7634_s26 }
 0x44b   : > { %1093 = vrot.lane.b32.xlu1 %v909_v16, %s7634_s26 }
 0x44c   : > { %1045 = vrot.lane.b32.xlu0 %v913_v57, %s7629_s24 }
 0x47a   : > { %v8719_v7 = vpop.permute.xlu1 %1390 }
 0x47e   : > { %v8722_v43 = vpop.permute.xlu1 %1394 }
 0x49d   : > { %v996_v33 = vpop.permute.xlu0 %995 }
 0x49e   : > { %1051 = vrot.lane.b32.xlu0 %v996_v33, %s7629_s24 }
 0x4a2   : > { %v928_v51 = vpop.permute.xlu0 %927 }
 0x4a3   : > { %1095 = vrot.lane.b32.xlu0 %v928_v51, %s7634_s26 }
 0x4a6   : > { %v1363_v3 = vpop.permute.xlu0 %1362 }
 0x4aa   : > { %v1365_v13 = vpop.permute.xlu0 %1364 }
 0x4ad   : > { %v8724_v29 = vpop.permute.xlu1 %1398 }
 0x4ae   : > { %v8726_v62 = vpop.permute.xlu0 %1392 }
 0x4b1   : > { %v988_v37 = vpop.permute.xlu1 %987 }
 0x4b2   : > { %v8728_v1 = vpop.permute.xlu0 %1396  ;;  %1099 = vrot.lane.b32.xlu0 %v988_v37, %s7634_s26 }
 0x4b5   : > { %v1048_v34 = vpop.permute.xlu1 %1047 }
 0x4b6   : > { %v986_v4 = vpop.permute.xlu0 %985  ;;  %1103 = vrot.lane.b32.xlu0 %v1048_v34, %s7634_s26 }
 0x4b7   : > { %1097 = vrot.lane.b32.xlu1 %v986_v4, %s7634_s26 }
 0x4b9   : > { %v1050_v28 = vpop.permute.xlu1 %1049 }
 0x4ba   : > { %v8733_v16 = vpop.permute.xlu0 %1400  ;;  %1105 = vrot.lane.b32.xlu0 %v1050_v28, %s7634_s26 }
 0x4bd   : > { %v8753_v4 = vpop.permute.xlu1 %1093 }
 0x4be   : > { %v1046_v57 = vpop.permute.xlu0 %1045  ;;  %2419 = vrot.lane.b32.xlu0 %v8679_v30, %s7627_s20 }
 0x4bf   : > { %1101 = vrot.lane.b32.xlu1 %v1046_v57, %s7634_s26 }
 0x4c2   : > { %2411 = vrot.lane.b32.xlu0 %v8671_v45, %s7627_s20 }
 0x4c3   : > { %2415 = vrot.lane.b32.xlu1 %v8675_v21, %s7627_s20 }
 0x4c6   : > { %2417 = vrot.lane.b32.xlu0 %v8681_v10, %s7627_s20 }
 0x510   : > { %v1052_v33 = vpop.permute.xlu0 %1051 }
 0x511   : > { %1107 = vrot.lane.b32.xlu0 %v1052_v33, %s7634_s26 }
 0x515   : > { %1404 = vrot.lane.b32.xlu0 %v1365_v13, %s7634_s26  ;;  %v8747_v51 = vpop.permute.xlu0 %1095 }
 0x524   : > { %v8749_v37 = vpop.permute.xlu0 %1099 }
 0x528   : > { %v8751_v34 = vpop.permute.xlu0 %1103 }
 0x529   : > { %v8757_v57 = vpop.permute.xlu1 %1097 }
 0x52c   : > { %v8755_v28 = vpop.permute.xlu0 %1105 }
 0x530   : > { %v2420_v31 = vpop.permute.xlu0 %2419 }
 0x531   : > { %v2436_v0 = vsel %vm8078_vm1, %v2420_v31, %v8679_v30  ;;  %v8763_v13 = vpop.permute.xlu1 %1101 }
 0x532   : > { %2459 = vrot.lane.b32.xlu1 %v2436_v0, %s7628_s16 }
 0x534   : > { %v2412_v33 = vpop.permute.xlu0 %2411 }
 0x535   : > { %v2432_v40 = vsel %vm8089_vm2, %v2412_v33, %v8671_v45  ;;  %v2416_v35 = vpop.permute.xlu1 %2415  ;;  %v6141_v45 = vld [vmem:[%s11089_s3 + $0x1] ss:$0 sm:$0xff] }
 0x536   : > { %2139 = vrot.lane.b32.xlu1 %v8663_v6, %s7627_s20  ;;  %2451 = vrot.lane.b32.xlu0 %v2432_v40, %s7628_s16  ;;  %v2434_v31 = vsel %vm8121_vm3, %v2416_v35, %v8675_v21 }
 0x538   : > { %v2418_v30 = vpop.permute.xlu0 %2417 }
 0x539   : > { %v2435_v33 = vsel %vm8325_vm10, %v2418_v30, %v8681_v10 }
 0x53a   : > { %2407 = vrot.lane.b32.xlu1 %v8667_v17, %s7627_s20  ;;  %2131 = vrot.lane.b32.xlu0 %v8655_v27, %s7627_s20 }
 0x53e   : > { %2409 = vrot.lane.b32.xlu1 %v8673_v42, %s7627_s20  ;;  %2455 = vrot.lane.b32.xlu0 %v2434_v31, %s7628_s16 }
 0x542   : > { %1857 = vrot.lane.b32.xlu1 %v6141_v45, %s7629_s24  ;;  %2457 = vrot.lane.b32.xlu0 %v2435_v33, %s7628_s16 }
 0x546   : > { %1402 = vrot.lane.b32.xlu1 %v1363_v3, %s7634_s26 }
 0x54a   : > { %2413 = vrot.lane.b32.xlu1 %v8677_v56, %s7627_s20 }
 0x54e   : > { %2135 = vrot.lane.b32.xlu1 %v8659_v18, %s7627_s20 }
 0x583   : > { %v8794_v35 = vpop.permute.xlu0 %1107 }
 0x587   : > { %v1405_v30 = vpop.permute.xlu0 %1404 }
 0x5a4   : > { %v2460_v21 = vpop.permute.xlu1 %2459 }
 0x5a5   : > { %v8798_v24 = vsel %vm8345_vm11, %v2460_v21, %v2436_v0  ;;  %v6194_v0 = vld [vmem:[%s11090_s4 + $0x2] ss:$0 sm:$0xff] }
 0x5a6   : > { %2499 = vrot.lane.b32.xlu1 %v8798_v24, %s7631_s11 }
 0x5a8   : > { %v2140_v10 = vpop.permute.xlu1 %2139  ;;  %v2452_v21 = vpop.permute.xlu0 %2451 }
 0x5a9   : > { %v8805_v3 = vsel %vm8078_vm1, %v2140_v10, %v8663_v6  ;;  %v8819_v10 = vsel %vm8282_vm8, %v2452_v21, %v2432_v40  ;;  %vm11385_vm1 = vnez %v11325_v20 }
 0x5aa   : > { %2137 = vrot.lane.b32.xlu1 %v8665_v50, %s7627_s20  ;;  %2179 = vrot.lane.b32.xlu0 %v8805_v3, %s7628_s16 }
 0x5ac   : > { %v2408_v45 = vpop.permute.xlu1 %2407  ;;  %v2132_v21 = vpop.permute.xlu0 %2131 }
 0x5ae   : > { %3218 = vrot.lane.b32.xlu1 %v6194_v0, %s7634_s26  ;;  %2127 = vrot.lane.b32.xlu0 %v8651_v9, %s7627_s20  ;;  %v8830_v0 = vsel %vm8249_vm6, %v2408_v45, %v8667_v17  ;;  %v7356_v45 = vld [vmem:[%s7925_s23 + $0x8] sm:$0xff] }
 0x5b0   : > { %v2410_v6 = vpop.permute.xlu1 %2409  ;;  %v2456_v63 = vpop.permute.xlu0 %2455 }
 0x5b1   : > { %v8837_v40 = vsel %vm8245_vm5, %v2410_v6, %v8673_v42 }
 0x5b2   : > { %2405 = vrot.lane.b32.xlu1 %v8669_v60, %s7627_s20  ;;  %2491 = vrot.lane.b32.xlu0 %v8819_v10, %s7631_s11 }
 0x5b4   : > { %v8825_v55 = vpop.permute.xlu1 %1857 }
 0x5b5   : > { %v1860_v25 = vadd.f32 %v7355_v26, %v8825_v55  ;;  %v1861_v6 = vadd.f32 %v7356_v45, %v8825_v55  ;;  %v8857_v26 = vsel %vm8089_vm2, %v2132_v21, %v8655_v27  ;;  %v7357_v45 = vld [vmem:[%s7925_s23 + $0x10] sm:$0xff]  ;;  %vm11387_vm2 = vnez %v11351_v22 }
 0x5b6   : > { %2447 = vrot.lane.b32.xlu1 %v8830_v0, %s7628_s16  ;;  %v1862_v27 = vadd.f32 %v7357_v45, %v8825_v55  ;;  %v1545_v45 = vadd.f32 %v8518_v15, %v8753_v4  ;;  %v1555_v15 = vadd.f32 %v8529_v58, %v8757_v57 }
 0x5b7   : > { %v1868_v42 = vmul.f32 0.17677669, %v1860_v25  ;;  %v2458_v25 = vpop.permute.xlu0 %2457 }
 0x5b8   : > { %v1403_v41 = vpop.permute.xlu1 %1402  ;;  %v8873_v21 = vsel %vm11387_vm2, %v2458_v25, %v2435_v33 }
 0x5ba   : > { %2449 = vrot.lane.b32.xlu1 %v8837_v40, %s7628_s16 }
 0x5bc   : > { %v2414_v48 = vpop.permute.xlu1 %2413 }
 0x5bd   : > { %v8846_v17 = vsel %vm11385_vm1, %v2414_v48, %v8677_v56  ;;  %v1869_v48 = vmul.f32 0.17677669, %v1861_v6  ;;  %v8864_v56 = vsel %vm11386_vm14, %v2456_v63, %v2434_v31  ;;  %v1870_v63 = vmul.f32 0.17677669, %v1862_v27  ;;  %v7358_v31 = vld [vmem:[%s7925_s23 + $0x18] sm:$0xff] }
 0x5be   : > { %2129 = vrot.lane.b32.xlu1 %v8657_v47, %s7627_s20  ;;  %2453 = vrot.lane.b32.xlu0 %v8846_v17, %s7628_s16 }
 0x5c0   : > { %v2136_v59 = vpop.permute.xlu1 %2135 }
 0x5c1   : > { %v8884_v6 = vsel %vm8121_vm3, %v2136_v59, %v8659_v18  ;;  %vm11186_vm3 = vcmask 523264  }
 0x5c2   : > { %2171 = vrot.lane.b32.xlu1 %v8857_v26, %s7628_s16  ;;  %2717 = vrot.lane.b32.xlu0 %v1868_v42, %s7630_s0  ;;  %v1863_v42 = vadd.f32 %v7358_v31, %v8825_v55  ;;  %v1550_v31 = vadd.f32 %v8511_v46, %v8747_v51 }
 0x5c4   : > { %v1871_v33 = vmul.f32 0.17677669, %v1863_v42 }
 0x5c6   : > { %2495 = vrot.lane.b32.xlu1 %v8864_v56, %s7631_s11  ;;  %2719 = vrot.lane.b32.xlu0 %v1869_v48, %s7630_s0 }
 0x5ca   : > { %2133 = vrot.lane.b32.xlu1 %v8661_v38, %s7627_s20  ;;  %2497 = vrot.lane.b32.xlu0 %v8873_v21, %s7631_s11 }
 0x5ce   : > { %2721 = vrot.lane.b32.xlu0 %v1870_v63, %s7630_s0  ;;  %2175 = vrot.lane.b32.xlu1 %v8884_v6, %s7628_s16 }
 0x5d2   : > { %2723 = vrot.lane.b32.xlu1 %v1871_v33, %s7630_s0 }
 0x5fb   : > { %1422 = vxpose.xlu1.b32.start [1/8] (short) (narrow) %v8719_v7, 64 }
 0x5ff   : > { %1423 = vxpose.xlu1.b32.cont [2/8] (short) (narrow) %v8726_v62, 64 }
 0x603   : > { %1424 = vxpose.xlu1.b32.cont [3/8] (short) (narrow) %v8722_v43, 64 }
 0x607   : > { %1425 = vxpose.xlu1.b32.cont [4/8] (short) (narrow) %v8728_v1, 64 }
 0x60b   : > { %1426 = vxpose.xlu1.b32.cont [5/8] (short) (narrow) %v8724_v29, 64 }
 0x60f   : > { %1427 = vxpose.xlu1.b32.cont [6/8] (short) (narrow) %v8733_v16, 64 }
 0x613   : > { %1428 = vxpose.xlu1.b32.cont [7/8] (short) (narrow) %v1403_v41, 64 }
 0x617   : > { %1429 = vxpose.xlu1.b32.end [8/8] (short) (narrow) %v1405_v30, 64 }
 0x618   : > { %v8896_v59 = vpop.permute.xlu1 %2499 }
 0x61c   : > { %v8898_v18 = vpop.permute.xlu1 %2137 }
 0x620   : > { %v8900_v48 = vpop.permute.xlu1 %3218 }
 0x624   : > { %v8902_v7 = vpop.permute.xlu1 %2405 }
 0x628   : > { %v8904_v62 = vpop.permute.xlu1 %2447 }
 0x62c   : > { %v8906_v43 = vpop.permute.xlu1 %2449 }
 0x630   : > { %v8908_v1 = vpop.permute.xlu1 %2129 }
 0x634   : > { %v8910_v29 = vpop.permute.xlu1 %2171 }
 0x638   : > { %v8912_v25 = vpop.permute.xlu1 %2495 }
 0x63c   : > { %v8914_v41 = vpop.permute.xlu1 %2133 }
 0x640   : > { %v8916_v16 = vpop.permute.xlu1 %2175 }
 0x644   : > { %v8918_v30 = vpop.permute.xlu1 %2723 }
 0x645   : > { %11388 = vst [vmem:[#allocation56_spill] sm:$0xff] %v8918_v30 }
 0x67b   : > { %v1438_v27 = vpop.trf.xlu1 }
 0x67c   : > { %v1583_v63 = vadd.f32 %v1545_v45, %v1438_v27  ;;  %v1560_v45 = vadd.f32 %v8527_v53, %v8749_v37 }
 0x67e   : > { %1591 = vst.msk [vmem:[%s8925_s1] sm:$0xff] %vm11186_vm3, %v1583_v63  ;;  %v1599_v42 = vsel %vm11186_vm3, %v1583_v63, -inf }
 0x67f   : > { %1600 = vmax.xlane.f32.xlu0 %v1599_v42  ;;  %v1439_v33 = vpop.trf.xlu1 }
 0x680   : > { %v1584_v8 = vadd.f32 %v1550_v31, %v1439_v33  ;;  %v1565_v31 = vadd.f32 %v8536_v14, %v8763_v13  ;;  %v1570_v33 = vadd.f32 %v8531_v36, %v8751_v34 }
 0x682   : > { %1592 = vst.msk [vmem:[%s8925_s1 + $0x8] sm:$0xff] %vm11186_vm3, %v1584_v8  ;;  %v1602_v46 = vsel %vm11186_vm3, %v1584_v8, -inf }
 0x683   : > { %1603 = vmax.xlane.f32.xlu0 %v1602_v46  ;;  %v1440_v51 = vpop.trf.xlu1  ;;  %v1575_v46 = vadd.f32 %v8546_v39, %v8755_v28  ;;  %v2516_v28 = vsel %vm8475_vm15, %v8896_v59, %v8798_v24 }
 0x684   : > { %v8935_v4 = vadd.f32 %v1555_v15, %v1440_v51 }
 0x686   : > { %1593 = vst.msk [vmem:[%s8925_s1 + $0x10] sm:$0xff] %vm11186_vm3, %v8935_v4  ;;  %v1605_v27 = vsel %vm11186_vm3, %v8935_v4, -inf }
 0x687   : > { %1606 = vmax.xlane.f32.xlu0 %v1605_v27  ;;  %v1441_v58 = vpop.trf.xlu1 }
 0x688   : > { %v8944_v57 = vadd.f32 %v1560_v45, %v1441_v58  ;;  %v1580_v45 = vadd.f32 %v8544_v12, %v8794_v35  ;;  %v8987_v12 = vsel %vm8325_vm10, %v8898_v18, %v8665_v50  ;;  %v2180_v35 = vpop.permute.xlu0 %2179 }
 0x68a   : > { %1594 = vst.msk [vmem:[%s8925_s1 + $0x18] sm:$0xff] %vm11186_vm3, %v8944_v57  ;;  %v1608_v53 = vsel %vm11186_vm3, %v8944_v57, -inf }
 0x68b   : > { %1609 = vmax.xlane.f32.xlu0 %v1608_v53  ;;  %v1442_v37 = vpop.trf.xlu1 }
 0x68c   : > { %v8953_v42 = vadd.f32 %v1565_v31, %v1442_v37  ;;  %v8996_v53 = vpop.permute.xlu0 %2127 }
 0x68e   : > { %1595 = vst.msk [vmem:[%s8925_s1 + $0x20] sm:$0xff] %vm11186_vm3, %v8953_v42  ;;  %v1611_v14 = vsel %vm11186_vm3, %v8953_v42, -inf }
 0x68f   : > { %1612 = vmax.xlane.f32.xlu0 %v1611_v14  ;;  %v1443_v13 = vpop.trf.xlu1 }
 0x690   : > { %v8962_v15 = vadd.f32 %v1570_v33, %v1443_v13  ;;  %v8998_v37 = vpop.permute.xlu0 %2491 }
 0x692   : > { %1596 = vst.msk [vmem:[%s8925_s1 + $0x28] sm:$0xff] %vm11186_vm3, %v8962_v15  ;;  %v1614_v36 = vsel %vm11186_vm3, %v8962_v15, -inf }
 0x693   : > { %1615 = vmax.xlane.f32.xlu0 %v1614_v36  ;;  %v1444_v34 = vpop.trf.xlu1 }
 0x694   : > { %v1589_v51 = vadd.f32 %v1575_v46, %v1444_v34  ;;  %v9000_v33 = vpop.permute.xlu0 %2453 }
 0x696   : > { %1597 = vst.msk [vmem:[%s8925_s1 + $0x30] sm:$0xff] %vm11186_vm3, %v1589_v51  ;;  %v1617_v27 = vsel %vm11186_vm3, %v1589_v51, -inf }
 0x697   : > { %1618 = vmax.xlane.f32.xlu1 %v1617_v27  ;;  %v1445_v58 = vpop.trf.xlu1 }
 0x698   : > { %v8976_v31 = vadd.f32 %v1580_v45, %v1445_v58  ;;  %v9002_v14 = vpop.permute.xlu0 %2717 }
 0x69a   : > { %1598 = vst.msk [vmem:[%s8925_s1 + $0x38] sm:$0xff] %vm11186_vm3, %v8976_v31  ;;  %v1620_v39 = vsel %vm11186_vm3, %v8976_v31, -inf }
 0x69b   : > { %1621 = vmax.xlane.f32.xlu0 %v1620_v39 }
 0x69c   : > { %v9004_v50 = vpop.permute.xlu0 %2719 }
 0x6a0   : > { %v9006_v18 = vpop.permute.xlu0 %2497 }
 0x6a4   : > { %v9008_v13 = vpop.permute.xlu0 %2721 }
 0x6a5   : > { %11389 = vst [vmem:[#allocation57_spill] sm:$0xff] %v9008_v13 }
 0x6a8   : > { %2177 = vrot.lane.b32.xlu1 %v8987_v12, %s7628_s16 }
 0x6b1   : > { %2539 = vrot.lane.b32.xlu0 %v2516_v28, %s7632_s13 }
 0x70c   : > { %v1601_v46 = vpop.xlane.xlu0 %1600 }
 0x70d   : > { %v1623_v24 = vsub.f32 %v1583_v63, %v1601_v46  ;;  %v9021_v63 = vsel %vm8345_vm11, %v2180_v35, %v8805_v3  ;;  %vm11392_vm11 = vcmask 523264  }
 0x70f   : > { %v1631_v59 = vmul.f32 1.442695, %v1623_v24 }
 0x710   : > { %v1604_v36 = vpop.xlane.xlu0 %1603 }
 0x711   : > { %7227 = vpow2.f32 %v1631_v59  ;;  %v1624_v34 = vsub.f32 %v1584_v8, %v1604_v36  ;;  %v7359_v8 = vld [vmem:[%s7925_s23 + $0x20] sm:$0xff] }
 0x712   : > { %v1864_v46 = vadd.f32 %v7359_v8, %v8825_v55 }
 0x713   : > { %v1633_v45 = vmul.f32 1.442695, %v1624_v34 }
 0x714   : > { %v1607_v24 = vpop.xlane.xlu0 %1606  ;;  %v1872_v59 = vmul.f32 0.17677669, %v1864_v46 }
 0x715   : > { %7229 = vpow2.f32 %v1633_v45 }
 0x718   : > { %v1610_v36 = vpop.xlane.xlu0 %1609 }
 0x719   : > { %v1626_v34 = vsub.f32 %v8944_v57, %v1610_v36 }
 0x71b   : > { %v9010_v27 = vpop.eup %7227 }
 0x71c   : > { %v1647_v58 = vsel %vm11186_vm3, %v9010_v27, 0.0  ;;  %v1613_v45 = vpop.xlane.xlu0 %1612 }
 0x71d   : > { %1648 = vadd.xlane.f32.xlu1 %v1647_v58  ;;  %v1625_v58 = vsub.f32 %v8935_v4, %v1607_v24  ;;  %v1627_v3 = vsub.f32 %v8953_v42, %v1613_v45 }
 0x71f   : > { %v9014_v39 = vpop.eup %7229  ;;  %v1635_v5 = vmul.f32 1.442695, %v1625_v58  ;;  %v1639_v11 = vmul.f32 1.442695, %v1627_v3 }
 0x720   : > { %v1650_v28 = vsel %vm11186_vm3, %v9014_v39, 0.0  ;;  %v1616_v35 = vpop.xlane.xlu0 %1615 }
 0x721   : > { %1651 = vadd.xlane.f32.xlu0 %v1650_v28  ;;  %v1637_v28 = vmul.f32 1.442695, %v1626_v34  ;;  %v1628_v8 = vsub.f32 %v8962_v15, %v1616_v35  ;;  %v9061_v35 = vld [vmem:[%s7925_s23 + $0x10] sm:$0xff] }
 0x723   : > { %7231 = vpow2.f32 %v1637_v28  ;;  %v1641_v46 = vmul.f32 1.442695, %v1628_v8  ;;  %v9055_v28 = vld [vmem:[%s7925_s23] sm:$0xff]  ;;  %v3223_v8 = vadd.f32 %v8900_v48, %v9061_v35 }
 0x724   : > { %7233 = vpow2.f32 %v1635_v5  ;;  %v1619_v30 = vpop.xlane.xlu1 %1618  ;;  %v3221_v3 = vadd.f32 %v8900_v48, %v9055_v28 }
 0x725   : > { %7235 = vpow2.f32 %v1639_v11 }
 0x726   : > { %7237 = vpow2.f32 %v1641_v46  ;;  %v3165_v46 = vld [vmem:[%s7925_s23 + $0x20] sm:$0xff] }
 0x72d   : > { %v9032_v13 = vpop.eup %7231 }
 0x72e   : > { %2219 = vrot.lane.b32.xlu1 %v9021_v63, %s7631_s11  ;;  %v1656_v4 = vsel %vm11186_vm3, %v9032_v13, 0.0  ;;  %v9036_v24 = vpop.eup %7233 }
 0x72f   : > { %v1653_v5 = vsel %vm11186_vm3, %v9036_v24, 0.0  ;;  %v9040_v42 = vpop.eup %7235 }
 0x730   : > { %v1659_v11 = vsel %vm11186_vm3, %v9040_v42, 0.0 }
 0x737   : > { %2725 = vrot.lane.b32.xlu0 %v1872_v59, %s7630_s0  ;;  %v1629_v59 = vsub.f32 %v1589_v51, %v1619_v30  ;;  %v9044_v30 = vpop.eup %7237  ;;  %v7360_v51 = vld [vmem:[%s7925_s23 + $0x30] sm:$0xff] }
 0x738   : > { %v1662_v15 = vsel %vm11186_vm3, %v9044_v30, 0.0  ;;  %v1866_v36 = vadd.f32 %v7360_v51, %v8825_v55  ;;  %v1622_v51 = vpop.xlane.xlu0 %1621 }
 0x739   : > { %v1643_v57 = vmul.f32 1.442695, %v1629_v59  ;;  %v3225_v59 = vadd.f32 %v8900_v48, %v3165_v46 }
 0x73a   : > { %v1874_v58 = vmul.f32 0.17677669, %v1866_v36 }
 0x73b   : > { %7239 = vpow2.f32 %v1643_v57  ;;  %v7361_v57 = vld [vmem:[%s7925_s23 + $0x28] sm:$0xff] }
 0x745   : > { %v9050_v34 = vpop.eup %7239 }
 0x746   : > { %v1665_v45 = vsel %vm11186_vm3, %v9050_v34, 0.0 }
 0x752   : > { %1657 = vadd.xlane.f32.xlu1 %v1656_v4  ;;  %v1865_v4 = vadd.f32 %v7361_v57, %v8825_v55  ;;  %v3168_v57 = vld [vmem:[%s7925_s23 + $0x38] sm:$0xff] }
 0x756   : > { %1654 = vadd.xlane.f32.xlu0 %v1653_v5  ;;  %v1873_v5 = vmul.f32 0.17677669, %v1865_v4  ;;  %v3228_v4 = vadd.f32 %v8900_v48, %v3168_v57  ;;  %v9141_v57 = vsel %vm8539_vm12, %v9000_v33, %v8846_v17  ;;  %v9154_v17 = vld [vmem:[%s7933_s29 + $0x20] sm:$0xff] }
 0x75a   : > { %1660 = vadd.xlane.f32.xlu0 %v1659_v11  ;;  %v7362_v11 = vld [vmem:[%s7925_s23 + $0x38] sm:$0xff] }
 0x75e   : > { %1663 = vadd.xlane.f32.xlu0 %v1662_v15  ;;  %v1867_v15 = vadd.f32 %v7362_v11, %v8825_v55 }
 0x760   : > { %v1875_v36 = vmul.f32 0.17677669, %v1867_v15 }
 0x762   : > { %1666 = vadd.xlane.f32.xlu0 %v1665_v45  ;;  %v9076_v45 = vld [vmem:[%s7925_s23 + $0x8] sm:$0xff] }
 0x763   : > { %2729 = vrot.lane.b32.xlu1 %v1874_v58, %s7630_s0  ;;  %v1630_v58 = vsub.f32 %v8976_v31, %v1622_v51  ;;  %v9110_v51 = vsel %vm8249_vm6, %v8996_v53, %v8651_v9  ;;  %v9124_v9 = vsel %vm8506_vm0, %v8904_v62, %v8830_v0  ;;  %v3169_v53 = vld [vmem:[%s7933_s29] sm:$0xff]  ;;  %v2540_v0 = vpop.permute.xlu0 %2539  ;;  %vm11391_vm6 = vnez %v11374_v61 }
 0x764   : > { %v2515_v33 = vsel %vm11391_vm6, %v9006_v18, %v8873_v21  ;;  %v11393_v21 = vld [vmem:[#allocation42_spill] sm:$0xff]  ;;  %vm11397_vm6 = vmmov %vm11392_vm11 }
 0x765   : > { %v1645_v55 = vmul.f32 1.442695, %v1630_v58  ;;  %v3176_v58 = vld [vmem:[%s7933_s29 + $0x38] sm:$0xff]  ;;  %vm11394_vm10 = vnez %v11393_v21 }
 0x766   : > { %v9173_v18 = vsel %vm11394_vm10, %v8902_v7, %v8669_v60  ;;  %v11401_v60 = vld [vmem:[#allocation44_spill] sm:$0xff] }
 0x767   : > { %3245 = vrot.lane.b32.xlu1 %v3221_v3, %s7634_s26  ;;  %v3222_v3 = vadd.f32 %v8900_v48, %v9076_v45  ;;  %7241 = vpow2.f32 %v1645_v55 }
 0x76b   : > { %3249 = vrot.lane.b32.xlu1 %v3223_v8, %s7634_s26  ;;  %v9083_v8 = vld [vmem:[%s7925_s23 + $0x18] sm:$0xff] }
 0x76c   : > { %v3224_v46 = vadd.f32 %v8900_v48, %v9083_v8 }
 0x76f   : > { %3253 = vrot.lane.b32.xlu1 %v3225_v59, %s7634_s26  ;;  %v9089_v59 = vld [vmem:[%s7925_s23 + $0x28] sm:$0xff] }
 0x770   : > { %v3226_v31 = vadd.f32 %v8900_v48, %v9089_v59 }
 0x771   : > { %v9099_v11 = vpop.eup %7241 }
 0x772   : > { %v1668_v15 = vsel %vm11186_vm3, %v9099_v11, 0.0  ;;  %vm11390_vm3 = vnez %v11365_v44 }
 0x778   : > { %2727 = vrot.lane.b32.xlu0 %v1873_v5, %s7630_s0  ;;  %v3170_v5 = vld [vmem:[%s7933_s29 + $0x8] sm:$0xff] }
 0x77c   : > { %2731 = vrot.lane.b32.xlu0 %v1875_v36, %s7630_s0  ;;  %v3174_v36 = vld [vmem:[%s7933_s29 + $0x28] sm:$0xff] }
 0x780   : > { %3247 = vrot.lane.b32.xlu0 %v3222_v3, %s7634_s26  ;;  %v3167_v3 = vld [vmem:[%s7925_s23 + $0x30] sm:$0xff] }
 0x781   : > { %v3227_v55 = vadd.f32 %v8900_v48, %v3167_v3  ;;  %v3171_v48 = vld [vmem:[%s7933_s29 + $0x10] sm:$0xff]  ;;  %v11395_v3 = vld [vmem:[#allocation37_spill] sm:$0xff] }
 0x784   : > { %3251 = vrot.lane.b32.xlu0 %v3224_v46, %s7634_s26  ;;  %v2178_v46 = vpop.permute.xlu1 %2177 }
 0x788   : > { %3255 = vrot.lane.b32.xlu0 %v3226_v31, %s7634_s26  ;;  %v2512_v31 = vsel %vm8522_vm4, %v8998_v37, %v8819_v10  ;;  %v3172_v10 = vld [vmem:[%s7933_s29 + $0x18] sm:$0xff] }
 0x78c   : > { %3259 = vrot.lane.b32.xlu0 %v3228_v4, %s7634_s26  ;;  %v2514_v4 = vsel %vm11390_vm3, %v8912_v25, %v8864_v56  ;;  %vm11402_vm3 = vnez %v11401_v60 }
 0x78d   : > { %v9193_v7 = vsel %vm11402_vm3, %v8906_v43, %v8837_v40  ;;  %v9215_v43 = vsel %vm8282_vm8, %v8910_v29, %v8857_v26  ;;  %v9237_v26 = vsel %vm11386_vm14, %v8916_v16, %v8884_v6  ;;  %v11409_v29 = vld [vmem:[#allocation25_spill] sm:$0xff] }
 0x790   : > { %3263 = vrot.lane.b32.xlu0 %v3170_v5, %s7634_s26 }
 0x793   : > { %1669 = vadd.xlane.f32.xlu1 %v1668_v15  ;;  %v3175_v15 = vld [vmem:[%s7933_s29 + $0x30] sm:$0xff] }
 0x794   : > { %2125 = vrot.lane.b32.xlu0 %v8653_v52, %s7627_s20 }
 0x798   : > { %2167 = vrot.lane.b32.xlu0 %v9110_v51, %s7628_s16 }
 0x79c   : > { %3271 = vrot.lane.b32.xlu0 %v3174_v36, %s7634_s26 }
 0x7a0   : > { %3275 = vrot.lane.b32.xlu0 %v3176_v58, %s7634_s26 }
 0x7a4   : > { %3257 = vrot.lane.b32.xlu1 %v3227_v55, %s7634_s26  ;;  %2487 = vrot.lane.b32.xlu0 %v9124_v9, %s7631_s11  ;;  %v11396_v55 = vld [vmem:[#allocation38_spill] sm:$0xff] }
 0x7a8   : > { %3261 = vrot.lane.b32.xlu1 %v3169_v53, %s7634_s26  ;;  %2531 = vrot.lane.b32.xlu0 %v2512_v31, %s7632_s13  ;;  %v6927_v53 = vpack.c.bf16 %v11396_v55, %v11395_v3  ;;  %v11398_v31 = vld [vmem:[#allocation36_spill] sm:$0xff] }
 0x7aa   : > { %v1649_v62 = vpop.xlane.xlu1 %1648 }
 0x7ab   : > { %7243 = vrcp.f32 %v1649_v62  ;;  %v11405_v62 = vld [vmem:[#allocation40_spill] sm:$0xff] }
 0x7ac   : > { %3265 = vrot.lane.b32.xlu1 %v3171_v48, %s7634_s26  ;;  %2493 = vrot.lane.b32.xlu0 %v9141_v57, %s7631_s11  ;;  %v9201_v48 = vsel %vm8245_vm5, %v8908_v1, %v8657_v47  ;;  %v9223_v47 = vsel %vm11385_vm1, %v8914_v41, %v8661_v38  ;;  %v11407_v1 = vld [vmem:[#allocation41_spill] sm:$0xff]  ;;  %v9244_v38 = vsel %vm11387_vm2, %v2178_v46, %v8987_v12  ;;  %vm11411_vm2 = vmmov %vm11397_vm6 }
 0x7ad   : > { %vm11412_vm5 = vmmov %vm11411_vm2 }
 0x7ae   : > { %v1652_v37 = vpop.xlane.xlu0 %1651  ;;  %v2220_v36 = vpop.permute.xlu1 %2219 }
 0x7af   : > { %7245 = vrcp.f32 %v1652_v37  ;;  %v11408_v37 = vld [vmem:[#allocation43_spill] sm:$0xff] }
 0x7b0   : > { %3267 = vrot.lane.b32.xlu1 %v3172_v10, %s7634_s26  ;;  %2535 = vrot.lane.b32.xlu0 %v2514_v4, %s7632_s13  ;;  %v6939_v4 = vpack.c.bf16 %v11408_v37, %v11407_v1 }
 0x7b2   : > { %v9251_v41 = vpop.permute.xlu0 %2725 }
 0x7b4   : > { %3269 = vrot.lane.b32.xlu1 %v9154_v17, %s7634_s26  ;;  %2577 = vrot.lane.b32.xlu0 %v2515_v33, %s7633_s6 }
 0x7b5   : > { %v7244_v5 = vpop.eup %7243 }
 0x7b6   : > { %v1679_v56 = vmul.f32 %v7244_v5, %v9010_v27  ;;  %v2236_v27 = vsel %vm8475_vm15, %v2220_v36, %v9021_v63  ;;  %v11403_v63 = vld [vmem:[#allocation31_spill] sm:$0xff]  ;;  %vm11410_vm15 = vmmov %vm11397_vm6 }
 0x7b8   : > { %3273 = vrot.lane.b32.xlu1 %v3175_v15, %s7634_s26  ;;  %2579 = vrot.lane.b32.xlu0 %v2540_v0, %s7633_s6  ;;  %v11404_v0 = vld [vmem:[#allocation39_spill] sm:$0xff] }
 0x7b9   : > { %v7246_v25 = vpop.eup %7245  ;;  %6589 = vmatprep.mubr.msk.f32.mxu0 %vm11392_vm11, %v1679_v56  ;;  %v6933_v10 = vpack.c.bf16 %v11405_v62, %v11404_v0 }
 0x7ba   : > { %v1680_v58 = vmul.f32 %v7246_v25, %v9014_v39  ;;  %v11399_v39 = vld [vmem:[#allocation30_spill] sm:$0xff] }
 0x7bb   : > { %vm11400_vm11 = vnez %v11399_v39 }
 0x7bc   : > { %2445 = vrot.lane.b32.xlu1 %v9173_v18, %s7628_s16  ;;  %6590 = vmatmul.mubr.msk.f32.vlgmr.msra.gmra.mrb[16].mxu0 %vm11397_vm6, %v1680_v58 }
 0x7bd   : > { %6926 = vmatpush3.bf16.xpose.msk.msra.mxu0 %vm11400_vm11, %v11398_v31  ;;  %2259 = vrot.lane.b32.xlu0 %v2236_v27, %s7632_s13 }
 0x7be   : > { %6929 = vmatprep.subr.msk.bf16.mxu0 %vm11400_vm11, %v6927_v53 }
 0x7c0   : > { %2489 = vrot.lane.b32.xlu1 %v9193_v7, %s7631_s11 }
 0x7c4   : > { %2169 = vrot.lane.b32.xlu1 %v9201_v48, %s7628_s16 }
 0x7c5   : > { %6932 = vmatpush3.bf16.xpose.msk.msra.mxu0 %vm11400_vm11, %v6927_v53 }
 0x7c6   : > { %6935 = vmatprep.subr.msk.bf16.mxu0 %vm11400_vm11, %v6933_v10 }
 0x7c8   : > { %2211 = vrot.lane.b32.xlu1 %v9215_v43, %s7631_s11 }
 0x7cc   : > { %2173 = vrot.lane.b32.xlu1 %v9223_v47, %s7628_s16 }
 0x7cd   : > { %6938 = vmatpush3.bf16.xpose.msk.msra.mxu0 %vm11400_vm11, %v6933_v10 }
 0x7ce   : > { %6941 = vmatprep.subr.msk.bf16.mxu0 %vm11400_vm11, %v6939_v4 }
 0x7d0   : > { %2215 = vrot.lane.b32.xlu1 %v9237_v26, %s7631_s11 }
 0x7d4   : > { %2217 = vrot.lane.b32.xlu1 %v9244_v38, %s7631_s11 }
 0x7d5   : > { %6944 = vmatpush3.bf16.xpose.msk.msra.mxu0 %vm11400_vm11, %v6939_v4 }
 0x7d6   : > { %6962 = vmatprep.subr.bf16.mxu0 %v11409_v29 }
 0x7df   : > { %v1658_v6 = vpop.xlane.xlu1 %1657 }
 0x7e0   : > { %7247 = vrcp.f32 %v1658_v6 }
 0x7e3   : > { %v1655_v16 = vpop.xlane.xlu0 %1654  ;;  %v2730_v10 = vpop.permute.xlu1 %2729 }
 0x7e4   : > { %7249 = vrcp.f32 %v1655_v16 }
 0x7e7   : > { %v1661_v33 = vpop.xlane.xlu0 %1660 }
 0x7e8   : > { %7251 = vrcp.f32 %v1661_v33 }
 0x7ea   : > { %v7248_v12 = vpop.eup %7247 }
 0x7eb   : > { %v1664_v5 = vpop.xlane.xlu0 %1663  ;;  %v1682_v25 = vmul.f32 %v7248_v12, %v9032_v13 }
 0x7ec   : > { %7253 = vrcp.f32 %v1664_v5 }
 0x7ee   : > { %v7250_v46 = vpop.eup %7249 }
 0x7ef   : > { %v1667_v15 = vpop.xlane.xlu0 %1666  ;;  %v1681_v56 = vmul.f32 %v7250_v46, %v9036_v24 }
 0x7f0   : > { %7255 = vrcp.f32 %v1667_v15 }
 0x7f1   : > { %6592 = vmatprep.mubr.msk.f32.mxu0 %vm11397_vm6, %v1681_v56  ;;  %vm11413_vm6 = vmmov %vm11411_vm2 }
 0x7f2   : > { %v7252_v36 = vpop.eup %7251  ;;  %6593 = vmatmul.mubr.msk.f32.gmra.mrb[18].mxu0 %vm11410_vm15, %v1682_v25 }
 0x7f3   : > { %v2728_v58 = vpop.permute.xlu0 %2727  ;;  %v1683_v3 = vmul.f32 %v7252_v36, %v9040_v42 }
 0x7f5   : > { %6595 = vmatprep.mubr.msk.f32.mxu0 %vm11411_vm2, %v1683_v3 }
 0x7f6   : > { %v7254_v55 = vpop.eup %7253 }
 0x7f7   : > { %v9259_v53 = vpop.permute.xlu0 %2731  ;;  %v1684_v27 = vmul.f32 %v7254_v55, %v9044_v30  ;;  %v3246_v30 = vpop.permute.xlu1 %3245 }
 0x7f9   : > { %6596 = vmatmul.mubr.msk.f32.gmra.mrb[20].mxu0 %vm11412_vm5, %v1684_v27  ;;  %vm11416_vm5 = vcmask 261120  }
 0x7fa   : > { %v7256_v24 = vpop.eup %7255  ;;  %vm11417_vm15 = vmmov %vm11416_vm5 }
 0x7fb   : > { %v9263_v31 = vpop.permute.xlu0 %3247  ;;  %v1685_v13 = vmul.f32 %v7256_v24, %v9050_v34  ;;  %v3250_v16 = vpop.permute.xlu1 %3249 }
 0x7fd   : > { %6598 = vmatprep.mubr.msk.f32.mxu0 %vm11413_vm6, %v1685_v13  ;;  %vm11419_vm6 = vmmov %vm11416_vm5 }
 0x7ff   : > { %v9267_v0 = vpop.permute.xlu0 %3251  ;;  %v3254_v12 = vpop.permute.xlu1 %3253 }
 0x803   : > { %v9269_v62 = vpop.permute.xlu0 %3255 }
 0x807   : > { %v9271_v42 = vpop.permute.xlu0 %3259 }
 0x80b   : > { %v9273_v1 = vpop.permute.xlu0 %3263 }
 0x80f   : > { %v2126_v37 = vpop.permute.xlu0 %2125 }
 0x810   : > { %v9278_v4 = vsel %vm11394_vm10, %v2126_v37, %v8653_v52 }
 0x811   : > { %2165 = vrot.lane.b32.xlu1 %v9278_v4, %s7628_s16 }
 0x813   : > { %v2168_v34 = vpop.permute.xlu0 %2167 }
 0x814   : > { %v9285_v6 = vsel %vm8506_vm0, %v2168_v34, %v9110_v51 }
 0x815   : > { %2207 = vrot.lane.b32.xlu0 %v9285_v6, %s7631_s11 }
 0x817   : > { %v9289_v33 = vpop.permute.xlu0 %3271 }
 0x81b   : > { %v9291_v5 = vpop.permute.xlu0 %3275 }
 0x81f   : > { %v2488_v52 = vpop.permute.xlu0 %2487 }
 0x820   : > { %v2510_v15 = vsel %vm8633_vm13, %v2488_v52, %v9124_v9  ;;  %v1670_v56 = vpop.xlane.xlu1 %1669 }
 0x821   : > { %7257 = vrcp.f32 %v1670_v56  ;;  %2527 = vrot.lane.b32.xlu0 %v2510_v15, %s7632_s13  ;;  %v11418_v15 = vld [vmem:[#allocation57_spill] sm:$0xff]  ;;  %v11420_v56 = vld [vmem:[#allocation26_spill] sm:$0xff] }
 0x823   : > { %v2532_v51 = vpop.permute.xlu0 %2531 }
 0x824   : > { %v3258_v25 = vpop.permute.xlu1 %3257 }
 0x825   : > { %2571 = vrot.lane.b32.xlu0 %v2532_v51, %s7633_s6 }
 0x827   : > { %v2494_v36 = vpop.permute.xlu0 %2493 }
 0x828   : > { %v2513_v55 = vsel %vm8643_vm9, %v2494_v36, %v9141_v57  ;;  %v9301_v27 = vpop.permute.xlu1 %3261 }
 0x829   : > { %2613 = vrot.lane.b32.xlu0 %v2513_v55, %s7629_s24  ;;  %v11426_v55 = vld [vmem:[#allocation50_spill] sm:$0xff] }
 0x82a   : > { %vm11427_vm10 = vnez %v11426_v55 }
 0x82b   : > { %v7258_v24 = vpop.eup %7257  ;;  %v2536_v13 = vpop.permute.xlu0 %2535 }
 0x82c   : > { %v9304_v9 = vpop.permute.xlu1 %3265  ;;  %v1686_v37 = vmul.f32 %v7258_v24, %v9099_v11 }
 0x82d   : > { %2615 = vrot.lane.b32.xlu0 %v2536_v13, %s7629_s24 }
 0x82e   : > { %6599 = vmatmul.mubr.msk.f32.gmra.mrb[22].mxu0 %vm11411_vm2, %v1686_v37  ;;  %vm11422_vm2 = vmmov %vm11416_vm5 }
 0x82f   : > { %v2578_v34 = vpop.permute.xlu0 %2577  ;;  %6649 = vmatprep.mubr.msk.f32.mxu0 %vm11416_vm5, %v9002_v14  ;;  %v11421_v14 = vld [vmem:[#allocation56_spill] sm:$0xff]  ;;  %vm11423_vm5 = vmmov %vm11422_vm2 }
 0x830   : > { %v9311_v52 = vpop.permute.xlu1 %3267 }
 0x831   : > { %2617 = vrot.lane.b32.xlu0 %v2578_v34, %s7629_s24  ;;  %v11446_v34 = vld [vmem:[#allocation55_spill] sm:$0xff] }
 0x832   : > { %6650 = vmatmul.mubr.msk.f32.vlgmr.msra.gmra.mrb[24].mxu0 %vm11417_vm15, %v9004_v50  ;;  %vm11424_vm15 = vmmov %vm11422_vm2 }
 0x833   : > { %v2580_v57 = vpop.permute.xlu0 %2579  ;;  %6652 = vmatprep.mubr.msk.f32.mxu0 %vm11419_vm6, %v11418_v15  ;;  %6964 = vmatpush3.bf16.msra.mxu0 %v11409_v29  ;;  %vm11425_vm6 = vmmov %vm11422_vm2 }
 0x834   : > { %v9319_v11 = vpop.permute.xlu1 %3269  ;;  %6966 = vmatprep.subr.bf16.mxu0 %v11420_v56 }
 0x835   : > { %2619 = vrot.lane.b32.xlu0 %v2580_v57, %s7629_s24 }
 0x836   : > { %6653 = vmatmul.mubr.msk.f32.gmra.mrb[26].mxu0 %vm11422_vm2, %v11421_v14 }
 0x837   : > { %v2260_v51 = vpop.permute.xlu0 %2259  ;;  %6655 = vmatprep.mubr.msk.f32.mxu0 %vm11423_vm5, %v9251_v41  ;;  %6968 = vmatpush3.bf16.msra.mxu0 %v11420_v56  ;;  %vm11428_vm5 = vmmov %vm11422_vm2 }
 0x838   : > { %v9328_v50 = vpop.permute.xlu1 %3273 }
 0x839   : > { %2299 = vrot.lane.b32.xlu0 %v2260_v51, %s7633_s6 }
 0x83a   : > { %6656 = vmatmul.mubr.msk.f32.gmra.mrb[28].mxu0 %vm11424_vm15, %v2728_v58  ;;  %vm11430_vm15 = vmmov %vm11422_vm2 }
 0x83b   : > { %6658 = vmatprep.mubr.msk.f32.mxu0 %vm11425_vm6, %v2730_v10  ;;  %vm11431_vm6 = vmmov %vm11422_vm2 }
 0x83c   : > { %v2446_v36 = vpop.permute.xlu1 %2445 }
 0x83d   : > { %v2469_v24 = vsel %vm11427_vm10, %v2446_v36, %v9173_v18 }
 0x83e   : > { %6659 = vmatmul.mubr.msk.f32.gmra.mrb[30].mxu0 %vm11422_vm2, %v9259_v53  ;;  %2485 = vrot.lane.b32.xlu1 %v2469_v24, %s7631_s11 }
 0x83f   : > { %6697 = vmatprep.mubr.msk.f32.mxu0 %vm11428_vm5, %v3246_v30  ;;  %vm11432_vm5 = vmmov %vm11422_vm2 }
 0x840   : > { %v2490_v41 = vpop.permute.xlu1 %2489 }
 0x841   : > { %v2511_v37 = vsel %vm8573_vm7, %v2490_v41, %v9193_v7 }
 0x842   : > { %6698 = vmatmul.mubr.msk.f32.vlgmr.msra.gmra.mrb[32].mxu0 %vm11430_vm15, %v9263_v31  ;;  %2569 = vrot.lane.b32.xlu1 %v2511_v37, %s7633_s6  ;;  %vm11433_vm15 = vmmov %vm11422_vm2 }
 0x843   : > { %6700 = vmatprep.mubr.msk.f32.mxu0 %vm11431_vm6, %v3250_v16  ;;  %vm11434_vm6 = vmmov %vm11422_vm2 }
 0x844   : > { %v2170_v18 = vpop.permute.xlu1 %2169 }
 0x845   : > { %v2191_v58 = vsel %vm11402_vm3, %v2170_v18, %v9201_v48  ;;  %vm11438_vm3 = vmmov %vm11422_vm2 }
 0x846   : > { %6701 = vmatmul.mubr.msk.f32.gmra.mrb[34].mxu0 %vm11422_vm2, %v9267_v0  ;;  %2209 = vrot.lane.b32.xlu1 %v2191_v58, %s7631_s11 }
 0x847   : > { %6703 = vmatprep.mubr.msk.f32.mxu0 %vm11432_vm5, %v3254_v12  ;;  %vm11435_vm5 = vmmov %vm11422_vm2 }
 0x848   : > { %v2212_v7 = vpop.permute.xlu1 %2211 }
 0x849   : > { %v2232_v53 = vsel %vm8522_vm4, %v2212_v7, %v9215_v43 }
 0x84a   : > { %6704 = vmatmul.mubr.msk.f32.gmra.mrb[36].mxu0 %vm11433_vm15, %v9269_v62  ;;  %2251 = vrot.lane.b32.xlu1 %v2232_v53, %s7632_s13  ;;  %vm11436_vm15 = vnez %v11365_v44  ;;  %v1844_v44 = vld [vmem:[%s7940_s21 + $0x20] sm:$0xff] }
 0x84b   : > { %6706 = vmatprep.mubr.msk.f32.mxu0 %vm11434_vm6, %v3258_v25  ;;  %vm11437_vm6 = vmmov %vm11422_vm2 }
 0x84c   : > { %v2174_v48 = vpop.permute.xlu1 %2173 }
 0x84d   : > { %v2193_v31 = vsel %vm8539_vm12, %v2174_v48, %v9223_v47  ;;  %vm11443_vm12 = vmmov %vm11438_vm3 }
 0x84e   : > { %6707 = vmatmul.mubr.msk.f32.gmra.mrb[38].mxu0 %vm11422_vm2, %v9271_v42  ;;  %2213 = vrot.lane.b32.xlu1 %v2193_v31, %s7631_s11  ;;  %vm11439_vm2 = vnez %v11374_v61 }
 0x84f   : > { %6709 = vmatprep.mubr.msk.f32.mxu0 %vm11435_vm5, %v9301_v27  ;;  %vm11440_vm5 = vmmov %vm11438_vm3 }
 0x850   : > { %v2216_v43 = vpop.permute.xlu1 %2215 }
 0x851   : > { %v2234_v0 = vsel %vm11436_vm15, %v2216_v43, %v9237_v26  ;;  %vm11441_vm15 = vmmov %vm11438_vm3 }
 0x852   : > { %6710 = vmatmul.mubr.msk.f32.gmra.mrb[40].mxu0 %vm11437_vm6, %v9273_v1  ;;  %2255 = vrot.lane.b32.xlu1 %v2234_v0, %s7632_s13  ;;  %vm11442_vm6 = vmmov %vm11438_vm3 }
 0x853   : > { %6712 = vmatprep.mubr.msk.f32.mxu0 %vm11438_vm3, %v9304_v9 }
 0x854   : > { %v2218_v47 = vpop.permute.xlu1 %2217 }
 0x855   : > { %v2235_v62 = vsel %vm11439_vm2, %v2218_v47, %v9244_v38 }
 0x856   : > { %6713 = vmatmul.mubr.msk.f32.gmra.mrb[42].mxu0 %vm11440_vm5, %v9311_v52  ;;  %2297 = vrot.lane.b32.xlu1 %v2235_v62, %s7633_s6  ;;  %vm11447_vm5 = vnez %v11446_v34 }
 0x857   : > { %6715 = vmatprep.mubr.msk.f32.mxu0 %vm11441_vm15, %v9319_v11  ;;  %vm11445_vm15 = vmmov %vm11438_vm3 }
 0x85a   : > { %6716 = vmatmul.mubr.msk.f32.gmra.mrb[44].mxu0 %vm11442_vm6, %v9289_v33  ;;  %vm11448_vm6 = vmmov %vm11438_vm3 }
 0x85b   : > { %6718 = vmatprep.mubr.msk.f32.mxu0 %vm11443_vm12, %v9328_v50  ;;  %vm11444_vm12 = vmmov %vm11438_vm3 }
 0x85e   : > { %6719 = vmatmul.mubr.msk.f32.gmra.mrb[46].mxu0 %vm11438_vm3, %v9291_v5 }
 0x883   : > { %v2166_v26 = vpop.permute.xlu1 %2165 }
 0x884   : > { %v2189_v38 = vsel %vm11427_vm10, %v2166_v26, %v9278_v4 }
 0x885   : > { %2205 = vrot.lane.b32.xlu1 %v2189_v38, %s7631_s11 }
 0x887   : > { %v2208_v42 = vpop.permute.xlu0 %2207 }
 0x888   : > { %v2230_v10 = vsel %vm8633_vm13, %v2208_v42, %v9285_v6 }
 0x889   : > { %2247 = vrot.lane.b32.xlu0 %v2230_v10, %s7632_s13 }
 0x88f   : > { %v6591_v30 = vpop.f32.mrb[16].mxu0 }
 0x890   : > { %1817 = vst.msk [vmem:[%s9400_s10 + $0x8] sm:$0xff] %vm11444_vm12, %v6591_v30  ;;  %v1777_v16 = vpop.f32.mrb[17].mxu0  ;;  %vm11449_vm12 = vmmov %vm11438_vm3 }
 0x891   : > { %1816 = vst.msk [vmem:[%s9400_s10] sm:$0xff] %vm11445_vm15, %v1777_v16  ;;  %vm11450_vm15 = vmmov %vm11438_vm3 }
 0x893   : > { %v2528_v4 = vpop.permute.xlu0 %2527 }
 0x894   : > { %2647 = vrot.lane.b32.xlu0 %v2528_v4, %s7634_s26 }
 0x897   : > { %v2572_v12 = vpop.permute.xlu0 %2571 }
 0x898   : > { %2651 = vrot.lane.b32.xlu0 %v2572_v12, %s7634_s26 }
 0x89b   : > { %v2614_v6 = vpop.permute.xlu0 %2613 }
 0x89f   : > { %v2616_v14 = vpop.permute.xlu0 %2615 }
 0x8a3   : > { %v2618_v37 = vpop.permute.xlu0 %2617 }
 0x8b0   : > { %v2486_v25 = vpop.permute.xlu1 %2485 }
 0x8b1   : > { %v2509_v57 = vsel %vm11447_vm5, %v2486_v25, %v2469_v24 }
 0x8b2   : > { %2645 = vrot.lane.b32.xlu1 %v2509_v57, %s7634_s26 }
 0x8b4   : > { %v2570_v15 = vpop.permute.xlu1 %2569 }
 0x8b6   : > { %2649 = vrot.lane.b32.xlu1 %v2570_v15, %s7634_s26 }
 0x8b8   : > { %v2210_v51 = vpop.permute.xlu1 %2209 }
 0x8b9   : > { %v2231_v36 = vsel %vm8573_vm7, %v2210_v51, %v2191_v58  ;;  %v2620_v58 = vpop.permute.xlu0 %2619 }
 0x8ba   : > { %2653 = vrot.lane.b32.xlu1 %v2614_v6, %s7634_s26  ;;  %2289 = vrot.lane.b32.xlu0 %v2231_v36, %s7633_s6 }
 0x8bc   : > { %v2252_v41 = vpop.permute.xlu1 %2251 }
 0x8bd   : > { %v2300_v43 = vpop.permute.xlu0 %2299 }
 0x8be   : > { %2655 = vrot.lane.b32.xlu0 %v2616_v14, %s7634_s26  ;;  %2291 = vrot.lane.b32.xlu1 %v2252_v41, %s7633_s6 }
 0x8c0   : > { %v2214_v24 = vpop.permute.xlu1 %2213 }
 0x8c1   : > { %v2233_v18 = vsel %vm8643_vm9, %v2214_v24, %v2193_v31 }
 0x8c2   : > { %2657 = vrot.lane.b32.xlu1 %v2618_v37, %s7634_s26  ;;  %2333 = vrot.lane.b32.xlu0 %v2233_v18, %s7629_s24 }
 0x8c4   : > { %v2256_v7 = vpop.permute.xlu1 %2255 }
 0x8c5   : > { %v6594_v53 = vpop.f32.mrb[18].mxu0 }
 0x8c6   : > { %1819 = vst.msk [vmem:[%s9400_s10 + $0x18] sm:$0xff] %vm11448_vm6, %v6594_v53  ;;  %v1787_v48 = vpop.f32.mrb[19].mxu0  ;;  %2659 = vrot.lane.b32.xlu0 %v2620_v58, %s7634_s26  ;;  %2335 = vrot.lane.b32.xlu1 %v2256_v7, %s7629_s24  ;;  %vm11451_vm6 = vmmov %vm11438_vm3 }
 0x8c7   : > { %1818 = vst.msk [vmem:[%s9400_s10 + $0x10] sm:$0xff] %vm11438_vm3, %v1787_v48 }
 0x8c8   : > { %v2298_v31 = vpop.permute.xlu1 %2297 }
 0x8ca   : > { %2339 = vrot.lane.b32.xlu0 %v2300_v43, %s7629_s24  ;;  %2337 = vrot.lane.b32.xlu1 %v2298_v31, %s7629_s24 }
 0x8cc   : > { %v6597_v0 = vpop.f32.mrb[20].mxu0 }
 0x8cd   : > { %1821 = vst.msk [vmem:[%s9400_s10 + $0x28] sm:$0xff] %vm11449_vm12, %v6597_v0  ;;  %v1797_v47 = vpop.f32.mrb[21].mxu0  ;;  %vm11453_vm12 = vcmask 523264  }
 0x8ce   : > { %1820 = vst.msk [vmem:[%s9400_s10 + $0x20] sm:$0xff] %vm11450_vm15, %v1797_v47  ;;  %vm11454_vm15 = vmmov %vm11453_vm12 }
 0x8f7   : > { %v2206_v62 = vpop.permute.xlu1 %2205 }
 0x8f8   : > { %v2229_v26 = vsel %vm11447_vm5, %v2206_v62, %v2189_v38 }
 0x8f9   : > { %2365 = vrot.lane.b32.xlu1 %v2229_v26, %s7634_s26 }
 0x8fb   : > { %v2248_v42 = vpop.permute.xlu0 %2247 }
 0x8fc   : > { %2367 = vrot.lane.b32.xlu0 %v2248_v42, %s7634_s26 }
 0x901   : > { %v6600_v10 = vpop.f32.mrb[22].mxu0 }
 0x902   : > { %1823 = vst.msk [vmem:[%s9400_s10 + $0x38] sm:$0xff] %vm11451_vm6, %v6600_v10  ;;  %v1807_v30 = vpop.f32.mrb[23].mxu0  ;;  %vm11455_vm6 = vmmov %vm11453_vm12 }
 0x903   : > { %1822 = vst.msk [vmem:[%s9400_s10 + $0x30] sm:$0xff] %vm11438_vm3, %v1807_v30  ;;  %vm11456_vm3 = vmmov %vm11455_vm6 }
 0x904   : > { %vm11463_vm5 = vmmov %vm11456_vm3 }
 0x905   : > { %v9442_v16 = vpop.f32.mrb[24].mxu0  ;;  %vm11464_vm7 = vmmov %vm11456_vm3 }
 0x906   : > { %v9444_v4 = vpop.f32.mrb[25].mxu0  ;;  %v2648_v58 = vpop.permute.xlu0 %2647 }
 0x909   : > { %v9446_v12 = vpop.f32.mrb[26].mxu0 }
 0x90a   : > { %v9448_v25 = vpop.f32.mrb[27].mxu0  ;;  %v2652_v43 = vpop.permute.xlu0 %2651 }
 0x90d   : > { %v9450_v38 = vpop.f32.mrb[28].mxu0 }
 0x90e   : > { %v9452_v6 = vpop.f32.mrb[29].mxu0 }
 0x911   : > { %v9454_v57 = vpop.f32.mrb[30].mxu0 }
 0x912   : > { %v9456_v15 = vpop.f32.mrb[31].mxu0 }
 0x915   : > { %v9458_v14 = vpop.f32.mrb[32].mxu0 }
 0x916   : > { %v9460_v51 = vpop.f32.mrb[33].mxu0 }
 0x917   : > { %11452 = vst [vmem:[#allocation37_spill] sm:$0xff] %v9460_v51 }
 0x919   : > { %v9462_v36 = vpop.f32.mrb[34].mxu0 }
 0x91a   : > { %v9464_v41 = vpop.f32.mrb[35].mxu0 }
 0x91d   : > { %v9466_v37 = vpop.f32.mrb[36].mxu0 }
 0x91e   : > { %v9468_v24 = vpop.f32.mrb[37].mxu0 }
 0x921   : > { %v9470_v18 = vpop.f32.mrb[38].mxu0 }
 0x922   : > { %v9472_v7 = vpop.f32.mrb[39].mxu0 }
 0x924   : > { %v2646_v53 = vpop.permute.xlu1 %2645 }
 0x925   : > { %v9474_v48 = vpop.f32.mrb[40].mxu0  ;;  %2677 = vxpose.xlu1.b32.start [1/8] (short) (narrow) %v2646_v53, 64 }
 0x926   : > { %v9476_v31 = vpop.f32.mrb[41].mxu0 }
 0x928   : > { %v2650_v0 = vpop.permute.xlu1 %2649 }
 0x929   : > { %v9478_v47 = vpop.f32.mrb[42].mxu0  ;;  %2678 = vxpose.xlu1.b32.cont [2/8] (short) (narrow) %v2648_v58, 64 }
 0x92a   : > { %v9480_v62 = vpop.f32.mrb[43].mxu0 }
 0x92c   : > { %v2290_v26 = vpop.permute.xlu0 %2289  ;;  %v2654_v42 = vpop.permute.xlu1 %2653 }
 0x92d   : > { %v9482_v10 = vpop.f32.mrb[44].mxu0  ;;  %2679 = vxpose.xlu1.b32.cont [3/8] (short) (narrow) %v2650_v0, 64 }
 0x92e   : > { %v9484_v30 = vpop.f32.mrb[45].mxu0 }
 0x930   : > { %v2656_v34 = vpop.permute.xlu0 %2655  ;;  %v2292_v13 = vpop.permute.xlu1 %2291 }
 0x931   : > { %v9486_v53 = vpop.f32.mrb[46].mxu0  ;;  %2680 = vxpose.xlu1.b32.cont [4/8] (short) (narrow) %v2652_v43, 64  ;;  %2371 = vrot.lane.b32.xlu0 %v2292_v13, %s7634_s26  ;;  %v1840_v43 = vld [vmem:[%s7940_s21] sm:$0xff]  ;;  %v1841_v13 = vld [vmem:[%s7940_s21 + $0x8] sm:$0xff] }
 0x932   : > { %v9489_v55 = vpop.f32.mrb[47].mxu0  ;;  %v7167_v21 = vpack.i.bf16 %v1841_v13, %v1840_v43 }
 0x934   : > { %v2334_v58 = vpop.permute.xlu0 %2333  ;;  %v2658_v3 = vpop.permute.xlu1 %2657 }
 0x935   : > { %2681 = vxpose.xlu1.b32.cont [5/8] (short) (narrow) %v2654_v42, 64  ;;  %v1842_v42 = vld [vmem:[%s7940_s21 + $0x10] sm:$0xff] }
 0x938   : > { %v2336_v46 = vpop.permute.xlu1 %2335  ;;  %v2660_v0 = vpop.permute.xlu0 %2659 }
 0x939   : > { %2682 = vxpose.xlu1.b32.cont [6/8] (short) (narrow) %v2656_v34, 64  ;;  %2375 = vrot.lane.b32.xlu0 %v2336_v46, %s7634_s26  ;;  %v1843_v34 = vld [vmem:[%s7940_s21 + $0x18] sm:$0xff] }
 0x93a   : > { %v7172_v46 = vpack.i.bf16 %v1843_v34, %v1842_v42 }
 0x93c   : > { %v2338_v60 = vpop.permute.xlu1 %2337  ;;  %v2340_v61 = vpop.permute.xlu0 %2339 }
 0x93d   : > { %2683 = vxpose.xlu1.b32.cont [7/8] (short) (narrow) %v2658_v3, 64  ;;  %2377 = vrot.lane.b32.xlu0 %v2338_v60, %s7634_s26  ;;  %v7177_v3 = vpack.i.bf16 %v1845_v54, %v1844_v44  ;;  %v6246_v60 = vld [vmem:[%s11090_s4 + $0x3] ss:$0 sm:$0xff]  ;;  %v1847_v54 = vld [vmem:[%s7940_s21 + $0x38] sm:$0xff] }
 0x941   : > { %2684 = vxpose.xlu1.b32.end [8/8] (short) (narrow) %v2660_v0, 64  ;;  %2379 = vrot.lane.b32.xlu0 %v2340_v61, %s7634_s26  ;;  %v6193_v61 = vld [vmem:[%s11089_s3 + $0x2] ss:$0 sm:$0xff] }
 0x945   : > { %7168 = vrot.lane.b32.xlu0 %v7167_v21, %s7630_s0  ;;  %v1846_v21 = vld [vmem:[%s7940_s21 + $0x30] sm:$0xff] }
 0x946   : > { %v7182_v44 = vpack.i.bf16 %v1847_v54, %v1846_v21 }
 0x949   : > { %7173 = vrot.lane.b32.xlu0 %v7172_v46, %s7630_s0 }
 0x94d   : > { %7178 = vrot.lane.b32.xlu0 %v7177_v3, %s7630_s0 }
 0x951   : > { %4555 = vrot.lane.b32.xlu0 %v6246_v60, %s7630_s0 }
 0x95f   : > { %2369 = vrot.lane.b32.xlu1 %v2290_v26, %s7634_s26 }
 0x963   : > { %2373 = vrot.lane.b32.xlu1 %v2334_v58, %s7634_s26 }
 0x967   : > { %3194 = vrot.lane.b32.xlu1 %v6193_v61, %s7634_s26 }
 0x96b   : > { %7183 = vrot.lane.b32.xlu1 %v7182_v44, %s7630_s0  ;;  %v2366_v0 = vpop.permute.xlu1 %2365 }
 0x96c   : > { %v2816_v13 = vadd.f32 %v9444_v4, %v2366_v0 }
 0x96e   : > { %v2368_v43 = vpop.permute.xlu0 %2367 }
 0x96f   : > { %v2821_v34 = vadd.f32 %v9442_v16, %v2368_v43 }
 0x9a3   : > { %v2372_v58 = vpop.permute.xlu0 %2371 }
 0x9a4   : > { %v2831_v4 = vadd.f32 %v9446_v12, %v2372_v58 }
 0x9a5   : > { %v2693_v26 = vpop.trf.xlu1 }
 0x9a6   : > { %v9517_v42 = vadd.f32 %v2816_v13, %v2693_v26 }
 0x9a8   : > { %6175 = vst.msk [vmem:[%s8925_s1 + $0x40] sm:$0xff] %vm11453_vm12, %v9517_v42  ;;  %vm11457_vm12 = vmmov %vm11456_vm3 }
 0x9a9   : > { %v2694_v46 = vpop.trf.xlu1 }
 0x9aa   : > { %v9523_v3 = vadd.f32 %v2821_v34, %v2694_v46 }
 0x9ab   : > { %v2376_v60 = vpop.permute.xlu0 %2375 }
 0x9ac   : > { %6176 = vst.msk [vmem:[%s8925_s1 + $0x48] sm:$0xff] %vm11454_vm15, %v9523_v3  ;;  %v2841_v13 = vadd.f32 %v9450_v38, %v2376_v60  ;;  %vm11458_vm15 = vmmov %vm11456_vm3 }
 0x9ad   : > { %v2695_v61 = vpop.trf.xlu1 }
 0x9af   : > { %v2378_v21 = vpop.permute.xlu0 %2377 }
 0x9b0   : > { %v2846_v12 = vadd.f32 %v9456_v15, %v2378_v21 }
 0x9b1   : > { %v2696_v54 = vpop.trf.xlu1 }
 0x9b2   : > { %v9529_v44 = vadd.f32 %v2831_v4, %v2696_v54 }
 0x9b3   : > { %v2380_v0 = vpop.permute.xlu0 %2379 }
 0x9b4   : > { %6178 = vst.msk [vmem:[%s8925_s1 + $0x58] sm:$0xff] %vm11455_vm6, %v9529_v44  ;;  %vm11459_vm6 = vmmov %vm11456_vm3 }
 0x9b5   : > { %v2697_v16 = vpop.trf.xlu1 }
 0x9b7   : > { %v7169_v43 = vpop.permute.xlu0 %7168 }
 0x9b8   : > { %v7171_v26 = vunpack.i.h.bf16 %v7169_v43  ;;  %v7170_v34 = vunpack.i.l.bf16 %v7169_v43 }
 0x9b9   : > { %v2698_v46 = vpop.trf.xlu1 }
 0x9ba   : > { %v9535_v19 = vadd.f32 %v2841_v13, %v2698_v46  ;;  %v6945_v32 = vpack.c.bf16 %v7171_v26, %v7170_v34  ;;  %v2851_v13 = vadd.f32 %v9454_v57, %v2380_v0 }
 0x9bb   : > { %v7174_v56 = vpop.permute.xlu0 %7173 }
 0x9bc   : > { %6180 = vst.msk [vmem:[%s8925_s1 + $0x68] sm:$0xff] %vm11456_vm3, %v9535_v19  ;;  %v7176_v58 = vunpack.i.h.bf16 %v7174_v56  ;;  %v7175_v4 = vunpack.i.l.bf16 %v7174_v56  ;;  %6946 = vmatprep.subr.bf16.mxu1 %v6945_v32 }
 0x9bd   : > { %v2699_v54 = vpop.trf.xlu1  ;;  %6948 = vmatpush3.bf16.msra.mxu1 %v6945_v32 }
 0x9be   : > { %v9541_v38 = vadd.f32 %v2846_v12, %v2699_v54  ;;  %v6949_v60 = vpack.c.bf16 %v7176_v58, %v7175_v4 }
 0x9bf   : > { %v7179_v43 = vpop.permute.xlu0 %7178 }
 0x9c0   : > { %6181 = vst.msk [vmem:[%s8925_s1 + $0x70] sm:$0xff] %vm11457_vm12, %v9541_v38  ;;  %v7181_v15 = vunpack.i.h.bf16 %v7179_v43  ;;  %v7180_v21 = vunpack.i.l.bf16 %v7179_v43  ;;  %6950 = vmatprep.subr.bf16.mxu1 %v6949_v60  ;;  %vm11460_vm12 = vmmov %vm11456_vm3 }
 0x9c1   : > { %v2700_v26 = vpop.trf.xlu1  ;;  %6952 = vmatpush3.bf16.msra.mxu1 %v6949_v60 }
 0x9c2   : > { %v9547_v56 = vadd.f32 %v2851_v13, %v2700_v26  ;;  %v6953_v34 = vpack.c.bf16 %v7181_v15, %v7180_v21 }
 0x9c4   : > { %6182 = vst.msk [vmem:[%s8925_s1 + $0x78] sm:$0xff] %vm11458_vm15, %v9547_v56  ;;  %6954 = vmatprep.subr.bf16.mxu1 %v6953_v34  ;;  %vm11461_vm15 = vmmov %vm11456_vm3 }
 0x9c5   : > { %6956 = vmatpush3.bf16.msra.mxu1 %v6953_v34  ;;  %v2886_v34 = vsel %vm11463_vm5, %v9535_v19, -inf }
 0x9d1   : > { %v2370_v32 = vpop.permute.xlu1 %2369 }
 0x9d2   : > { %v2826_v57 = vadd.f32 %v9448_v25, %v2370_v32 }
 0x9d4   : > { %v9553_v0 = vadd.f32 %v2826_v57, %v2695_v61 }
 0x9d5   : > { %v2374_v46 = vpop.permute.xlu1 %2373 }
 0x9d6   : > { %6177 = vst.msk [vmem:[%s8925_s1 + $0x50] sm:$0xff] %vm11459_vm6, %v9553_v0  ;;  %v2836_v12 = vadd.f32 %v9452_v6, %v2374_v46  ;;  %vm11462_vm6 = vmmov %vm11456_vm3  ;;  %v2877_v26 = vsel %vm11456_vm3, %v9553_v0, -inf }
 0x9d8   : > { %v9559_v58 = vadd.f32 %v2836_v12, %v2697_v16 }
 0x9d9   : > { %v9561_v4 = vpop.permute.xlu1 %3194 }
 0x9da   : > { %6179 = vst.msk [vmem:[%s8925_s1 + $0x60] sm:$0xff] %vm11456_vm3, %v9559_v58  ;;  %v3198_v54 = vadd.f32 %v9561_v4, %v9076_v45  ;;  %v3197_v25 = vadd.f32 %v9561_v4, %v9055_v28  ;;  %v3199_v43 = vadd.f32 %v9561_v4, %v9061_v35  ;;  %v3200_v45 = vadd.f32 %v9561_v4, %v9083_v8 }
 0x9db   : > { %v9578_v28 = vpack.c.bf16 %v9273_v1, %v9301_v27  ;;  %v2874_v8 = vsel %vm11460_vm12, %v9523_v3, -inf  ;;  %v2871_v1 = vsel %vm11461_vm15, %v9517_v42, -inf  ;;  %v2880_v27 = vsel %vm11462_vm6, %v9529_v44, -inf  ;;  %vm11465_vm12 = vmmov %vm11456_vm3 }
 0x9dc   : > { %v3206_v61 = vmul.f32 0.17677669, %v3198_v54  ;;  %v3205_v60 = vmul.f32 0.17677669, %v3197_v25  ;;  %v3207_v15 = vmul.f32 0.17677669, %v3199_v43  ;;  %vm11466_vm15 = vmmov %vm11456_vm3 }
 0x9dd   : > { %v7184_v13 = vpop.permute.xlu1 %7183  ;;  %v3208_v35 = vmul.f32 0.17677669, %v3200_v45  ;;  %v2883_v32 = vsel %vm11464_vm7, %v9559_v58, -inf  ;;  %v2892_v57 = vsel %vm11465_vm12, %v9547_v56, -inf  ;;  %v2889_v46 = vsel %vm11466_vm15, %v9541_v38, -inf  ;;  %v9643_v45 = vpop.permute.xlu0 %4555  ;;  %vm11475_vm6 = vmmov %vm11456_vm3 }
 0x9de   : > { %v7186_v6 = vunpack.i.h.bf16 %v7184_v13  ;;  %v7185_v16 = vunpack.i.l.bf16 %v7184_v13  ;;  %4056 = vrot.lane.b32.xlu0 %v3206_v61, %s7634_s26  ;;  %4054 = vrot.lane.b32.xlu1 %v3205_v60, %s7634_s26  ;;  %v11470_v13 = vld [vmem:[#allocation28_spill] sm:$0xff]  ;;  %vm11478_vm12 = vmmov %vm11475_vm6 }
 0x9df   : > { %vm11471_vm7 = vnez %v11470_v13  ;;  %vm11479_vm15 = vmmov %vm11475_vm6 }
 0x9e0   : > { %v6957_v21 = vpack.c.bf16 %v7186_v6, %v7185_v16  ;;  %vm11483_vm10 = vmmov %vm11478_vm12 }
 0x9e1   : > { %vm11484_vm9 = vmmov %vm11483_vm10 }
 0x9e2   : > { %4058 = vrot.lane.b32.xlu1 %v3207_v15, %s7634_s26  ;;  %6958 = vmatprep.subr.bf16.mxu1 %v6957_v21  ;;  %v11472_v15 = vld [vmem:[#allocation29_spill] sm:$0xff] }
 0x9e3   : > { %6960 = vmatpush3.bf16.msra.mxu1 %v6957_v21  ;;  %vm11473_vm5 = vnez %v11472_v15 }
 0x9e4   : > { %6971 = vmatprep.subr.msk.bf16.mxu1 %vm11400_vm11, %v9578_v28 }
 0x9e6   : > { %4060 = vrot.lane.b32.xlu1 %v3208_v35, %s7634_s26 }
 0x9ea   : > { %3476 = vrot.lane.b32.xlu1 %v9470_v18, %s7627_s20 }
 0x9ee   : > { %3744 = vrot.lane.b32.xlu1 %v9474_v48, %s7627_s20 }
 0x9f2   : > { %3748 = vrot.lane.b32.xlu1 %v9478_v47, %s7627_s20 }
 0x9f6   : > { %3752 = vrot.lane.b32.xlu1 %v9482_v10, %s7627_s20 }
 0x9fa   : > { %3750 = vrot.lane.b32.xlu1 %v9484_v30, %s7627_s20 }
 0x9fd   : > { %2875 = vmax.xlane.f32.xlu0 %v2874_v8 }
 0xa01   : > { %2872 = vmax.xlane.f32.xlu0 %v2871_v1 }
 0xa05   : > { %2881 = vmax.xlane.f32.xlu0 %v2880_v27 }
 0xa09   : > { %2878 = vmax.xlane.f32.xlu0 %v2877_v26 }
 0xa0d   : > { %2887 = vmax.xlane.f32.xlu0 %v2886_v34 }
 0xa11   : > { %2884 = vmax.xlane.f32.xlu0 %v2883_v32 }
 0xa15   : > { %2893 = vmax.xlane.f32.xlu0 %v2892_v57 }
 0xa19   : > { %2890 = vmax.xlane.f32.xlu0 %v2889_v46 }
 0xa2f   : > { %3468 = vrot.lane.b32.xlu0 %v9462_v36, %s7627_s20 }
 0xa33   : > { %3746 = vrot.lane.b32.xlu0 %v9480_v62, %s7627_s20 }
 0xa37   : > { %3756 = vrot.lane.b32.xlu0 %v9486_v53, %s7627_s20 }
 0xa3b   : > { %3754 = vrot.lane.b32.xlu0 %v9489_v55, %s7627_s20 }
 0xa50   : > { %v9619_v12 = vpop.permute.xlu1 %4054  ;;  %v9645_v35 = vpop.permute.xlu0 %4056 }
 0xa51   : > { %11467 = vst [vmem:[#allocation38_spill] sm:$0xff] %v9619_v12  ;;  %11474 = vst [vmem:[#allocation31_spill] sm:$0xff] %v9645_v35 }
 0xa54   : > { %v9621_v54 = vpop.permute.xlu1 %4058 }
 0xa55   : > { %11468 = vst [vmem:[#allocation36_spill] sm:$0xff] %v9621_v54 }
 0xa58   : > { %v9623_v25 = vpop.permute.xlu1 %4060 }
 0xa59   : > { %11469 = vst [vmem:[#allocation30_spill] sm:$0xff] %v9623_v25 }
 0xa5c   : > { %v9625_v61 = vpop.permute.xlu1 %3476 }
 0xa60   : > { %v9627_v60 = vpop.permute.xlu1 %3744 }
 0xa64   : > { %v3749_v43 = vpop.permute.xlu1 %3748 }
 0xa65   : > { %v9632_v6 = vsel %vm11471_vm7, %v3749_v43, %v9478_v47 }
 0xa66   : > { %3788 = vrot.lane.b32.xlu1 %v9632_v6, %s7628_s16 }
 0xa68   : > { %v3753_v16 = vpop.permute.xlu1 %3752 }
 0xa69   : > { %v9639_v21 = vsel %vm11473_vm5, %v3753_v16, %v9482_v10 }
 0xa6a   : > { %3792 = vrot.lane.b32.xlu0 %v9639_v21, %s7628_s16 }
 0xa8a   : > { %v2876_v8 = vpop.xlane.xlu0 %2875 }
 0xa8b   : > { %v2896_v47 = vsub.f32 %v9523_v3, %v2876_v8 }
 0xa8d   : > { %v2905_v1 = vmul.f32 1.442695, %v2896_v47  ;;  %v11476_v47 = vld [vmem:[#allocation27_spill] sm:$0xff] }
 0xa8e   : > { %v2873_v27 = vpop.xlane.xlu0 %2872  ;;  %vm11477_vm3 = vnez %v11476_v47 }
 0xa8f   : > { %7259 = vpow2.f32 %v2905_v1  ;;  %v2895_v54 = vsub.f32 %v9517_v42, %v2873_v27 }
 0xa91   : > { %v2903_v23 = vmul.f32 1.442695, %v2895_v54 }
 0xa92   : > { %v2882_v26 = vpop.xlane.xlu0 %2881 }
 0xa96   : > { %v2879_v34 = vpop.xlane.xlu0 %2878 }
 0xa97   : > { %v2897_v27 = vsub.f32 %v9553_v0, %v2879_v34 }
 0xa99   : > { %v9648_v32 = vpop.eup %7259 }
 0xa9a   : > { %v2888_v57 = vpop.xlane.xlu0 %2887  ;;  %v2922_v10 = vsel %vm11475_vm6, %v9648_v32, 0.0 }
 0xa9b   : > { %2923 = vadd.xlane.f32.xlu1 %v2922_v10  ;;  %v2898_v10 = vsub.f32 %v9529_v44, %v2882_v26  ;;  %v3202_v44 = vadd.f32 %v9561_v4, %v9089_v59  ;;  %v2900_v59 = vsub.f32 %v9535_v19, %v2888_v57 }
 0xa9d   : > { %v2909_v35 = vmul.f32 1.442695, %v2898_v10  ;;  %v3210_v42 = vmul.f32 0.17677669, %v3202_v44  ;;  %v2913_v10 = vmul.f32 1.442695, %v2900_v59 }
 0xa9e   : > { %v2885_v46 = vpop.xlane.xlu0 %2884  ;;  %v4502_v59 = vld [vmem:[%s7925_s23 + $0x20] sm:$0xff] }
 0xa9f   : > { %7261 = vpow2.f32 %v2909_v35 }
 0xaa0   : > { %7263 = vpow2.f32 %v2903_v23  ;;  %v11480_v23 = vld [vmem:[#allocation34_spill] sm:$0xff] }
 0xaa1   : > { %vm11481_vm6 = vnez %v11480_v23 }
 0xaa2   : > { %v2894_v43 = vpop.xlane.xlu0 %2893 }
 0xaa6   : > { %v2891_v16 = vpop.xlane.xlu0 %2890 }
 0xaa9   : > { %v9667_v12 = vpop.eup %7261 }
 0xaaa   : > { %v9652_v25 = vpop.permute.xlu0 %3468  ;;  %v9669_v51 = vpop.eup %7263  ;;  %v2928_v29 = vsel %vm11478_vm12, %v9667_v12, 0.0 }
 0xaac   : > { %3472 = vrot.lane.b32.xlu1 %v9466_v37, %s7627_s20 }
 0xaae   : > { %v9656_v3 = vpop.permute.xlu0 %3746 }
 0xab2   : > { %v3757_v8 = vpop.permute.xlu0 %3756 }
 0xab3   : > { %v9661_v1 = vsel %vm11477_vm3, %v3757_v8, %v9486_v53  ;;  %v2919_v53 = vsel %vm11479_vm15, %v9669_v51, 0.0  ;;  %v2907_v8 = vmul.f32 1.442695, %v2897_v27  ;;  %vm11482_vm15 = vmmov %vm11478_vm12 }
 0xab4   : > { %3796 = vrot.lane.b32.xlu0 %v9661_v1, %s7628_s16 }
 0xab6   : > { %v3755_v54 = vpop.permute.xlu0 %3754 }
 0xab7   : > { %v9681_v35 = vsel %vm11481_vm6, %v3755_v54, %v9489_v55  ;;  %v2902_v55 = vsub.f32 %v9547_v56, %v2894_v43 }
 0xab9   : > { %v2917_v54 = vmul.f32 1.442695, %v2902_v55 }
 0xad0   : > { %2929 = vadd.xlane.f32.xlu1 %v2928_v29  ;;  %v2901_v29 = vsub.f32 %v9541_v38, %v2891_v16  ;;  %v9716_v16 = vsel %vm11477_vm3, %v9625_v61, %v9470_v18  ;;  %v7363_v18 = vld [vmem:[%s7925_s23 + $0x20] sm:$0xff] }
 0xad1   : > { %v3201_v61 = vadd.f32 %v7363_v18, %v9561_v4  ;;  %v4501_v18 = vld [vmem:[%s7925_s23 + $0x18] sm:$0xff] }
 0xad2   : > { %v2915_v26 = vmul.f32 1.442695, %v2901_v29  ;;  %v4498_v29 = vld [vmem:[%s7925_s23] sm:$0xff] }
 0xad3   : > { %2920 = vadd.xlane.f32.xlu0 %v2919_v53  ;;  %v2899_v53 = vsub.f32 %v9559_v58, %v2885_v46  ;;  %v4558_v27 = vadd.f32 %v9643_v45, %v4498_v29  ;;  %v3209_v55 = vmul.f32 0.17677669, %v3201_v61  ;;  %v4513_v61 = vld [vmem:[%s7933_s29 + $0x38] sm:$0xff] }
 0xad4   : > { %7265 = vpow2.f32 %v2915_v26  ;;  %v4500_v26 = vld [vmem:[%s7925_s23 + $0x10] sm:$0xff] }
 0xad5   : > { %7267 = vpow2.f32 %v2907_v8  ;;  %v2911_v44 = vmul.f32 1.442695, %v2899_v53  ;;  %v4560_v8 = vadd.f32 %v9643_v45, %v4500_v26  ;;  %v7364_v53 = vld [vmem:[%s7925_s23 + $0x30] sm:$0xff] }
 0xad6   : > { %7269 = vpow2.f32 %v2913_v10  ;;  %v4562_v10 = vadd.f32 %v9643_v45, %v4502_v59  ;;  %v7367_v26 = vld [vmem:[%s7933_s29 + $0x10] sm:$0xff] }
 0xad7   : > { %7271 = vpow2.f32 %v2911_v44  ;;  %v4564_v44 = vadd.f32 %v7364_v53, %v9643_v45 }
 0xad8   : > { %7273 = vpow2.f32 %v2917_v54  ;;  %v3203_v54 = vadd.f32 %v7364_v53, %v9561_v4  ;;  %v4503_v53 = vld [vmem:[%s7925_s23 + $0x28] sm:$0xff] }
 0xae1   : > { %4064 = vrot.lane.b32.xlu1 %v3210_v42, %s7634_s26  ;;  %v9690_v42 = vpop.eup %7265 }
 0xae2   : > { %v9692_v38 = vpop.eup %7267  ;;  %v2937_v0 = vsel %vm11478_vm12, %v9690_v42, 0.0  ;;  %vm11485_vm12 = vmmov %vm11484_vm9 }
 0xae3   : > { %v2925_v19 = vsel %vm11482_vm15, %v9692_v38, 0.0  ;;  %v9698_v58 = vpop.eup %7269  ;;  %vm11489_vm15 = vnez %v11403_v63 }
 0xae4   : > { %v2934_v56 = vsel %vm11483_vm10, %v9698_v58, 0.0  ;;  %v9702_v34 = vpop.eup %7271  ;;  %vm11488_vm10 = vnez %v11322_v2 }
 0xae5   : > { %v2931_v57 = vsel %vm11484_vm9, %v9702_v34, 0.0  ;;  %v9706_v46 = vpop.eup %7273 }
 0xae6   : > { %v2940_v43 = vsel %vm11485_vm12, %v9706_v46, 0.0  ;;  %vm11490_vm12 = vnez %v11351_v22 }
 0xae9   : > { %3794 = vrot.lane.b32.xlu0 %v9681_v35, %s7628_s16 }
 0xb05   : > { %2938 = vadd.xlane.f32.xlu1 %v2937_v0  ;;  %v3211_v0 = vmul.f32 0.17677669, %v3203_v54  ;;  %v4505_v54 = vld [vmem:[%s7925_s23 + $0x38] sm:$0xff] }
 0xb08   : > { %2926 = vadd.xlane.f32.xlu0 %v2925_v19  ;;  %v7365_v19 = vld [vmem:[%s7925_s23 + $0x38] sm:$0xff] }
 0xb0c   : > { %2935 = vadd.xlane.f32.xlu0 %v2934_v56  ;;  %v3204_v56 = vadd.f32 %v7365_v19, %v9561_v4  ;;  %v4499_v4 = vld [vmem:[%s7925_s23 + $0x8] sm:$0xff]  ;;  %v4565_v19 = vadd.f32 %v9643_v45, %v4505_v54 }
 0xb0e   : > { %v3212_v29 = vmul.f32 0.17677669, %v3204_v56 }
 0xb10   : > { %2932 = vadd.xlane.f32.xlu0 %v2931_v57  ;;  %v3793_v57 = vpop.permute.xlu0 %3792 }
 0xb14   : > { %2941 = vadd.xlane.f32.xlu0 %v2940_v43  ;;  %v7366_v43 = vld [vmem:[%s7933_s29] sm:$0xff] }
 0xb16   : > { %3474 = vrot.lane.b32.xlu1 %v9472_v7, %s7627_s20 }
 0xb1a   : > { %3516 = vrot.lane.b32.xlu1 %v9716_v16, %s7628_s16 }
 0xb1e   : > { %4582 = vrot.lane.b32.xlu1 %v4558_v27, %s7629_s24 }
 0xb22   : > { %4586 = vrot.lane.b32.xlu1 %v4560_v8, %s7629_s24  ;;  %v11486_v8 = vld [vmem:[#allocation35_spill] sm:$0xff] }
 0xb23   : > { %vm11487_vm9 = vnez %v11486_v8 }
 0xb26   : > { %4590 = vrot.lane.b32.xlu1 %v4562_v10, %s7629_s24  ;;  %v3797_v27 = vpop.permute.xlu0 %3796  ;;  %v4559_v10 = vadd.f32 %v9643_v45, %v4499_v4 }
 0xb27   : > { %v9747_v59 = vsel %vm11487_vm9, %v3797_v27, %v9661_v1  ;;  %v4561_v1 = vadd.f32 %v9643_v45, %v4501_v18  ;;  %v6975_v18 = vpack.c.bf16 %v9311_v52, %v9304_v9  ;;  %v6987_v9 = vpack.c.bf16 %v9291_v5, %v9328_v50 }
 0xb2a   : > { %4594 = vrot.lane.b32.xlu1 %v4564_v44, %s7629_s24  ;;  %4062 = vrot.lane.b32.xlu0 %v3209_v55, %s7634_s26  ;;  %v3751_v44 = vpop.permute.xlu1 %3750  ;;  %v9769_v55 = vsel %vm11488_vm10, %v9627_v60, %v9474_v48  ;;  %v4507_v48 = vld [vmem:[%s7933_s29 + $0x8] sm:$0xff] }
 0xb2b   : > { %v9788_v60 = vsel %vm11385_vm1, %v3751_v44, %v9484_v30  ;;  %v4512_v30 = vld [vmem:[%s7933_s29 + $0x30] sm:$0xff] }
 0xb2e   : > { %4598 = vrot.lane.b32.xlu1 %v7366_v43, %s7629_s24  ;;  %4066 = vrot.lane.b32.xlu0 %v3211_v0, %s7634_s26  ;;  %v3789_v0 = vpop.permute.xlu1 %3788  ;;  %v4511_v43 = vld [vmem:[%s7933_s29 + $0x28] sm:$0xff] }
 0xb2f   : > { %v9779_v56 = vsel %vm8282_vm8, %v3789_v0, %v9632_v6  ;;  %v9797_v6 = vsel %vm11386_vm14, %v3793_v57, %v9639_v21  ;;  %v9812_v21 = vsel %vm11489_vm15, %v9656_v3, %v9480_v62 }
 0xb32   : > { %4602 = vrot.lane.b32.xlu1 %v7367_v26, %s7629_s24  ;;  %4068 = vrot.lane.b32.xlu0 %v3212_v29, %s7634_s26  ;;  %v2924_v57 = vpop.xlane.xlu1 %2923  ;;  %v9822_v26 = vsel %vm11471_vm7, %v9652_v25, %v9462_v36  ;;  %vm11491_vm7 = vcmask 523264  }
 0xb33   : > { %7275 = vrcp.f32 %v2924_v57  ;;  %vm11492_vm3 = vmmov %vm11491_vm7 }
 0xb36   : > { %4606 = vrot.lane.b32.xlu1 %v9154_v17, %s7629_s24  ;;  %3836 = vrot.lane.b32.xlu0 %v9747_v59, %s7631_s11  ;;  %v4563_v17 = vadd.f32 %v9643_v45, %v4503_v53  ;;  %v4509_v45 = vld [vmem:[%s7933_s29 + $0x18] sm:$0xff]  ;;  %v3473_v4 = vpop.permute.xlu1 %3472 }
 0xb3a   : > { %3464 = vrot.lane.b32.xlu1 %v9458_v14, %s7627_s20  ;;  %4584 = vrot.lane.b32.xlu0 %v4559_v10, %s7629_s24 }
 0xb3d   : > { %v7276_v3 = vpop.eup %7275 }
 0xb3e   : > { %4612 = vrot.lane.b32.xlu1 %v4513_v61, %s7629_s24  ;;  %4588 = vrot.lane.b32.xlu0 %v4561_v1, %s7629_s24  ;;  %v2952_v25 = vmul.f32 %v7276_v3, %v9648_v32  ;;  %v11494_v1 = vld [vmem:[#allocation37_spill] sm:$0xff] }
 0xb42   : > { %3784 = vrot.lane.b32.xlu1 %v9769_v55, %s7628_s16  ;;  %4592 = vrot.lane.b32.xlu0 %v4563_v17, %s7629_s24 }
 0xb46   : > { %4596 = vrot.lane.b32.xlu0 %v4565_v19, %s7629_s24  ;;  %3828 = vrot.lane.b32.xlu1 %v9779_v56, %s7631_s11 }
 0xb4a   : > { %4600 = vrot.lane.b32.xlu0 %v4507_v48, %s7629_s24  ;;  %3790 = vrot.lane.b32.xlu1 %v9788_v60, %s7628_s16 }
 0xb4e   : > { %4604 = vrot.lane.b32.xlu0 %v4509_v45, %s7629_s24  ;;  %3832 = vrot.lane.b32.xlu1 %v9797_v6, %s7631_s11 }
 0xb52   : > { %4608 = vrot.lane.b32.xlu0 %v4511_v43, %s7629_s24 }
 0xb56   : > { %4610 = vrot.lane.b32.xlu0 %v4512_v30, %s7629_s24 }
 0xb5a   : > { %3742 = vrot.lane.b32.xlu0 %v9476_v31, %s7627_s20 }
 0xb5d   : > { %v2930_v52 = vpop.xlane.xlu1 %2929 }
 0xb5e   : > { %3786 = vrot.lane.b32.xlu0 %v9812_v21, %s7628_s16 }
 0xb60   : > { %v2921_v29 = vpop.xlane.xlu0 %2920 }
 0xb61   : > { %7277 = vrcp.f32 %v2921_v29 }
 0xb62   : > { %3466 = vrot.lane.b32.xlu0 %v9464_v41, %s7627_s20  ;;  %7279 = vrcp.f32 %v2930_v52  ;;  %v11504_v52 = vld [vmem:[#allocation31_spill] sm:$0xff] }
 0xb64   : > { %v3795_v27 = vpop.permute.xlu0 %3794 }
 0xb65   : > { %v9827_v62 = vsel %vm11490_vm12, %v3795_v27, %v9681_v35  ;;  %v9840_v35 = vsel %vm11473_vm5, %v3473_v4, %v9466_v37  ;;  %vm11497_vm5 = vmmov %vm11492_vm3 }
 0xb66   : > { %3508 = vrot.lane.b32.xlu0 %v9822_v26, %s7628_s16  ;;  %3834 = vrot.lane.b32.xlu1 %v9827_v62, %s7631_s11 }
 0xb6a   : > { %3470 = vrot.lane.b32.xlu0 %v9468_v24, %s7627_s20 }
 0xb6b   : > { %v7278_v10 = vpop.eup %7277 }
 0xb6c   : > { %v2951_v36 = vmul.f32 %v7278_v10, %v9669_v51  ;;  %v6981_v51 = vpack.c.bf16 %v9289_v33, %v9319_v11  ;;  %v11493_v33 = vld [vmem:[#allocation25_spill] sm:$0xff]  ;;  %v9868_v11 = vpop.permute.xlu1 %4064  ;;  %v7280_v17 = vpop.eup %7279 }
 0xb6d   : > { %v2954_v48 = vmul.f32 %v7280_v17, %v9667_v12 }
 0xb6e   : > { %6677 = vmatprep.mubr.msk.f32.mxu1 %vm11491_vm7, %v2951_v36  ;;  %3512 = vrot.lane.b32.xlu0 %v9840_v35, %s7628_s16  ;;  %vm11495_vm7 = vmmov %vm11492_vm3 }
 0xb6f   : > { %6678 = vmatmul.mubr.msk.f32.vlgmr.msra.gmra.mrb[24].mxu1 %vm11492_vm3, %v2952_v25 }
 0xb70   : > { %6974 = vmatpush3.bf16.xpose.msk.msra.mxu1 %vm11400_vm11, %v9578_v28 }
 0xb71   : > { %6977 = vmatprep.subr.msk.bf16.mxu1 %vm11400_vm11, %v6975_v18 }
 0xb78   : > { %6980 = vmatpush3.bf16.xpose.msk.msra.mxu1 %vm11400_vm11, %v6975_v18 }
 0xb79   : > { %6983 = vmatprep.subr.msk.bf16.mxu1 %vm11400_vm11, %v6981_v51 }
 0xb80   : > { %6986 = vmatpush3.bf16.xpose.msk.msra.mxu1 %vm11400_vm11, %v6981_v51  ;;  %v11499_v51 = vld [vmem:[#allocation38_spill] sm:$0xff] }
 0xb81   : > { %6989 = vmatprep.subr.msk.bf16.mxu1 %vm11400_vm11, %v6987_v9 }
 0xb88   : > { %6992 = vmatpush3.bf16.xpose.msk.msra.mxu1 %vm11400_vm11, %v6987_v9  ;;  %vm11496_vm11 = vmmov %vm11492_vm3 }
 0xb89   : > { %7010 = vmatprep.subr.bf16.mxu1 %v11493_v33 }
 0xb92   : > { %v2939_v37 = vpop.xlane.xlu1 %2938 }
 0xb95   : > { %v2927_v28 = vpop.xlane.xlu0 %2926 }
 0xb96   : > { %7281 = vrcp.f32 %v2927_v28  ;;  %v3475_v32 = vpop.permute.xlu1 %3474 }
 0xb97   : > { %v9873_v5 = vsel %vm11481_vm6, %v3475_v32, %v9472_v7  ;;  %7283 = vrcp.f32 %v2939_v37  ;;  %vm11500_vm6 = vcmask 261120   ;;  %v11506_v37 = vld [vmem:[#allocation36_spill] sm:$0xff] }
 0xb98   : > { %3514 = vrot.lane.b32.xlu0 %v9873_v5, %s7628_s16 }
 0xb99   : > { %v2936_v50 = vpop.xlane.xlu0 %2935 }
 0xb9a   : > { %v3517_v61 = vpop.permute.xlu1 %3516  ;;  %7285 = vrcp.f32 %v2936_v50  ;;  %v11510_v50 = vld [vmem:[#allocation30_spill] sm:$0xff] }
 0xb9b   : > { %v9909_v28 = vsel %vm11487_vm9, %v3517_v61, %v9716_v16 }
 0xb9c   : > { %3462 = vrot.lane.b32.xlu0 %v11494_v1, %s7627_s20 }
 0xb9d   : > { %v2933_v53 = vpop.xlane.xlu0 %2932 }
 0xb9e   : > { %7287 = vrcp.f32 %v2933_v53  ;;  %v4583_v44 = vpop.permute.xlu1 %4582 }
 0xba0   : > { %v7282_v54 = vpop.eup %7281 }
 0xba1   : > { %v2942_v0 = vpop.xlane.xlu0 %2941  ;;  %v2953_v19 = vmul.f32 %v7282_v54, %v9692_v38  ;;  %v7284_v43 = vpop.eup %7283 }
 0xba2   : > { %7289 = vrcp.f32 %v2942_v0  ;;  %v4587_v7 = vpop.permute.xlu1 %4586  ;;  %v2957_v38 = vmul.f32 %v7284_v43, %v9690_v42 }
 0xba3   : > { %6680 = vmatprep.mubr.msk.f32.mxu1 %vm11495_vm7, %v2953_v19  ;;  %vm11498_vm7 = vmmov %vm11492_vm3 }
 0xba4   : > { %6681 = vmatmul.mubr.msk.f32.gmra.mrb[26].mxu1 %vm11492_vm3, %v2954_v48  ;;  %v7286_v57 = vpop.eup %7285 }
 0xba5   : > { %v4063_v45 = vpop.permute.xlu0 %4062  ;;  %v2956_v10 = vmul.f32 %v7286_v57, %v9698_v58  ;;  %v11501_v58 = vld [vmem:[#allocation45_spill] sm:$0xff]  ;;  %v11523_v57 = vld [vmem:[#allocation48_spill] sm:$0xff] }
 0xba6   : > { %v4591_v30 = vpop.permute.xlu1 %4590 }
 0xba8   : > { %v7288_v29 = vpop.eup %7287 }
 0xba9   : > { %v4067_v27 = vpop.permute.xlu0 %4066  ;;  %v2955_v3 = vmul.f32 %v7288_v29, %v9702_v34 }
 0xbaa   : > { %v4595_v4 = vpop.permute.xlu1 %4594 }
 0xbab   : > { %6683 = vmatprep.mubr.msk.f32.mxu1 %vm11496_vm11, %v2955_v3  ;;  %vm11502_vm11 = vnez %v11501_v58 }
 0xbac   : > { %v7290_v12 = vpop.eup %7289  ;;  %6684 = vmatmul.mubr.msk.f32.gmra.mrb[28].mxu1 %vm11497_vm5, %v2956_v10  ;;  %vm11505_vm5 = vmmov %vm11500_vm6 }
 0xbad   : > { %v4069_v36 = vpop.permute.xlu0 %4068  ;;  %6686 = vmatprep.mubr.msk.f32.mxu1 %vm11498_vm7, %v2957_v38  ;;  %v2958_v25 = vmul.f32 %v7290_v12, %v9706_v46  ;;  %vm11507_vm7 = vmmov %vm11505_vm5 }
 0xbae   : > { %v9890_v18 = vpop.permute.xlu1 %4598 }
 0xbb0   : > { %6687 = vmatmul.mubr.msk.f32.gmra.mrb[30].mxu1 %vm11492_vm3, %v2958_v25  ;;  %vm11512_vm3 = vmmov %vm11505_vm5  ;;  %v11538_v25 = vld [vmem:[#allocation44_spill] sm:$0xff] }
 0xbb1   : > { %v3837_v34 = vpop.permute.xlu0 %3836  ;;  %6737 = vmatprep.mubr.msk.f32.mxu1 %vm11500_vm6, %v11499_v51  ;;  %vm11511_vm6 = vmmov %vm11505_vm5 }
 0xbb2   : > { %v3853_v42 = vsel %vm11502_vm11, %v3837_v34, %v9747_v59  ;;  %v9898_v9 = vpop.permute.xlu1 %4602  ;;  %v11509_v59 = vld [vmem:[#allocation26_spill] sm:$0xff]  ;;  %vm11527_vm9 = vmmov %vm11512_vm3 }
 0xbb3   : > { %11503 = vst [vmem:[#allocation39_spill] sm:$0xff] %v9898_v9  ;;  %3876 = vrot.lane.b32.xlu1 %v3853_v42, %s7632_s13 }
 0xbb4   : > { %6738 = vmatmul.mubr.msk.f32.vlgmr.msra.gmra.mrb[32].mxu1 %vm11505_vm5, %v11504_v52  ;;  %vm11513_vm5 = vmmov %vm11512_vm3 }
 0xbb5   : > { %v4585_v46 = vpop.permute.xlu0 %4584  ;;  %6740 = vmatprep.mubr.msk.f32.mxu1 %vm11507_vm7, %v11506_v37  ;;  %7012 = vmatpush3.bf16.msra.mxu1 %v11493_v33  ;;  %vm11514_vm7 = vmmov %vm11512_vm3 }
 0xbb6   : > { %v9911_v32 = vpop.permute.xlu1 %4606  ;;  %7014 = vmatprep.subr.bf16.mxu1 %v11509_v59 }
 0xbb7   : > { %11508 = vst [vmem:[#allocation40_spill] sm:$0xff] %v9911_v32  ;;  %3556 = vrot.lane.b32.xlu1 %v9909_v28, %s7631_s11 }
 0xbb8   : > { %6741 = vmatmul.mubr.msk.f32.gmra.mrb[34].mxu1 %vm11511_vm6, %v11510_v50  ;;  %vm11516_vm6 = vmmov %vm11512_vm3 }
 0xbb9   : > { %v4589_v53 = vpop.permute.xlu0 %4588  ;;  %6743 = vmatprep.mubr.msk.f32.mxu1 %vm11512_vm3, %v4063_v45  ;;  %7016 = vmatpush3.bf16.msra.mxu1 %v11509_v59 }
 0xbba   : > { %v3465_v33 = vpop.permute.xlu1 %3464 }
 0xbbb   : > { %v9923_v16 = vsel %vm11488_vm10, %v3465_v33, %v9458_v14  ;;  %vm11531_vm10 = vmmov %vm11512_vm3 }
 0xbbc   : > { %3504 = vrot.lane.b32.xlu1 %v9923_v16, %s7628_s16  ;;  %6744 = vmatmul.mubr.msk.f32.gmra.mrb[36].mxu1 %vm11513_vm5, %v9868_v11  ;;  %vm11518_vm5 = vmmov %vm11512_vm3 }
 0xbbd   : > { %v4593_v61 = vpop.permute.xlu0 %4592  ;;  %6746 = vmatprep.mubr.msk.f32.mxu1 %vm11514_vm7, %v4067_v27  ;;  %vm11519_vm7 = vmmov %vm11512_vm3  ;;  %v11528_v27 = vld [vmem:[#allocation49_spill] sm:$0xff] }
 0xbbe   : > { %v9930_v17 = vpop.permute.xlu1 %4612 }
 0xbbf   : > { %11515 = vst [vmem:[#allocation33_spill] sm:$0xff] %v9930_v17 }
 0xbc0   : > { %6747 = vmatmul.mubr.msk.f32.gmra.mrb[38].mxu1 %vm11516_vm6, %v4069_v36  ;;  %vm11521_vm6 = vmmov %vm11512_vm3 }
 0xbc1   : > { %v4597_v54 = vpop.permute.xlu0 %4596  ;;  %6785 = vmatprep.mubr.msk.f32.mxu1 %vm11512_vm3, %v4583_v44 }
 0xbc2   : > { %v3785_v0 = vpop.permute.xlu1 %3784 }
 0xbc3   : > { %v9937_v19 = vsel %vm8506_vm0, %v3785_v0, %v9769_v55 }
 0xbc4   : > { %3824 = vrot.lane.b32.xlu1 %v9937_v19, %s7631_s11  ;;  %6786 = vmatmul.mubr.msk.f32.vlgmr.msra.gmra.mrb[40].mxu1 %vm11518_vm5, %v4585_v46  ;;  %vm11524_vm5 = vnez %v11523_v57 }
 0xbc5   : > { %v9942_v11 = vpop.permute.xlu0 %4600  ;;  %6788 = vmatprep.mubr.msk.f32.mxu1 %vm11519_vm7, %v4587_v7  ;;  %vm11525_vm7 = vmmov %vm11512_vm3 }
 0xbc6   : > { %v3829_v48 = vpop.permute.xlu1 %3828 }
 0xbc7   : > { %v3849_v44 = vsel %vm8522_vm4, %v3829_v48, %v9779_v56  ;;  %v11543_v48 = vld [vmem:[#allocation54_spill] sm:$0xff] }
 0xbc8   : > { %3868 = vrot.lane.b32.xlu1 %v3849_v44, %s7632_s13  ;;  %6789 = vmatmul.mubr.msk.f32.gmra.mrb[42].mxu1 %vm11521_vm6, %v4589_v53  ;;  %vm11529_vm6 = vnez %v11528_v27 }
 0xbc9   : > { %v9950_v55 = vpop.permute.xlu0 %4604  ;;  %6791 = vmatprep.mubr.msk.f32.mxu1 %vm11512_vm3, %v4591_v30 }
 0xbca   : > { %11522 = vst [vmem:[#allocation41_spill] sm:$0xff] %v9950_v55  ;;  %v3791_v43 = vpop.permute.xlu1 %3790 }
 0xbcb   : > { %v3810_v29 = vsel %vm11524_vm5, %v3791_v43, %v9788_v60 }
 0xbcc   : > { %3830 = vrot.lane.b32.xlu1 %v3810_v29, %s7631_s11  ;;  %6792 = vmatmul.mubr.msk.f32.gmra.mrb[44].mxu1 %vm11525_vm7, %v4593_v61  ;;  %vm11532_vm7 = vmmov %vm11512_vm3  ;;  %v11559_v61 = vld [vmem:[#allocation55_spill] sm:$0xff] }
 0xbcd   : > { %v9958_v7 = vpop.permute.xlu0 %4608  ;;  %6794 = vmatprep.mubr.msk.f32.mxu1 %vm11527_vm9, %v4595_v4  ;;  %vm11533_vm9 = vmmov %vm11512_vm3  ;;  %v11534_v4 = vld [vmem:[#allocation42_spill] sm:$0xff] }
 0xbce   : > { %11526 = vst [vmem:[#allocation43_spill] sm:$0xff] %v9958_v7  ;;  %v3833_v56 = vpop.permute.xlu1 %3832  ;;  %vm11535_vm5 = vnez %v11534_v4 }
 0xbcf   : > { %v3851_v3 = vsel %vm11529_vm6, %v3833_v56, %v9797_v6 }
 0xbd0   : > { %3872 = vrot.lane.b32.xlu1 %v3851_v3, %s7632_s13  ;;  %6795 = vmatmul.mubr.msk.f32.gmra.mrb[46].mxu1 %vm11512_vm3, %v4597_v54 }
 0xbd1   : > { %v9966_v30 = vpop.permute.xlu0 %4610  ;;  %6797 = vmatprep.mubr.msk.f32.mxu1 %vm11531_vm10, %v9890_v18  ;;  %vm11537_vm10 = vmmov %vm11512_vm3 }
 0xbd2   : > { %11530 = vst [vmem:[#allocation57_spill] sm:$0xff] %v9966_v30 }
 0xbd4   : > { %6798 = vmatmul.mubr.msk.f32.gmra.mrb[48].mxu1 %vm11532_vm7, %v9942_v11  ;;  %vm11539_vm7 = vnez %v11538_v25  ;;  %v3180_v25 = vld [vmem:[%s7940_s21 + $0x18] sm:$0xff] }
 0xbd5   : > { %v3743_v60 = vpop.permute.xlu0 %3742  ;;  %6800 = vmatprep.mubr.msk.f32.mxu1 %vm11533_vm9, %v9898_v9  ;;  %vm11540_vm9 = vmmov %vm11512_vm3 }
 0xbd6   : > { %v3766_v6 = vsel %vm11535_vm5, %v3743_v60, %v9476_v31 }
 0xbd7   : > { %3782 = vrot.lane.b32.xlu0 %v3766_v6, %s7628_s16 }
 0xbd8   : > { %v3835_v10 = vpop.permute.xlu1 %3834  ;;  %6801 = vmatmul.mubr.msk.f32.gmra.mrb[50].mxu1 %vm11512_vm3, %v9950_v55 }
 0xbd9   : > { %v3852_v12 = vsel %vm11439_vm2, %v3835_v10, %v9827_v62  ;;  %v3787_v36 = vpop.permute.xlu0 %3786  ;;  %6803 = vmatprep.mubr.msk.f32.mxu1 %vm11537_vm10, %v9911_v32  ;;  %vm11541_vm10 = vmmov %vm11512_vm3 }
 0xbda   : > { %v3808_v34 = vsel %vm11539_vm7, %v3787_v36, %v9812_v21  ;;  %3914 = vrot.lane.b32.xlu1 %v3852_v12, %s7633_s6  ;;  %v11549_v12 = vld [vmem:[#allocation51_spill] sm:$0xff] }
 0xbdb   : > { %3826 = vrot.lane.b32.xlu0 %v3808_v34, %s7631_s11 }
 0xbdc   : > { %6804 = vmatmul.mubr.msk.f32.gmra.mrb[52].mxu1 %vm11540_vm9, %v9958_v7  ;;  %vm11544_vm9 = vnez %v11543_v48 }
 0xbdd   : > { %v3467_v31 = vpop.permute.xlu0 %3466  ;;  %6806 = vmatprep.mubr.msk.f32.mxu1 %vm11512_vm3, %v9966_v30 }
 0xbde   : > { %v3488_v62 = vsel %vm11489_vm15, %v3467_v31, %v9464_v41 }
 0xbdf   : > { %3506 = vrot.lane.b32.xlu0 %v3488_v62, %s7628_s16 }
 0xbe0   : > { %6807 = vmatmul.mubr.msk.f32.gmra.mrb[54].mxu1 %vm11541_vm10, %v9930_v17  ;;  %vm11550_vm10 = vnez %v11549_v12 }
 0xbe1   : > { %v3509_v21 = vpop.permute.xlu0 %3508 }
 0xbe2   : > { %v3529_v51 = vsel %vm8282_vm8, %v3509_v21, %v9822_v26 }
 0xbe3   : > { %3548 = vrot.lane.b32.xlu0 %v3529_v51, %s7631_s11 }
 0xbe5   : > { %v3471_v42 = vpop.permute.xlu0 %3470 }
 0xbe6   : > { %v3490_v52 = vsel %vm11385_vm1, %v3471_v42, %v9468_v24 }
 0xbe7   : > { %3510 = vrot.lane.b32.xlu0 %v3490_v52, %s7628_s16 }
 0xbe9   : > { %v3513_v41 = vpop.permute.xlu0 %3512 }
 0xbea   : > { %v3531_v46 = vsel %vm11386_vm14, %v3513_v41, %v9840_v35 }
 0xbeb   : > { %3552 = vrot.lane.b32.xlu0 %v3531_v46, %s7631_s11 }
 0xc0a   : > { %v3515_v37 = vpop.permute.xlu0 %3514 }
 0xc0b   : > { %v3532_v26 = vsel %vm11490_vm12, %v3515_v37, %v9873_v5 }
 0xc0c   : > { %3554 = vrot.lane.b32.xlu0 %v3532_v26, %s7631_s11 }
 0xc0e   : > { %v3463_v59 = vpop.permute.xlu0 %3462 }
 0xc0f   : > { %v3486_v24 = vsel %vm11535_vm5, %v3463_v59, %v11494_v1 }
 0xc10   : > { %3502 = vrot.lane.b32.xlu0 %v3486_v24, %s7628_s16 }
 0xc25   : > { %v3877_v50 = vpop.permute.xlu1 %3876 }
 0xc26   : > { %3916 = vrot.lane.b32.xlu1 %v3877_v50, %s7633_s6 }
 0xc29   : > { %v3557_v35 = vpop.permute.xlu1 %3556 }
 0xc2a   : > { %v3573_v53 = vsel %vm11502_vm11, %v3557_v35, %v9909_v28 }
 0xc2b   : > { %3596 = vrot.lane.b32.xlu1 %v3573_v53, %s7632_s13 }
 0xc2e   : > { %v3505_v5 = vpop.permute.xlu1 %3504 }
 0xc2f   : > { %v10028_v33 = vsel %vm8506_vm0, %v3505_v5, %v9923_v16  ;;  %vm11551_vm0 = vnez %v11523_v57  ;;  %v3179_v57 = vld [vmem:[%s7940_s21 + $0x10] sm:$0xff] }
 0xc30   : > { %3544 = vrot.lane.b32.xlu1 %v10028_v33, %s7631_s11 }
 0xc36   : > { %v3825_v1 = vpop.permute.xlu1 %3824 }
 0xc37   : > { %v3847_v54 = vsel %vm8633_vm13, %v3825_v1, %v9937_v19  ;;  %v11547_v19 = vld [vmem:[#allocation50_spill] sm:$0xff] }
 0xc38   : > { %3864 = vrot.lane.b32.xlu1 %v3847_v54, %s7632_s13  ;;  %vm11548_vm3 = vnez %v11547_v19 }
 0xc3a   : > { %v3869_v0 = vpop.permute.xlu1 %3868 }
 0xc3c   : > { %3908 = vrot.lane.b32.xlu1 %v3869_v0, %s7633_s6 }
 0xc3e   : > { %v3831_v28 = vpop.permute.xlu1 %3830 }
 0xc3f   : > { %v3850_v44 = vsel %vm11544_vm9, %v3831_v28, %v3810_v29 }
 0xc40   : > { %3950 = vrot.lane.b32.xlu1 %v3850_v44, %s7629_s24 }
 0xc42   : > { %v3873_v16 = vpop.permute.xlu1 %3872  ;;  %v10040_v43 = vpop.f32.mrb[24].mxu1 }
 0xc43   : > { %11545 = vst [vmem:[#allocation56_spill] sm:$0xff] %v10040_v43  ;;  %v10042_v56 = vpop.f32.mrb[25].mxu1 }
 0xc44   : > { %11546 = vst [vmem:[#allocation28_spill] sm:$0xff] %v10042_v56  ;;  %3952 = vrot.lane.b32.xlu1 %v3873_v16, %s7629_s24 }
 0xc49   : > { %v3783_v3 = vpop.permute.xlu0 %3782 }
 0xc4a   : > { %v10047_v60 = vsel %vm11548_vm3, %v3783_v3, %v3766_v6 }
 0xc4b   : > { %3822 = vrot.lane.b32.xlu0 %v10047_v60, %s7631_s11 }
 0xc4c   : > { %v3915_v3 = vpop.permute.xlu1 %3914 }
 0xc4d   : > { %v3827_v10 = vpop.permute.xlu0 %3826 }
 0xc4e   : > { %v3848_v29 = vsel %vm11550_vm10, %v3827_v10, %v3808_v34 }
 0xc4f   : > { %3906 = vrot.lane.b32.xlu0 %v3848_v29, %s7633_s6 }
 0xc51   : > { %v3507_v36 = vpop.permute.xlu0 %3506 }
 0xc52   : > { %v10056_v31 = vsel %vm11539_vm7, %v3507_v36, %v3488_v62 }
 0xc53   : > { %3546 = vrot.lane.b32.xlu0 %v10056_v31, %s7631_s11 }
 0xc55   : > { %v3549_v21 = vpop.permute.xlu0 %3548 }
 0xc56   : > { %v3569_v6 = vsel %vm8522_vm4, %v3549_v21, %v3529_v51 }
 0xc57   : > { %3588 = vrot.lane.b32.xlu0 %v3569_v6, %s7632_s13 }
 0xc59   : > { %v3511_v42 = vpop.permute.xlu0 %3510 }
 0xc5a   : > { %v10065_v34 = vsel %vm11551_vm0, %v3511_v42, %v3490_v52 }
 0xc5b   : > { %3550 = vrot.lane.b32.xlu0 %v10065_v34, %s7631_s11 }
 0xc5d   : > { %v3553_v41 = vpop.permute.xlu0 %3552 }
 0xc5e   : > { %v3571_v62 = vsel %vm11529_vm6, %v3553_v41, %v3531_v46 }
 0xc5f   : > { %3592 = vrot.lane.b32.xlu0 %v3571_v62, %s7632_s13 }
 0xc77   : > { %v10072_v37 = vpop.f32.mrb[26].mxu1 }
 0xc78   : > { %11552 = vst [vmem:[#allocation29_spill] sm:$0xff] %v10072_v37  ;;  %v10074_v59 = vpop.f32.mrb[27].mxu1 }
 0xc79   : > { %11553 = vst [vmem:[#allocation27_spill] sm:$0xff] %v10074_v59 }
 0xc7e   : > { %v3555_v51 = vpop.permute.xlu0 %3554 }
 0xc7f   : > { %v3572_v50 = vsel %vm11439_vm2, %v3555_v51, %v3532_v26  ;;  %v10078_v35 = vpop.f32.mrb[28].mxu1 }
 0xc80   : > { %11554 = vst [vmem:[#allocation34_spill] sm:$0xff] %v10078_v35  ;;  %3634 = vrot.lane.b32.xlu0 %v3572_v50, %s7633_s6  ;;  %v10081_v52 = vpop.f32.mrb[29].mxu1 }
 0xc81   : > { %11555 = vst [vmem:[#allocation35_spill] sm:$0xff] %v10081_v52 }
 0xc82   : > { %v3503_v53 = vpop.permute.xlu0 %3502 }
 0xc83   : > { %v10085_v46 = vsel %vm11548_vm3, %v3503_v53, %v3486_v24  ;;  %v10087_v5 = vpop.f32.mrb[30].mxu1  ;;  %vm11571_vm3 = vnez %v11486_v8 }
 0xc84   : > { %11556 = vst [vmem:[#allocation25_spill] sm:$0xff] %v10087_v5  ;;  %3542 = vrot.lane.b32.xlu0 %v10085_v46, %s7631_s11  ;;  %v10091_v1 = vpop.f32.mrb[31].mxu1 }
 0xc85   : > { %11557 = vst [vmem:[#allocation37_spill] sm:$0xff] %v10091_v1 }
 0xc87   : > { %v10093_v54 = vpop.f32.mrb[32].mxu1 }
 0xc88   : > { %v10095_v26 = vpop.f32.mrb[33].mxu1 }
 0xc8b   : > { %v10097_v0 = vpop.f32.mrb[34].mxu1 }
 0xc8c   : > { %v10099_v28 = vpop.f32.mrb[35].mxu1 }
 0xc8f   : > { %v10101_v44 = vpop.f32.mrb[36].mxu1 }
 0xc90   : > { %v10103_v16 = vpop.f32.mrb[37].mxu1 }
 0xc93   : > { %v10105_v24 = vpop.f32.mrb[38].mxu1 }
 0xc94   : > { %v10107_v10 = vpop.f32.mrb[39].mxu1 }
 0xc97   : > { %v10109_v29 = vpop.f32.mrb[40].mxu1 }
 0xc98   : > { %11558 = vst [vmem:[#allocation38_spill] sm:$0xff] %v10109_v29  ;;  %v3917_v36 = vpop.permute.xlu1 %3916  ;;  %v10111_v21 = vpop.f32.mrb[41].mxu1 }
 0xc9b   : > { %v10113_v6 = vpop.f32.mrb[42].mxu1 }
 0xc9c   : > { %v10115_v42 = vpop.f32.mrb[43].mxu1 }
 0xc9d   : > { %v3597_v41 = vpop.permute.xlu1 %3596 }
 0xc9e   : > { %3636 = vrot.lane.b32.xlu1 %v3597_v41, %s7633_s6 }
 0xc9f   : > { %v10118_v62 = vpop.f32.mrb[44].mxu1 }
 0xca0   : > { %v10120_v51 = vpop.f32.mrb[45].mxu1 }
 0xca2   : > { %v3545_v50 = vpop.permute.xlu1 %3544 }
 0xca3   : > { %v3567_v53 = vsel %vm8633_vm13, %v3545_v50, %v10028_v33  ;;  %v10125_v5 = vpop.f32.mrb[46].mxu1  ;;  %vm11560_vm13 = vnez %v11559_v61 }
 0xca4   : > { %3584 = vrot.lane.b32.xlu1 %v3567_v53, %s7632_s13  ;;  %v10128_v35 = vpop.f32.mrb[47].mxu1 }
 0xca7   : > { %v10130_v37 = vpop.f32.mrb[48].mxu1 }
 0xca8   : > { %v10132_v43 = vpop.f32.mrb[49].mxu1 }
 0xcaa   : > { %v3865_v41 = vpop.permute.xlu1 %3864 }
 0xcab   : > { %3984 = vrot.lane.b32.xlu1 %v3865_v41, %s7634_s26  ;;  %v10135_v56 = vpop.f32.mrb[50].mxu1 }
 0xcac   : > { %v10137_v1 = vpop.f32.mrb[51].mxu1 }
 0xcae   : > { %v3909_v41 = vpop.permute.xlu1 %3908 }
 0xcaf   : > { %v10139_v52 = vpop.f32.mrb[52].mxu1 }
 0xcb0   : > { %v10141_v33 = vpop.f32.mrb[53].mxu1 }
 0xcb2   : > { %v3951_v30 = vpop.permute.xlu1 %3950 }
 0xcb3   : > { %v10143_v50 = vpop.f32.mrb[54].mxu1 }
 0xcb4   : > { %v10145_v53 = vpop.f32.mrb[55].mxu1 }
 0xcbd   : > { %v3823_v59 = vpop.permute.xlu0 %3822 }
 0xcbe   : > { %v3846_v19 = vsel %vm11560_vm13, %v3823_v59, %v10047_v60 }
 0xcbf   : > { %3982 = vrot.lane.b32.xlu0 %v3846_v19, %s7634_s26 }
 0xcc1   : > { %v3907_v38 = vpop.permute.xlu0 %3906 }
 0xcc3   : > { %3986 = vrot.lane.b32.xlu0 %v3907_v38, %s7634_s26  ;;  %v3953_v38 = vpop.permute.xlu1 %3952 }
 0xcc5   : > { %v3547_v17 = vpop.permute.xlu0 %3546 }
 0xcc6   : > { %v3568_v7 = vsel %vm11550_vm10, %v3547_v17, %v10056_v31  ;;  %vm11563_vm10 = vnez %v11480_v23 }
 0xcc7   : > { %3626 = vrot.lane.b32.xlu1 %v3568_v7, %s7633_s6  ;;  %3990 = vrot.lane.b32.xlu0 %v3951_v30, %s7634_s26 }
 0xcc9   : > { %v3589_v32 = vpop.permute.xlu0 %3588 }
 0xccb   : > { %3954 = vrot.lane.b32.xlu1 %v3915_v3, %s7629_s24  ;;  %3628 = vrot.lane.b32.xlu0 %v3589_v32, %s7633_s6 }
 0xccd   : > { %v3551_v19 = vpop.permute.xlu0 %3550 }
 0xcce   : > { %v3570_v17 = vsel %vm11544_vm9, %v3551_v19, %v10065_v34  ;;  %vm11562_vm9 = vnez %v11470_v13 }
 0xccf   : > { %3988 = vrot.lane.b32.xlu1 %v3909_v41, %s7634_s26 }
 0xcd1   : > { %v3593_v60 = vpop.permute.xlu0 %3592 }
 0xcd2   : > { %3672 = vrot.lane.b32.xlu0 %v3593_v60, %s7629_s24 }
 0xcd3   : > { %3956 = vrot.lane.b32.xlu1 %v3917_v36, %s7629_s24 }
 0xcd7   : > { %3992 = vrot.lane.b32.xlu1 %v3953_v38, %s7634_s26 }
 0xcdb   : > { %3670 = vrot.lane.b32.xlu1 %v3570_v17, %s7629_s24 }
 0xcf2   : > { %v3635_v7 = vpop.permute.xlu0 %3634 }
 0xcf3   : > { %3674 = vrot.lane.b32.xlu0 %v3635_v7, %s7629_s24 }
 0xcf6   : > { %v3543_v32 = vpop.permute.xlu0 %3542 }
 0xcf7   : > { %v3566_v30 = vsel %vm11560_vm13, %v3543_v32, %v10085_v46  ;;  %vm11561_vm13 = vnez %v11476_v47 }
 0xcf8   : > { %3702 = vrot.lane.b32.xlu0 %v3566_v30, %s7634_s26 }
 0xd10   : > { %v3637_v31 = vpop.permute.xlu1 %3636 }
 0xd11   : > { %3676 = vrot.lane.b32.xlu1 %v3637_v31, %s7629_s24 }
 0xd16   : > { %v3585_v59 = vpop.permute.xlu1 %3584 }
 0xd17   : > { %3704 = vrot.lane.b32.xlu1 %v3585_v59, %s7634_s26 }
 0xd1d   : > { %v10176_v34 = vpop.permute.xlu1 %3984 }
 0xd31   : > { %v10174_v3 = vpop.permute.xlu0 %3982 }
 0xd35   : > { %v10178_v36 = vpop.permute.xlu0 %3986 }
 0xd39   : > { %v10180_v41 = vpop.permute.xlu0 %3990  ;;  %v3627_v19 = vpop.permute.xlu1 %3626 }
 0xd3a   : > { %3706 = vrot.lane.b32.xlu0 %v3627_v19, %s7634_s26 }
 0xd3d   : > { %v3629_v46 = vpop.permute.xlu0 %3628  ;;  %v3955_v60 = vpop.permute.xlu1 %3954 }
 0xd3e   : > { %3708 = vrot.lane.b32.xlu1 %v3629_v46, %s7634_s26 }
 0xd41   : > { %v10184_v38 = vpop.permute.xlu1 %3988 }
 0xd44   : > { %v3673_v17 = vpop.permute.xlu0 %3672 }
 0xd45   : > { %3712 = vrot.lane.b32.xlu1 %v3673_v17, %s7634_s26  ;;  %v3957_v7 = vpop.permute.xlu1 %3956 }
 0xd49   : > { %v10187_v32 = vpop.permute.xlu1 %3992 }
 0xd4d   : > { %v3671_v30 = vpop.permute.xlu1 %3670 }
 0xd4e   : > { %3710 = vrot.lane.b32.xlu0 %v3671_v30, %s7634_s26 }
 0xd52   : > { %4813 = vrot.lane.b32.xlu0 %v10125_v5, %s7627_s20 }
 0xd56   : > { %5091 = vrot.lane.b32.xlu0 %v10145_v53, %s7627_s20 }
 0xd5a   : > { %3994 = vrot.lane.b32.xlu0 %v3955_v60, %s7634_s26 }
 0xd5e   : > { %5081 = vrot.lane.b32.xlu0 %v10130_v37, %s7627_s20 }
 0xd62   : > { %5083 = vrot.lane.b32.xlu0 %v10137_v1, %s7627_s20 }
 0xd65   : > { %v3675_v31 = vpop.permute.xlu0 %3674 }
 0xd66   : > { %3714 = vrot.lane.b32.xlu1 %v3675_v31, %s7634_s26 }
 0xd6a   : > { %5093 = vrot.lane.b32.xlu1 %v10143_v50, %s7627_s20  ;;  %v10211_v46 = vpop.permute.xlu0 %3702 }
 0xd6e   : > { %5085 = vrot.lane.b32.xlu1 %v10135_v56, %s7627_s20 }
 0xd72   : > { %5089 = vrot.lane.b32.xlu1 %v10139_v52, %s7627_s20 }
 0xd76   : > { %4805 = vrot.lane.b32.xlu1 %v10113_v6, %s7627_s20 }
 0xd83   : > { %v3677_v59 = vpop.permute.xlu1 %3676 }
 0xd84   : > { %3716 = vrot.lane.b32.xlu1 %v3677_v59, %s7634_s26 }
 0xd89   : > { %v10209_v19 = vpop.permute.xlu1 %3704 }
 0xdac   : > { %v10215_v17 = vpop.permute.xlu0 %3706 }
 0xdb0   : > { %v10213_v60 = vpop.permute.xlu1 %3708 }
 0xdb7   : > { %v10217_v30 = vpop.permute.xlu1 %3712 }
 0xdc0   : > { %v10219_v31 = vpop.permute.xlu0 %3710 }
 0xdc4   : > { %v4814_v48 = vpop.permute.xlu0 %4813 }
 0xdc8   : > { %v5092_v27 = vpop.permute.xlu0 %5091 }
 0xdcc   : > { %v10257_v14 = vpop.permute.xlu0 %3994 }
 0xdd0   : > { %v5082_v47 = vpop.permute.xlu0 %5081 }
 0xdd8   : > { %v10221_v61 = vpop.permute.xlu1 %3714 }
 0xddc   : > { %v5094_v59 = vpop.permute.xlu1 %5093 }
 0xddd   : > { %v5110_v12 = vsel %vm11561_vm13, %v5094_v59, %v10143_v50  ;;  %v10240_v50 = vsel %vm11563_vm10, %v5092_v27, %v10145_v53  ;;  %v4830_v53 = vsel %vm11561_vm13, %v4814_v48, %v10125_v5  ;;  %v3177_v48 = vld [vmem:[%s7940_s21] sm:$0xff]  ;;  %v3178_v5 = vld [vmem:[%s7940_s21 + $0x8] sm:$0xff]  ;;  %vm11565_vm13 = vnez %v11322_v2 }
 0xdde   : > { %5133 = vrot.lane.b32.xlu1 %v5110_v12, %s7628_s16  ;;  %v10281_v13 = vsel %vm11565_vm13, %v5082_v47, %v10130_v37 }
 0xddf   : > { %11566 = vst [vmem:[#allocation31_spill] sm:$0xff] %v10281_v13 }
 0xde0   : > { %v5086_v55 = vpop.permute.xlu1 %5085 }
 0xde1   : > { %v10230_v9 = vsel %vm11562_vm9, %v5086_v55, %v10135_v56  ;;  %v10246_v55 = vpack.i.bf16 %v3180_v25, %v3179_v57  ;;  %v3183_v56 = vld [vmem:[%s7940_s21 + $0x30] sm:$0xff]  ;;  %v6245_v25 = vld [vmem:[%s11089_s3 + $0x3] ss:$0 sm:$0xff] }
 0xde2   : > { %3996 = vrot.lane.b32.xlu1 %v3957_v7, %s7634_s26  ;;  %5125 = vrot.lane.b32.xlu0 %v10230_v9, %s7628_s16  ;;  %v3184_v7 = vld [vmem:[%s7940_s21 + $0x38] sm:$0xff] }
 0xde3   : > { %11564 = vst [vmem:[#allocation45_spill] sm:$0xff] %v10246_v55  ;;  %v7202_v27 = vpack.i.bf16 %v3184_v7, %v3183_v56  ;;  %v5084_v7 = vpop.permute.xlu0 %5083 }
 0xde4   : > { %v5090_v59 = vpop.permute.xlu1 %5089  ;;  %v10299_v37 = vsel %vm11489_vm15, %v5084_v7, %v10137_v1 }
 0xde5   : > { %11569 = vst [vmem:[#allocation26_spill] sm:$0xff] %v10299_v37 }
 0xde6   : > { %4809 = vrot.lane.b32.xlu1 %v10118_v62, %s7627_s20  ;;  %5131 = vrot.lane.b32.xlu0 %v10240_v50, %s7628_s16 }
 0xde8   : > { %v4806_v57 = vpop.permute.xlu1 %4805 }
 0xde9   : > { %v10267_v56 = vsel %vm11562_vm9, %v4806_v57, %v10113_v6  ;;  %vm11567_vm9 = vnez %v11472_v15  ;;  %v3181_v57 = vld [vmem:[%s7940_s21 + $0x20] sm:$0xff] }
 0xdea   : > { %4811 = vrot.lane.b32.xlu1 %v10128_v35, %s7627_s20  ;;  %7193 = vrot.lane.b32.xlu0 %v10246_v55, %s7634_s26  ;;  %v10286_v6 = vsel %vm11567_vm9, %v5090_v59, %v10139_v52 }
 0xdee   : > { %4853 = vrot.lane.b32.xlu1 %v4830_v53, %s7628_s16  ;;  %7203 = vrot.lane.b32.xlu0 %v7202_v27, %s7634_s26  ;;  %v10292_v27 = vpack.i.bf16 %v3178_v5, %v3177_v48 }
 0xdf0   : > { %11568 = vst [vmem:[#allocation36_spill] sm:$0xff] %v10292_v27 }
 0xdf2   : > { %4531 = vrot.lane.b32.xlu1 %v6245_v25, %s7630_s0  ;;  %4845 = vrot.lane.b32.xlu0 %v10267_v56, %s7628_s16  ;;  %v3182_v25 = vld [vmem:[%s7940_s21 + $0x28] sm:$0xff] }
 0xdf3   : > { %v10305_v52 = vpack.i.bf16 %v3182_v25, %v3181_v57 }
 0xdf5   : > { %11570 = vst [vmem:[#allocation30_spill] sm:$0xff] %v10305_v52 }
 0xdf6   : > { %5087 = vrot.lane.b32.xlu1 %v10141_v33, %s7627_s20  ;;  %4801 = vrot.lane.b32.xlu0 %v10109_v29, %s7627_s20  ;;  %v10313_v59 = vpop.permute.xlu1 %3716 }
 0xdfa   : > { %5129 = vrot.lane.b32.xlu1 %v10286_v6, %s7628_s16  ;;  %5121 = vrot.lane.b32.xlu0 %v10281_v13, %s7628_s16 }
 0xdfe   : > { %7188 = vrot.lane.b32.xlu1 %v10292_v27, %s7634_s26  ;;  %5123 = vrot.lane.b32.xlu0 %v10299_v37, %s7628_s16 }
 0xe02   : > { %7198 = vrot.lane.b32.xlu1 %v10305_v52, %s7634_s26 }
 0xe06   : > { %4803 = vrot.lane.b32.xlu1 %v10115_v42, %s7627_s20 }
 0xe0a   : > { %4807 = vrot.lane.b32.xlu1 %v10120_v51, %s7627_s20 }
 0xe50   : > { %v5134_v1 = vpop.permute.xlu1 %5133 }
 0xe51   : > { %v10317_v47 = vsel %vm11571_vm3, %v5134_v1, %v5110_v12 }
 0xe52   : > { %5173 = vrot.lane.b32.xlu0 %v10317_v47, %s7631_s11 }
 0xe54   : > { %v3997_v48 = vpop.permute.xlu1 %3996  ;;  %v5126_v1 = vpop.permute.xlu0 %5125 }
 0xe55   : > { %v10352_v23 = vsel %vm8282_vm8, %v5126_v1, %v10230_v9 }
 0xe56   : > { %11572 = vst [vmem:[#allocation58_spill] sm:$0xff] %v10352_v23 }
 0xe58   : > { %v4810_v5 = vpop.permute.xlu1 %4809 }
 0xe59   : > { %v10324_v7 = vsel %vm11567_vm9, %v4810_v5, %v10118_v62  ;;  %v10345_v5 = vpop.permute.xlu0 %5131 }
 0xe5a   : > { %4849 = vrot.lane.b32.xlu1 %v10324_v7, %s7628_s16 }
 0xe5c   : > { %v4812_v57 = vpop.permute.xlu1 %4811 }
 0xe5d   : > { %v10333_v12 = vsel %vm11563_vm10, %v4812_v57, %v10128_v35  ;;  %v7194_v8 = vpop.permute.xlu0 %7193  ;;  %vm11574_vm10 = vcmask 523264   ;;  %v11595_v20 = vld [vmem:[#allocation58_spill] sm:$0xff] }
 0xe5e   : > { %5079 = vrot.lane.b32.xlu1 %v10132_v43, %s7627_s20  ;;  %v7195_v57 = vunpack.i.l.bf16 %v7194_v8  ;;  %vm11575_vm9 = vmmov %vm11574_vm10 }
 0xe5f   : > { %vm11576_vm2 = vmmov %vm11575_vm9 }
 0xe60   : > { %v4854_v25 = vpop.permute.xlu1 %4853  ;;  %vm11586_vm6 = vmmov %vm11576_vm2 }
 0xe61   : > { %v10341_v62 = vsel %vm11571_vm3, %v4854_v25, %v4830_v53  ;;  %v7196_v53 = vunpack.i.h.bf16 %v7194_v8  ;;  %v7204_v29 = vpop.permute.xlu0 %7203  ;;  %vm11573_vm3 = vnez %v11399_v39  ;;  %vm11587_vm0 = vmmov %vm11576_vm2 }
 0xe62   : > { %4851 = vrot.lane.b32.xlu1 %v10333_v12, %s7628_s16  ;;  %v7206_v45 = vunpack.i.h.bf16 %v7204_v29 }
 0xe63   : > { %v6997_v13 = vpack.c.bf16 %v7196_v53, %v7195_v57  ;;  %v4183_v53 = vadd.f32 %v10107_v10, %v10221_v61  ;;  %v7368_v10 = vld [vmem:[%s7925_s23] sm:$0xff] }
 0xe64   : > { %v10337_v15 = vpop.permute.xlu1 %4531 }
 0xe66   : > { %4893 = vrot.lane.b32.xlu1 %v10341_v62, %s7631_s11 }
 0xe68   : > { %v10347_v52 = vpop.permute.xlu1 %5087 }
 0xe6a   : > { %5165 = vrot.lane.b32.xlu1 %v10352_v23, %s7631_s11  ;;  %v7205_v23 = vunpack.i.l.bf16 %v7204_v29 }
 0xe6c   : > { %v10356_v35 = vpop.permute.xlu1 %5129 }
 0xe70   : > { %v7189_v25 = vpop.permute.xlu1 %7188  ;;  %4014 = vxpose.xlu0.b32.start [1/8] (short) (narrow) %v10174_v3, 64  ;;  %v7005_v3 = vpack.c.bf16 %v7206_v45, %v7205_v23  ;;  %v10372_v45 = vpop.permute.xlu0 %4845  ;;  %v4178_v23 = vadd.f32 %v10101_v44, %v10217_v30 }
 0xe71   : > { %v7191_v55 = vunpack.i.h.bf16 %v7189_v25  ;;  %v7190_v27 = vunpack.i.l.bf16 %v7189_v25  ;;  %v4188_v25 = vadd.f32 %v10105_v24, %v10313_v59  ;;  %v10445_v24 = vsel %vm11385_vm1, %v10347_v52, %v10141_v33 }
 0xe73   : > { %v6993_v37 = vpack.c.bf16 %v7191_v55, %v7190_v27 }
 0xe74   : > { %v7199_v2 = vpop.permute.xlu1 %7198  ;;  %4015 = vxpose.xlu0.b32.cont [2/8] (short) (narrow) %v10176_v34, 64 }
 0xe75   : > { %v7201_v9 = vunpack.i.h.bf16 %v7199_v2  ;;  %v7200_v1 = vunpack.i.l.bf16 %v7199_v2  ;;  %6994 = vmatprep.subr.bf16.mxu0 %v6993_v37  ;;  %v10365_v2 = vpack.c.bf16 %v9942_v11, %v9890_v18  ;;  %v4153_v11 = vadd.f32 %v10095_v26, %v10211_v46 }
 0xe76   : > { %6996 = vmatpush3.bf16.msra.mxu0 %v6993_v37 }
 0xe77   : > { %6998 = vmatprep.subr.bf16.mxu0 %v6997_v13  ;;  %v7001_v4 = vpack.c.bf16 %v7201_v9, %v7200_v1 }
 0xe78   : > { %4016 = vxpose.xlu0.b32.cont [3/8] (short) (narrow) %v10178_v36, 64  ;;  %v10449_v59 = vpop.permute.xlu1 %4803 }
 0xe79   : > { %v10561_v40 = vsel %vm11489_vm15, %v10449_v59, %v10115_v42  ;;  %v11602_v59 = vld [vmem:[#allocation26_spill] sm:$0xff]  ;;  %vm11608_vm15 = vmmov %vm11587_vm0 }
 0xe7a   : > { %7000 = vmatpush3.bf16.msra.mxu0 %v6997_v13  ;;  %v4163_v13 = vadd.f32 %v10099_v28, %v10215_v17  ;;  %v4173_v17 = vadd.f32 %v10103_v16, %v10219_v31 }
 0xe7b   : > { %7002 = vmatprep.subr.bf16.mxu0 %v7001_v4 }
 0xe7c   : > { %4017 = vxpose.xlu0.b32.cont [4/8] (short) (narrow) %v10184_v38, 64 }
 0xe7e   : > { %7004 = vmatpush3.bf16.msra.mxu0 %v7001_v4  ;;  %v10374_v4 = vpop.permute.xlu0 %4801 }
 0xe7f   : > { %7006 = vmatprep.subr.bf16.mxu0 %v7005_v3 }
 0xe80   : > { %4018 = vxpose.xlu0.b32.cont [5/8] (short) (narrow) %v10180_v41, 64 }
 0xe82   : > { %7008 = vmatpush3.bf16.msra.mxu0 %v7005_v3  ;;  %v10376_v29 = vpop.permute.xlu0 %5121 }
 0xe83   : > { %7019 = vmatprep.subr.msk.bf16.mxu0 %vm11573_vm3, %v10365_v2  ;;  %vm11577_vm3 = vmmov %vm11576_vm2 }
 0xe84   : > { %4019 = vxpose.xlu0.b32.cont [6/8] (short) (narrow) %v10187_v32, 64 }
 0xe86   : > { %v10378_v34 = vpop.permute.xlu0 %5123 }
 0xe88   : > { %4020 = vxpose.xlu0.b32.cont [7/8] (short) (narrow) %v10257_v14, 64  ;;  %v4158_v14 = vadd.f32 %v10093_v54, %v10209_v19  ;;  %v4168_v54 = vadd.f32 %v10097_v0, %v10213_v60 }
 0xe8c   : > { %4021 = vxpose.xlu0.b32.end [8/8] (short) (narrow) %v3997_v48, 64 }
 0xec4   : > { %v10380_v18 = vpop.permute.xlu0 %5173 }
 0xef0   : > { %v4030_v36 = vpop.trf.xlu0 }
 0xef1   : > { %v4191_v41 = vadd.f32 %v4153_v11, %v4030_v36  ;;  %v4534_v11 = vadd.f32 %v7368_v10, %v10337_v15 }
 0xef3   : > { %6227 = vst.msk [vmem:[%s8925_s1 + $0x80] sm:$0xff] %vm11574_vm10, %v4191_v41  ;;  %v4208_v38 = vsel %vm11575_vm9, %v4191_v41, -inf  ;;  %vm11578_vm10 = vmmov %vm11576_vm2  ;;  %v4542_v36 = vmul.f32 0.17677669, %v4534_v11 }
 0xef4   : > { %v4031_v32 = vpop.trf.xlu0  ;;  %4209 = vmax.xlane.f32.xlu1 %v4208_v38  ;;  %vm11579_vm9 = vmmov %vm11576_vm2 }
 0xef5   : > { %v4192_v55 = vadd.f32 %v4158_v14, %v4031_v32  ;;  %v10451_v14 = vpop.permute.xlu1 %4807 }
 0xef7   : > { %6228 = vst.msk [vmem:[%s8925_s1 + $0x88] sm:$0xff] %vm11576_vm2, %v4192_v55  ;;  %v4211_v26 = vsel %vm11577_vm3, %v4192_v55, -inf  ;;  %vm11580_vm3 = vmmov %vm11576_vm2 }
 0xef8   : > { %v4032_v46 = vpop.trf.xlu0  ;;  %4212 = vmax.xlane.f32.xlu1 %v4211_v26 }
 0xef9   : > { %v10394_v27 = vadd.f32 %v4163_v13, %v4032_v46  ;;  %v10453_v38 = vpop.permute.xlu1 %4849 }
 0xefb   : > { %6229 = vst.msk [vmem:[%s8925_s1 + $0x90] sm:$0xff] %vm11578_vm10, %v10394_v27  ;;  %v4214_v19 = vsel %vm11579_vm9, %v10394_v27, -inf  ;;  %vm11581_vm10 = vmmov %vm11576_vm2 }
 0xefc   : > { %v4033_v37 = vpop.trf.xlu0  ;;  %4215 = vmax.xlane.f32.xlu1 %v4214_v19  ;;  %vm11582_vm9 = vmmov %vm11576_vm2 }
 0xefd   : > { %v10403_v28 = vadd.f32 %v4168_v54, %v4033_v37  ;;  %v10455_v32 = vpop.permute.xlu1 %5079 }
 0xefe   : > { %v10591_v42 = vsel %vm11535_vm5, %v10455_v32, %v10132_v43  ;;  %v11599_v43 = vld [vmem:[#allocation31_spill] sm:$0xff]  ;;  %v11604_v32 = vld [vmem:[#allocation48_spill] sm:$0xff] }
 0xeff   : > { %6230 = vst.msk [vmem:[%s8925_s1 + $0x98] sm:$0xff] %vm11576_vm2, %v10403_v28  ;;  %v4217_v0 = vsel %vm11580_vm3, %v10403_v28, -inf  ;;  %vm11583_vm3 = vmmov %vm11576_vm2 }
 0xf00   : > { %v4034_v60 = vpop.trf.xlu0  ;;  %4218 = vmax.xlane.f32.xlu1 %v4217_v0 }
 0xf01   : > { %v10412_v48 = vadd.f32 %v4173_v17, %v4034_v60  ;;  %v10457_v13 = vpop.permute.xlu1 %4851 }
 0xf02   : > { %v10571_v49 = vsel %vm11490_vm12, %v10457_v13, %v10333_v12  ;;  %v11597_v12 = vld [vmem:[#allocation38_spill] sm:$0xff] }
 0xf03   : > { %6231 = vst.msk [vmem:[%s8925_s1 + $0xa0] sm:$0xff] %vm11581_vm10, %v10412_v48  ;;  %v4220_v16 = vsel %vm11582_vm9, %v10412_v48, -inf  ;;  %vm11584_vm10 = vmmov %vm11576_vm2 }
 0xf04   : > { %v4035_v31 = vpop.trf.xlu0  ;;  %4221 = vmax.xlane.f32.xlu1 %v4220_v16  ;;  %vm11585_vm9 = vmmov %vm11576_vm2 }
 0xf05   : > { %v10421_v8 = vadd.f32 %v4178_v23, %v4035_v31  ;;  %v10459_v26 = vpop.permute.xlu1 %4893 }
 0xf06   : > { %v4910_v63 = vsel %vm11502_vm11, %v10459_v26, %v10341_v62  ;;  %v11600_v62 = vld [vmem:[#allocation46_spill] sm:$0xff] }
 0xf07   : > { %6232 = vst.msk [vmem:[%s8925_s1 + $0xa8] sm:$0xff] %vm11576_vm2, %v10421_v8  ;;  %v4223_v44 = vsel %vm11583_vm3, %v10421_v8, -inf  ;;  %vm11589_vm2 = vmmov %vm11587_vm0 }
 0xf08   : > { %v4036_v30 = vpop.trf.xlu0  ;;  %4224 = vmax.xlane.f32.xlu1 %v4223_v44  ;;  %vm11590_vm3 = vmmov %vm11587_vm0 }
 0xf09   : > { %v4197_v57 = vadd.f32 %v4183_v53, %v4036_v30  ;;  %v10461_v46 = vpop.permute.xlu1 %5165  ;;  %v10477_v30 = vsel %vm11386_vm14, %v10356_v35, %v10286_v6 }
 0xf0b   : > { %6233 = vst.msk [vmem:[%s8925_s1 + $0xb0] sm:$0xff] %vm11584_vm10, %v4197_v57  ;;  %v4226_v9 = vsel %vm11585_vm9, %v4197_v57, -inf  ;;  %vm11591_vm10 = vmmov %vm11587_vm0 }
 0xf0c   : > { %v4037_v1 = vpop.trf.xlu0  ;;  %4227 = vmax.xlane.f32.xlu1 %v4226_v9  ;;  %vm11592_vm9 = vmmov %vm11587_vm0 }
 0xf0d   : > { %v4198_v3 = vadd.f32 %v4188_v25, %v4037_v1 }
 0xf0f   : > { %6234 = vst.msk [vmem:[%s8925_s1 + $0xb8] sm:$0xff] %vm11586_vm6, %v4198_v3  ;;  %v4229_v61 = vsel %vm11587_vm0, %v4198_v3, -inf  ;;  %vm11588_vm6 = vmmov %vm11587_vm0 }
 0xf10   : > { %4230 = vmax.xlane.f32.xlu0 %v4229_v61 }
 0xf1d   : > { %5391 = vrot.lane.b32.xlu1 %v4542_v36, %s7629_s24 }
 0xf26   : > { %5127 = vrot.lane.b32.xlu0 %v10445_v24, %s7628_s16 }
 0xf81   : > { %v4210_v33 = vpop.xlane.xlu1 %4209 }
 0xf82   : > { %v4232_v52 = vsub.f32 %v4191_v41, %v4210_v33  ;;  %v7369_v41 = vld [vmem:[%s7925_s23 + $0x8] sm:$0xff] }
 0xf83   : > { %v4535_v53 = vadd.f32 %v7369_v41, %v10337_v15 }
 0xf84   : > { %v4240_v54 = vmul.f32 1.442695, %v4232_v52 }
 0xf85   : > { %v4213_v19 = vpop.xlane.xlu1 %4212 }
 0xf86   : > { %7291 = vpow2.f32 %v4240_v54  ;;  %v4233_v37 = vsub.f32 %v4192_v55, %v4213_v19  ;;  %v4543_v55 = vmul.f32 0.17677669, %v4535_v53 }
 0xf88   : > { %v4242_v17 = vmul.f32 1.442695, %v4233_v37 }
 0xf89   : > { %v4216_v31 = vpop.xlane.xlu1 %4215 }
 0xf8a   : > { %7293 = vpow2.f32 %v4242_v17  ;;  %v4234_v61 = vsub.f32 %v10394_v27, %v4216_v31 }
 0xf8c   : > { %v4244_v33 = vmul.f32 1.442695, %v4234_v61  ;;  %v7371_v61 = vld [vmem:[%s7925_s23 + $0x28] sm:$0xff] }
 0xf8d   : > { %v4219_v44 = vpop.xlane.xlu1 %4218 }
 0xf8e   : > { %v4235_v1 = vsub.f32 %v10403_v28, %v4219_v44 }
 0xf90   : > { %v10463_v0 = vpop.eup %7291  ;;  %v4246_v10 = vmul.f32 1.442695, %v4235_v1 }
 0xf91   : > { %v4256_v60 = vsel %vm11587_vm0, %v10463_v0, 0.0  ;;  %v4222_v25 = vpop.xlane.xlu1 %4221 }
 0xf92   : > { %4257 = vadd.xlane.f32.xlu0 %v4256_v60  ;;  %v4236_v11 = vsub.f32 %v10412_v48, %v4222_v25  ;;  %7295 = vpow2.f32 %v4246_v10  ;;  %v7370_v25 = vld [vmem:[%s7925_s23 + $0x10] sm:$0xff]  ;;  %v4539_v10 = vadd.f32 %v7371_v61, %v10337_v15 }
 0xf93   : > { %7297 = vpow2.f32 %v4244_v33  ;;  %v7372_v33 = vld [vmem:[%s7925_s23 + $0x38] sm:$0xff] }
 0xf94   : > { %v10467_v23 = vpop.eup %7293  ;;  %v4248_v6 = vmul.f32 1.442695, %v4236_v11  ;;  %v5190_v11 = vsel %vm11502_vm11, %v10380_v18, %v10317_v47  ;;  %vm11612_vm11 = vnez %v11399_v39 }
 0xf95   : > { %v4259_v16 = vsel %vm11588_vm6, %v10467_v23, 0.0  ;;  %v4225_v9 = vpop.xlane.xlu1 %4224  ;;  %vm11593_vm6 = vmmov %vm11587_vm0 }
 0xf96   : > { %4260 = vadd.xlane.f32.xlu1 %v4259_v16  ;;  %v4237_v52 = vsub.f32 %v10421_v8, %v4225_v9  ;;  %7299 = vpow2.f32 %v4248_v6  ;;  %v4536_v9 = vadd.f32 %v7370_v25, %v10337_v15  ;;  %v7373_v6 = vld [vmem:[%s7925_s23 + $0x18] sm:$0xff] }
 0xf98   : > { %v4250_v19 = vmul.f32 1.442695, %v4237_v52  ;;  %v4544_v1 = vmul.f32 0.17677669, %v4536_v9  ;;  %v4541_v52 = vadd.f32 %v7372_v33, %v10337_v15  ;;  %v11609_v9 = vld [vmem:[#allocation39_spill] sm:$0xff] }
 0xf99   : > { %v4228_v36 = vpop.xlane.xlu1 %4227 }
 0xf9a   : > { %v4238_v35 = vsub.f32 %v4197_v57, %v4228_v36  ;;  %7301 = vpow2.f32 %v4250_v19  ;;  %v4547_v36 = vmul.f32 0.17677669, %v4539_v10  ;;  %v4549_v47 = vmul.f32 0.17677669, %v4541_v52  ;;  %v7374_v19 = vld [vmem:[%s7925_s23 + $0x20] sm:$0xff]  ;;  %v11614_v10 = vld [vmem:[#allocation43_spill] sm:$0xff] }
 0xf9c   : > { %v4252_v37 = vmul.f32 1.442695, %v4238_v35  ;;  %v10486_v27 = vpop.eup %7295  ;;  %v4537_v35 = vadd.f32 %v7373_v6, %v10337_v15 }
 0xf9d   : > { %v4231_v54 = vpop.xlane.xlu0 %4230  ;;  %v10488_v48 = vpop.eup %7297  ;;  %v4265_v8 = vsel %vm11589_vm2, %v10486_v27, 0.0  ;;  %vm11619_vm2 = vmmov %vm11587_vm0 }
 0xf9e   : > { %v4239_v17 = vsub.f32 %v4198_v3, %v4231_v54  ;;  %7303 = vpow2.f32 %v4252_v37  ;;  %v4262_v3 = vsel %vm11590_vm3, %v10488_v48, 0.0  ;;  %v10528_v54 = vsel %vm11490_vm12, %v10345_v5, %v10240_v50  ;;  %vm11611_vm12 = vmmov %vm11587_vm0 }
 0xf9f   : > { %v4545_v18 = vmul.f32 0.17677669, %v4537_v35  ;;  %v4538_v37 = vadd.f32 %v7374_v19, %v10337_v15  ;;  %v10541_v50 = vsel %vm8282_vm8, %v10372_v45, %v10267_v56  ;;  %v10577_v56 = vsel %vm11385_vm1, %v10451_v14, %v10120_v51  ;;  %vm11620_vm3 = vmmov %vm11587_vm0 }
 0xfa0   : > { %v4254_v28 = vmul.f32 1.442695, %v4239_v17  ;;  %v10492_v60 = vpop.eup %7299  ;;  %v7375_v17 = vld [vmem:[%s7925_s23 + $0x30] sm:$0xff]  ;;  %vm11601_vm1 = vnez %v11600_v62  ;;  %vm11605_vm8 = vnez %v11604_v32  ;;  %s6304_s23 = sshll.u32 %s7610_s27, 12 }
 0xfa1   : > { %v4268_v16 = vsel %vm11591_vm10, %v10492_v60, 0.0  ;;  %v4546_v5 = vmul.f32 0.17677669, %v4538_v37  ;;  %v10613_v45 = vsel %vm11601_vm1, %v10376_v29, %v11599_v43  ;;  %v10632_v29 = vpop.permute.xlu1 %5391  ;;  %vm11621_vm10 = vmmov %vm11587_vm0 }
 0xfa2   : > { %7305 = vpow2.f32 %v4254_v28  ;;  %v4540_v28 = vadd.f32 %v7375_v17, %v10337_v15  ;;  %v10604_v15 = vsel %vm11565_vm13, %v10374_v4, %v11597_v12  ;;  %v10621_v4 = vsel %vm11539_vm7, %v10378_v34, %v11602_v59  ;;  %v11606_v34 = vld [vmem:[#allocation49_spill] sm:$0xff] }
 0xfa4   : > { %v10494_v57 = vpop.eup %7301 }
 0xfa5   : > { %v4271_v41 = vsel %vm11592_vm9, %v10494_v57, 0.0  ;;  %vm11622_vm9 = vmmov %vm11587_vm0 }
 0xfa7   : > { %5393 = vrot.lane.b32.xlu1 %v4543_v55, %s7629_s24 }
 0xfa8   : > { %5169 = vrot.lane.b32.xlu0 %v10477_v30, %s7631_s11  ;;  %v10500_v31 = vpop.eup %7303 }
 0xfa9   : > { %v4274_v53 = vsel %vm11587_vm0, %v10500_v31, 0.0 }
 0xfac   : > { %v10506_v44 = vpop.eup %7305 }
 0xfad   : > { %v4277_v55 = vsel %vm11593_vm6, %v10506_v44, 0.0  ;;  %vm11623_vm6 = vmmov %vm11587_vm0 }
 0xfc7   : > { %4266 = vadd.xlane.f32.xlu0 %v4265_v8  ;;  %v10552_v8 = vsel %vm11386_vm14, %v10453_v38, %v10324_v7  ;;  %v5186_v7 = vsel %vm8522_vm4, %v10461_v46, %v11595_v20  ;;  %v5128_v38 = vpop.permute.xlu0 %5127  ;;  %vm11607_vm14 = vnez %v11606_v34  ;;  %v11630_v34 = vld [vmem:[#allocation50_spill] sm:$0xff] }
 0xfc8   : > { %v10628_v13 = vsel %vm11605_vm8, %v5128_v38, %v10445_v24 }
 0xfcb   : > { %4263 = vadd.xlane.f32.xlu1 %v4262_v3  ;;  %4269 = vadd.xlane.f32.xlu0 %v4268_v16  ;;  %v4548_v3 = vmul.f32 0.17677669, %v4540_v28 }
 0xfcf   : > { %4272 = vadd.xlane.f32.xlu0 %v4271_v41  ;;  %4275 = vadd.xlane.f32.xlu1 %v4274_v53 }
 0xfd3   : > { %4278 = vadd.xlane.f32.xlu0 %v4277_v55 }
 0xfe0   : > { %5395 = vrot.lane.b32.xlu1 %v4544_v1, %s7629_s24  ;;  %v11610_v1 = vld [vmem:[#allocation41_spill] sm:$0xff] }
 0xfe1   : > { %v7023_v61 = vpack.c.bf16 %v11610_v1, %v11609_v9 }
 0xfe4   : > { %5213 = vrot.lane.b32.xlu1 %v5190_v11, %s7632_s13  ;;  %v11616_v11 = vld [vmem:[#allocation33_spill] sm:$0xff] }
 0xfe8   : > { %5401 = vrot.lane.b32.xlu1 %v4547_v36, %s7629_s24 }
 0xfe9   : > { %5171 = vrot.lane.b32.xlu0 %v10528_v54, %s7631_s11 }
 0xfec   : > { %5405 = vrot.lane.b32.xlu1 %v4549_v47, %s7629_s24 }
 0xfed   : > { %5397 = vrot.lane.b32.xlu0 %v4545_v18, %s7629_s24 }
 0xff0   : > { %4885 = vrot.lane.b32.xlu1 %v10541_v50, %s7631_s11 }
 0xff1   : > { %5399 = vrot.lane.b32.xlu0 %v4546_v5, %s7629_s24 }
 0xff4   : > { %4889 = vrot.lane.b32.xlu1 %v10552_v8, %s7631_s11 }
 0xff5   : > { %5403 = vrot.lane.b32.xlu0 %v4548_v3, %s7629_s24  ;;  %v11617_v3 = vld [vmem:[#allocation52_spill] sm:$0xff] }
 0xff6   : > { %vm11618_vm13 = vnez %v11617_v3 }
 0xff8   : > { %4799 = vrot.lane.b32.xlu1 %v10111_v21, %s7627_s20 }
 0xff9   : > { %4843 = vrot.lane.b32.xlu0 %v10561_v40, %s7628_s16 }
 0xffc   : > { %4891 = vrot.lane.b32.xlu1 %v10571_v49, %s7631_s11 }
 0xffd   : > { %4847 = vrot.lane.b32.xlu0 %v10577_v56, %s7628_s16 }
0x1000   : > { %4933 = vrot.lane.b32.xlu1 %v4910_v63, %s7632_s13 }
0x1001   : > { %5119 = vrot.lane.b32.xlu0 %v10591_v42, %s7628_s16 }
0x1004   : > { %5205 = vrot.lane.b32.xlu1 %v5186_v7, %s7632_s13 }
0x1005   : > { %4841 = vrot.lane.b32.xlu0 %v10604_v15, %s7628_s16 }
0x1009   : > { %5161 = vrot.lane.b32.xlu0 %v10613_v45, %s7631_s11 }
0x100d   : > { %5163 = vrot.lane.b32.xlu0 %v10621_v4, %s7631_s11 }
0x1011   : > { %5167 = vrot.lane.b32.xlu0 %v10628_v13, %s7631_s11 }
0x101f   : > { %v4258_v26 = vpop.xlane.xlu0 %4257 }
0x1020   : > { %7307 = vrcp.f32 %v4258_v26 }
0x1023   : > { %v5170_v46 = vpop.permute.xlu0 %5169  ;;  %v4261_v16 = vpop.xlane.xlu1 %4260 }
0x1024   : > { %v5188_v41 = vsel %vm11607_vm14, %v5170_v46, %v10477_v30  ;;  %7309 = vrcp.f32 %v4261_v16  ;;  %v11613_v30 = vld [vmem:[#allocation40_spill] sm:$0xff] }
0x1025   : > { %5209 = vrot.lane.b32.xlu1 %v5188_v41, %s7632_s13 }
0x102a   : > { %v7308_v53 = vpop.eup %7307 }
0x102b   : > { %v4288_v24 = vmul.f32 %v7308_v53, %v10463_v0  ;;  %v7029_v0 = vpack.c.bf16 %v11614_v10, %v11613_v30  ;;  %v11638_v30 = vld [vmem:[#allocation54_spill] sm:$0xff] }
0x102d   : > { %6765 = vmatprep.mubr.msk.f32.mxu0 %vm11608_vm15, %v4288_v24  ;;  %vm11624_vm15 = vcmask 261120  }
0x102e   : > { %v7310_v55 = vpop.eup %7309 }
0x102f   : > { %v4289_v25 = vmul.f32 %v7310_v55, %v10467_v23  ;;  %v11615_v23 = vld [vmem:[#allocation57_spill] sm:$0xff] }
0x1030   : > { %v7035_v36 = vpack.c.bf16 %v11616_v11, %v11615_v23 }
0x1031   : > { %6766 = vmatmul.mubr.msk.f32.vlgmr.msra.gmra.mrb[48].mxu0 %vm11611_vm12, %v4289_v25  ;;  %vm11625_vm12 = vmmov %vm11624_vm15 }
0x1032   : > { %7022 = vmatpush3.bf16.xpose.msk.msra.mxu0 %vm11612_vm11, %v10365_v2  ;;  %v5394_v2 = vpop.permute.xlu1 %5393 }
0x1033   : > { %7025 = vmatprep.subr.msk.bf16.mxu0 %vm11612_vm11, %v7023_v61 }
0x103a   : > { %7028 = vmatpush3.bf16.xpose.msk.msra.mxu0 %vm11612_vm11, %v7023_v61  ;;  %v11636_v61 = vld [vmem:[#allocation51_spill] sm:$0xff] }
0x103b   : > { %7031 = vmatprep.subr.msk.bf16.mxu0 %vm11612_vm11, %v7029_v0 }
0x1042   : > { %7034 = vmatpush3.bf16.xpose.msk.msra.mxu0 %vm11612_vm11, %v7029_v0 }
0x1043   : > { %7037 = vmatprep.subr.msk.bf16.mxu0 %vm11612_vm11, %v7035_v36 }
0x104a   : > { %7040 = vmatpush3.bf16.xpose.msk.msra.mxu0 %vm11612_vm11, %v7035_v36  ;;  %vm11626_vm11 = vmmov %vm11625_vm12 }
0x1054   : > { %v4267_v33 = vpop.xlane.xlu0 %4266 }
0x1055   : > { %7311 = vrcp.f32 %v4267_v33 }
0x1058   : > { %v4270_v52 = vpop.xlane.xlu0 %4269  ;;  %v4264_v6 = vpop.xlane.xlu1 %4263 }
0x1059   : > { %7313 = vrcp.f32 %v4270_v52 }
0x105a   : > { %7315 = vrcp.f32 %v4264_v6 }
0x105c   : > { %v4273_v35 = vpop.xlane.xlu0 %4272  ;;  %v4276_v47 = vpop.xlane.xlu1 %4275 }
0x105d   : > { %7317 = vrcp.f32 %v4273_v35 }
0x105e   : > { %7319 = vrcp.f32 %v4276_v47  ;;  %v11640_v47 = vld [vmem:[#allocation55_spill] sm:$0xff] }
0x105f   : > { %v7312_v37 = vpop.eup %7311 }
0x1060   : > { %v4279_v18 = vpop.xlane.xlu0 %4278  ;;  %v5396_v19 = vpop.permute.xlu1 %5395  ;;  %v4291_v7 = vmul.f32 %v7312_v37, %v10486_v27 }
0x1061   : > { %7321 = vrcp.f32 %v4279_v18 }
0x1063   : > { %v7314_v5 = vpop.eup %7313 }
0x1064   : > { %v7316_v17 = vpop.eup %7315  ;;  %v5172_v28 = vpop.permute.xlu0 %5171  ;;  %v4292_v58 = vmul.f32 %v7314_v5, %v10492_v60 }
0x1065   : > { %v5214_v39 = vpop.permute.xlu1 %5213  ;;  %v5189_v63 = vsel %vm11618_vm13, %v5172_v28, %v10528_v54  ;;  %v4290_v20 = vmul.f32 %v7316_v17, %v10488_v48 }
0x1066   : > { %5253 = vrot.lane.b32.xlu1 %v5214_v39, %s7633_s6  ;;  %5251 = vrot.lane.b32.xlu0 %v5189_v63, %s7633_s6 }
0x1067   : > { %v7318_v12 = vpop.eup %7317  ;;  %6768 = vmatprep.mubr.msk.f32.mxu0 %vm11619_vm2, %v4290_v20 }
0x1068   : > { %v7320_v43 = vpop.eup %7319  ;;  %6769 = vmatmul.mubr.msk.f32.gmra.mrb[50].mxu0 %vm11620_vm3, %v4291_v7  ;;  %v5398_v59 = vpop.permute.xlu0 %5397  ;;  %v4293_v54 = vmul.f32 %v7318_v12, %v10494_v57 }
0x1069   : > { %v5402_v38 = vpop.permute.xlu1 %5401  ;;  %6771 = vmatprep.mubr.msk.f32.mxu0 %vm11621_vm10, %v4292_v58  ;;  %v4294_v48 = vmul.f32 %v7320_v43, %v10500_v31  ;;  %vm11641_vm10 = vnez %v11640_v47 }
0x106b   : > { %v7322_v26 = vpop.eup %7321 }
0x106c   : > { %6772 = vmatmul.mubr.msk.f32.gmra.mrb[52].mxu0 %vm11622_vm9, %v4293_v54  ;;  %v5400_v27 = vpop.permute.xlu0 %5399  ;;  %v4295_v16 = vmul.f32 %v7322_v26, %v10506_v44  ;;  %vm11642_vm9 = vmmov %vm11587_vm0 }
0x106d   : > { %v5406_v46 = vpop.permute.xlu1 %5405  ;;  %6774 = vmatprep.mubr.msk.f32.mxu0 %vm11587_vm0, %v4294_v48 }
0x1070   : > { %6775 = vmatmul.mubr.msk.f32.gmra.mrb[54].mxu0 %vm11623_vm6, %v4295_v16  ;;  %v5404_v60 = vpop.permute.xlu0 %5403  ;;  %vm11643_vm6 = vmmov %vm11587_vm0 }
0x1071   : > { %v4886_v41 = vpop.permute.xlu1 %4885  ;;  %6825 = vmatprep.mubr.msk.f32.mxu0 %vm11624_vm15, %v10632_v29  ;;  %vm11644_vm15 = vmmov %vm11587_vm0 }
0x1072   : > { %v4906_v57 = vsel %vm8522_vm4, %v4886_v41, %v10541_v50  ;;  %vm11627_vm4 = vmmov %vm11626_vm11 }
0x1073   : > { %4925 = vrot.lane.b32.xlu1 %v4906_v57, %s7632_s13  ;;  %vm11628_vm2 = vmmov %vm11627_vm4 }
0x1074   : > { %6826 = vmatmul.mubr.msk.f32.vlgmr.msra.gmra.mrb[56].mxu0 %vm11625_vm12, %v5394_v2  ;;  %v4844_v31 = vpop.permute.xlu0 %4843  ;;  %vm11632_vm3 = vmmov %vm11628_vm2 }
0x1075   : > { %v4890_v53 = vpop.permute.xlu1 %4889  ;;  %v4865_v44 = vsel %vm11539_vm7, %v4844_v31, %v10561_v40  ;;  %6828 = vmatprep.mubr.msk.f32.mxu0 %vm11626_vm11, %v5396_v19  ;;  %vm11629_vm7 = vmmov %vm11628_vm2 }
0x1076   : > { %v4908_v29 = vsel %vm11607_vm14, %v4890_v53, %v10552_v8  ;;  %4883 = vrot.lane.b32.xlu0 %v4865_v44, %s7631_s11  ;;  %vm11631_vm14 = vnez %v11630_v34  ;;  %vm11645_vm12 = vmmov %vm11587_vm0 }
0x1077   : > { %4929 = vrot.lane.b32.xlu1 %v4908_v29, %s7632_s13  ;;  %vm11646_vm11 = vmmov %vm11587_vm0 }
0x1078   : > { %6829 = vmatmul.mubr.msk.f32.gmra.mrb[58].mxu0 %vm11627_vm4, %v5398_v59  ;;  %v4848_v50 = vpop.permute.xlu0 %4847  ;;  %vm11647_vm4 = vmmov %vm11587_vm0 }
0x1079   : > { %v4800_v51 = vpop.permute.xlu1 %4799  ;;  %v4867_v24 = vsel %vm11605_vm8, %v4848_v50, %v10577_v56  ;;  %6831 = vmatprep.mubr.msk.f32.mxu0 %vm11628_vm2, %v5400_v27 }
0x107a   : > { %v4823_v40 = vsel %vm11535_vm5, %v4800_v51, %v10111_v21  ;;  %4887 = vrot.lane.b32.xlu0 %v4867_v24, %s7631_s11  ;;  %vm11633_vm5 = vmmov %vm11628_vm2 }
0x107b   : > { %4839 = vrot.lane.b32.xlu1 %v4823_v40, %s7628_s16  ;;  %vm11649_vm2 = vmmov %vm11587_vm0  ;;  %s10974_s16 = scalar_lea.hbm %s11093_s7, %s6304_s23 }
0x107c   : > { %6832 = vmatmul.mubr.msk.f32.gmra.mrb[60].mxu0 %vm11629_vm7, %v5402_v38  ;;  %v5120_v8 = vpop.permute.xlu0 %5119  ;;  %vm11650_vm7 = vmmov %vm11587_vm0 }
0x107d   : > { %v4892_v14 = vpop.permute.xlu1 %4891  ;;  %v5143_v55 = vsel %vm11631_vm14, %v5120_v8, %v10591_v42  ;;  %6834 = vmatprep.mubr.msk.f32.mxu0 %vm11632_vm3, %v5404_v60  ;;  %vm11656_vm3 = vmmov %vm11587_vm0 }
0x107e   : > { %v4909_v56 = vsel %vm11618_vm13, %v4892_v14, %v10571_v49  ;;  %5159 = vrot.lane.b32.xlu0 %v5143_v55, %s7631_s11  ;;  %v11634_v49 = vld [vmem:[#allocation53_spill] sm:$0xff]  ;;  %vm11637_vm13 = vnez %v11636_v61 }
0x107f   : > { %4971 = vrot.lane.b32.xlu1 %v4909_v56, %s7633_s6  ;;  %vm11635_vm8 = vnez %v11634_v49 }
0x1080   : > { %6835 = vmatmul.mubr.msk.f32.gmra.mrb[62].mxu0 %vm11633_vm5, %v5406_v46  ;;  %v4842_v21 = vpop.permute.xlu0 %4841  ;;  %vm11657_vm5 = vmmov %vm11587_vm0 }
0x1081   : > { %v4934_v22 = vpop.permute.xlu1 %4933  ;;  %v4864_v32 = vsel %vm11601_vm1, %v4842_v21, %v10604_v15  ;;  %vm11639_vm1 = vnez %v11638_v30 }
0x1082   : > { %4881 = vrot.lane.b32.xlu0 %v4864_v32, %s7631_s11 }
0x1083   : > { %4973 = vrot.lane.b32.xlu1 %v4934_v22, %s7633_s6 }
0x1084   : > { %v5162_v42 = vpop.permute.xlu0 %5161 }
0x1085   : > { %v5206_v25 = vpop.permute.xlu1 %5205  ;;  %v5184_v9 = vsel %vm11635_vm8, %v5162_v42, %v10613_v45 }
0x1086   : > { %5201 = vrot.lane.b32.xlu0 %v5184_v9, %s7632_s13 }
0x1087   : > { %5245 = vrot.lane.b32.xlu1 %v5206_v25, %s7633_s6 }
0x1088   : > { %v5164_v1 = vpop.permute.xlu0 %5163 }
0x1089   : > { %v5185_v62 = vsel %vm11637_vm13, %v5164_v1, %v10621_v4 }
0x108a   : > { %5243 = vrot.lane.b32.xlu0 %v5185_v62, %s7633_s6 }
0x108c   : > { %v5168_v15 = vpop.permute.xlu0 %5167 }
0x108d   : > { %v5187_v10 = vsel %vm11639_vm1, %v5168_v15, %v10628_v13 }
0x108e   : > { %5287 = vrot.lane.b32.xlu0 %v5187_v10, %s7629_s24 }
0x1097   : > { %v5210_v0 = vpop.permute.xlu1 %5209 }
0x1098   : > { %5289 = vrot.lane.b32.xlu1 %v5210_v0, %s7629_s24 }
0x10d8   : > { %v5254_v45 = vpop.permute.xlu1 %5253  ;;  %v5252_v23 = vpop.permute.xlu0 %5251 }
0x10d9   : > { %5293 = vrot.lane.b32.xlu1 %v5254_v45, %s7629_s24  ;;  %5291 = vrot.lane.b32.xlu0 %v5252_v23, %s7629_s24 }
0x10e5   : > { %v4926_v11 = vpop.permute.xlu1 %4925 }
0x10e6   : > { %4965 = vrot.lane.b32.xlu1 %v4926_v11, %s7633_s6 }
0x10e8   : > { %v4884_v4 = vpop.permute.xlu0 %4883 }
0x10e9   : > { %v4930_v36 = vpop.permute.xlu1 %4929  ;;  %v4905_v2 = vsel %vm11637_vm13, %v4884_v4, %v4865_v44  ;;  %vm11659_vm13 = vmmov %vm11587_vm0 }
0x10ea   : > { %5009 = vrot.lane.b32.xlu1 %v4930_v36, %s7629_s24  ;;  %4963 = vrot.lane.b32.xlu0 %v4905_v2, %s7633_s6 }
0x10ec   : > { %v4888_v13 = vpop.permute.xlu0 %4887 }
0x10ed   : > { %v4840_v33 = vpop.permute.xlu1 %4839  ;;  %v4907_v52 = vsel %vm11639_vm1, %v4888_v13, %v4867_v24  ;;  %vm11660_vm1 = vmmov %vm11587_vm0 }
0x10ee   : > { %v4863_v6 = vsel %vm11631_vm14, %v4840_v33, %v4823_v40  ;;  %5007 = vrot.lane.b32.xlu0 %v4907_v52, %s7629_s24  ;;  %vm11652_vm14 = vmmov %vm11587_vm0 }
0x10ef   : > { %4879 = vrot.lane.b32.xlu1 %v4863_v6, %s7631_s11  ;;  %s5841_s11 = scalar_lea.sflag [#allocation12], %s7918_s8 }
0x10f0   : > { %v5160_v35 = vpop.permute.xlu0 %5159 }
0x10f1   : > { %v5183_v18 = vsel %vm11641_vm10, %v5160_v35, %v5143_v55  ;;  %v4972_v19 = vpop.permute.xlu1 %4971 }
0x10f2   : > { %5319 = vrot.lane.b32.xlu0 %v5183_v18, %s7634_s26 }
0x10f4   : > { %v4882_v37 = vpop.permute.xlu0 %4881 }
0x10f5   : > { %v4904_v17 = vsel %vm11635_vm8, %v4882_v37, %v4864_v32  ;;  %v4974_v28 = vpop.permute.xlu1 %4973  ;;  %vm11658_vm8 = vmmov %vm11587_vm0 }
0x10f6   : > { %5011 = vrot.lane.b32.xlu0 %v4972_v19, %s7629_s24 }
0x10f8   : > { %v5202_v5 = vpop.permute.xlu0 %5201 }
0x10f9   : > { %5321 = vrot.lane.b32.xlu1 %v5202_v5, %s7634_s26  ;;  %v5246_v3 = vpop.permute.xlu1 %5245 }
0x10fa   : > { %4921 = vrot.lane.b32.xlu0 %v4904_v17, %s7632_s13 }
0x10fc   : > { %v5244_v39 = vpop.permute.xlu0 %5243 }
0x10fd   : > { %5013 = vrot.lane.b32.xlu1 %v4974_v28, %s7629_s24 }
0x10fe   : > { %5323 = vrot.lane.b32.xlu0 %v5244_v39, %s7634_s26 }
0x1100   : > { %v5288_v63 = vpop.permute.xlu0 %5287 }
0x1101   : > { %5325 = vrot.lane.b32.xlu1 %v5246_v3, %s7634_s26 }
0x1102   : > { %5327 = vrot.lane.b32.xlu0 %v5288_v63, %s7634_s26 }
0x1104   : > { %v10761_v20 = vpop.f32.mrb[48].mxu0 }
0x1105   : > { %v10763_v7 = vpop.f32.mrb[49].mxu0 }
0x110a   : > { %v5290_v12 = vpop.permute.xlu1 %5289 }
0x110b   : > { %5329 = vrot.lane.b32.xlu1 %v5290_v12, %s7634_s26  ;;  %v11648_v12 = vld [vmem:[#allocation36_spill] sm:$0xff] }
0x113b   : > { %v10766_v58 = vpop.f32.mrb[50].mxu0 }
0x113c   : > { %v10768_v43 = vpop.f32.mrb[51].mxu0 }
0x113f   : > { %v10770_v59 = vpop.f32.mrb[52].mxu0 }
0x1140   : > { %v10772_v38 = vpop.f32.mrb[53].mxu0 }
0x1143   : > { %v10774_v54 = vpop.f32.mrb[54].mxu0 }
0x1144   : > { %v10776_v26 = vpop.f32.mrb[55].mxu0 }
0x1147   : > { %v6827_v48 = vpop.f32.mrb[56].mxu0 }
0x1148   : > { %v5489_v27 = vpop.f32.mrb[57].mxu0 }
0x114b   : > { %v6830_v46 = vpop.f32.mrb[58].mxu0  ;;  %v5294_v57 = vpop.permute.xlu1 %5293 }
0x114c   : > { %v5499_v16 = vpop.f32.mrb[59].mxu0  ;;  %v5292_v29 = vpop.permute.xlu0 %5291 }
0x114f   : > { %v6833_v60 = vpop.f32.mrb[60].mxu0 }
0x1150   : > { %v5509_v41 = vpop.f32.mrb[61].mxu0 }
0x1153   : > { %v10778_v31 = vpop.f32.mrb[62].mxu0 }
0x1154   : > { %v5519_v53 = vpop.f32.mrb[63].mxu0 }
0x1158   : > { %v4966_v44 = vpop.permute.xlu1 %4965 }
0x1159   : > { %5045 = vrot.lane.b32.xlu1 %v4966_v44, %s7634_s26  ;;  %v11654_v44 = vld [vmem:[#allocation35_spill] sm:$0xff] }
0x115c   : > { %v5010_v50 = vpop.permute.xlu1 %5009  ;;  %v4964_v51 = vpop.permute.xlu0 %4963 }
0x115d   : > { %5049 = vrot.lane.b32.xlu1 %v5010_v50, %s7634_s26  ;;  %5043 = vrot.lane.b32.xlu0 %v4964_v51, %s7634_s26 }
0x1160   : > { %v5008_v24 = vpop.permute.xlu0 %5007 }
0x1161   : > { %v4880_v40 = vpop.permute.xlu1 %4879  ;;  %5047 = vrot.lane.b32.xlu0 %v5008_v24, %s7634_s26 }
0x1162   : > { %v4903_v8 = vsel %vm11641_vm10, %v4880_v40, %v4863_v6  ;;  %vm11661_vm10 = vmmov %vm11587_vm0 }
0x1164   : > { %v5320_v14 = vpop.permute.xlu0 %5319 }
0x1165   : > { %5039 = vrot.lane.b32.xlu0 %v4903_v8, %s7634_s26 }
0x1168   : > { %v5012_v34 = vpop.permute.xlu0 %5011 }
0x1169   : > { %5051 = vrot.lane.b32.xlu1 %v5012_v34, %s7634_s26  ;;  %5331 = vrot.lane.b32.xlu0 %v5292_v29, %s7634_s26 }
0x116b   : > { %v5322_v55 = vpop.permute.xlu1 %5321 }
0x116c   : > { %v4922_v56 = vpop.permute.xlu0 %4921 }
0x116d   : > { %5333 = vrot.lane.b32.xlu1 %v5294_v57, %s7634_s26  ;;  %5041 = vrot.lane.b32.xlu0 %v4922_v56, %s7634_s26  ;;  %v11651_v57 = vld [vmem:[#allocation45_spill] sm:$0xff] }
0x116f   : > { %v5014_v21 = vpop.permute.xlu1 %5013 }
0x1170   : > { %v5324_v22 = vpop.permute.xlu0 %5323 }
0x1171   : > { %5053 = vrot.lane.b32.xlu1 %v5014_v21, %s7634_s26 }
0x1173   : > { %v5326_v32 = vpop.permute.xlu1 %5325 }
0x1174   : > { %v5328_v42 = vpop.permute.xlu0 %5327 }
0x117d   : > { %v5330_v25 = vpop.permute.xlu1 %5329 }
0x118b   : > { %5351 = vxpose.xlu0.b32.start [1/8] (short) (narrow) %v5320_v14, 64 }
0x118f   : > { %5352 = vxpose.xlu0.b32.cont [2/8] (short) (narrow) %v5322_v55, 64 }
0x1193   : > { %5353 = vxpose.xlu0.b32.cont [3/8] (short) (narrow) %v5324_v22, 64 }
0x1197   : > { %5354 = vxpose.xlu0.b32.cont [4/8] (short) (narrow) %v5326_v32, 64 }
0x119b   : > { %5355 = vxpose.xlu0.b32.cont [5/8] (short) (narrow) %v5328_v42, 64 }
0x119f   : > { %5356 = vxpose.xlu0.b32.cont [6/8] (short) (narrow) %v5330_v25, 64 }
0x11cb   : > { %v5046_v49 = vpop.permute.xlu1 %5045 }
0x11cc   : > { %v5505_v9 = vadd.f32 %v6830_v46, %v5046_v49 }
0x11cf   : > { %v5050_v1 = vpop.permute.xlu1 %5049  ;;  %v5044_v62 = vpop.permute.xlu0 %5043 }
0x11d0   : > { %v5515_v61 = vadd.f32 %v6833_v60, %v5050_v1  ;;  %v5500_v15 = vadd.f32 %v5499_v16, %v5044_v62 }
0x11d3   : > { %v5048_v30 = vpop.permute.xlu0 %5047 }
0x11d4   : > { %v5510_v10 = vadd.f32 %v5509_v41, %v5048_v30 }
0x11d7   : > { %v5040_v0 = vpop.permute.xlu0 %5039 }
0x11d8   : > { %v5490_v45 = vadd.f32 %v5489_v27, %v5040_v0 }
0x11db   : > { %v5332_v23 = vpop.permute.xlu0 %5331  ;;  %v5052_v11 = vpop.permute.xlu1 %5051 }
0x11dc   : > { %v5520_v4 = vadd.f32 %v5519_v53, %v5052_v11  ;;  %5357 = vxpose.xlu0.b32.cont [7/8] (short) (narrow) %v5332_v23, 64  ;;  %v11653_v53 = vld [vmem:[#allocation27_spill] sm:$0xff] }
0x11df   : > { %v5334_v36 = vpop.permute.xlu1 %5333  ;;  %v5042_v2 = vpop.permute.xlu0 %5041 }
0x11e0   : > { %5358 = vxpose.xlu0.b32.end [8/8] (short) (narrow) %v5334_v36, 64  ;;  %v5495_v52 = vadd.f32 %v6827_v48, %v5042_v2 }
0x11e3   : > { %v5054_v48 = vpop.permute.xlu1 %5053 }
0x11e4   : > { %v5525_v16 = vadd.f32 %v10778_v31, %v5054_v48  ;;  %v11655_v31 = vld [vmem:[#allocation37_spill] sm:$0xff] }
0x1244   : > { %v5367_v13 = vpop.trf.xlu0 }
0x1245   : > { %v5528_v33 = vadd.f32 %v5490_v45, %v5367_v13 }
0x1247   : > { %6279 = vst.msk [vmem:[%s8925_s1 + $0xc0] sm:$0xff] %vm11642_vm9, %v5528_v33  ;;  %v5545_v6 = vsel %vm11587_vm0, %v5528_v33, -inf  ;;  %vm3152_vm9 = vcmask 523520  }
0x1248   : > { %5546 = vmax.xlane.f32.xlu1 %v5545_v6  ;;  %v5368_v35 = vpop.trf.xlu0 }
0x1249   : > { %v5529_v47 = vadd.f32 %v5495_v52, %v5368_v35 }
0x124b   : > { %6280 = vst.msk [vmem:[%s8925_s1 + $0xc8] sm:$0xff] %vm11643_vm6, %v5529_v47  ;;  %v5548_v18 = vsel %vm11644_vm15, %v5529_v47, -inf  ;;  %vm11663_vm6 = vmmov %vm11587_vm0  ;;  %vm4489_vm15 = vcmask 785920  }
0x124c   : > { %5549 = vmax.xlane.f32.xlu0 %v5548_v18  ;;  %v5369_v19 = vpop.trf.xlu0 }
0x124d   : > { %v10798_v37 = vadd.f32 %v5500_v15, %v5369_v19 }
0x124f   : > { %6281 = vst.msk [vmem:[%s8925_s1 + $0xd0] sm:$0xff] %vm11645_vm12, %v10798_v37  ;;  %v5551_v29 = vsel %vm11656_vm3, %v10798_v37, -inf  ;;  %vm11664_vm12 = vmmov %vm11587_vm0 }
0x1250   : > { %v5370_v5 = vpop.trf.xlu0  ;;  %vm11675_vm3 = vmmov %vm11587_vm0 }
0x1251   : > { %v10803_v17 = vadd.f32 %v5505_v9, %v5370_v5 }
0x1253   : > { %6282 = vst.msk [vmem:[%s8925_s1 + $0xd8] sm:$0xff] %vm11646_vm11, %v10803_v17  ;;  %v5554_v50 = vsel %vm11657_vm5, %v10803_v17, -inf  ;;  %vm11665_vm11 = vmmov %vm11587_vm0 }
0x1254   : > { %v5371_v28 = vpop.trf.xlu0  ;;  %vm11676_vm5 = vmmov %vm11587_vm0 }
0x1255   : > { %v10808_v39 = vadd.f32 %v5510_v10, %v5371_v28 }
0x1257   : > { %6283 = vst.msk [vmem:[%s8925_s1 + $0xe0] sm:$0xff] %vm11647_vm4, %v10808_v39  ;;  %vm11666_vm4 = vmmov %vm11587_vm0 }
0x1258   : > { %v5372_v3 = vpop.trf.xlu0 }
0x1259   : > { %v10813_v63 = vadd.f32 %v5515_v61, %v5372_v3  ;;  %7208 = vrot.lane.b32.xlu1 %v11648_v12, %s7629_s24 }
0x125b   : > { %6284 = vst.msk [vmem:[%s8925_s1 + $0xe8] sm:$0xff] %vm11649_vm2, %v10813_v63  ;;  %vm11667_vm2 = vmmov %vm11587_vm0 }
0x125c   : > { %v5373_v27 = vpop.trf.xlu0 }
0x125d   : > { %v10820_v46 = vadd.f32 %v5520_v4, %v5373_v27 }
0x125f   : > { %6285 = vst.msk [vmem:[%s8925_s1 + $0xf0] sm:$0xff] %vm11650_vm7, %v10820_v46  ;;  %vm11668_vm7 = vmmov %vm11587_vm0 }
0x1260   : > { %v5374_v60 = vpop.trf.xlu0 }
0x1261   : > { %v10826_v41 = vadd.f32 %v5525_v16, %v5374_v60 }
0x1262   : > { %7213 = vrot.lane.b32.xlu0 %v11651_v57, %s7629_s24 }
0x1263   : > { %6286 = vst.msk [vmem:[%s8925_s1 + $0xf8] sm:$0xff] %vm11652_vm14, %v10826_v41  ;;  %v5566_v51 = vsel %vm11661_vm10, %v10826_v41, -inf  ;;  %vm11669_vm14 = vmmov %vm11587_vm0 }
0x1264   : > { %vm11680_vm10 = vmmov %vm11587_vm0 }
0x1266   : > { %3132 = vrot.lane.b32.xlu0 %v11653_v53, %s7629_s24 }
0x126a   : > { %3136 = vrot.lane.b32.xlu0 %v11654_v44, %s7629_s24 }
0x126e   : > { %3140 = vrot.lane.b32.xlu0 %v11655_v31, %s7629_s24 }
0x1272   : > { %4465 = vrot.lane.b32.xlu0 %v10763_v7, %s7634_s26  ;;  %v5557_v7 = vsel %vm11658_vm8, %v10808_v39, -inf  ;;  %vm11677_vm8 = vmmov %vm11587_vm0 }
0x1276   : > { %4469 = vrot.lane.b32.xlu0 %v10768_v43, %s7634_s26  ;;  %v5560_v43 = vsel %vm11659_vm13, %v10813_v63, -inf  ;;  %vm11678_vm13 = vmmov %vm11587_vm0 }
0x127a   : > { %4473 = vrot.lane.b32.xlu0 %v10772_v38, %s7634_s26  ;;  %v5563_v38 = vsel %vm11660_vm1, %v10820_v46, -inf  ;;  %vm11679_vm1 = vmmov %vm11587_vm0 }
0x127d   : > { %5552 = vmax.xlane.f32.xlu1 %v5551_v29 }
0x127e   : > { %4477 = vrot.lane.b32.xlu0 %v10776_v26, %s7634_s26  ;;  %v11662_v26 = vld [vmem:[#allocation30_spill] sm:$0xff] }
0x1281   : > { %5555 = vmax.xlane.f32.xlu1 %v5554_v50 }
0x1285   : > { %5558 = vmax.xlane.f32.xlu1 %v5557_v7 }
0x1289   : > { %5561 = vmax.xlane.f32.xlu1 %v5560_v43 }
0x128d   : > { %5564 = vmax.xlane.f32.xlu1 %v5563_v38 }
0x1291   : > { %5567 = vmax.xlane.f32.xlu1 %v5566_v51 }
0x12a2   : > { %7218 = vrot.lane.b32.xlu1 %v11662_v26, %s7629_s24  ;;  %v4520_v26 = vld [vmem:[%s7940_s21 + $0x30] sm:$0xff] }
0x12d5   : > { %v5547_v24 = vpop.xlane.xlu1 %5546 }
0x12d6   : > { %v5569_v40 = vsub.f32 %v5528_v33, %v5547_v24  ;;  %v4521_v24 = vld [vmem:[%s7940_s21 + $0x38] sm:$0xff] }
0x12d8   : > { %v5577_v8 = vmul.f32 1.442695, %v5569_v40  ;;  %v7222_v40 = vpack.i.bf16 %v4521_v24, %v4520_v26 }
0x12d9   : > { %v5550_v14 = vpop.xlane.xlu0 %5549  ;;  %v7209_v34 = vpop.permute.xlu1 %7208 }
0x12da   : > { %7323 = vpow2.f32 %v5577_v8  ;;  %v5570_v55 = vsub.f32 %v5529_v47, %v5550_v14  ;;  %v7211_v56 = vunpack.i.h.bf16 %v7209_v34  ;;  %v7210_v21 = vunpack.i.l.bf16 %v7209_v34  ;;  %v11670_v8 = vld [vmem:[#allocation28_spill] sm:$0xff]  ;;  %v11672_v34 = vld [vmem:[#allocation29_spill] sm:$0xff] }
0x12db   : > { %v11671_v14 = vld [vmem:[#allocation56_spill] sm:$0xff] }
0x12dc   : > { %v5579_v22 = vmul.f32 1.442695, %v5570_v55  ;;  %v7041_v32 = vpack.c.bf16 %v7211_v56, %v7210_v21  ;;  %v11673_v55 = vld [vmem:[#allocation34_spill] sm:$0xff]  ;;  %v11674_v56 = vld [vmem:[#allocation25_spill] sm:$0xff] }
0x12dd   : > { %v7214_v42 = vpop.permute.xlu0 %7213 }
0x12de   : > { %7325 = vpow2.f32 %v5579_v22  ;;  %v7216_v25 = vunpack.i.h.bf16 %v7214_v42  ;;  %v7215_v49 = vunpack.i.l.bf16 %v7214_v42  ;;  %7042 = vmatprep.subr.bf16.mxu0 %v7041_v32  ;;  %7057 = vmatprep.subr.bf16.mxu1 %v7041_v32 }
0x12df   : > { %7044 = vmatpush3.bf16.msra.mxu0 %v7041_v32  ;;  %7061 = vmatpush3.bf16.msra.mxu1 %v7041_v32 }
0x12e0   : > { %v7045_v9 = vpack.c.bf16 %v7216_v25, %v7215_v49 }
0x12e1   : > { %v3133_v1 = vpop.permute.xlu0 %3132 }
0x12e2   : > { %3155 = vst.msk [vmem:[%s9400_s10 + $0x10] sm:$0xff] %vm3152_vm9, %v3133_v1  ;;  %7046 = vmatprep.subr.bf16.mxu0 %v7045_v9  ;;  %7058 = vmatprep.subr.bf16.mxu1 %v7045_v9 }
0x12e3   : > { %7048 = vmatpush3.bf16.msra.mxu0 %v7045_v9  ;;  %7062 = vmatpush3.bf16.msra.mxu1 %v7045_v9 }
0x12e4   : > { %v10863_v61 = vpop.eup %7323 }
0x12e5   : > { %v3137_v62 = vpop.permute.xlu0 %3136  ;;  %v5593_v15 = vsel %vm11587_vm0, %v10863_v61, 0.0 }
0x12e6   : > { %3157 = vst.msk [vmem:[%s9400_s10 + $0x20] sm:$0xff] %vm3152_vm9, %v3137_v62  ;;  %5594 = vadd.xlane.f32.xlu1 %v5593_v15 }
0x12e8   : > { %v10869_v30 = vpop.eup %7325 }
0x12e9   : > { %v3141_v10 = vpop.permute.xlu0 %3140  ;;  %v5596_v0 = vsel %vm11663_vm6, %v10869_v30, 0.0  ;;  %vm11681_vm6 = vmmov %vm11587_vm0 }
0x12ea   : > { %3159 = vst.msk [vmem:[%s9400_s10 + $0x30] sm:$0xff] %vm3152_vm9, %v3141_v10  ;;  %5597 = vadd.xlane.f32.xlu1 %v5596_v0 }
0x12ed   : > { %v10875_v45 = vpop.permute.xlu0 %4465 }
0x12f1   : > { %v4470_v23 = vpop.permute.xlu0 %4469 }
0x12f2   : > { %4492 = vst.msk [vmem:[%s9400_s10 + $0x10] sm:$0xff] %vm4489_vm15, %v4470_v23 }
0x12f5   : > { %v4474_v11 = vpop.permute.xlu0 %4473 }
0x12f6   : > { %4494 = vst.msk [vmem:[%s9400_s10 + $0x20] sm:$0xff] %vm4489_vm15, %v4474_v11 }
0x12f9   : > { %v4478_v4 = vpop.permute.xlu0 %4477 }
0x12fa   : > { %4496 = vst.msk [vmem:[%s9400_s10 + $0x30] sm:$0xff] %vm4489_vm15, %v4478_v4 }
0x130a   : > { %v5553_v36 = vpop.xlane.xlu1 %5552 }
0x130b   : > { %v5571_v2 = vsub.f32 %v10798_v37, %v5553_v36 }
0x130d   : > { %v5581_v13 = vmul.f32 1.442695, %v5571_v2 }
0x130e   : > { %v5556_v33 = vpop.xlane.xlu1 %5555 }
0x130f   : > { %7327 = vpow2.f32 %v5581_v13  ;;  %v5572_v52 = vsub.f32 %v10803_v17, %v5556_v33 }
0x1311   : > { %v5583_v6 = vmul.f32 1.442695, %v5572_v52 }
0x1312   : > { %v5559_v35 = vpop.xlane.xlu1 %5558 }
0x1313   : > { %7329 = vpow2.f32 %v5583_v6  ;;  %v5573_v47 = vsub.f32 %v10808_v39, %v5559_v35 }
0x1315   : > { %v5585_v18 = vmul.f32 1.442695, %v5573_v47 }
0x1316   : > { %v5562_v19 = vpop.xlane.xlu1 %5561 }
0x1317   : > { %7331 = vpow2.f32 %v5585_v18  ;;  %v5574_v5 = vsub.f32 %v10813_v63, %v5562_v19 }
0x1319   : > { %v7328_v28 = vpop.eup %7327  ;;  %v5587_v3 = vmul.f32 1.442695, %v5574_v5 }
0x131a   : > { %v5565_v12 = vpop.xlane.xlu1 %5564  ;;  %v5599_v37 = vsel %vm11664_vm12, %v7328_v28, 0.0 }
0x131b   : > { %7333 = vpow2.f32 %v5587_v3  ;;  %v5575_v48 = vsub.f32 %v10820_v46, %v5565_v12  ;;  %5600 = vadd.xlane.f32.xlu1 %v5599_v37 }
0x131d   : > { %v10889_v17 = vpop.eup %7329  ;;  %v5589_v27 = vmul.f32 1.442695, %v5575_v48 }
0x131e   : > { %v5568_v16 = vpop.xlane.xlu1 %5567  ;;  %v5602_v39 = vsel %vm11665_vm11, %v10889_v17, 0.0 }
0x131f   : > { %7335 = vpow2.f32 %v5589_v27  ;;  %v5576_v60 = vsub.f32 %v10826_v41, %v5568_v16  ;;  %5603 = vadd.xlane.f32.xlu1 %v5602_v39 }
0x1321   : > { %v10894_v63 = vpop.eup %7331  ;;  %v5591_v57 = vmul.f32 1.442695, %v5576_v60 }
0x1322   : > { %v5605_v53 = vsel %vm11666_vm4, %v10894_v63, 0.0  ;;  %v7219_v44 = vpop.permute.xlu1 %7218 }
0x1323   : > { %7337 = vpow2.f32 %v5591_v57  ;;  %5606 = vadd.xlane.f32.xlu1 %v5605_v53  ;;  %v7221_v46 = vunpack.i.h.bf16 %v7219_v44  ;;  %v7220_v31 = vunpack.i.l.bf16 %v7219_v44 }
0x1325   : > { %v10898_v29 = vpop.eup %7333  ;;  %v7049_v50 = vpack.c.bf16 %v7221_v46, %v7220_v31 }
0x1326   : > { %v5608_v41 = vsel %vm11667_vm2, %v10898_v29, 0.0 }
0x1327   : > { %5609 = vadd.xlane.f32.xlu1 %v5608_v41  ;;  %7050 = vmatprep.subr.bf16.mxu0 %v7049_v50 }
0x1328   : > { %7059 = vmatprep.subr.bf16.mxu1 %v7049_v50  ;;  %7052 = vmatpush3.bf16.msra.mxu0 %v7049_v50 }
0x1329   : > { %v10902_v7 = vpop.eup %7335  ;;  %7063 = vmatpush3.bf16.msra.mxu1 %v7049_v50 }
0x132a   : > { %v5611_v43 = vsel %vm11668_vm7, %v10902_v7, 0.0 }
0x132b   : > { %5612 = vadd.xlane.f32.xlu1 %v5611_v43 }
0x132d   : > { %v10906_v38 = vpop.eup %7337 }
0x132e   : > { %v5614_v51 = vsel %vm11669_vm14, %v10906_v38, 0.0 }
0x132f   : > { %5615 = vadd.xlane.f32.xlu1 %v5614_v51 }
0x1340   : > { %7223 = vrot.lane.b32.xlu1 %v7222_v40, %s7629_s24 }
0x1344   : > { %3128 = vrot.lane.b32.xlu1 %v11670_v8, %s7629_s24 }
0x1348   : > { %3130 = vrot.lane.b32.xlu1 %v11671_v14, %s7629_s24 }
0x134c   : > { %3134 = vrot.lane.b32.xlu1 %v11672_v34, %s7629_s24 }
0x1350   : > { %3138 = vrot.lane.b32.xlu1 %v11673_v55, %s7629_s24 }
0x1354   : > { %3142 = vrot.lane.b32.xlu1 %v11674_v56, %s7629_s24  ;;  %s5874_s24 = sshll.u32 %s8925_s1, 4  ;;  %s10978_s24 = int_to_ptr.vmem [resolvable:$true] %s5874_s24 }
0x1355   : > { %s7496_s6 = scalar_lea.vmem %s10978_s24, 4096 }
0x1356   : > { %p7497_p2 = scmp.ne.s32.totalorder %s10978_s24, %s7496_s6 }
0x1358   : > { %4467 = vrot.lane.b32.xlu1 %v10761_v20, %s7634_s26  ;;  %p7498_p11 = pnand %p7497_p2, %p11682_p13 }
0x135a   : > { %p7499_p0 = pneg %p7498_p11 }
0x135c   : > { %4471 = vrot.lane.b32.xlu1 %v10766_v58, %s7634_s26 }
0x1360   : > { %4475 = vrot.lane.b32.xlu1 %v10770_v59, %s7634_s26 }
0x1364   : > { %4479 = vrot.lane.b32.xlu1 %v10774_v54, %s7634_s26  ;;  %s7635_s26 = smov [#allocation11]  }
0x1365   : > { %s7500_s14 = sshll.u32 %s7635_s26, 4  ;;  %s7501_s14 = int_to_ptr.vmem [resolvable:$false] %s7500_s14 }
0x1366   : > { %s7502_s22 = scalar_lea.vmem %s7501_s14, 8192  ;;  %p7503_p5 = scmp.lt.s32.totalorder %s10978_s24, %s7501_s14 }
0x1367   : > { %p7504_p10 = scmp.lt.s32.totalorder %s7502_s22, %s7496_s6 }
0x1369   : > { %p7505_p7 = por %p7504_p10, %p7503_p5 }
0x136b   : > { %p7506_p4 = pnand %p7505_p7, %p7499_p0 }
0x1373   : > { %v5595_v21 = vpop.xlane.xlu1 %5594 }
0x1374   : > { %7339 = vrcp.f32 %v5595_v21 }
0x1377   : > { %v5598_v42 = vpop.xlane.xlu1 %5597 }
0x137e   : > { %v7340_v22 = vpop.eup %7339 }
0x137f   : > { %v5625_v32 = vmul.f32 %v7340_v22, %v10863_v61 }
0x1381   : > { %6853 = vmatprep.mubr.msk.f32.mxu0 %vm11675_vm3, %v5625_v32 }
0x13a8   : > { %v5601_v25 = vpop.xlane.xlu1 %5600 }
0x13a9   : > { %7341 = vrcp.f32 %v5601_v25 }
0x13aa   : > { %7343 = vrcp.f32 %v5598_v42 }
0x13ac   : > { %v5604_v20 = vpop.xlane.xlu1 %5603 }
0x13ad   : > { %7345 = vrcp.f32 %v5604_v20 }
0x13b0   : > { %v5607_v49 = vpop.xlane.xlu1 %5606 }
0x13b1   : > { %7347 = vrcp.f32 %v5607_v49 }
0x13b3   : > { %v7342_v9 = vpop.eup %7341 }
0x13b4   : > { %v5610_v58 = vpop.xlane.xlu1 %5609  ;;  %v5627_v1 = vmul.f32 %v7342_v9, %v7328_v28  ;;  %v7344_v10 = vpop.eup %7343 }
0x13b5   : > { %7349 = vrcp.f32 %v5610_v58  ;;  %v5626_v36 = vmul.f32 %v7344_v10, %v10869_v30 }
0x13b6   : > { %6856 = vmatprep.mubr.msk.f32.mxu1 %vm11676_vm5, %v5627_v1 }
0x13b7   : > { %v7346_v23 = vpop.eup %7345 }
0x13b8   : > { %v5613_v59 = vpop.xlane.xlu1 %5612  ;;  %v5628_v2 = vmul.f32 %v7346_v23, %v10889_v17 }
0x13b9   : > { %7351 = vrcp.f32 %v5613_v59 }
0x13bb   : > { %v7348_v4 = vpop.eup %7347 }
0x13bc   : > { %v5616_v54 = vpop.xlane.xlu1 %5615  ;;  %v5629_v52 = vmul.f32 %v7348_v4, %v10894_v63 }
0x13bd   : > { %7353 = vrcp.f32 %v5616_v54 }
0x13bf   : > { %v7350_v13 = vpop.eup %7349 }
0x13c0   : > { %v7224_v61 = vpop.permute.xlu1 %7223  ;;  %v5630_v30 = vmul.f32 %v7350_v13, %v10898_v29 }
0x13c1   : > { %v7226_v62 = vunpack.i.h.bf16 %v7224_v61  ;;  %v7225_v15 = vunpack.i.l.bf16 %v7224_v61 }
0x13c3   : > { %v7053_v0 = vpack.c.bf16 %v7226_v62, %v7225_v15  ;;  %v7352_v6 = vpop.eup %7351 }
0x13c4   : > { %v3129_v11 = vpop.permute.xlu1 %3128  ;;  %v5631_v47 = vmul.f32 %v7352_v6, %v10902_v7 }
0x13c5   : > { %3153 = vst.msk [vmem:[%s9400_s10] sm:$0xff] %vm3152_vm9, %v3129_v11  ;;  %7054 = vmatprep.subr.bf16.mxu0 %v7053_v0  ;;  %7060 = vmatprep.subr.bf16.mxu1 %v7053_v0 }
0x13c6   : > { %4490 = vst.msk [vmem:[%s9400_s10] sm:$0xff] %vm4489_vm15, %v10875_v45  ;;  %7056 = vmatpush3.bf16.msra.mxu0 %v7053_v0  ;;  %7064 = vmatpush3.bf16.msra.mxu1 %v7053_v0 }
0x13c7   : > { %v7354_v45 = vpop.eup %7353 }
0x13c8   : > { %v3131_v33 = vpop.permute.xlu1 %3130  ;;  %v5632_v18 = vmul.f32 %v7354_v45, %v10906_v38 }
0x13c9   : > { %3154 = vst.msk [vmem:[%s9400_s10 + $0x8] sm:$0xff] %vm3152_vm9, %v3131_v33  ;;  %6854 = vmatmul.mubr.msk.f32.vlgmr.msra.gmra.mrb[64].mxu0 %vm11677_vm8, %v5626_v36  ;;  %6857 = vmatmul.mubr.msk.f32.vlgmr.msra.gmra.mrb[56].mxu1 %vm11678_vm13, %v5628_v2 }
0x13ca   : > { %6859 = vmatprep.mubr.msk.f32.mxu1 %vm11679_vm1, %v5629_v52 }
0x13cc   : > { %v3135_v35 = vpop.permute.xlu1 %3134 }
0x13cd   : > { %3156 = vst.msk [vmem:[%s9400_s10 + $0x18] sm:$0xff] %vm3152_vm9, %v3135_v35  ;;  %6860 = vmatmul.mubr.msk.f32.gmra.mrb[58].mxu1 %vm11680_vm10, %v5630_v30 }
0x13ce   : > { %6862 = vmatprep.mubr.msk.f32.mxu1 %vm11587_vm0, %v5631_v47 }
0x13d0   : > { %v3139_v19 = vpop.permute.xlu1 %3138 }
0x13d1   : > { %3158 = vst.msk [vmem:[%s9400_s10 + $0x28] sm:$0xff] %vm3152_vm9, %v3139_v19  ;;  %6863 = vmatmul.mubr.msk.f32.gmra.mrb[60].mxu1 %vm11681_vm6, %v5632_v18 }
0x13d4   : > { %v3143_v5 = vpop.permute.xlu1 %3142 }
0x13d5   : > { %3160 = vst.msk [vmem:[%s9400_s10 + $0x38] sm:$0xff] %vm3152_vm9, %v3143_v5 }
0x13d8   : > { %v4468_v28 = vpop.permute.xlu1 %4467 }
0x13d9   : > { %4491 = vst.msk [vmem:[%s9400_s10 + $0x8] sm:$0xff] %vm4489_vm15, %v4468_v28 }
0x13dc   : > { %v4472_v3 = vpop.permute.xlu1 %4471 }
0x13dd   : > { %4493 = vst.msk [vmem:[%s9400_s10 + $0x18] sm:$0xff] %vm4489_vm15, %v4472_v3 }
0x13e0   : > { %v4476_v12 = vpop.permute.xlu1 %4475 }
0x13e1   : > { %4495 = vst.msk [vmem:[%s9400_s10 + $0x28] sm:$0xff] %vm4489_vm15, %v4476_v12 }
0x13e4   : > { %v4480_v37 = vpop.permute.xlu1 %4479 }
0x13e5   : > { %4497 = vst.msk [vmem:[%s9400_s10 + $0x38] sm:$0xff] %vm4489_vm15, %v4480_v37 }
0x149c   : > { %v6855_v48 = vpop.f32.mrb[64].mxu0  ;;  %v6858_v17 = vpop.f32.mrb[56].mxu1 }
0x149d   : > { %v5765_v27 = vpop.f32.mrb[57].mxu1  ;;  %5804 = vrot.lane.b32.xlu1 %v6855_v48, %s7630_s0  ;;  %v5755_v16 = vpop.f32.mrb[65].mxu0 }
0x149e   : > { %5802 = vrot.lane.b32.xlu0 %v5755_v16, %s7630_s0 }
0x14a0   : > { %v6861_v39 = vpop.f32.mrb[58].mxu1 }
0x14a1   : > { %v5775_v60 = vpop.f32.mrb[59].mxu1  ;;  %5808 = vrot.lane.b32.xlu1 %v6858_v17, %s7630_s0 }
0x14a2   : > { %5806 = vrot.lane.b32.xlu0 %v5765_v27, %s7630_s0 }
0x14a3   : > { %7509 = shalt.err (!%p7506_p4)
}
0x14a4   : > { %s7510_s9 = scalar_lea.hbm %s10974_s16, 4096  ;;  %s7514_s17 = scalar_lea.hbm %s11093_s7, 8192 }
0x14a5   : > { %p7511_p3 = scmp.ne.s32.totalorder %s10974_s16, %s7510_s9  ;;  %p7515_p8 = scmp.lt.u32.totalorder %s10974_s16, %s11093_s7 }
0x14a6   : > { %p7516_p12 = scmp.lt.u32.totalorder %s7514_s17, %s7510_s9  ;;  %p7518_p2 = scmp.lt.u32.totalorder %s7510_s9, %s10974_s16 }
0x14a7   : > { %p7512_p6 = pnand %p7511_p3, %p11682_p13 }
0x14a8   : > { %p7517_p1 = por %p7516_p12, %p7515_p8 }
0x14a9   : > { %p7513_p9 = pneg %p7512_p6 }
0x14aa   : > { %p7519_p11 = por %p7518_p2, %p7517_p1 }
0x14ac   : > { %p7520_p0 = pnand %p7519_p11, %p7513_p9 }
0x14ae   : > { %7523 = shalt.err (!%p7520_p0)
}
0x14af   : > { %s7636_s30 = smov 128   ;;  %v6864_v63 = vpop.f32.mrb[60].mxu1  ;;  %5812 = vrot.lane.b32.xlu1 %v6861_v39, %s7630_s0  ;;  %5810 = vrot.lane.b32.xlu0 %v5775_v60, %s7630_s0  ;;  %vm5826_vm9 = vcmask 1048320   ;;  %s5855_s29 = sshll.u32 %s9400_s10, 4  ;;  %s11030_s29 = int_to_ptr.vmem [resolvable:$true] %s5855_s29 }
0x14b0   : > { %7077 = dma.vmem_to_hbm [thread:$0]  (%p11682_p13), %s10978_s24, 4096, %s10974_s16, %s5841_s11, %s7636_s30, %s7636_s30, %s7632_s13   ;;  %v5785_v57 = vpop.f32.mrb[61].mxu1 }
0x14b1   : > { %s11683_s21 = sld [smem:[#allocation61_spill]]  ;;  %s7524_s16 = scalar_lea.vmem %s11030_s29, 1024 }
0x14b2   : > { %p7525_p5 = scmp.ne.s32.totalorder %s11030_s29, %s7524_s16  ;;  %s7637_s24 = smov [#allocation10]  }
0x14b3   : > { %5816 = vrot.lane.b32.xlu1 %v6864_v63, %s7630_s0  ;;  %5814 = vrot.lane.b32.xlu0 %v5785_v57, %s7630_s0  ;;  %s6303_s0 = sshll.u32 %s7610_s27, 10  ;;  %s5836_s27 = scalar_lea.sflag [#allocation4], %s7918_s8 }
0x14b4   : > { %p7526_p10 = pnand %p7525_p5, %p11682_p13  ;;  %s7528_s11 = sshll.u32 %s7637_s24, 4  ;;  %s7529_s11 = int_to_ptr.vmem [resolvable:$false] %s7528_s11 }
0x14b5   : > { %s7530_s6 = scalar_lea.vmem %s7529_s11, 2048  ;;  %p7531_p4 = scmp.lt.s32.totalorder %s11030_s29, %s7529_s11 }
0x14b6   : > { %p7527_p7 = pneg %p7526_p10  ;;  %p7532_p3 = scmp.lt.s32.totalorder %s7530_s6, %s7524_s16 }
0x14b7   : > { %s11028_s20 = scalar_lea.hbm %s11683_s21, %s6303_s0 }
0x14b8   : > { %p7533_p6 = por %p7532_p3, %p7531_p4 }
0x14ba   : > { %p7534_p9 = pnand %p7533_p6, %p7527_p7 }
0x150f   : > { %v5805_v53 = vpop.permute.xlu1 %5804 }
0x1510   : > { %5828 = vst.msk [vmem:[%s9400_s10 + $0x8] sm:$0xff] %vm5826_vm9, %v5805_v53  ;;  %v5803_v44 = vpop.permute.xlu0 %5802 }
0x1511   : > { %5827 = vst.msk [vmem:[%s9400_s10] sm:$0xff] %vm5826_vm9, %v5803_v44 }
0x1513   : > { %v5809_v46 = vpop.permute.xlu1 %5808 }
0x1514   : > { %5830 = vst.msk [vmem:[%s9400_s10 + $0x18] sm:$0xff] %vm5826_vm9, %v5809_v46  ;;  %v5807_v31 = vpop.permute.xlu0 %5806 }
0x1515   : > { %5829 = vst.msk [vmem:[%s9400_s10 + $0x10] sm:$0xff] %vm5826_vm9, %v5807_v31 }
0x1521   : > { %v5813_v29 = vpop.permute.xlu1 %5812  ;;  %v5811_v50 = vpop.permute.xlu0 %5810 }
0x1522   : > { %5832 = vst.msk [vmem:[%s9400_s10 + $0x28] sm:$0xff] %vm5826_vm9, %v5813_v29  ;;  %5831 = vst.msk [vmem:[%s9400_s10 + $0x20] sm:$0xff] %vm5826_vm9, %v5811_v50 }
0x1525   : > { %v5817_v41 = vpop.permute.xlu1 %5816  ;;  %v5815_v7 = vpop.permute.xlu0 %5814 }
0x1526   : > { %5834 = vst.msk [vmem:[%s9400_s10 + $0x38] sm:$0xff] %vm5826_vm9, %v5817_v41  ;;  %5833 = vst.msk [vmem:[%s9400_s10 + $0x30] sm:$0xff] %vm5826_vm9, %v5815_v7 }
0x1527   : > { %7537 = shalt.err (!%p7534_p9)
}
0x1528   : > { %s7538_s10 = scalar_lea.hbm %s11028_s20, 1024  ;;  %s7542_s22 = scalar_lea.hbm %s11683_s21, 2048 }
0x1529   : > { %p7539_p8 = scmp.ne.s32.totalorder %s11028_s20, %s7538_s10  ;;  %p7543_p2 = scmp.lt.u32.totalorder %s11028_s20, %s11683_s21 }
0x152a   : > { %p7544_p11 = scmp.lt.u32.totalorder %s7542_s22, %s7538_s10  ;;  %p7546_p5 = scmp.lt.u32.totalorder %s7538_s10, %s11028_s20 }
0x152b   : > { %p7540_p12 = pnand %p7539_p8, %p11682_p13 }
0x152c   : > { %p7545_p0 = por %p7544_p11, %p7543_p2 }
0x152d   : > { %p7541_p1 = pneg %p7540_p12 }
0x152e   : > { %p7547_p10 = por %p7546_p5, %p7545_p0 }
0x1530   : > { %p7548_p7 = pnand %p7547_p10, %p7541_p1 }
0x1532   : > { %7551 = shalt.err (!%p7548_p7)
}
0x1533   : > { %7076 = dma.vmem_to_hbm [thread:$0]  (%p11682_p13), %s11030_s29, 1024, %s11028_s20, %s5836_s27, %s7636_s30, %s7636_s30, %s7632_s13  }
0x1534 PF: > { %s11684_s1 = sld [smem:[#allocation18_spill]]  ;;  %s11685_s17 = sld [smem:[#allocation24_spill]] }
0x1535   : > { %s11686_s28 = sld [smem:[#allocation21_spill]] }
0x153a   : > { %s5889_s15 = sand.u32 1, %s11684_s1   ;;  %p11687_p4 = scmp.ne.s32.totalorder %s11685_s17, 0 }
0x153b   : > { %p11688_p3 = scmp.ge.s32.totalorder %s11686_s28, 2  ;;  %s5890_s0 = scalar_lea.sflag [#allocation4], %s5889_s15 }
0x153d   : > { %p7095_p6 = pnand %p11688_p3, %p11687_p4 }
0x153f   : > { %7589 = dma.done.wait (!%p7095_p6), %s5890_s0, 1024  }
0x1540   : > { %7591 = vsyncadd (!%p7095_p6), %s5890_s0, 4294966272  ;;  %s5899_s19 = scalar_lea.sflag [#allocation12], %s5889_s15 }
0x1541   : > { %7593 = dma.done.wait (!%p7095_p6), %s5899_s19, 4096  }
0x1542   : > { %7595 = vsyncadd (!%p7095_p6), %s5899_s19, 4294963200  ;;  %s31_s29 = sadd.s32 1, %s11686_s28   ;;  %s11689_s8 = sld [smem:[#allocation19_spill]] }
0x1543   : > { %p28_p9 = scmp.ge.s32.totalorder %s31_s29, 4   ;;  %s11690_s26 = sld [smem:[#allocation23_spill]] }
0x1544   : > { %s11691_s27 = sld [smem:[#allocation20_spill]]  ;;  %s11692_s28 = sld [smem:[#allocation22_spill]] }
0x1545   : > { %s11693_s24 = smov %s7602_s25  ;;  %30 = sbr.rel (!%p28_p9) target bundleno = 15 (0xf), region = 149 }
0x1548   : > { %s11694_s25 = smov %s11689_s8 }
0x154c   :  { %5904 = vsyncpa [#allocation3], 1 }
0x154d   :  { %5906 = vsyncpa [#allocation3 + $0x1], 1 }
0x154e   :  { %5907 = vsyncpa [#allocation6], 1 }
0x154f   :  { %5909 = vsyncpa [#allocation6 + $0x1], 1 }
0x1550   :  { %5910 = vsyncpa [#allocation9], 1 }
0x1551   :  { %5911 = vsyncpa [#allocation4], 1 }
0x1552   :  { %5913 = vsyncpa [#allocation4 + $0x1], 1 }
0x1553   :  { %5914 = vsyncpa [#allocation12], 1 }
0x1554   :  { %5916 = vsyncpa [#allocation12 + $0x1], 1 }

</bundles_post_ra>
